<compile_context>
chip_gen: v5e
topology: v5e:2x2
jax: 0.10.0
libtpu: 0.0.40
codegen_flags: <defaults>
</compile_context>

<pallas_src>
import math
import functools

import numpy as np
import jax
import jax.numpy as jnp
from jax import lax
from jax.experimental import pallas as pl
from jax.experimental.pallas import tpu as pltpu

# ---- model hyper-parameters (from SPDEncoder.__init__) ----
EMB = 64                                    # embedding_dim / channels
PE_DIM = 20                                 # pe_dim
NUM_LAYERS = 10                             # num_layers
HEADS = 4                                   # GPSConv heads
HEAD_CH = 64                                # PerformerAttention head_channels
INNER = HEADS * HEAD_CH                     # 256
NUM_FEATURES = int(HEAD_CH * math.log(HEAD_CH))       # 266 random features
RP = ((NUM_FEATURES + 127) // 128) * 128               # 384: lane-dense padded features
KERNEL_EPS = 1e-3
BN_EPS = 1e-5
VMEM_LIMIT = 48 * 1024 * 1024               # fits v7x (64 MiB VMEM) and v5e/v6e
ROW_TARGET = 512                            # target rows per block (v5e/v6e sweet spot)


def _round_up(x, m):
    return ((x + m - 1) // m) * m


# ----------------------------------------------------------------------------
# Fused GPSConv layer: block-diagonal GIN + Performer attention + FFN, one call
# ----------------------------------------------------------------------------
def _gps_layer_kernel(a_ref, x_ref, m_ref, km_ref, g_ref,
                      w1_ref, b1_ref, w2_ref, b2_ref, s1_ref,
                      wqkv_ref, proj_ref, eps_ref, wo_ref, bo_ref, s2_ref,
                      f1_ref, fb1_ref, f2_ref, fb2_ref, s3_ref,
                      out_ref):
    f32 = jnp.float32
    bf16 = jnp.bfloat16

    x = x_ref[...]                               # [T, 64] f32
    m = m_ref[...]                               # [T, 1]  real-node mask
    xm_bf = (x * m).astype(bf16)                 # masked once; reused by agg & QKV

    # ---- local GIN branch: block-diagonal (A + I) @ x, MLP, BN1 + residual folded
    agg = jnp.dot(a_ref[...].astype(bf16), xm_bf, preferred_element_type=f32)
    h = jnp.maximum(jnp.dot(agg.astype(bf16), w1_ref[...],
                            preferred_element_type=f32) + b1_ref[...], 0.0)
    h_local = (jnp.dot(h.astype(bf16), w2_ref[...], preferred_element_type=f32)
               + b2_ref[...] + x * s1_ref[...])

    # ---- Performer attention: fused QKV, block-level projections, masked-S form
    qkv = jnp.dot(xm_bf, wqkv_ref[...], preferred_element_type=f32)     # [T, 768]
    proj = proj_ref[...]                                                # [64, 384] bf16
    feps = eps_ref[...]                                                 # [1, 384]
    km = km_ref[...]                                                    # [T, 1]
    gmask = g_ref[...]                                                  # [T, T] same-graph

    oh_heads = []
    for hh in range(HEADS):
        q = qkv[:, hh * HEAD_CH:(hh + 1) * HEAD_CH]
        k = qkv[:, INNER + hh * HEAD_CH:INNER + (hh + 1) * HEAD_CH]
        v = qkv[:, 2 * INNER + hh * HEAD_CH:2 * INNER + (hh + 1) * HEAD_CH]

        qp = jnp.maximum(jnp.dot(q.astype(bf16), proj,
                                 preferred_element_type=f32), 0.0) + feps
        kp = (jnp.maximum(jnp.dot(k.astype(bf16), proj,
                                  preferred_element_type=f32), 0.0) + feps) * km

        # S[r, c] = qp_r . kp_c restricted to same-graph columns; identical to the
        # Performer linear-attention qp @ (kp^T v) / (qp . k_sum) computed per graph.
        s = lax.dot_general(qp.astype(bf16), kp.astype(bf16),
                            (((1,), (1,)), ((), ())),
                            preferred_element_type=f32) * gmask          # [T, T]
        d = jnp.maximum(jnp.sum(s, axis=-1, keepdims=True), 1e-9)        # qp . k_sum
        oh = jnp.dot(s.astype(bf16), v.astype(bf16),
                     preferred_element_type=f32)                         # [T, 64]
        oh_heads.append(oh * pl.reciprocal(d, approx=True))

    # single K=256 output projection (Wo folded with BN2), residual/bias folded
    oh_all = jnp.concatenate(oh_heads, axis=-1)                          # [T, 256]
    h_attn = (x * s2_ref[...] + bo_ref[...]
              + jnp.dot(oh_all.astype(bf16), wo_ref[...],
                        preferred_element_type=f32))

    # ---- combine + FFN 64->128->64 with BN3 scale/shift and residual folded
    out0 = h_local + h_attn
    ff = jnp.maximum(jnp.dot(out0.astype(bf16), f1_ref[...],
                             preferred_element_type=f32) + fb1_ref[...], 0.0)
    out_ref[...] = (jnp.dot(ff.astype(bf16), f2_ref[...],
                            preferred_element_type=f32)
                    + fb2_ref[...] + out0 * s3_ref[...])


def pallas_gps_layer(x, a_compact, mask, kmask, gmask, lp, *, block):
    pp, c = x.shape
    return pl.pallas_call(
        _gps_layer_kernel,
        out_shape=jax.ShapeDtypeStruct((pp, c), jnp.float32),
        grid_spec=pltpu.PrefetchScalarGridSpec(
            num_scalar_prefetch=0,
            grid=(pp // block,),
            in_specs=[
                pl.BlockSpec((block, block), lambda i: (i, 0)),       # compact (A+I)
                pl.BlockSpec((block, c), lambda i: (i, 0)),           # x
                pl.BlockSpec((block, 1), lambda i: (i, 0)),           # node mask
                pl.BlockSpec((block, 1), lambda i: (i, 0)),           # dense-row mask
                pl.BlockSpec((block, block), lambda i: (0, 0)),       # same-graph mask
                pl.BlockSpec((c, c), lambda i: (0, 0)),               # gin w1 (bf16)
                pl.BlockSpec((1, c), lambda i: (0, 0)),               # gin b1
                pl.BlockSpec((c, c), lambda i: (0, 0)),               # gin w2*bn1_s
                pl.BlockSpec((1, c), lambda i: (0, 0)),               # gin b2 folded
                pl.BlockSpec((1, c), lambda i: (0, 0)),               # bn1 scale
                pl.BlockSpec((c, 3 * INNER), lambda i: (0, 0)),       # wq|wk|wv (bf16)
                pl.BlockSpec((HEAD_CH, RP), lambda i: (0, 0)),        # proj^T padded
                pl.BlockSpec((1, RP), lambda i: (0, 0)),              # feature eps mask
                pl.BlockSpec((INNER, c), lambda i: (0, 0)),           # wo*bn2_s (bf16)
                pl.BlockSpec((1, c), lambda i: (0, 0)),               # bo folded
                pl.BlockSpec((1, c), lambda i: (0, 0)),               # bn2 scale
                pl.BlockSpec((c, 2 * c), lambda i: (0, 0)),           # ffn w1 (bf16)
                pl.BlockSpec((1, 2 * c), lambda i: (0, 0)),           # ffn b1
                pl.BlockSpec((2 * c, c), lambda i: (0, 0)),           # ffn w2*bn3_s
                pl.BlockSpec((1, c), lambda i: (0, 0)),               # ffn b2 folded
                pl.BlockSpec((1, c), lambda i: (0, 0)),               # bn3 scale
            ],
            out_specs=pl.BlockSpec((block, c), lambda i: (i, 0)),
        ),
        compiler_params=pltpu.CompilerParams(
            dimension_semantics=("parallel",),
            vmem_limit_bytes=VMEM_LIMIT),
    )(a_compact, x, mask, kmask, gmask,
      lp["gin_w1"], lp["gin_b1"], lp["gin_w2"], lp["gin_b2"], lp["bn1_s"],
      lp["wqkv"], lp["projT"], lp["feat_eps"], lp["wo"], lp["bo"], lp["bn2_s"],
      lp["ffn_w1"], lp["ffn_b1"], lp["ffn_w2"], lp["ffn_b2"], lp["bn3_s"])


# ----------------------------------------------------------------------------
# pe_lin and the final 64->64->128->64 MLP (single fused kernels)
# ----------------------------------------------------------------------------
def _pe_lin_kernel(pe_ref, w_ref, b_ref, o_ref):
    o_ref[...] = jnp.dot(pe_ref[...].astype(jnp.bfloat16), w_ref[...],
                         preferred_element_type=jnp.float32) + b_ref[...]


def pallas_pe_lin(pe_dense, w, b, *, block):
    pp, pdim = pe_dense.shape
    c = w.shape[1]
    return pl.pallas_call(
        _pe_lin_kernel,
        out_shape=jax.ShapeDtypeStruct((pp, c), jnp.float32),
        grid_spec=pltpu.PrefetchScalarGridSpec(
            num_scalar_prefetch=0,
            grid=(pp // block,),
            in_specs=[
                pl.BlockSpec((block, pdim), lambda i: (i, 0)),
                pl.BlockSpec((pdim, c), lambda i: (0, 0)),
                pl.BlockSpec((1, c), lambda i: (0, 0)),
            ],
            out_specs=pl.BlockSpec((block, c), lambda i: (i, 0)),
        ),
        compiler_params=pltpu.CompilerParams(
            dimension_semantics=("parallel",),
            vmem_limit_bytes=VMEM_LIMIT),
    )(pe_dense, w, b)


def _out_mlp_kernel(x_ref, w1_ref, b1_ref, w2_ref, b2_ref, w3_ref, b3_ref, o_ref):
    h = jnp.maximum(jnp.dot(x_ref[...].astype(jnp.bfloat16), w1_ref[...],
                            preferred_element_type=jnp.float32) + b1_ref[...], 0.0)
    h = jnp.maximum(jnp.dot(h.astype(jnp.bfloat16), w2_ref[...],
                            preferred_element_type=jnp.float32) + b2_ref[...], 0.0)
    o_ref[...] = jnp.dot(h.astype(jnp.bfloat16), w3_ref[...],
                         preferred_element_type=jnp.float32) + b3_ref[...]


def pallas_out_mlp(x, prep, *, block):
    pp, c = x.shape
    return pl.pallas_call(
        _out_mlp_kernel,
        out_shape=jax.ShapeDtypeStruct((pp, c), jnp.float32),
        grid_spec=pltpu.PrefetchScalarGridSpec(
            num_scalar_prefetch=0,
            grid=(pp // block,),
            in_specs=[
                pl.BlockSpec((block, c), lambda i: (i, 0)),
                pl.BlockSpec((c, c), lambda i: (0, 0)),
                pl.BlockSpec((1, c), lambda i: (0, 0)),
                pl.BlockSpec((c, 2 * c), lambda i: (0, 0)),
                pl.BlockSpec((1, 2 * c), lambda i: (0, 0)),
                pl.BlockSpec((2 * c, c), lambda i: (0, 0)),
                pl.BlockSpec((1, c), lambda i: (0, 0)),
            ],
            out_specs=pl.BlockSpec((block, c), lambda i: (i, 0)),
        ),
        compiler_params=pltpu.CompilerParams(
            dimension_semantics=("parallel",),
            vmem_limit_bytes=VMEM_LIMIT),
    )(x, prep["mlp_w1"], prep["mlp_b1"], prep["mlp_w2"], prep["mlp_b2"],
      prep["mlp_w3"], prep["mlp_b3"])


# ----------------------------------------------------------------------------
# Full forward (jitted; 12 pallas_calls: pe_lin + 10 fused layers + out MLP)
# ----------------------------------------------------------------------------
def spd_encoder_forward(prep, pe_dense, a_compact, mask, kmask, gmask, *, block):
    x = pallas_pe_lin(pe_dense, prep["pe_w"], prep["pe_b"], block=block)
    for lp in prep["layers"]:
        x = pallas_gps_layer(x, a_compact, mask, kmask, gmask, lp, block=block)
    return pallas_out_mlp(x, prep, block=block)


# ----------------------------------------------------------------------------
# Host-side graph preprocessing (dense-batch layout, compact block-diag adjacency)
# ----------------------------------------------------------------------------
def build_graph_prep(edge_index_np, batch_np, num_graphs, *, row_target=ROW_TARGET):
    batch_np = np.asarray(batch_np, np.int64)
    n = batch_np.shape[0]
    counts = np.bincount(batch_np, minlength=num_graphs)
    nmax = int(counts.max()) if n else 1
    nmax_p = _round_up(max(nmax, 1), 8)

    # graphs per row block: big enough to amortize per-step overhead, but keep at
    # least 2 row blocks when the batch allows it (v7x has 2 TensorCores).
    gb = max(1, min(num_graphs, max(1, row_target // nmax_p)))
    if num_graphs >= 2 and -(-num_graphs // gb) < 2:
        gb = max(1, (num_graphs + 1) // 2)
    bp = _round_up(num_graphs, gb)
    block = gb * nmax_p
    pp = bp * nmax_p

    pos = np.zeros(n, np.int64)
    cursor = np.zeros(num_graphs, np.int64)
    for i in range(n):
        g = batch_np[i]
        pos[i] = cursor[g]
        cursor[g] += 1
    flat_idx = batch_np * nmax_p + pos                  # node -> dense-flat row

    mask = np.zeros((pp, 1), np.float32)
    mask[flat_idx, 0] = 1.0
    kmask = np.zeros((pp, 1), np.float32)               # rows of the reference dense batch
    for g in range(num_graphs):
        kmask[g * nmax_p: g * nmax_p + nmax, 0] = 1.0

    # compact block-diagonal (A + I): row r stores only its own row block's columns.
    # Edges never cross graphs, and graphs never cross row blocks, so this is exact.
    a = np.zeros((pp, block), np.float32)
    if edge_index_np.size:
        src, dst = edge_index_np[0], edge_index_np[1]
        np.add.at(a, (flat_idx[dst], flat_idx[src] % block), 1.0)
    a[flat_idx, flat_idx % block] += 1.0                # GIN eps=0: A + I on real nodes

    # same-graph column mask within a row block (identical for every block)
    gidx = np.arange(block) // nmax_p
    gmask = (gidx[:, None] == gidx[None, :]).astype(np.float32)

    return dict(
        nmax_p=nmax_p, block=block, pp=pp,
        flat_idx=jnp.asarray(flat_idx, jnp.int32),
        mask=jnp.asarray(mask),
        kmask=jnp.asarray(kmask),
        gmask=jnp.asarray(gmask),
        a_compact=jnp.asarray(a, jnp.float32),
    )


# ----------------------------------------------------------------------------
# Deterministic parameter init (torch.nn.Linear-style bounds) + prep/folding
# ----------------------------------------------------------------------------
def init_linear(key, din, dout, bias=True):
    k1, k2 = jax.random.split(key)
    bound = 1.0 / math.sqrt(din)
    w = jax.random.uniform(k1, (din, dout), jnp.float32, -bound, bound)
    if bias:
        b = jax.random.uniform(k2, (dout,), jnp.float32, -bound, bound)
    else:
        b = jnp.zeros((dout,), jnp.float32)
    return w, b


def init_params(key):
    keys = jax.random.split(key, 4 + NUM_LAYERS)
    params = {}
    params["pe_lin_w"], params["pe_lin_b"] = init_linear(keys[0], PE_DIM, EMB)

    bn_scale = jnp.full((EMB,), 1.0 / math.sqrt(1.0 + BN_EPS), jnp.float32)
    bn_shift = jnp.zeros((EMB,), jnp.float32)

    layers = []
    for l in range(NUM_LAYERS):
        lk = jax.random.split(keys[4 + l], 10)
        lp = {}
        lp["gin_w1"], lp["gin_b1"] = init_linear(lk[0], EMB, EMB)
        lp["gin_w2"], lp["gin_b2"] = init_linear(lk[1], EMB, EMB)
        lp["wq"], _ = init_linear(lk[2], EMB, INNER, bias=False)
        lp["wk"], _ = init_linear(lk[3], EMB, INNER, bias=False)
        lp["wv"], _ = init_linear(lk[4], EMB, INNER, bias=False)
        lp["wo"], lp["bo"] = init_linear(lk[5], INNER, EMB)
        # TODO(synk): PyG builds the Performer projection from QR-orthogonalised
        # Gaussian blocks; a plain deterministic Gaussian is used here.
        lp["proj"] = jax.random.normal(lk[6], (NUM_FEATURES, HEAD_CH), jnp.float32)
        lp["mlp_w1"], lp["mlp_b1"] = init_linear(lk[7], EMB, 2 * EMB)
        lp["mlp_w2"], lp["mlp_b2"] = init_linear(lk[8], 2 * EMB, EMB)
        for name in ("bn1", "bn2", "bn3"):
            lp[name + "_scale"] = bn_scale
            lp[name + "_shift"] = bn_shift
        layers.append(lp)
    params["layers"] = layers

    params["mlp_w1"], params["mlp_b1"] = init_linear(keys[1], EMB, EMB)
    params["mlp_w2"], params["mlp_b2"] = init_linear(keys[2], EMB, 2 * EMB)
    params["mlp_w3"], params["mlp_b3"] = init_linear(keys[3], 2 * EMB, EMB)
    return params


def prepare_params(params):
    """Fold BN(eval) into weights/biases, fuse QKV, pad Performer features, cast bf16."""
    bf16 = lambda a: jnp.asarray(a, jnp.bfloat16)
    row = lambda a: jnp.asarray(a, jnp.float32).reshape(1, -1)

    prep = {"pe_w": bf16(params["pe_lin_w"]), "pe_b": row(params["pe_lin_b"])}
    layers = []
    for lp in params["layers"]:
        s1, t1 = lp["bn1_scale"], lp["bn1_shift"]
        s2, t2 = lp["bn2_scale"], lp["bn2_shift"]
        s3, t3 = lp["bn3_scale"], lp["bn3_shift"]
        d = {}
        # GIN mlp: bn1(gin + x) = h@(W2*s1) + (b2*s1+t1) + x*s1
        d["gin_w1"] = bf16(lp["gin_w1"])
        d["gin_b1"] = row(lp["gin_b1"])
        d["gin_w2"] = bf16(lp["gin_w2"] * s1[None, :])
        d["gin_b2"] = row(lp["gin_b2"] * s1 + t1)
        d["bn1_s"] = row(s1)
        # fused Q|K|V (bias-free) -> [64, 768], lane-dense
        d["wqkv"] = bf16(jnp.concatenate([lp["wq"], lp["wk"], lp["wv"]], axis=1))
        # Performer projection: transpose and zero-pad 266 -> 384 features;
        # the +eps offset is applied only on real feature columns.
        projT = jnp.pad(lp["proj"].T, ((0, 0), (0, RP - NUM_FEATURES)))
        d["projT"] = bf16(projT)
        d["feat_eps"] = row(jnp.concatenate(
            [jnp.full((NUM_FEATURES,), KERNEL_EPS, jnp.float32),
             jnp.zeros((RP - NUM_FEATURES,), jnp.float32)]))
        # attn_out + residual + BN2: attn@(Wo*s2) + (bo*s2+t2) + x*s2
        d["wo"] = bf16(lp["wo"] * s2[None, :])
        d["bo"] = row(lp["bo"] * s2 + t2)
        d["bn2_s"] = row(s2)
        # FFN + residual + BN3: ff@(W2*s3) + (b2*s3+t3) + out0*s3
        d["ffn_w1"] = bf16(lp["mlp_w1"])
        d["ffn_b1"] = row(lp["mlp_b1"])
        d["ffn_w2"] = bf16(lp["mlp_w2"] * s3[None, :])
        d["ffn_b2"] = row(lp["mlp_b2"] * s3 + t3)
        d["bn3_s"] = row(s3)
        layers.append(d)
    prep["layers"] = layers

    prep["mlp_w1"] = bf16(params["mlp_w1"]); prep["mlp_b1"] = row(params["mlp_b1"])
    prep["mlp_w2"] = bf16(params["mlp_w2"]); prep["mlp_b2"] = row(params["mlp_b2"])
    prep["mlp_w3"] = bf16(params["mlp_w3"]); prep["mlp_b3"] = row(params["mlp_b3"])
    return prep


# ----------------------------------------------------------------------------
if __name__ == "__main__":
    key = jax.random.PRNGKey(0)
    k_param, k_x = jax.random.split(key)

    num_graphs = 2
    nodes_per_graph = 8
    n_nodes = num_graphs * nodes_per_graph

    # node positional encodings (pe_dim = 20)
    x = jax.random.normal(k_x, (n_nodes, PE_DIM), jnp.float32)

    # ring graph inside each of the two 8-node subgraphs (bidirectional edges)
    edges = []
    for g in range(num_graphs):
        base = g * nodes_per_graph
        for i in range(nodes_per_graph):
            a, b = base + i, base + (i + 1) % nodes_per_graph
            edges.append((a, b))
            edges.append((b, a))
    edge_index = np.asarray(edges, dtype=np.int32).T            # [2, 32]
    batch = np.repeat(np.arange(num_graphs), nodes_per_graph).astype(np.int32)

    params = init_params(k_param)
    prep = prepare_params(params)
    gprep = build_graph_prep(edge_index, batch, num_graphs)

    # scatter pe into the padded dense-batch flat layout once
    pe_dense = jnp.zeros((gprep["pp"], PE_DIM), jnp.float32).at[gprep["flat_idx"]].set(x)

    fwd = jax.jit(functools.partial(spd_encoder_forward, block=gprep["block"]))

    out_dense = fwd(prep, pe_dense, gprep["a_compact"], gprep["mask"],
                    gprep["kmask"], gprep["gmask"])
    out = out_dense[gprep["flat_idx"]]                          # back to node-major
    out = jax.block_until_ready(out)

    assert out.shape == (n_nodes, EMB), out.shape
    assert bool(jnp.all(jnp.isfinite(out)))
    print("KERNEL_OK")
</pallas_src>

<mosaic_0001>
module attributes {stable_mosaic.version = 11 : i64} {
  func.func @_pe_lin_kernel(%arg0: i32, %arg1: memref<8x20xf32, #tpu.memory_space<vmem>>, %arg2: memref<20x64xbf16, #tpu.memory_space<vmem>>, %arg3: memref<1x64xf32, #tpu.memory_space<vmem>>, %arg4: memref<8x64xf32, #tpu.memory_space<vmem>>) attributes {dimension_semantics = [#tpu.dimension_semantics<parallel>], iteration_bounds = array<i64: 2>, scalar_prefetch = 0 : i64, scratch_operands = 0 : i64, tpu.core_type = #tpu.core_type<tc>, window_params = [{transform_indices = @transform_0, window_bounds = array<i64: 8, 20>}, {pipeline_mode = #tpu.pipeline_mode<synchronous>, transform_indices = @transform_1, window_bounds = array<i64: 20, 64>}, {pipeline_mode = #tpu.pipeline_mode<synchronous>, transform_indices = @transform_2, window_bounds = array<i64: 1, 64>}, {transform_indices = @transform_3, window_bounds = array<i64: 8, 64>}]} {
    %c0 = arith.constant 0 : index
    %c0_0 = arith.constant 0 : index
    %0 = vector.load %arg1[%c0, %c0_0] : memref<8x20xf32, #tpu.memory_space<vmem>>, vector<8x20xf32>
    %1 = arith.truncf %0 : vector<8x20xf32> to vector<8x20xbf16>
    %c0_1 = arith.constant 0 : index
    %c0_2 = arith.constant 0 : index
    %2 = vector.load %arg2[%c0_1, %c0_2] : memref<20x64xbf16, #tpu.memory_space<vmem>>, vector<20x64xbf16>
    %cst = arith.constant dense<0.000000e+00> : vector<8x64xf32>
    %3 = tpu.matmul %1, %2, %cst {dimension_numbers = #tpu.dot_dimension_numbers<[1], [0], [0], [1], [0, 0, 1, 1], [], []>} : vector<8x20xbf16>, vector<20x64xbf16>, vector<8x64xf32> -> vector<8x64xf32>
    %c0_3 = arith.constant 0 : index
    %c0_4 = arith.constant 0 : index
    %4 = vector.load %arg3[%c0_3, %c0_4] : memref<1x64xf32, #tpu.memory_space<vmem>>, vector<1x64xf32>
    %5 = vector.broadcast %4 : vector<1x64xf32> to vector<8x64xf32>
    %6 = arith.addf %3, %5 : vector<8x64xf32>
    %c0_5 = arith.constant 0 : index
    %c0_6 = arith.constant 0 : index
    %7 = vector.load %arg4[%c0_5, %c0_6] : memref<8x64xf32, #tpu.memory_space<vmem>>, vector<8x64xf32>
    tpu.vector_store %arg4[%c0_5, %c0_6], %6 {strides = array<i32>} : memref<8x64xf32, #tpu.memory_space<vmem>>, vector<8x64xf32>,
    return
  }
  func.func @transform_0(%arg0: i32) -> (i32, i32) {
    %c0_i32 = arith.constant 0 : i32
    %c0_i32_0 = arith.constant 0 : i32
    return %arg0, %c0_i32 : i32, i32
  }
  func.func @transform_1(%arg0: i32) -> (i32, i32) {
    %c0_i32 = arith.constant 0 : i32
    %c0_i32_0 = arith.constant 0 : i32
    %c0_i32_1 = arith.constant 0 : i32
    return %c0_i32, %c0_i32_0 : i32, i32
  }
  func.func @transform_2(%arg0: i32) -> (i32, i32) {
    %c0_i32 = arith.constant 0 : i32
    %c0_i32_0 = arith.constant 0 : i32
    %c0_i32_1 = arith.constant 0 : i32
    return %c0_i32, %c0_i32_0 : i32, i32
  }
  func.func @transform_3(%arg0: i32) -> (i32, i32) {
    %c0_i32 = arith.constant 0 : i32
    %c0_i32_0 = arith.constant 0 : i32
    return %arg0, %c0_i32 : i32, i32
  }
}

module attributes {stable_mosaic.version = 11 : i64} {
  func.func @_gps_layer_kernel(%arg0: i32, %arg1: memref<8x8xf32, #tpu.memory_space<vmem>>, %arg2: memref<8x64xf32, #tpu.memory_space<vmem>>, %arg3: memref<8x1xf32, #tpu.memory_space<vmem>>, %arg4: memref<8x1xf32, #tpu.memory_space<vmem>>, %arg5: memref<8x8xf32, #tpu.memory_space<vmem>>, %arg6: memref<64x64xbf16, #tpu.memory_space<vmem>>, %arg7: memref<1x64xf32, #tpu.memory_space<vmem>>, %arg8: memref<64x64xbf16, #tpu.memory_space<vmem>>, %arg9: memref<1x64xf32, #tpu.memory_space<vmem>>, %arg10: memref<1x64xf32, #tpu.memory_space<vmem>>, %arg11: memref<64x768xbf16, #tpu.memory_space<vmem>>, %arg12: memref<64x384xbf16, #tpu.memory_space<vmem>>, %arg13: memref<1x384xf32, #tpu.memory_space<vmem>>, %arg14: memref<256x64xbf16, #tpu.memory_space<vmem>>, %arg15: memref<1x64xf32, #tpu.memory_space<vmem>>, %arg16: memref<1x64xf32, #tpu.memory_space<vmem>>, %arg17: memref<64x128xbf16, #tpu.memory_space<vmem>>, %arg18: memref<1x128xf32, #tpu.memory_space<vmem>>, %arg19: memref<128x64xbf16, #tpu.memory_space<vmem>>, %arg20: memref<1x64xf32, #tpu.memory_space<vmem>>, %arg21: memref<1x64xf32, #tpu.memory_space<vmem>>, %arg22: memref<8x64xf32, #tpu.memory_space<vmem>>) attributes {dimension_semantics = [#tpu.dimension_semantics<parallel>], iteration_bounds = array<i64: 2>, scalar_prefetch = 0 : i64, scratch_operands = 0 : i64, tpu.core_type = #tpu.core_type<tc>, window_params = [{transform_indices = @transform_0, window_bounds = array<i64: 8, 8>}, {transform_indices = @transform_1, window_bounds = array<i64: 8, 64>}, {transform_indices = @transform_2, window_bounds = array<i64: 8, 1>}, {transform_indices = @transform_3, window_bounds = array<i64: 8, 1>}, {pipeline_mode = #tpu.pipeline_mode<synchronous>, transform_indices = @transform_4, window_bounds = array<i64: 8, 8>}, {pipeline_mode = #tpu.pipeline_mode<synchronous>, transform_indices = @transform_5, window_bounds = array<i64: 64, 64>}, {pipeline_mode = #tpu.pipeline_mode<synchronous>, transform_indices = @transform_6, window_bounds = array<i64: 1, 64>}, {pipeline_mode = #tpu.pipeline_mode<synchronous>, transform_indices = @transform_7, window_bounds = array<i64: 64, 64>}, {pipeline_mode = #tpu.pipeline_mode<synchronous>, transform_indices = @transform_8, window_bounds = array<i64: 1, 64>}, {pipeline_mode = #tpu.pipeline_mode<synchronous>, transform_indices = @transform_9, window_bounds = array<i64: 1, 64>}, {pipeline_mode = #tpu.pipeline_mode<synchronous>, transform_indices = @transform_10, window_bounds = array<i64: 64, 768>}, {pipeline_mode = #tpu.pipeline_mode<synchronous>, transform_indices = @transform_11, window_bounds = array<i64: 64, 384>}, {pipeline_mode = #tpu.pipeline_mode<synchronous>, transform_indices = @transform_12, window_bounds = array<i64: 1, 384>}, {pipeline_mode = #tpu.pipeline_mode<synchronous>, transform_indices = @transform_13, window_bounds = array<i64: 256, 64>}, {pipeline_mode = #tpu.pipeline_mode<synchronous>, transform_indices = @transform_14, window_bounds = array<i64: 1, 64>}, {pipeline_mode = #tpu.pipeline_mode<synchronous>, transform_indices = @transform_15, window_bounds = array<i64: 1, 64>}, {pipeline_mode = #tpu.pipeline_mode<synchronous>, transform_indices = @transform_16, window_bounds = array<i64: 64, 128>}, {pipeline_mode = #tpu.pipeline_mode<synchronous>, transform_indices = @transform_17, window_bounds = array<i64: 1, 128>}, {pipeline_mode = #tpu.pipeline_mode<synchronous>, transform_indices = @transform_18, window_bounds = array<i64: 128, 64>}, {pipeline_mode = #tpu.pipeline_mode<synchronous>, transform_indices = @transform_19, window_bounds = array<i64: 1, 64>}, {pipeline_mode = #tpu.pipeline_mode<synchronous>, transform_indices = @transform_20, window_bounds = array<i64: 1, 64>}, {transform_indices = @transform_21, window_bounds = array<i64: 8, 64>}]} {
    %c0 = arith.constant 0 : index
    %c0_0 = arith.constant 0 : index
    %0 = vector.load %arg2[%c0, %c0_0] : memref<8x64xf32, #tpu.memory_space<vmem>>, vector<8x64xf32>
    %c0_1 = arith.constant 0 : index
    %c0_2 = arith.constant 0 : index
    %1 = vector.load %arg3[%c0_1, %c0_2] : memref<8x1xf32, #tpu.memory_space<vmem>>, vector<8x1xf32>
    %2 = vector.broadcast %1 : vector<8x1xf32> to vector<8x64xf32>
    %3 = arith.mulf %0, %2 : vector<8x64xf32>
    %4 = arith.truncf %3 : vector<8x64xf32> to vector<8x64xbf16>
    %c0_3 = arith.constant 0 : index
    %c0_4 = arith.constant 0 : index
    %5 = vector.load %arg1[%c0_3, %c0_4] : memref<8x8xf32, #tpu.memory_space<vmem>>, vector<8x8xf32>
    %6 = arith.truncf %5 : vector<8x8xf32> to vector<8x8xbf16>
    %cst = arith.constant dense<0.000000e+00> : vector<8x64xf32>
    %7 = tpu.matmul %6, %4, %cst {dimension_numbers = #tpu.dot_dimension_numbers<[1], [0], [0], [1], [0, 0, 1, 1], [], []>} : vector<8x8xbf16>, vector<8x64xbf16>, vector<8x64xf32> -> vector<8x64xf32>
    %8 = arith.truncf %7 : vector<8x64xf32> to vector<8x64xbf16>
    %c0_5 = arith.constant 0 : index
    %c0_6 = arith.constant 0 : index
    %9 = vector.load %arg6[%c0_5, %c0_6] : memref<64x64xbf16, #tpu.memory_space<vmem>>, vector<64x64xbf16>
    %cst_7 = arith.constant dense<0.000000e+00> : vector<8x64xf32>
    %10 = tpu.matmul %8, %9, %cst_7 {dimension_numbers = #tpu.dot_dimension_numbers<[1], [0], [0], [1], [0, 0, 1, 1], [], []>} : vector<8x64xbf16>, vector<64x64xbf16>, vector<8x64xf32> -> vector<8x64xf32>
    %c0_8 = arith.constant 0 : index
    %c0_9 = arith.constant 0 : index
    %11 = vector.load %arg7[%c0_8, %c0_9] : memref<1x64xf32, #tpu.memory_space<vmem>>, vector<1x64xf32>
    %12 = vector.broadcast %11 : vector<1x64xf32> to vector<8x64xf32>
    %13 = arith.addf %10, %12 : vector<8x64xf32>
    %cst_10 = arith.constant 0.000000e+00 : f32
    %14 = vector.broadcast %cst_10 : f32 to vector<8x64xf32>
    %15 = arith.maximumf %13, %14 : vector<8x64xf32>
    %16 = arith.truncf %15 : vector<8x64xf32> to vector<8x64xbf16>
    %c0_11 = arith.constant 0 : index
    %c0_12 = arith.constant 0 : index
    %17 = vector.load %arg8[%c0_11, %c0_12] : memref<64x64xbf16, #tpu.memory_space<vmem>>, vector<64x64xbf16>
    %cst_13 = arith.constant dense<0.000000e+00> : vector<8x64xf32>
    %18 = tpu.matmul %16, %17, %cst_13 {dimension_numbers = #tpu.dot_dimension_numbers<[1], [0], [0], [1], [0, 0, 1, 1], [], []>} : vector<8x64xbf16>, vector<64x64xbf16>, vector<8x64xf32> -> vector<8x64xf32>
    %c0_14 = arith.constant 0 : index
    %c0_15 = arith.constant 0 : index
    %19 = vector.load %arg9[%c0_14, %c0_15] : memref<1x64xf32, #tpu.memory_space<vmem>>, vector<1x64xf32>
    %20 = vector.broadcast %19 : vector<1x64xf32> to vector<8x64xf32>
    %21 = arith.addf %18, %20 : vector<8x64xf32>
    %c0_16 = arith.constant 0 : index
    %c0_17 = arith.constant 0 : index
    %22 = vector.load %arg10[%c0_16, %c0_17] : memref<1x64xf32, #tpu.memory_space<vmem>>, vector<1x64xf32>
    %23 = vector.broadcast %22 : vector<1x64xf32> to vector<8x64xf32>
    %24 = arith.mulf %0, %23 : vector<8x64xf32>
    %25 = arith.addf %21, %24 : vector<8x64xf32>
    %c0_18 = arith.constant 0 : index
    %c0_19 = arith.constant 0 : index
    %26 = vector.load %arg11[%c0_18, %c0_19] : memref<64x768xbf16, #tpu.memory_space<vmem>>, vector<64x768xbf16>
    %cst_20 = arith.constant dense<0.000000e+00> : vector<8x768xf32>
    %27 = tpu.matmul %4, %26, %cst_20 {dimension_numbers = #tpu.dot_dimension_numbers<[1], [0], [0], [1], [0, 0, 1, 1], [], []>} : vector<8x64xbf16>, vector<64x768xbf16>, vector<8x768xf32> -> vector<8x768xf32>
    %c0_21 = arith.constant 0 : index
    %c0_22 = arith.constant 0 : index
    %28 = vector.load %arg12[%c0_21, %c0_22] : memref<64x384xbf16, #tpu.memory_space<vmem>>, vector<64x384xbf16>
    %c0_23 = arith.constant 0 : index
    %c0_24 = arith.constant 0 : index
    %29 = vector.load %arg13[%c0_23, %c0_24] : memref<1x384xf32, #tpu.memory_space<vmem>>, vector<1x384xf32>
    %c0_25 = arith.constant 0 : index
    %c0_26 = arith.constant 0 : index
    %30 = vector.load %arg4[%c0_25, %c0_26] : memref<8x1xf32, #tpu.memory_space<vmem>>, vector<8x1xf32>
    %c0_27 = arith.constant 0 : index
    %c0_28 = arith.constant 0 : index
    %31 = vector.load %arg5[%c0_27, %c0_28] : memref<8x8xf32, #tpu.memory_space<vmem>>, vector<8x8xf32>
    %32 = vector.extract_strided_slice %27 {offsets = [0, 0], sizes = [8, 64], strides = [1, 1]} : vector<8x768xf32> to vector<8x64xf32>
    %33 = vector.extract_strided_slice %27 {offsets = [0, 256], sizes = [8, 64], strides = [1, 1]} : vector<8x768xf32> to vector<8x64xf32>
    %34 = vector.extract_strided_slice %27 {offsets = [0, 512], sizes = [8, 64], strides = [1, 1]} : vector<8x768xf32> to vector<8x64xf32>
    %35 = arith.truncf %32 : vector<8x64xf32> to vector<8x64xbf16>
    %cst_29 = arith.constant dense<0.000000e+00> : vector<8x384xf32>
    %36 = tpu.matmul %35, %28, %cst_29 {dimension_numbers = #tpu.dot_dimension_numbers<[1], [0], [0], [1], [0, 0, 1, 1], [], []>} : vector<8x64xbf16>, vector<64x384xbf16>, vector<8x384xf32> -> vector<8x384xf32>
    %cst_30 = arith.constant 0.000000e+00 : f32
    %37 = vector.broadcast %cst_30 : f32 to vector<8x384xf32>
    %38 = arith.maximumf %36, %37 : vector<8x384xf32>
    %39 = vector.broadcast %29 : vector<1x384xf32> to vector<8x384xf32>
    %40 = arith.addf %38, %39 : vector<8x384xf32>
    %41 = arith.truncf %33 : vector<8x64xf32> to vector<8x64xbf16>
    %cst_31 = arith.constant dense<0.000000e+00> : vector<8x384xf32>
    %42 = tpu.matmul %41, %28, %cst_31 {dimension_numbers = #tpu.dot_dimension_numbers<[1], [0], [0], [1], [0, 0, 1, 1], [], []>} : vector<8x64xbf16>, vector<64x384xbf16>, vector<8x384xf32> -> vector<8x384xf32>
    %cst_32 = arith.constant 0.000000e+00 : f32
    %43 = vector.broadcast %cst_32 : f32 to vector<8x384xf32>
    %44 = arith.maximumf %42, %43 : vector<8x384xf32>
    %45 = vector.broadcast %29 : vector<1x384xf32> to vector<8x384xf32>
    %46 = arith.addf %44, %45 : vector<8x384xf32>
    %47 = vector.broadcast %30 : vector<8x1xf32> to vector<8x384xf32>
    %48 = arith.mulf %46, %47 : vector<8x384xf32>
    %49 = arith.truncf %40 : vector<8x384xf32> to vector<8x384xbf16>
    %50 = arith.truncf %48 : vector<8x384xf32> to vector<8x384xbf16>
    %cst_33 = arith.constant dense<0.000000e+00> : vector<8x8xf32>
    %51 = tpu.matmul %49, %50, %cst_33 {dimension_numbers = #tpu.dot_dimension_numbers<[1], [1], [0], [0], [0, 0, 1, 0], [], []>} : vector<8x384xbf16>, vector<8x384xbf16>, vector<8x8xf32> -> vector<8x8xf32>
    %52 = arith.mulf %51, %31 : vector<8x8xf32>
    %cst_34 = arith.constant dense<0.000000e+00> : vector<8xf32>
    %53 = vector.multi_reduction <add>, %52, %cst_34 [1] : vector<8x8xf32> to vector<8xf32>
    %54 = vector.shape_cast %53 : vector<8xf32> to vector<8x1xf32>
    %cst_35 = arith.constant 9.99999971E-10 : f32
    %55 = vector.broadcast %cst_35 : f32 to vector<8x1xf32>
    %56 = arith.maximumf %54, %55 : vector<8x1xf32>
    %57 = arith.truncf %52 : vector<8x8xf32> to vector<8x8xbf16>
    %58 = arith.truncf %34 : vector<8x64xf32> to vector<8x64xbf16>
    %cst_36 = arith.constant dense<0.000000e+00> : vector<8x64xf32>
    %59 = tpu.matmul %57, %58, %cst_36 {dimension_numbers = #tpu.dot_dimension_numbers<[1], [0], [0], [1], [0, 0, 1, 1], [], []>} : vector<8x8xbf16>, vector<8x64xbf16>, vector<8x64xf32> -> vector<8x64xf32>
    %60 = tpu.reciprocal %56 {approx = true} : vector<8x1xf32> -> vector<8x1xf32>
    %61 = vector.broadcast %60 : vector<8x1xf32> to vector<8x64xf32>
    %62 = arith.mulf %59, %61 : vector<8x64xf32>
    %63 = vector.extract_strided_slice %27 {offsets = [0, 64], sizes = [8, 64], strides = [1, 1]} : vector<8x768xf32> to vector<8x64xf32>
    %64 = vector.extract_strided_slice %27 {offsets = [0, 320], sizes = [8, 64], strides = [1, 1]} : vector<8x768xf32> to vector<8x64xf32>
    %65 = vector.extract_strided_slice %27 {offsets = [0, 576], sizes = [8, 64], strides = [1, 1]} : vector<8x768xf32> to vector<8x64xf32>
    %66 = arith.truncf %63 : vector<8x64xf32> to vector<8x64xbf16>
    %cst_37 = arith.constant dense<0.000000e+00> : vector<8x384xf32>
    %67 = tpu.matmul %66, %28, %cst_37 {dimension_numbers = #tpu.dot_dimension_numbers<[1], [0], [0], [1], [0, 0, 1, 1], [], []>} : vector<8x64xbf16>, vector<64x384xbf16>, vector<8x384xf32> -> vector<8x384xf32>
    %cst_38 = arith.constant 0.000000e+00 : f32
    %68 = vector.broadcast %cst_38 : f32 to vector<8x384xf32>
    %69 = arith.maximumf %67, %68 : vector<8x384xf32>
    %70 = vector.broadcast %29 : vector<1x384xf32> to vector<8x384xf32>
    %71 = arith.addf %69, %70 : vector<8x384xf32>
    %72 = arith.truncf %64 : vector<8x64xf32> to vector<8x64xbf16>
    %cst_39 = arith.constant dense<0.000000e+00> : vector<8x384xf32>
    %73 = tpu.matmul %72, %28, %cst_39 {dimension_numbers = #tpu.dot_dimension_numbers<[1], [0], [0], [1], [0, 0, 1, 1], [], []>} : vector<8x64xbf16>, vector<64x384xbf16>, vector<8x384xf32> -> vector<8x384xf32>
    %cst_40 = arith.constant 0.000000e+00 : f32
    %74 = vector.broadcast %cst_40 : f32 to vector<8x384xf32>
    %75 = arith.maximumf %73, %74 : vector<8x384xf32>
    %76 = vector.broadcast %29 : vector<1x384xf32> to vector<8x384xf32>
    %77 = arith.addf %75, %76 : vector<8x384xf32>
    %78 = vector.broadcast %30 : vector<8x1xf32> to vector<8x384xf32>
    %79 = arith.mulf %77, %78 : vector<8x384xf32>
    %80 = arith.truncf %71 : vector<8x384xf32> to vector<8x384xbf16>
    %81 = arith.truncf %79 : vector<8x384xf32> to vector<8x384xbf16>
    %cst_41 = arith.constant dense<0.000000e+00> : vector<8x8xf32>
    %82 = tpu.matmul %80, %81, %cst_41 {dimension_numbers = #tpu.dot_dimension_numbers<[1], [1], [0], [0], [0, 0, 1, 0], [], []>} : vector<8x384xbf16>, vector<8x384xbf16>, vector<8x8xf32> -> vector<8x8xf32>
    %83 = arith.mulf %82, %31 : vector<8x8xf32>
    %cst_42 = arith.constant dense<0.000000e+00> : vector<8xf32>
    %84 = vector.multi_reduction <add>, %83, %cst_42 [1] : vector<8x8xf32> to vector<8xf32>
    %85 = vector.shape_cast %84 : vector<8xf32> to vector<8x1xf32>
    %cst_43 = arith.constant 9.99999971E-10 : f32
    %86 = vector.broadcast %cst_43 : f32 to vector<8x1xf32>
    %87 = arith.maximumf %85, %86 : vector<8x1xf32>
    %88 = arith.truncf %83 : vector<8x8xf32> to vector<8x8xbf16>
    %89 = arith.truncf %65 : vector<8x64xf32> to vector<8x64xbf16>
    %cst_44 = arith.constant dense<0.000000e+00> : vector<8x64xf32>
    %90 = tpu.matmul %88, %89, %cst_44 {dimension_numbers = #tpu.dot_dimension_numbers<[1], [0], [0], [1], [0, 0, 1, 1], [], []>} : vector<8x8xbf16>, vector<8x64xbf16>, vector<8x64xf32> -> vector<8x64xf32>
    %91 = tpu.reciprocal %87 {approx = true} : vector<8x1xf32> -> vector<8x1xf32>
    %92 = vector.broadcast %91 : vector<8x1xf32> to vector<8x64xf32>
    %93 = arith.mulf %90, %92 : vector<8x64xf32>
    %94 = vector.extract_strided_slice %27 {offsets = [0, 128], sizes = [8, 64], strides = [1, 1]} : vector<8x768xf32> to vector<8x64xf32>
    %95 = vector.extract_strided_slice %27 {offsets = [0, 384], sizes = [8, 64], strides = [1, 1]} : vector<8x768xf32> to vector<8x64xf32>
    %96 = vector.extract_strided_slice %27 {offsets = [0, 640], sizes = [8, 64], strides = [1, 1]} : vector<8x768xf32> to vector<8x64xf32>
    %97 = arith.truncf %94 : vector<8x64xf32> to vector<8x64xbf16>
    %cst_45 = arith.constant dense<0.000000e+00> : vector<8x384xf32>
    %98 = tpu.matmul %97, %28, %cst_45 {dimension_numbers = #tpu.dot_dimension_numbers<[1], [0], [0], [1], [0, 0, 1, 1], [], []>} : vector<8x64xbf16>, vector<64x384xbf16>, vector<8x384xf32> -> vector<8x384xf32>
    %cst_46 = arith.constant 0.000000e+00 : f32
    %99 = vector.broadcast %cst_46 : f32 to vector<8x384xf32>
    %100 = arith.maximumf %98, %99 : vector<8x384xf32>
    %101 = vector.broadcast %29 : vector<1x384xf32> to vector<8x384xf32>
    %102 = arith.addf %100, %101 : vector<8x384xf32>
    %103 = arith.truncf %95 : vector<8x64xf32> to vector<8x64xbf16>
    %cst_47 = arith.constant dense<0.000000e+00> : vector<8x384xf32>
    %104 = tpu.matmul %103, %28, %cst_47 {dimension_numbers = #tpu.dot_dimension_numbers<[1], [0], [0], [1], [0, 0, 1, 1], [], []>} : vector<8x64xbf16>, vector<64x384xbf16>, vector<8x384xf32> -> vector<8x384xf32>
    %cst_48 = arith.constant 0.000000e+00 : f32
    %105 = vector.broadcast %cst_48 : f32 to vector<8x384xf32>
    %106 = arith.maximumf %104, %105 : vector<8x384xf32>
    %107 = vector.broadcast %29 : vector<1x384xf32> to vector<8x384xf32>
    %108 = arith.addf %106, %107 : vector<8x384xf32>
    %109 = vector.broadcast %30 : vector<8x1xf32> to vector<8x384xf32>
    %110 = arith.mulf %108, %109 : vector<8x384xf32>
    %111 = arith.truncf %102 : vector<8x384xf32> to vector<8x384xbf16>
    %112 = arith.truncf %110 : vector<8x384xf32> to vector<8x384xbf16>
    %cst_49 = arith.constant dense<0.000000e+00> : vector<8x8xf32>
    %113 = tpu.matmul %111, %112, %cst_49 {dimension_numbers = #tpu.dot_dimension_numbers<[1], [1], [0], [0], [0, 0, 1, 0], [], []>} : vector<8x384xbf16>, vector<8x384xbf16>, vector<8x8xf32> -> vector<8x8xf32>
    %114 = arith.mulf %113, %31 : vector<8x8xf32>
    %cst_50 = arith.constant dense<0.000000e+00> : vector<8xf32>
    %115 = vector.multi_reduction <add>, %114, %cst_50 [1] : vector<8x8xf32> to vector<8xf32>
    %116 = vector.shape_cast %115 : vector<8xf32> to vector<8x1xf32>
    %cst_51 = arith.constant 9.99999971E-10 : f32
    %117 = vector.broadcast %cst_51 : f32 to vector<8x1xf32>
    %118 = arith.maximumf %116, %117 : vector<8x1xf32>
    %119 = arith.truncf %114 : vector<8x8xf32> to vector<8x8xbf16>
    %120 = arith.truncf %96 : vector<8x64xf32> to vector<8x64xbf16>
    %cst_52 = arith.constant dense<0.000000e+00> : vector<8x64xf32>
    %121 = tpu.matmul %119, %120, %cst_52 {dimension_numbers = #tpu.dot_dimension_numbers<[1], [0], [0], [1], [0, 0, 1, 1], [], []>} : vector<8x8xbf16>, vector<8x64xbf16>, vector<8x64xf32> -> vector<8x64xf32>
    %122 = tpu.reciprocal %118 {approx = true} : vector<8x1xf32> -> vector<8x1xf32>
    %123 = vector.broadcast %122 : vector<8x1xf32> to vector<8x64xf32>
    %124 = arith.mulf %121, %123 : vector<8x64xf32>
    %125 = vector.extract_strided_slice %27 {offsets = [0, 192], sizes = [8, 64], strides = [1, 1]} : vector<8x768xf32> to vector<8x64xf32>
    %126 = vector.extract_strided_slice %27 {offsets = [0, 448], sizes = [8, 64], strides = [1, 1]} : vector<8x768xf32> to vector<8x64xf32>
    %127 = vector.extract_strided_slice %27 {offsets = [0, 704], sizes = [8, 64], strides = [1, 1]} : vector<8x768xf32> to vector<8x64xf32>
    %128 = arith.truncf %125 : vector<8x64xf32> to vector<8x64xbf16>
    %cst_53 = arith.constant dense<0.000000e+00> : vector<8x384xf32>
    %129 = tpu.matmul %128, %28, %cst_53 {dimension_numbers = #tpu.dot_dimension_numbers<[1], [0], [0], [1], [0, 0, 1, 1], [], []>} : vector<8x64xbf16>, vector<64x384xbf16>, vector<8x384xf32> -> vector<8x384xf32>
    %cst_54 = arith.constant 0.000000e+00 : f32
    %130 = vector.broadcast %cst_54 : f32 to vector<8x384xf32>
    %131 = arith.maximumf %129, %130 : vector<8x384xf32>
    %132 = vector.broadcast %29 : vector<1x384xf32> to vector<8x384xf32>
    %133 = arith.addf %131, %132 : vector<8x384xf32>
    %134 = arith.truncf %126 : vector<8x64xf32> to vector<8x64xbf16>
    %cst_55 = arith.constant dense<0.000000e+00> : vector<8x384xf32>
    %135 = tpu.matmul %134, %28, %cst_55 {dimension_numbers = #tpu.dot_dimension_numbers<[1], [0], [0], [1], [0, 0, 1, 1], [], []>} : vector<8x64xbf16>, vector<64x384xbf16>, vector<8x384xf32> -> vector<8x384xf32>
    %cst_56 = arith.constant 0.000000e+00 : f32
    %136 = vector.broadcast %cst_56 : f32 to vector<8x384xf32>
    %137 = arith.maximumf %135, %136 : vector<8x384xf32>
    %138 = vector.broadcast %29 : vector<1x384xf32> to vector<8x384xf32>
    %139 = arith.addf %137, %138 : vector<8x384xf32>
    %140 = vector.broadcast %30 : vector<8x1xf32> to vector<8x384xf32>
    %141 = arith.mulf %139, %140 : vector<8x384xf32>
    %142 = arith.truncf %133 : vector<8x384xf32> to vector<8x384xbf16>
    %143 = arith.truncf %141 : vector<8x384xf32> to vector<8x384xbf16>
    %cst_57 = arith.constant dense<0.000000e+00> : vector<8x8xf32>
    %144 = tpu.matmul %142, %143, %cst_57 {dimension_numbers = #tpu.dot_dimension_numbers<[1], [1], [0], [0], [0, 0, 1, 0], [], []>} : vector<8x384xbf16>, vector<8x384xbf16>, vector<8x8xf32> -> vector<8x8xf32>
    %145 = arith.mulf %144, %31 : vector<8x8xf32>
    %cst_58 = arith.constant dense<0.000000e+00> : vector<8xf32>
    %146 = vector.multi_reduction <add>, %145, %cst_58 [1] : vector<8x8xf32> to vector<8xf32>
    %147 = vector.shape_cast %146 : vector<8xf32> to vector<8x1xf32>
    %cst_59 = arith.constant 9.99999971E-10 : f32
    %148 = vector.broadcast %cst_59 : f32 to vector<8x1xf32>
    %149 = arith.maximumf %147, %148 : vector<8x1xf32>
    %150 = arith.truncf %145 : vector<8x8xf32> to vector<8x8xbf16>
    %151 = arith.truncf %127 : vector<8x64xf32> to vector<8x64xbf16>
    %cst_60 = arith.constant dense<0.000000e+00> : vector<8x64xf32>
    %152 = tpu.matmul %150, %151, %cst_60 {dimension_numbers = #tpu.dot_dimension_numbers<[1], [0], [0], [1], [0, 0, 1, 1], [], []>} : vector<8x8xbf16>, vector<8x64xbf16>, vector<8x64xf32> -> vector<8x64xf32>
    %153 = tpu.reciprocal %149 {approx = true} : vector<8x1xf32> -> vector<8x1xf32>
    %154 = vector.broadcast %153 : vector<8x1xf32> to vector<8x64xf32>
    %155 = arith.mulf %152, %154 : vector<8x64xf32>
    %156 = tpu.concatenate %62, %93, %124, %155 in 1 : vector<8x64xf32>, vector<8x64xf32>, vector<8x64xf32>, vector<8x64xf32> -> vector<8x256xf32>
    %c0_61 = arith.constant 0 : index
    %c0_62 = arith.constant 0 : index
    %157 = vector.load %arg16[%c0_61, %c0_62] : memref<1x64xf32, #tpu.memory_space<vmem>>, vector<1x64xf32>
    %158 = vector.broadcast %157 : vector<1x64xf32> to vector<8x64xf32>
    %159 = arith.mulf %0, %158 : vector<8x64xf32>
    %c0_63 = arith.constant 0 : index
    %c0_64 = arith.constant 0 : index
    %160 = vector.load %arg15[%c0_63, %c0_64] : memref<1x64xf32, #tpu.memory_space<vmem>>, vector<1x64xf32>
    %161 = vector.broadcast %160 : vector<1x64xf32> to vector<8x64xf32>
    %162 = arith.addf %159, %161 : vector<8x64xf32>
    %163 = arith.truncf %156 : vector<8x256xf32> to vector<8x256xbf16>
    %c0_65 = arith.constant 0 : index
    %c0_66 = arith.constant 0 : index
    %164 = vector.load %arg14[%c0_65, %c0_66] : memref<256x64xbf16, #tpu.memory_space<vmem>>, vector<256x64xbf16>
    %cst_67 = arith.constant dense<0.000000e+00> : vector<8x64xf32>
    %165 = tpu.matmul %163, %164, %cst_67 {dimension_numbers = #tpu.dot_dimension_numbers<[1], [0], [0], [1], [0, 0, 1, 1], [], []>} : vector<8x256xbf16>, vector<256x64xbf16>, vector<8x64xf32> -> vector<8x64xf32>
    %166 = arith.addf %162, %165 : vector<8x64xf32>
    %167 = arith.addf %25, %166 : vector<8x64xf32>
    %168 = arith.truncf %167 : vector<8x64xf32> to vector<8x64xbf16>
    %c0_68 = arith.constant 0 : index
    %c0_69 = arith.constant 0 : index
    %169 = vector.load %arg17[%c0_68, %c0_69] : memref<64x128xbf16, #tpu.memory_space<vmem>>, vector<64x128xbf16>
    %cst_70 = arith.constant dense<0.000000e+00> : vector<8x128xf32>
    %170 = tpu.matmul %168, %169, %cst_70 {dimension_numbers = #tpu.dot_dimension_numbers<[1], [0], [0], [1], [0, 0, 1, 1], [], []>} : vector<8x64xbf16>, vector<64x128xbf16>, vector<8x128xf32> -> vector<8x128xf32>
    %c0_71 = arith.constant 0 : index
    %c0_72 = arith.constant 0 : index
    %171 = vector.load %arg18[%c0_71, %c0_72] : memref<1x128xf32, #tpu.memory_space<vmem>>, vector<1x128xf32>
    %172 = vector.broadcast %171 : vector<1x128xf32> to vector<8x128xf32>
    %173 = arith.addf %170, %172 : vector<8x128xf32>
    %cst_73 = arith.constant 0.000000e+00 : f32
    %174 = vector.broadcast %cst_73 : f32 to vector<8x128xf32>
    %175 = arith.maximumf %173, %174 : vector<8x128xf32>
    %176 = arith.truncf %175 : vector<8x128xf32> to vector<8x128xbf16>
    %c0_74 = arith.constant 0 : index
    %c0_75 = arith.constant 0 : index
    %177 = vector.load %arg19[%c0_74, %c0_75] : memref<128x64xbf16, #tpu.memory_space<vmem>>, vector<128x64xbf16>
    %cst_76 = arith.constant dense<0.000000e+00> : vector<8x64xf32>
    %178 = tpu.matmul %176, %177, %cst_76 {dimension_numbers = #tpu.dot_dimension_numbers<[1], [0], [0], [1], [0, 0, 1, 1], [], []>} : vector<8x128xbf16>, vector<128x64xbf16>, vector<8x64xf32> -> vector<8x64xf32>
    %c0_77 = arith.constant 0 : index
    %c0_78 = arith.constant 0 : index
    %179 = vector.load %arg20[%c0_77, %c0_78] : memref<1x64xf32, #tpu.memory_space<vmem>>, vector<1x64xf32>
    %180 = vector.broadcast %179 : vector<1x64xf32> to vector<8x64xf32>
    %181 = arith.addf %178, %180 : vector<8x64xf32>
    %c0_79 = arith.constant 0 : index
    %c0_80 = arith.constant 0 : index
    %182 = vector.load %arg21[%c0_79, %c0_80] : memref<1x64xf32, #tpu.memory_space<vmem>>, vector<1x64xf32>
    %183 = vector.broadcast %182 : vector<1x64xf32> to vector<8x64xf32>
    %184 = arith.mulf %167, %183 : vector<8x64xf32>
    %185 = arith.addf %181, %184 : vector<8x64xf32>
    %c0_81 = arith.constant 0 : index
    %c0_82 = arith.constant 0 : index
    %186 = vector.load %arg22[%c0_81, %c0_82] : memref<8x64xf32, #tpu.memory_space<vmem>>, vector<8x64xf32>
    tpu.vector_store %arg22[%c0_81, %c0_82], %185 {strides = array<i32>} : memref<8x64xf32, #tpu.memory_space<vmem>>, vector<8x64xf32>,
    return
  }
  func.func @transform_0(%arg0: i32) -> (i32, i32) {
    %c0_i32 = arith.constant 0 : i32
    %c0_i32_0 = arith.constant 0 : i32
    return %arg0, %c0_i32 : i32, i32
  }
  func.func @transform_1(%arg0: i32) -> (i32, i32) {
    %c0_i32 = arith.constant 0 : i32
    %c0_i32_0 = arith.constant 0 : i32
    return %arg0, %c0_i32 : i32, i32
  }
  func.func @transform_2(%arg0: i32) -> (i32, i32) {
    %c0_i32 = arith.constant 0 : i32
    %c0_i32_0 = arith.constant 0 : i32
    return %arg0, %c0_i32 : i32, i32
  }
  func.func @transform_3(%arg0: i32) -> (i32, i32) {
    %c0_i32 = arith.constant 0 : i32
    %c0_i32_0 = arith.constant 0 : i32
    return %arg0, %c0_i32 : i32, i32
  }
  func.func @transform_4(%arg0: i32) -> (i32, i32) {
    %c0_i32 = arith.constant 0 : i32
    %c0_i32_0 = arith.constant 0 : i32
    %c0_i32_1 = arith.constant 0 : i32
    return %c0_i32, %c0_i32_0 : i32, i32
  }
  func.func @transform_5(%arg0: i32) -> (i32, i32) {
    %c0_i32 = arith.constant 0 : i32
    %c0_i32_0 = arith.constant 0 : i32
    %c0_i32_1 = arith.constant 0 : i32
    return %c0_i32, %c0_i32_0 : i32, i32
  }
  func.func @transform_6(%arg0: i32) -> (i32, i32) {
    %c0_i32 = arith.constant 0 : i32
    %c0_i32_0 = arith.constant 0 : i32
    %c0_i32_1 = arith.constant 0 : i32
    return %c0_i32, %c0_i32_0 : i32, i32
  }
  func.func @transform_7(%arg0: i32) -> (i32, i32) {
    %c0_i32 = arith.constant 0 : i32
    %c0_i32_0 = arith.constant 0 : i32
    %c0_i32_1 = arith.constant 0 : i32
    return %c0_i32, %c0_i32_0 : i32, i32
  }
  func.func @transform_8(%arg0: i32) -> (i32, i32) {
    %c0_i32 = arith.constant 0 : i32
    %c0_i32_0 = arith.constant 0 : i32
    %c0_i32_1 = arith.constant 0 : i32
    return %c0_i32, %c0_i32_0 : i32, i32
  }
  func.func @transform_9(%arg0: i32) -> (i32, i32) {
    %c0_i32 = arith.constant 0 : i32
    %c0_i32_0 = arith.constant 0 : i32
    %c0_i32_1 = arith.constant 0 : i32
    return %c0_i32, %c0_i32_0 : i32, i32
  }
  func.func @transform_10(%arg0: i32) -> (i32, i32) {
    %c0_i32 = arith.constant 0 : i32
    %c0_i32_0 = arith.constant 0 : i32
    %c0_i32_1 = arith.constant 0 : i32
    return %c0_i32, %c0_i32_0 : i32, i32
  }
  func.func @transform_11(%arg0: i32) -> (i32, i32) {
    %c0_i32 = arith.constant 0 : i32
    %c0_i32_0 = arith.constant 0 : i32
    %c0_i32_1 = arith.constant 0 : i32
    return %c0_i32, %c0_i32_0 : i32, i32
  }
  func.func @transform_12(%arg0: i32) -> (i32, i32) {
    %c0_i32 = arith.constant 0 : i32
    %c0_i32_0 = arith.constant 0 : i32
    %c0_i32_1 = arith.constant 0 : i32
    return %c0_i32, %c0_i32_0 : i32, i32
  }
  func.func @transform_13(%arg0: i32) -> (i32, i32) {
    %c0_i32 = arith.constant 0 : i32
    %c0_i32_0 = arith.constant 0 : i32
    %c0_i32_1 = arith.constant 0 : i32
    return %c0_i32, %c0_i32_0 : i32, i32
  }
  func.func @transform_14(%arg0: i32) -> (i32, i32) {
    %c0_i32 = arith.constant 0 : i32
    %c0_i32_0 = arith.constant 0 : i32
    %c0_i32_1 = arith.constant 0 : i32
    return %c0_i32, %c0_i32_0 : i32, i32
  }
  func.func @transform_15(%arg0: i32) -> (i32, i32) {
    %c0_i32 = arith.constant 0 : i32
    %c0_i32_0 = arith.constant 0 : i32
    %c0_i32_1 = arith.constant 0 : i32
    return %c0_i32, %c0_i32_0 : i32, i32
  }
  func.func @transform_16(%arg0: i32) -> (i32, i32) {
    %c0_i32 = arith.constant 0 : i32
    %c0_i32_0 = arith.constant 0 : i32
    %c0_i32_1 = arith.constant 0 : i32
    return %c0_i32, %c0_i32_0 : i32, i32
  }
  func.func @transform_17(%arg0: i32) -> (i32, i32) {
    %c0_i32 = arith.constant 0 : i32
    %c0_i32_0 = arith.constant 0 : i32
    %c0_i32_1 = arith.constant 0 : i32
    return %c0_i32, %c0_i32_0 : i32, i32
  }
  func.func @transform_18(%arg0: i32) -> (i32, i32) {
    %c0_i32 = arith.constant 0 : i32
    %c0_i32_0 = arith.constant 0 : i32
    %c0_i32_1 = arith.constant 0 : i32
    return %c0_i32, %c0_i32_0 : i32, i32
  }
  func.func @transform_19(%arg0: i32) -> (i32, i32) {
    %c0_i32 = arith.constant 0 : i32
    %c0_i32_0 = arith.constant 0 : i32
    %c0_i32_1 = arith.constant 0 : i32
    return %c0_i32, %c0_i32_0 : i32, i32
  }
  func.func @transform_20(%arg0: i32) -> (i32, i32) {
    %c0_i32 = arith.constant 0 : i32
    %c0_i32_0 = arith.constant 0 : i32
    %c0_i32_1 = arith.constant 0 : i32
    return %c0_i32, %c0_i32_0 : i32, i32
  }
  func.func @transform_21(%arg0: i32) -> (i32, i32) {
    %c0_i32 = arith.constant 0 : i32
    %c0_i32_0 = arith.constant 0 : i32
    return %arg0, %c0_i32 : i32, i32
  }
}

module attributes {stable_mosaic.version = 11 : i64} {
  func.func @_gps_layer_kernel(%arg0: i32, %arg1: memref<8x8xf32, #tpu.memory_space<vmem>>, %arg2: memref<8x64xf32, #tpu.memory_space<vmem>>, %arg3: memref<8x1xf32, #tpu.memory_space<vmem>>, %arg4: memref<8x1xf32, #tpu.memory_space<vmem>>, %arg5: memref<8x8xf32, #tpu.memory_space<vmem>>, %arg6: memref<64x64xbf16, #tpu.memory_space<vmem>>, %arg7: memref<1x64xf32, #tpu.memory_space<vmem>>, %arg8: memref<64x64xbf16, #tpu.memory_space<vmem>>, %arg9: memref<1x64xf32, #tpu.memory_space<vmem>>, %arg10: memref<1x64xf32, #tpu.memory_space<vmem>>, %arg11: memref<64x768xbf16, #tpu.memory_space<vmem>>, %arg12: memref<64x384xbf16, #tpu.memory_space<vmem>>, %arg13: memref<1x384xf32, #tpu.memory_space<vmem>>, %arg14: memref<256x64xbf16, #tpu.memory_space<vmem>>, %arg15: memref<1x64xf32, #tpu.memory_space<vmem>>, %arg16: memref<1x64xf32, #tpu.memory_space<vmem>>, %arg17: memref<64x128xbf16, #tpu.memory_space<vmem>>, %arg18: memref<1x128xf32, #tpu.memory_space<vmem>>, %arg19: memref<128x64xbf16, #tpu.memory_space<vmem>>, %arg20: memref<1x64xf32, #tpu.memory_space<vmem>>, %arg21: memref<1x64xf32, #tpu.memory_space<vmem>>, %arg22: memref<8x64xf32, #tpu.memory_space<vmem>>) attributes {dimension_semantics = [#tpu.dimension_semantics<parallel>], iteration_bounds = array<i64: 2>, scalar_prefetch = 0 : i64, scratch_operands = 0 : i64, tpu.core_type = #tpu.core_type<tc>, window_params = [{transform_indices = @transform_0, window_bounds = array<i64: 8, 8>}, {transform_indices = @transform_1, window_bounds = array<i64: 8, 64>}, {transform_indices = @transform_2, window_bounds = array<i64: 8, 1>}, {transform_indices = @transform_3, window_bounds = array<i64: 8, 1>}, {pipeline_mode = #tpu.pipeline_mode<synchronous>, transform_indices = @transform_4, window_bounds = array<i64: 8, 8>}, {pipeline_mode = #tpu.pipeline_mode<synchronous>, transform_indices = @transform_5, window_bounds = array<i64: 64, 64>}, {pipeline_mode = #tpu.pipeline_mode<synchronous>, transform_indices = @transform_6, window_bounds = array<i64: 1, 64>}, {pipeline_mode = #tpu.pipeline_mode<synchronous>, transform_indices = @transform_7, window_bounds = array<i64: 64, 64>}, {pipeline_mode = #tpu.pipeline_mode<synchronous>, transform_indices = @transform_8, window_bounds = array<i64: 1, 64>}, {pipeline_mode = #tpu.pipeline_mode<synchronous>, transform_indices = @transform_9, window_bounds = array<i64: 1, 64>}, {pipeline_mode = #tpu.pipeline_mode<synchronous>, transform_indices = @transform_10, window_bounds = array<i64: 64, 768>}, {pipeline_mode = #tpu.pipeline_mode<synchronous>, transform_indices = @transform_11, window_bounds = array<i64: 64, 384>}, {pipeline_mode = #tpu.pipeline_mode<synchronous>, transform_indices = @transform_12, window_bounds = array<i64: 1, 384>}, {pipeline_mode = #tpu.pipeline_mode<synchronous>, transform_indices = @transform_13, window_bounds = array<i64: 256, 64>}, {pipeline_mode = #tpu.pipeline_mode<synchronous>, transform_indices = @transform_14, window_bounds = array<i64: 1, 64>}, {pipeline_mode = #tpu.pipeline_mode<synchronous>, transform_indices = @transform_15, window_bounds = array<i64: 1, 64>}, {pipeline_mode = #tpu.pipeline_mode<synchronous>, transform_indices = @transform_16, window_bounds = array<i64: 64, 128>}, {pipeline_mode = #tpu.pipeline_mode<synchronous>, transform_indices = @transform_17, window_bounds = array<i64: 1, 128>}, {pipeline_mode = #tpu.pipeline_mode<synchronous>, transform_indices = @transform_18, window_bounds = array<i64: 128, 64>}, {pipeline_mode = #tpu.pipeline_mode<synchronous>, transform_indices = @transform_19, window_bounds = array<i64: 1, 64>}, {pipeline_mode = #tpu.pipeline_mode<synchronous>, transform_indices = @transform_20, window_bounds = array<i64: 1, 64>}, {transform_indices = @transform_21, window_bounds = array<i64: 8, 64>}]} {
    %c0 = arith.constant 0 : index
    %c0_0 = arith.constant 0 : index
    %0 = vector.load %arg2[%c0, %c0_0] : memref<8x64xf32, #tpu.memory_space<vmem>>, vector<8x64xf32>
    %c0_1 = arith.constant 0 : index
    %c0_2 = arith.constant 0 : index
    %1 = vector.load %arg3[%c0_1, %c0_2] : memref<8x1xf32, #tpu.memory_space<vmem>>, vector<8x1xf32>
    %2 = vector.broadcast %1 : vector<8x1xf32> to vector<8x64xf32>
    %3 = arith.mulf %0, %2 : vector<8x64xf32>
    %4 = arith.truncf %3 : vector<8x64xf32> to vector<8x64xbf16>
    %c0_3 = arith.constant 0 : index
    %c0_4 = arith.constant 0 : index
    %5 = vector.load %arg1[%c0_3, %c0_4] : memref<8x8xf32, #tpu.memory_space<vmem>>, vector<8x8xf32>
    %6 = arith.truncf %5 : vector<8x8xf32> to vector<8x8xbf16>
    %cst = arith.constant dense<0.000000e+00> : vector<8x64xf32>
    %7 = tpu.matmul %6, %4, %cst {dimension_numbers = #tpu.dot_dimension_numbers<[1], [0], [0], [1], [0, 0, 1, 1], [], []>} : vector<8x8xbf16>, vector<8x64xbf16>, vector<8x64xf32> -> vector<8x64xf32>
    %8 = arith.truncf %7 : vector<8x64xf32> to vector<8x64xbf16>
    %c0_5 = arith.constant 0 : index
    %c0_6 = arith.constant 0 : index
    %9 = vector.load %arg6[%c0_5, %c0_6] : memref<64x64xbf16, #tpu.memory_space<vmem>>, vector<64x64xbf16>
    %cst_7 = arith.constant dense<0.000000e+00> : vector<8x64xf32>
    %10 = tpu.matmul %8, %9, %cst_7 {dimension_numbers = #tpu.dot_dimension_numbers<[1], [0], [0], [1], [0, 0, 1, 1], [], []>} : vector<8x64xbf16>, vector<64x64xbf16>, vector<8x64xf32> -> vector<8x64xf32>
    %c0_8 = arith.constant 0 : index
    %c0_9 = arith.constant 0 : index
    %11 = vector.load %arg7[%c0_8, %c0_9] : memref<1x64xf32, #tpu.memory_space<vmem>>, vector<1x64xf32>
    %12 = vector.broadcast %11 : vector<1x64xf32> to vector<8x64xf32>
    %13 = arith.addf %10, %12 : vector<8x64xf32>
    %cst_10 = arith.constant 0.000000e+00 : f32
    %14 = vector.broadcast %cst_10 : f32 to vector<8x64xf32>
    %15 = arith.maximumf %13, %14 : vector<8x64xf32>
    %16 = arith.truncf %15 : vector<8x64xf32> to vector<8x64xbf16>
    %c0_11 = arith.constant 0 : index
    %c0_12 = arith.constant 0 : index
    %17 = vector.load %arg8[%c0_11, %c0_12] : memref<64x64xbf16, #tpu.memory_space<vmem>>, vector<64x64xbf16>
    %cst_13 = arith.constant dense<0.000000e+00> : vector<8x64xf32>
    %18 = tpu.matmul %16, %17, %cst_13 {dimension_numbers = #tpu.dot_dimension_numbers<[1], [0], [0], [1], [0, 0, 1, 1], [], []>} : vector<8x64xbf16>, vector<64x64xbf16>, vector<8x64xf32> -> vector<8x64xf32>
    %c0_14 = arith.constant 0 : index
    %c0_15 = arith.constant 0 : index
    %19 = vector.load %arg9[%c0_14, %c0_15] : memref<1x64xf32, #tpu.memory_space<vmem>>, vector<1x64xf32>
    %20 = vector.broadcast %19 : vector<1x64xf32> to vector<8x64xf32>
    %21 = arith.addf %18, %20 : vector<8x64xf32>
    %c0_16 = arith.constant 0 : index
    %c0_17 = arith.constant 0 : index
    %22 = vector.load %arg10[%c0_16, %c0_17] : memref<1x64xf32, #tpu.memory_space<vmem>>, vector<1x64xf32>
    %23 = vector.broadcast %22 : vector<1x64xf32> to vector<8x64xf32>
    %24 = arith.mulf %0, %23 : vector<8x64xf32>
    %25 = arith.addf %21, %24 : vector<8x64xf32>
    %c0_18 = arith.constant 0 : index
    %c0_19 = arith.constant 0 : index
    %26 = vector.load %arg11[%c0_18, %c0_19] : memref<64x768xbf16, #tpu.memory_space<vmem>>, vector<64x768xbf16>
    %cst_20 = arith.constant dense<0.000000e+00> : vector<8x768xf32>
    %27 = tpu.matmul %4, %26, %cst_20 {dimension_numbers = #tpu.dot_dimension_numbers<[1], [0], [0], [1], [0, 0, 1, 1], [], []>} : vector<8x64xbf16>, vector<64x768xbf16>, vector<8x768xf32> -> vector<8x768xf32>
    %c0_21 = arith.constant 0 : index
    %c0_22 = arith.constant 0 : index
    %28 = vector.load %arg12[%c0_21, %c0_22] : memref<64x384xbf16, #tpu.memory_space<vmem>>, vector<64x384xbf16>
    %c0_23 = arith.constant 0 : index
    %c0_24 = arith.constant 0 : index
    %29 = vector.load %arg13[%c0_23, %c0_24] : memref<1x384xf32, #tpu.memory_space<vmem>>, vector<1x384xf32>
    %c0_25 = arith.constant 0 : index
    %c0_26 = arith.constant 0 : index
    %30 = vector.load %arg4[%c0_25, %c0_26] : memref<8x1xf32, #tpu.memory_space<vmem>>, vector<8x1xf32>
    %c0_27 = arith.constant 0 : index
    %c0_28 = arith.constant 0 : index
    %31 = vector.load %arg5[%c0_27, %c0_28] : memref<8x8xf32, #tpu.memory_space<vmem>>, vector<8x8xf32>
    %32 = vector.extract_strided_slice %27 {offsets = [0, 0], sizes = [8, 64], strides = [1, 1]} : vector<8x768xf32> to vector<8x64xf32>
    %33 = vector.extract_strided_slice %27 {offsets = [0, 256], sizes = [8, 64], strides = [1, 1]} : vector<8x768xf32> to vector<8x64xf32>
    %34 = vector.extract_strided_slice %27 {offsets = [0, 512], sizes = [8, 64], strides = [1, 1]} : vector<8x768xf32> to vector<8x64xf32>
    %35 = arith.truncf %32 : vector<8x64xf32> to vector<8x64xbf16>
    %cst_29 = arith.constant dense<0.000000e+00> : vector<8x384xf32>
    %36 = tpu.matmul %35, %28, %cst_29 {dimension_numbers = #tpu.dot_dimension_numbers<[1], [0], [0], [1], [0, 0, 1, 1], [], []>} : vector<8x64xbf16>, vector<64x384xbf16>, vector<8x384xf32> -> vector<8x384xf32>
    %cst_30 = arith.constant 0.000000e+00 : f32
    %37 = vector.broadcast %cst_30 : f32 to vector<8x384xf32>
    %38 = arith.maximumf %36, %37 : vector<8x384xf32>
    %39 = vector.broadcast %29 : vector<1x384xf32> to vector<8x384xf32>
    %40 = arith.addf %38, %39 : vector<8x384xf32>
    %41 = arith.truncf %33 : vector<8x64xf32> to vector<8x64xbf16>
    %cst_31 = arith.constant dense<0.000000e+00> : vector<8x384xf32>
    %42 = tpu.matmul %41, %28, %cst_31 {dimension_numbers = #tpu.dot_dimension_numbers<[1], [0], [0], [1], [0, 0, 1, 1], [], []>} : vector<8x64xbf16>, vector<64x384xbf16>, vector<8x384xf32> -> vector<8x384xf32>
    %cst_32 = arith.constant 0.000000e+00 : f32
    %43 = vector.broadcast %cst_32 : f32 to vector<8x384xf32>
    %44 = arith.maximumf %42, %43 : vector<8x384xf32>
    %45 = vector.broadcast %29 : vector<1x384xf32> to vector<8x384xf32>
    %46 = arith.addf %44, %45 : vector<8x384xf32>
    %47 = vector.broadcast %30 : vector<8x1xf32> to vector<8x384xf32>
    %48 = arith.mulf %46, %47 : vector<8x384xf32>
    %49 = arith.truncf %40 : vector<8x384xf32> to vector<8x384xbf16>
    %50 = arith.truncf %48 : vector<8x384xf32> to vector<8x384xbf16>
    %cst_33 = arith.constant dense<0.000000e+00> : vector<8x8xf32>
    %51 = tpu.matmul %49, %50, %cst_33 {dimension_numbers = #tpu.dot_dimension_numbers<[1], [1], [0], [0], [0, 0, 1, 0], [], []>} : vector<8x384xbf16>, vector<8x384xbf16>, vector<8x8xf32> -> vector<8x8xf32>
    %52 = arith.mulf %51, %31 : vector<8x8xf32>
    %cst_34 = arith.constant dense<0.000000e+00> : vector<8xf32>
    %53 = vector.multi_reduction <add>, %52, %cst_34 [1] : vector<8x8xf32> to vector<8xf32>
    %54 = vector.shape_cast %53 : vector<8xf32> to vector<8x1xf32>
    %cst_35 = arith.constant 9.99999971E-10 : f32
    %55 = vector.broadcast %cst_35 : f32 to vector<8x1xf32>
    %56 = arith.maximumf %54, %55 : vector<8x1xf32>
    %57 = arith.truncf %52 : vector<8x8xf32> to vector<8x8xbf16>
    %58 = arith.truncf %34 : vector<8x64xf32> to vector<8x64xbf16>
    %cst_36 = arith.constant dense<0.000000e+00> : vector<8x64xf32>
    %59 = tpu.matmul %57, %58, %cst_36 {dimension_numbers = #tpu.dot_dimension_numbers<[1], [0], [0], [1], [0, 0, 1, 1], [], []>} : vector<8x8xbf16>, vector<8x64xbf16>, vector<8x64xf32> -> vector<8x64xf32>
    %60 = tpu.reciprocal %56 {approx = true} : vector<8x1xf32> -> vector<8x1xf32>
    %61 = vector.broadcast %60 : vector<8x1xf32> to vector<8x64xf32>
    %62 = arith.mulf %59, %61 : vector<8x64xf32>
    %63 = vector.extract_strided_slice %27 {offsets = [0, 64], sizes = [8, 64], strides = [1, 1]} : vector<8x768xf32> to vector<8x64xf32>
    %64 = vector.extract_strided_slice %27 {offsets = [0, 320], sizes = [8, 64], strides = [1, 1]} : vector<8x768xf32> to vector<8x64xf32>
    %65 = vector.extract_strided_slice %27 {offsets = [0, 576], sizes = [8, 64], strides = [1, 1]} : vector<8x768xf32> to vector<8x64xf32>
    %66 = arith.truncf %63 : vector<8x64xf32> to vector<8x64xbf16>
    %cst_37 = arith.constant dense<0.000000e+00> : vector<8x384xf32>
    %67 = tpu.matmul %66, %28, %cst_37 {dimension_numbers = #tpu.dot_dimension_numbers<[1], [0], [0], [1], [0, 0, 1, 1], [], []>} : vector<8x64xbf16>, vector<64x384xbf16>, vector<8x384xf32> -> vector<8x384xf32>
    %cst_38 = arith.constant 0.000000e+00 : f32
    %68 = vector.broadcast %cst_38 : f32 to vector<8x384xf32>
    %69 = arith.maximumf %67, %68 : vector<8x384xf32>
    %70 = vector.broadcast %29 : vector<1x384xf32> to vector<8x384xf32>
    %71 = arith.addf %69, %70 : vector<8x384xf32>
    %72 = arith.truncf %64 : vector<8x64xf32> to vector<8x64xbf16>
    %cst_39 = arith.constant dense<0.000000e+00> : vector<8x384xf32>
    %73 = tpu.matmul %72, %28, %cst_39 {dimension_numbers = #tpu.dot_dimension_numbers<[1], [0], [0], [1], [0, 0, 1, 1], [], []>} : vector<8x64xbf16>, vector<64x384xbf16>, vector<8x384xf32> -> vector<8x384xf32>
    %cst_40 = arith.constant 0.000000e+00 : f32
    %74 = vector.broadcast %cst_40 : f32 to vector<8x384xf32>
    %75 = arith.maximumf %73, %74 : vector<8x384xf32>
    %76 = vector.broadcast %29 : vector<1x384xf32> to vector<8x384xf32>
    %77 = arith.addf %75, %76 : vector<8x384xf32>
    %78 = vector.broadcast %30 : vector<8x1xf32> to vector<8x384xf32>
    %79 = arith.mulf %77, %78 : vector<8x384xf32>
    %80 = arith.truncf %71 : vector<8x384xf32> to vector<8x384xbf16>
    %81 = arith.truncf %79 : vector<8x384xf32> to vector<8x384xbf16>
    %cst_41 = arith.constant dense<0.000000e+00> : vector<8x8xf32>
    %82 = tpu.matmul %80, %81, %cst_41 {dimension_numbers = #tpu.dot_dimension_numbers<[1], [1], [0], [0], [0, 0, 1, 0], [], []>} : vector<8x384xbf16>, vector<8x384xbf16>, vector<8x8xf32> -> vector<8x8xf32>
    %83 = arith.mulf %82, %31 : vector<8x8xf32>
    %cst_42 = arith.constant dense<0.000000e+00> : vector<8xf32>
    %84 = vector.multi_reduction <add>, %83, %cst_42 [1] : vector<8x8xf32> to vector<8xf32>
    %85 = vector.shape_cast %84 : vector<8xf32> to vector<8x1xf32>
    %cst_43 = arith.constant 9.99999971E-10 : f32
    %86 = vector.broadcast %cst_43 : f32 to vector<8x1xf32>
    %87 = arith.maximumf %85, %86 : vector<8x1xf32>
    %88 = arith.truncf %83 : vector<8x8xf32> to vector<8x8xbf16>
    %89 = arith.truncf %65 : vector<8x64xf32> to vector<8x64xbf16>
    %cst_44 = arith.constant dense<0.000000e+00> : vector<8x64xf32>
    %90 = tpu.matmul %88, %89, %cst_44 {dimension_numbers = #tpu.dot_dimension_numbers<[1], [0], [0], [1], [0, 0, 1, 1], [], []>} : vector<8x8xbf16>, vector<8x64xbf16>, vector<8x64xf32> -> vector<8x64xf32>
    %91 = tpu.reciprocal %87 {approx = true} : vector<8x1xf32> -> vector<8x1xf32>
    %92 = vector.broadcast %91 : vector<8x1xf32> to vector<8x64xf32>
    %93 = arith.mulf %90, %92 : vector<8x64xf32>
    %94 = vector.extract_strided_slice %27 {offsets = [0, 128], sizes = [8, 64], strides = [1, 1]} : vector<8x768xf32> to vector<8x64xf32>
    %95 = vector.extract_strided_slice %27 {offsets = [0, 384], sizes = [8, 64], strides = [1, 1]} : vector<8x768xf32> to vector<8x64xf32>
    %96 = vector.extract_strided_slice %27 {offsets = [0, 640], sizes = [8, 64], strides = [1, 1]} : vector<8x768xf32> to vector<8x64xf32>
    %97 = arith.truncf %94 : vector<8x64xf32> to vector<8x64xbf16>
    %cst_45 = arith.constant dense<0.000000e+00> : vector<8x384xf32>
    %98 = tpu.matmul %97, %28, %cst_45 {dimension_numbers = #tpu.dot_dimension_numbers<[1], [0], [0], [1], [0, 0, 1, 1], [], []>} : vector<8x64xbf16>, vector<64x384xbf16>, vector<8x384xf32> -> vector<8x384xf32>
    %cst_46 = arith.constant 0.000000e+00 : f32
    %99 = vector.broadcast %cst_46 : f32 to vector<8x384xf32>
    %100 = arith.maximumf %98, %99 : vector<8x384xf32>
    %101 = vector.broadcast %29 : vector<1x384xf32> to vector<8x384xf32>
    %102 = arith.addf %100, %101 : vector<8x384xf32>
    %103 = arith.truncf %95 : vector<8x64xf32> to vector<8x64xbf16>
    %cst_47 = arith.constant dense<0.000000e+00> : vector<8x384xf32>
    %104 = tpu.matmul %103, %28, %cst_47 {dimension_numbers = #tpu.dot_dimension_numbers<[1], [0], [0], [1], [0, 0, 1, 1], [], []>} : vector<8x64xbf16>, vector<64x384xbf16>, vector<8x384xf32> -> vector<8x384xf32>
    %cst_48 = arith.constant 0.000000e+00 : f32
    %105 = vector.broadcast %cst_48 : f32 to vector<8x384xf32>
    %106 = arith.maximumf %104, %105 : vector<8x384xf32>
    %107 = vector.broadcast %29 : vector<1x384xf32> to vector<8x384xf32>
    %108 = arith.addf %106, %107 : vector<8x384xf32>
    %109 = vector.broadcast %30 : vector<8x1xf32> to vector<8x384xf32>
    %110 = arith.mulf %108, %109 : vector<8x384xf32>
    %111 = arith.truncf %102 : vector<8x384xf32> to vector<8x384xbf16>
    %112 = arith.truncf %110 : vector<8x384xf32> to vector<8x384xbf16>
    %cst_49 = arith.constant dense<0.000000e+00> : vector<8x8xf32>
    %113 = tpu.matmul %111, %112, %cst_49 {dimension_numbers = #tpu.dot_dimension_numbers<[1], [1], [0], [0], [0, 0, 1, 0], [], []>} : vector<8x384xbf16>, vector<8x384xbf16>, vector<8x8xf32> -> vector<8x8xf32>
    %114 = arith.mulf %113, %31 : vector<8x8xf32>
    %cst_50 = arith.constant dense<0.000000e+00> : vector<8xf32>
    %115 = vector.multi_reduction <add>, %114, %cst_50 [1] : vector<8x8xf32> to vector<8xf32>
    %116 = vector.shape_cast %115 : vector<8xf32> to vector<8x1xf32>
    %cst_51 = arith.constant 9.99999971E-10 : f32
    %117 = vector.broadcast %cst_51 : f32 to vector<8x1xf32>
    %118 = arith.maximumf %116, %117 : vector<8x1xf32>
    %119 = arith.truncf %114 : vector<8x8xf32> to vector<8x8xbf16>
    %120 = arith.truncf %96 : vector<8x64xf32> to vector<8x64xbf16>
    %cst_52 = arith.constant dense<0.000000e+00> : vector<8x64xf32>
    %121 = tpu.matmul %119, %120, %cst_52 {dimension_numbers = #tpu.dot_dimension_numbers<[1], [0], [0], [1], [0, 0, 1, 1], [], []>} : vector<8x8xbf16>, vector<8x64xbf16>, vector<8x64xf32> -> vector<8x64xf32>
    %122 = tpu.reciprocal %118 {approx = true} : vector<8x1xf32> -> vector<8x1xf32>
    %123 = vector.broadcast %122 : vector<8x1xf32> to vector<8x64xf32>
    %124 = arith.mulf %121, %123 : vector<8x64xf32>
    %125 = vector.extract_strided_slice %27 {offsets = [0, 192], sizes = [8, 64], strides = [1, 1]} : vector<8x768xf32> to vector<8x64xf32>
    %126 = vector.extract_strided_slice %27 {offsets = [0, 448], sizes = [8, 64], strides = [1, 1]} : vector<8x768xf32> to vector<8x64xf32>
    %127 = vector.extract_strided_slice %27 {offsets = [0, 704], sizes = [8, 64], strides = [1, 1]} : vector<8x768xf32> to vector<8x64xf32>
    %128 = arith.truncf %125 : vector<8x64xf32> to vector<8x64xbf16>
    %cst_53 = arith.constant dense<0.000000e+00> : vector<8x384xf32>
    %129 = tpu.matmul %128, %28, %cst_53 {dimension_numbers = #tpu.dot_dimension_numbers<[1], [0], [0], [1], [0, 0, 1, 1], [], []>} : vector<8x64xbf16>, vector<64x384xbf16>, vector<8x384xf32> -> vector<8x384xf32>
    %cst_54 = arith.constant 0.000000e+00 : f32
    %130 = vector.broadcast %cst_54 : f32 to vector<8x384xf32>
    %131 = arith.maximumf %129, %130 : vector<8x384xf32>
    %132 = vector.broadcast %29 : vector<1x384xf32> to vector<8x384xf32>
    %133 = arith.addf %131, %132 : vector<8x384xf32>
    %134 = arith.truncf %126 : vector<8x64xf32> to vector<8x64xbf16>
    %cst_55 = arith.constant dense<0.000000e+00> : vector<8x384xf32>
    %135 = tpu.matmul %134, %28, %cst_55 {dimension_numbers = #tpu.dot_dimension_numbers<[1], [0], [0], [1], [0, 0, 1, 1], [], []>} : vector<8x64xbf16>, vector<64x384xbf16>, vector<8x384xf32> -> vector<8x384xf32>
    %cst_56 = arith.constant 0.000000e+00 : f32
    %136 = vector.broadcast %cst_56 : f32 to vector<8x384xf32>
    %137 = arith.maximumf %135, %136 : vector<8x384xf32>
    %138 = vector.broadcast %29 : vector<1x384xf32> to vector<8x384xf32>
    %139 = arith.addf %137, %138 : vector<8x384xf32>
    %140 = vector.broadcast %30 : vector<8x1xf32> to vector<8x384xf32>
    %141 = arith.mulf %139, %140 : vector<8x384xf32>
    %142 = arith.truncf %133 : vector<8x384xf32> to vector<8x384xbf16>
    %143 = arith.truncf %141 : vector<8x384xf32> to vector<8x384xbf16>
    %cst_57 = arith.constant dense<0.000000e+00> : vector<8x8xf32>
    %144 = tpu.matmul %142, %143, %cst_57 {dimension_numbers = #tpu.dot_dimension_numbers<[1], [1], [0], [0], [0, 0, 1, 0], [], []>} : vector<8x384xbf16>, vector<8x384xbf16>, vector<8x8xf32> -> vector<8x8xf32>
    %145 = arith.mulf %144, %31 : vector<8x8xf32>
    %cst_58 = arith.constant dense<0.000000e+00> : vector<8xf32>
    %146 = vector.multi_reduction <add>, %145, %cst_58 [1] : vector<8x8xf32> to vector<8xf32>
    %147 = vector.shape_cast %146 : vector<8xf32> to vector<8x1xf32>
    %cst_59 = arith.constant 9.99999971E-10 : f32
    %148 = vector.broadcast %cst_59 : f32 to vector<8x1xf32>
    %149 = arith.maximumf %147, %148 : vector<8x1xf32>
    %150 = arith.truncf %145 : vector<8x8xf32> to vector<8x8xbf16>
    %151 = arith.truncf %127 : vector<8x64xf32> to vector<8x64xbf16>
    %cst_60 = arith.constant dense<0.000000e+00> : vector<8x64xf32>
    %152 = tpu.matmul %150, %151, %cst_60 {dimension_numbers = #tpu.dot_dimension_numbers<[1], [0], [0], [1], [0, 0, 1, 1], [], []>} : vector<8x8xbf16>, vector<8x64xbf16>, vector<8x64xf32> -> vector<8x64xf32>
    %153 = tpu.reciprocal %149 {approx = true} : vector<8x1xf32> -> vector<8x1xf32>
    %154 = vector.broadcast %153 : vector<8x1xf32> to vector<8x64xf32>
    %155 = arith.mulf %152, %154 : vector<8x64xf32>
    %156 = tpu.concatenate %62, %93, %124, %155 in 1 : vector<8x64xf32>, vector<8x64xf32>, vector<8x64xf32>, vector<8x64xf32> -> vector<8x256xf32>
    %c0_61 = arith.constant 0 : index
    %c0_62 = arith.constant 0 : index
    %157 = vector.load %arg16[%c0_61, %c0_62] : memref<1x64xf32, #tpu.memory_space<vmem>>, vector<1x64xf32>
    %158 = vector.broadcast %157 : vector<1x64xf32> to vector<8x64xf32>
    %159 = arith.mulf %0, %158 : vector<8x64xf32>
    %c0_63 = arith.constant 0 : index
    %c0_64 = arith.constant 0 : index
    %160 = vector.load %arg15[%c0_63, %c0_64] : memref<1x64xf32, #tpu.memory_space<vmem>>, vector<1x64xf32>
    %161 = vector.broadcast %160 : vector<1x64xf32> to vector<8x64xf32>
    %162 = arith.addf %159, %161 : vector<8x64xf32>
    %163 = arith.truncf %156 : vector<8x256xf32> to vector<8x256xbf16>
    %c0_65 = arith.constant 0 : index
    %c0_66 = arith.constant 0 : index
    %164 = vector.load %arg14[%c0_65, %c0_66] : memref<256x64xbf16, #tpu.memory_space<vmem>>, vector<256x64xbf16>
    %cst_67 = arith.constant dense<0.000000e+00> : vector<8x64xf32>
    %165 = tpu.matmul %163, %164, %cst_67 {dimension_numbers = #tpu.dot_dimension_numbers<[1], [0], [0], [1], [0, 0, 1, 1], [], []>} : vector<8x256xbf16>, vector<256x64xbf16>, vector<8x64xf32> -> vector<8x64xf32>
    %166 = arith.addf %162, %165 : vector<8x64xf32>
    %167 = arith.addf %25, %166 : vector<8x64xf32>
    %168 = arith.truncf %167 : vector<8x64xf32> to vector<8x64xbf16>
    %c0_68 = arith.constant 0 : index
    %c0_69 = arith.constant 0 : index
    %169 = vector.load %arg17[%c0_68, %c0_69] : memref<64x128xbf16, #tpu.memory_space<vmem>>, vector<64x128xbf16>
    %cst_70 = arith.constant dense<0.000000e+00> : vector<8x128xf32>
    %170 = tpu.matmul %168, %169, %cst_70 {dimension_numbers = #tpu.dot_dimension_numbers<[1], [0], [0], [1], [0, 0, 1, 1], [], []>} : vector<8x64xbf16>, vector<64x128xbf16>, vector<8x128xf32> -> vector<8x128xf32>
    %c0_71 = arith.constant 0 : index
    %c0_72 = arith.constant 0 : index
    %171 = vector.load %arg18[%c0_71, %c0_72] : memref<1x128xf32, #tpu.memory_space<vmem>>, vector<1x128xf32>
    %172 = vector.broadcast %171 : vector<1x128xf32> to vector<8x128xf32>
    %173 = arith.addf %170, %172 : vector<8x128xf32>
    %cst_73 = arith.constant 0.000000e+00 : f32
    %174 = vector.broadcast %cst_73 : f32 to vector<8x128xf32>
    %175 = arith.maximumf %173, %174 : vector<8x128xf32>
    %176 = arith.truncf %175 : vector<8x128xf32> to vector<8x128xbf16>
    %c0_74 = arith.constant 0 : index
    %c0_75 = arith.constant 0 : index
    %177 = vector.load %arg19[%c0_74, %c0_75] : memref<128x64xbf16, #tpu.memory_space<vmem>>, vector<128x64xbf16>
    %cst_76 = arith.constant dense<0.000000e+00> : vector<8x64xf32>
    %178 = tpu.matmul %176, %177, %cst_76 {dimension_numbers = #tpu.dot_dimension_numbers<[1], [0], [0], [1], [0, 0, 1, 1], [], []>} : vector<8x128xbf16>, vector<128x64xbf16>, vector<8x64xf32> -> vector<8x64xf32>
    %c0_77 = arith.constant 0 : index
    %c0_78 = arith.constant 0 : index
    %179 = vector.load %arg20[%c0_77, %c0_78] : memref<1x64xf32, #tpu.memory_space<vmem>>, vector<1x64xf32>
    %180 = vector.broadcast %179 : vector<1x64xf32> to vector<8x64xf32>
    %181 = arith.addf %178, %180 : vector<8x64xf32>
    %c0_79 = arith.constant 0 : index
    %c0_80 = arith.constant 0 : index
    %182 = vector.load %arg21[%c0_79, %c0_80] : memref<1x64xf32, #tpu.memory_space<vmem>>, vector<1x64xf32>
    %183 = vector.broadcast %182 : vector<1x64xf32> to vector<8x64xf32>
    %184 = arith.mulf %167, %183 : vector<8x64xf32>
    %185 = arith.addf %181, %184 : vector<8x64xf32>
    %c0_81 = arith.constant 0 : index
    %c0_82 = arith.constant 0 : index
    %186 = vector.load %arg22[%c0_81, %c0_82] : memref<8x64xf32, #tpu.memory_space<vmem>>, vector<8x64xf32>
    tpu.vector_store %arg22[%c0_81, %c0_82], %185 {strides = array<i32>} : memref<8x64xf32, #tpu.memory_space<vmem>>, vector<8x64xf32>,
    return
  }
  func.func @transform_0(%arg0: i32) -> (i32, i32) {
    %c0_i32 = arith.constant 0 : i32
    %c0_i32_0 = arith.constant 0 : i32
    return %arg0, %c0_i32 : i32, i32
  }
  func.func @transform_1(%arg0: i32) -> (i32, i32) {
    %c0_i32 = arith.constant 0 : i32
    %c0_i32_0 = arith.constant 0 : i32
    return %arg0, %c0_i32 : i32, i32
  }
  func.func @transform_2(%arg0: i32) -> (i32, i32) {
    %c0_i32 = arith.constant 0 : i32
    %c0_i32_0 = arith.constant 0 : i32
    return %arg0, %c0_i32 : i32, i32
  }
  func.func @transform_3(%arg0: i32) -> (i32, i32) {
    %c0_i32 = arith.constant 0 : i32
    %c0_i32_0 = arith.constant 0 : i32
    return %arg0, %c0_i32 : i32, i32
  }
  func.func @transform_4(%arg0: i32) -> (i32, i32) {
    %c0_i32 = arith.constant 0 : i32
    %c0_i32_0 = arith.constant 0 : i32
    %c0_i32_1 = arith.constant 0 : i32
    return %c0_i32, %c0_i32_0 : i32, i32
  }
  func.func @transform_5(%arg0: i32) -> (i32, i32) {
    %c0_i32 = arith.constant 0 : i32
    %c0_i32_0 = arith.constant 0 : i32
    %c0_i32_1 = arith.constant 0 : i32
    return %c0_i32, %c0_i32_0 : i32, i32
  }
  func.func @transform_6(%arg0: i32) -> (i32, i32) {
    %c0_i32 = arith.constant 0 : i32
    %c0_i32_0 = arith.constant 0 : i32
    %c0_i32_1 = arith.constant 0 : i32
    return %c0_i32, %c0_i32_0 : i32, i32
  }
  func.func @transform_7(%arg0: i32) -> (i32, i32) {
    %c0_i32 = arith.constant 0 : i32
    %c0_i32_0 = arith.constant 0 : i32
    %c0_i32_1 = arith.constant 0 : i32
    return %c0_i32, %c0_i32_0 : i32, i32
  }
  func.func @transform_8(%arg0: i32) -> (i32, i32) {
    %c0_i32 = arith.constant 0 : i32
    %c0_i32_0 = arith.constant 0 : i32
    %c0_i32_1 = arith.constant 0 : i32
    return %c0_i32, %c0_i32_0 : i32, i32
  }
  func.func @transform_9(%arg0: i32) -> (i32, i32) {
    %c0_i32 = arith.constant 0 : i32
    %c0_i32_0 = arith.constant 0 : i32
    %c0_i32_1 = arith.constant 0 : i32
    return %c0_i32, %c0_i32_0 : i32, i32
  }
  func.func @transform_10(%arg0: i32) -> (i32, i32) {
    %c0_i32 = arith.constant 0 : i32
    %c0_i32_0 = arith.constant 0 : i32
    %c0_i32_1 = arith.constant 0 : i32
    return %c0_i32, %c0_i32_0 : i32, i32
  }
  func.func @transform_11(%arg0: i32) -> (i32, i32) {
    %c0_i32 = arith.constant 0 : i32
    %c0_i32_0 = arith.constant 0 : i32
    %c0_i32_1 = arith.constant 0 : i32
    return %c0_i32, %c0_i32_0 : i32, i32
  }
  func.func @transform_12(%arg0: i32) -> (i32, i32) {
    %c0_i32 = arith.constant 0 : i32
    %c0_i32_0 = arith.constant 0 : i32
    %c0_i32_1 = arith.constant 0 : i32
    return %c0_i32, %c0_i32_0 : i32, i32
  }
  func.func @transform_13(%arg0: i32) -> (i32, i32) {
    %c0_i32 = arith.constant 0 : i32
    %c0_i32_0 = arith.constant 0 : i32
    %c0_i32_1 = arith.constant 0 : i32
    return %c0_i32, %c0_i32_0 : i32, i32
  }
  func.func @transform_14(%arg0: i32) -> (i32, i32) {
    %c0_i32 = arith.constant 0 : i32
    %c0_i32_0 = arith.constant 0 : i32
    %c0_i32_1 = arith.constant 0 : i32
    return %c0_i32, %c0_i32_0 : i32, i32
  }
  func.func @transform_15(%arg0: i32) -> (i32, i32) {
    %c0_i32 = arith.constant 0 : i32
    %c0_i32_0 = arith.constant 0 : i32
    %c0_i32_1 = arith.constant 0 : i32
    return %c0_i32, %c0_i32_0 : i32, i32
  }
  func.func @transform_16(%arg0: i32) -> (i32, i32) {
    %c0_i32 = arith.constant 0 : i32
    %c0_i32_0 = arith.constant 0 : i32
    %c0_i32_1 = arith.constant 0 : i32
    return %c0_i32, %c0_i32_0 : i32, i32
  }
  func.func @transform_17(%arg0: i32) -> (i32, i32) {
    %c0_i32 = arith.constant 0 : i32
    %c0_i32_0 = arith.constant 0 : i32
    %c0_i32_1 = arith.constant 0 : i32
    return %c0_i32, %c0_i32_0 : i32, i32
  }
  func.func @transform_18(%arg0: i32) -> (i32, i32) {
    %c0_i32 = arith.constant 0 : i32
    %c0_i32_0 = arith.constant 0 : i32
    %c0_i32_1 = arith.constant 0 : i32
    return %c0_i32, %c0_i32_0 : i32, i32
  }
  func.func @transform_19(%arg0: i32) -> (i32, i32) {
    %c0_i32 = arith.constant 0 : i32
    %c0_i32_0 = arith.constant 0 : i32
    %c0_i32_1 = arith.constant 0 : i32
    return %c0_i32, %c0_i32_0 : i32, i32
  }
  func.func @transform_20(%arg0: i32) -> (i32, i32) {
    %c0_i32 = arith.constant 0 : i32
    %c0_i32_0 = arith.constant 0 : i32
    %c0_i32_1 = arith.constant 0 : i32
    return %c0_i32, %c0_i32_0 : i32, i32
  }
  func.func @transform_21(%arg0: i32) -> (i32, i32) {
    %c0_i32 = arith.constant 0 : i32
    %c0_i32_0 = arith.constant 0 : i32
    return %arg0, %c0_i32 : i32, i32
  }
}

module attributes {stable_mosaic.version = 11 : i64} {
  func.func @_gps_layer_kernel(%arg0: i32, %arg1: memref<8x8xf32, #tpu.memory_space<vmem>>, %arg2: memref<8x64xf32, #tpu.memory_space<vmem>>, %arg3: memref<8x1xf32, #tpu.memory_space<vmem>>, %arg4: memref<8x1xf32, #tpu.memory_space<vmem>>, %arg5: memref<8x8xf32, #tpu.memory_space<vmem>>, %arg6: memref<64x64xbf16, #tpu.memory_space<vmem>>, %arg7: memref<1x64xf32, #tpu.memory_space<vmem>>, %arg8: memref<64x64xbf16, #tpu.memory_space<vmem>>, %arg9: memref<1x64xf32, #tpu.memory_space<vmem>>, %arg10: memref<1x64xf32, #tpu.memory_space<vmem>>, %arg11: memref<64x768xbf16, #tpu.memory_space<vmem>>, %arg12: memref<64x384xbf16, #tpu.memory_space<vmem>>, %arg13: memref<1x384xf32, #tpu.memory_space<vmem>>, %arg14: memref<256x64xbf16, #tpu.memory_space<vmem>>, %arg15: memref<1x64xf32, #tpu.memory_space<vmem>>, %arg16: memref<1x64xf32, #tpu.memory_space<vmem>>, %arg17: memref<64x128xbf16, #tpu.memory_space<vmem>>, %arg18: memref<1x128xf32, #tpu.memory_space<vmem>>, %arg19: memref<128x64xbf16, #tpu.memory_space<vmem>>, %arg20: memref<1x64xf32, #tpu.memory_space<vmem>>, %arg21: memref<1x64xf32, #tpu.memory_space<vmem>>, %arg22: memref<8x64xf32, #tpu.memory_space<vmem>>) attributes {dimension_semantics = [#tpu.dimension_semantics<parallel>], iteration_bounds = array<i64: 2>, scalar_prefetch = 0 : i64, scratch_operands = 0 : i64, tpu.core_type = #tpu.core_type<tc>, window_params = [{transform_indices = @transform_0, window_bounds = array<i64: 8, 8>}, {transform_indices = @transform_1, window_bounds = array<i64: 8, 64>}, {transform_indices = @transform_2, window_bounds = array<i64: 8, 1>}, {transform_indices = @transform_3, window_bounds = array<i64: 8, 1>}, {pipeline_mode = #tpu.pipeline_mode<synchronous>, transform_indices = @transform_4, window_bounds = array<i64: 8, 8>}, {pipeline_mode = #tpu.pipeline_mode<synchronous>, transform_indices = @transform_5, window_bounds = array<i64: 64, 64>}, {pipeline_mode = #tpu.pipeline_mode<synchronous>, transform_indices = @transform_6, window_bounds = array<i64: 1, 64>}, {pipeline_mode = #tpu.pipeline_mode<synchronous>, transform_indices = @transform_7, window_bounds = array<i64: 64, 64>}, {pipeline_mode = #tpu.pipeline_mode<synchronous>, transform_indices = @transform_8, window_bounds = array<i64: 1, 64>}, {pipeline_mode = #tpu.pipeline_mode<synchronous>, transform_indices = @transform_9, window_bounds = array<i64: 1, 64>}, {pipeline_mode = #tpu.pipeline_mode<synchronous>, transform_indices = @transform_10, window_bounds = array<i64: 64, 768>}, {pipeline_mode = #tpu.pipeline_mode<synchronous>, transform_indices = @transform_11, window_bounds = array<i64: 64, 384>}, {pipeline_mode = #tpu.pipeline_mode<synchronous>, transform_indices = @transform_12, window_bounds = array<i64: 1, 384>}, {pipeline_mode = #tpu.pipeline_mode<synchronous>, transform_indices = @transform_13, window_bounds = array<i64: 256, 64>}, {pipeline_mode = #tpu.pipeline_mode<synchronous>, transform_indices = @transform_14, window_bounds = array<i64: 1, 64>}, {pipeline_mode = #tpu.pipeline_mode<synchronous>, transform_indices = @transform_15, window_bounds = array<i64: 1, 64>}, {pipeline_mode = #tpu.pipeline_mode<synchronous>, transform_indices = @transform_16, window_bounds = array<i64: 64, 128>}, {pipeline_mode = #tpu.pipeline_mode<synchronous>, transform_indices = @transform_17, window_bounds = array<i64: 1, 128>}, {pipeline_mode = #tpu.pipeline_mode<synchronous>, transform_indices = @transform_18, window_bounds = array<i64: 128, 64>}, {pipeline_mode = #tpu.pipeline_mode<synchronous>, transform_indices = @transform_19, window_bounds = array<i64: 1, 64>}, {pipeline_mode = #tpu.pipeline_mode<synchronous>, transform_indices = @transform_20, window_bounds = array<i64: 1, 64>}, {transform_indices = @transform_21, window_bounds = array<i64: 8, 64>}]} {
    %c0 = arith.constant 0 : index
    %c0_0 = arith.constant 0 : index
    %0 = vector.load %arg2[%c0, %c0_0] : memref<8x64xf32, #tpu.memory_space<vmem>>, vector<8x64xf32>
    %c0_1 = arith.constant 0 : index
    %c0_2 = arith.constant 0 : index
    %1 = vector.load %arg3[%c0_1, %c0_2] : memref<8x1xf32, #tpu.memory_space<vmem>>, vector<8x1xf32>
    %2 = vector.broadcast %1 : vector<8x1xf32> to vector<8x64xf32>
    %3 = arith.mulf %0, %2 : vector<8x64xf32>
    %4 = arith.truncf %3 : vector<8x64xf32> to vector<8x64xbf16>
    %c0_3 = arith.constant 0 : index
    %c0_4 = arith.constant 0 : index
    %5 = vector.load %arg1[%c0_3, %c0_4] : memref<8x8xf32, #tpu.memory_space<vmem>>, vector<8x8xf32>
    %6 = arith.truncf %5 : vector<8x8xf32> to vector<8x8xbf16>
    %cst = arith.constant dense<0.000000e+00> : vector<8x64xf32>
    %7 = tpu.matmul %6, %4, %cst {dimension_numbers = #tpu.dot_dimension_numbers<[1], [0], [0], [1], [0, 0, 1, 1], [], []>} : vector<8x8xbf16>, vector<8x64xbf16>, vector<8x64xf32> -> vector<8x64xf32>
    %8 = arith.truncf %7 : vector<8x64xf32> to vector<8x64xbf16>
    %c0_5 = arith.constant 0 : index
    %c0_6 = arith.constant 0 : index
    %9 = vector.load %arg6[%c0_5, %c0_6] : memref<64x64xbf16, #tpu.memory_space<vmem>>, vector<64x64xbf16>
    %cst_7 = arith.constant dense<0.000000e+00> : vector<8x64xf32>
    %10 = tpu.matmul %8, %9, %cst_7 {dimension_numbers = #tpu.dot_dimension_numbers<[1], [0], [0], [1], [0, 0, 1, 1], [], []>} : vector<8x64xbf16>, vector<64x64xbf16>, vector<8x64xf32> -> vector<8x64xf32>
    %c0_8 = arith.constant 0 : index
    %c0_9 = arith.constant 0 : index
    %11 = vector.load %arg7[%c0_8, %c0_9] : memref<1x64xf32, #tpu.memory_space<vmem>>, vector<1x64xf32>
    %12 = vector.broadcast %11 : vector<1x64xf32> to vector<8x64xf32>
    %13 = arith.addf %10, %12 : vector<8x64xf32>
    %cst_10 = arith.constant 0.000000e+00 : f32
    %14 = vector.broadcast %cst_10 : f32 to vector<8x64xf32>
    %15 = arith.maximumf %13, %14 : vector<8x64xf32>
    %16 = arith.truncf %15 : vector<8x64xf32> to vector<8x64xbf16>
    %c0_11 = arith.constant 0 : index
    %c0_12 = arith.constant 0 : index
    %17 = vector.load %arg8[%c0_11, %c0_12] : memref<64x64xbf16, #tpu.memory_space<vmem>>, vector<64x64xbf16>
    %cst_13 = arith.constant dense<0.000000e+00> : vector<8x64xf32>
    %18 = tpu.matmul %16, %17, %cst_13 {dimension_numbers = #tpu.dot_dimension_numbers<[1], [0], [0], [1], [0, 0, 1, 1], [], []>} : vector<8x64xbf16>, vector<64x64xbf16>, vector<8x64xf32> -> vector<8x64xf32>
    %c0_14 = arith.constant 0 : index
    %c0_15 = arith.constant 0 : index
    %19 = vector.load %arg9[%c0_14, %c0_15] : memref<1x64xf32, #tpu.memory_space<vmem>>, vector<1x64xf32>
    %20 = vector.broadcast %19 : vector<1x64xf32> to vector<8x64xf32>
    %21 = arith.addf %18, %20 : vector<8x64xf32>
    %c0_16 = arith.constant 0 : index
    %c0_17 = arith.constant 0 : index
    %22 = vector.load %arg10[%c0_16, %c0_17] : memref<1x64xf32, #tpu.memory_space<vmem>>, vector<1x64xf32>
    %23 = vector.broadcast %22 : vector<1x64xf32> to vector<8x64xf32>
    %24 = arith.mulf %0, %23 : vector<8x64xf32>
    %25 = arith.addf %21, %24 : vector<8x64xf32>
    %c0_18 = arith.constant 0 : index
    %c0_19 = arith.constant 0 : index
    %26 = vector.load %arg11[%c0_18, %c0_19] : memref<64x768xbf16, #tpu.memory_space<vmem>>, vector<64x768xbf16>
    %cst_20 = arith.constant dense<0.000000e+00> : vector<8x768xf32>
    %27 = tpu.matmul %4, %26, %cst_20 {dimension_numbers = #tpu.dot_dimension_numbers<[1], [0], [0], [1], [0, 0, 1, 1], [], []>} : vector<8x64xbf16>, vector<64x768xbf16>, vector<8x768xf32> -> vector<8x768xf32>
    %c0_21 = arith.constant 0 : index
    %c0_22 = arith.constant 0 : index
    %28 = vector.load %arg12[%c0_21, %c0_22] : memref<64x384xbf16, #tpu.memory_space<vmem>>, vector<64x384xbf16>
    %c0_23 = arith.constant 0 : index
    %c0_24 = arith.constant 0 : index
    %29 = vector.load %arg13[%c0_23, %c0_24] : memref<1x384xf32, #tpu.memory_space<vmem>>, vector<1x384xf32>
    %c0_25 = arith.constant 0 : index
    %c0_26 = arith.constant 0 : index
    %30 = vector.load %arg4[%c0_25, %c0_26] : memref<8x1xf32, #tpu.memory_space<vmem>>, vector<8x1xf32>
    %c0_27 = arith.constant 0 : index
    %c0_28 = arith.constant 0 : index
    %31 = vector.load %arg5[%c0_27, %c0_28] : memref<8x8xf32, #tpu.memory_space<vmem>>, vector<8x8xf32>
    %32 = vector.extract_strided_slice %27 {offsets = [0, 0], sizes = [8, 64], strides = [1, 1]} : vector<8x768xf32> to vector<8x64xf32>
    %33 = vector.extract_strided_slice %27 {offsets = [0, 256], sizes = [8, 64], strides = [1, 1]} : vector<8x768xf32> to vector<8x64xf32>
    %34 = vector.extract_strided_slice %27 {offsets = [0, 512], sizes = [8, 64], strides = [1, 1]} : vector<8x768xf32> to vector<8x64xf32>
    %35 = arith.truncf %32 : vector<8x64xf32> to vector<8x64xbf16>
    %cst_29 = arith.constant dense<0.000000e+00> : vector<8x384xf32>
    %36 = tpu.matmul %35, %28, %cst_29 {dimension_numbers = #tpu.dot_dimension_numbers<[1], [0], [0], [1], [0, 0, 1, 1], [], []>} : vector<8x64xbf16>, vector<64x384xbf16>, vector<8x384xf32> -> vector<8x384xf32>
    %cst_30 = arith.constant 0.000000e+00 : f32
    %37 = vector.broadcast %cst_30 : f32 to vector<8x384xf32>
    %38 = arith.maximumf %36, %37 : vector<8x384xf32>
    %39 = vector.broadcast %29 : vector<1x384xf32> to vector<8x384xf32>
    %40 = arith.addf %38, %39 : vector<8x384xf32>
    %41 = arith.truncf %33 : vector<8x64xf32> to vector<8x64xbf16>
    %cst_31 = arith.constant dense<0.000000e+00> : vector<8x384xf32>
    %42 = tpu.matmul %41, %28, %cst_31 {dimension_numbers = #tpu.dot_dimension_numbers<[1], [0], [0], [1], [0, 0, 1, 1], [], []>} : vector<8x64xbf16>, vector<64x384xbf16>, vector<8x384xf32> -> vector<8x384xf32>
    %cst_32 = arith.constant 0.000000e+00 : f32
    %43 = vector.broadcast %cst_32 : f32 to vector<8x384xf32>
    %44 = arith.maximumf %42, %43 : vector<8x384xf32>
    %45 = vector.broadcast %29 : vector<1x384xf32> to vector<8x384xf32>
    %46 = arith.addf %44, %45 : vector<8x384xf32>
    %47 = vector.broadcast %30 : vector<8x1xf32> to vector<8x384xf32>
    %48 = arith.mulf %46, %47 : vector<8x384xf32>
    %49 = arith.truncf %40 : vector<8x384xf32> to vector<8x384xbf16>
    %50 = arith.truncf %48 : vector<8x384xf32> to vector<8x384xbf16>
    %cst_33 = arith.constant dense<0.000000e+00> : vector<8x8xf32>
    %51 = tpu.matmul %49, %50, %cst_33 {dimension_numbers = #tpu.dot_dimension_numbers<[1], [1], [0], [0], [0, 0, 1, 0], [], []>} : vector<8x384xbf16>, vector<8x384xbf16>, vector<8x8xf32> -> vector<8x8xf32>
    %52 = arith.mulf %51, %31 : vector<8x8xf32>
    %cst_34 = arith.constant dense<0.000000e+00> : vector<8xf32>
    %53 = vector.multi_reduction <add>, %52, %cst_34 [1] : vector<8x8xf32> to vector<8xf32>
    %54 = vector.shape_cast %53 : vector<8xf32> to vector<8x1xf32>
    %cst_35 = arith.constant 9.99999971E-10 : f32
    %55 = vector.broadcast %cst_35 : f32 to vector<8x1xf32>
    %56 = arith.maximumf %54, %55 : vector<8x1xf32>
    %57 = arith.truncf %52 : vector<8x8xf32> to vector<8x8xbf16>
    %58 = arith.truncf %34 : vector<8x64xf32> to vector<8x64xbf16>
    %cst_36 = arith.constant dense<0.000000e+00> : vector<8x64xf32>
    %59 = tpu.matmul %57, %58, %cst_36 {dimension_numbers = #tpu.dot_dimension_numbers<[1], [0], [0], [1], [0, 0, 1, 1], [], []>} : vector<8x8xbf16>, vector<8x64xbf16>, vector<8x64xf32> -> vector<8x64xf32>
    %60 = tpu.reciprocal %56 {approx = true} : vector<8x1xf32> -> vector<8x1xf32>
    %61 = vector.broadcast %60 : vector<8x1xf32> to vector<8x64xf32>
    %62 = arith.mulf %59, %61 : vector<8x64xf32>
    %63 = vector.extract_strided_slice %27 {offsets = [0, 64], sizes = [8, 64], strides = [1, 1]} : vector<8x768xf32> to vector<8x64xf32>
    %64 = vector.extract_strided_slice %27 {offsets = [0, 320], sizes = [8, 64], strides = [1, 1]} : vector<8x768xf32> to vector<8x64xf32>
    %65 = vector.extract_strided_slice %27 {offsets = [0, 576], sizes = [8, 64], strides = [1, 1]} : vector<8x768xf32> to vector<8x64xf32>
    %66 = arith.truncf %63 : vector<8x64xf32> to vector<8x64xbf16>
    %cst_37 = arith.constant dense<0.000000e+00> : vector<8x384xf32>
    %67 = tpu.matmul %66, %28, %cst_37 {dimension_numbers = #tpu.dot_dimension_numbers<[1], [0], [0], [1], [0, 0, 1, 1], [], []>} : vector<8x64xbf16>, vector<64x384xbf16>, vector<8x384xf32> -> vector<8x384xf32>
    %cst_38 = arith.constant 0.000000e+00 : f32
    %68 = vector.broadcast %cst_38 : f32 to vector<8x384xf32>
    %69 = arith.maximumf %67, %68 : vector<8x384xf32>
    %70 = vector.broadcast %29 : vector<1x384xf32> to vector<8x384xf32>
    %71 = arith.addf %69, %70 : vector<8x384xf32>
    %72 = arith.truncf %64 : vector<8x64xf32> to vector<8x64xbf16>
    %cst_39 = arith.constant dense<0.000000e+00> : vector<8x384xf32>
    %73 = tpu.matmul %72, %28, %cst_39 {dimension_numbers = #tpu.dot_dimension_numbers<[1], [0], [0], [1], [0, 0, 1, 1], [], []>} : vector<8x64xbf16>, vector<64x384xbf16>, vector<8x384xf32> -> vector<8x384xf32>
    %cst_40 = arith.constant 0.000000e+00 : f32
    %74 = vector.broadcast %cst_40 : f32 to vector<8x384xf32>
    %75 = arith.maximumf %73, %74 : vector<8x384xf32>
    %76 = vector.broadcast %29 : vector<1x384xf32> to vector<8x384xf32>
    %77 = arith.addf %75, %76 : vector<8x384xf32>
    %78 = vector.broadcast %30 : vector<8x1xf32> to vector<8x384xf32>
    %79 = arith.mulf %77, %78 : vector<8x384xf32>
    %80 = arith.truncf %71 : vector<8x384xf32> to vector<8x384xbf16>
    %81 = arith.truncf %79 : vector<8x384xf32> to vector<8x384xbf16>
    %cst_41 = arith.constant dense<0.000000e+00> : vector<8x8xf32>
    %82 = tpu.matmul %80, %81, %cst_41 {dimension_numbers = #tpu.dot_dimension_numbers<[1], [1], [0], [0], [0, 0, 1, 0], [], []>} : vector<8x384xbf16>, vector<8x384xbf16>, vector<8x8xf32> -> vector<8x8xf32>
    %83 = arith.mulf %82, %31 : vector<8x8xf32>
    %cst_42 = arith.constant dense<0.000000e+00> : vector<8xf32>
    %84 = vector.multi_reduction <add>, %83, %cst_42 [1] : vector<8x8xf32> to vector<8xf32>
    %85 = vector.shape_cast %84 : vector<8xf32> to vector<8x1xf32>
    %cst_43 = arith.constant 9.99999971E-10 : f32
    %86 = vector.broadcast %cst_43 : f32 to vector<8x1xf32>
    %87 = arith.maximumf %85, %86 : vector<8x1xf32>
    %88 = arith.truncf %83 : vector<8x8xf32> to vector<8x8xbf16>
    %89 = arith.truncf %65 : vector<8x64xf32> to vector<8x64xbf16>
    %cst_44 = arith.constant dense<0.000000e+00> : vector<8x64xf32>
    %90 = tpu.matmul %88, %89, %cst_44 {dimension_numbers = #tpu.dot_dimension_numbers<[1], [0], [0], [1], [0, 0, 1, 1], [], []>} : vector<8x8xbf16>, vector<8x64xbf16>, vector<8x64xf32> -> vector<8x64xf32>
    %91 = tpu.reciprocal %87 {approx = true} : vector<8x1xf32> -> vector<8x1xf32>
    %92 = vector.broadcast %91 : vector<8x1xf32> to vector<8x64xf32>
    %93 = arith.mulf %90, %92 : vector<8x64xf32>
    %94 = vector.extract_strided_slice %27 {offsets = [0, 128], sizes = [8, 64], strides = [1, 1]} : vector<8x768xf32> to vector<8x64xf32>
    %95 = vector.extract_strided_slice %27 {offsets = [0, 384], sizes = [8, 64], strides = [1, 1]} : vector<8x768xf32> to vector<8x64xf32>
    %96 = vector.extract_strided_slice %27 {offsets = [0, 640], sizes = [8, 64], strides = [1, 1]} : vector<8x768xf32> to vector<8x64xf32>
    %97 = arith.truncf %94 : vector<8x64xf32> to vector<8x64xbf16>
    %cst_45 = arith.constant dense<0.000000e+00> : vector<8x384xf32>
    %98 = tpu.matmul %97, %28, %cst_45 {dimension_numbers = #tpu.dot_dimension_numbers<[1], [0], [0], [1], [0, 0, 1, 1], [], []>} : vector<8x64xbf16>, vector<64x384xbf16>, vector<8x384xf32> -> vector<8x384xf32>
    %cst_46 = arith.constant 0.000000e+00 : f32
    %99 = vector.broadcast %cst_46 : f32 to vector<8x384xf32>
    %100 = arith.maximumf %98, %99 : vector<8x384xf32>
    %101 = vector.broadcast %29 : vector<1x384xf32> to vector<8x384xf32>
    %102 = arith.addf %100, %101 : vector<8x384xf32>
    %103 = arith.truncf %95 : vector<8x64xf32> to vector<8x64xbf16>
    %cst_47 = arith.constant dense<0.000000e+00> : vector<8x384xf32>
    %104 = tpu.matmul %103, %28, %cst_47 {dimension_numbers = #tpu.dot_dimension_numbers<[1], [0], [0], [1], [0, 0, 1, 1], [], []>} : vector<8x64xbf16>, vector<64x384xbf16>, vector<8x384xf32> -> vector<8x384xf32>
    %cst_48 = arith.constant 0.000000e+00 : f32
    %105 = vector.broadcast %cst_48 : f32 to vector<8x384xf32>
    %106 = arith.maximumf %104, %105 : vector<8x384xf32>
    %107 = vector.broadcast %29 : vector<1x384xf32> to vector<8x384xf32>
    %108 = arith.addf %106, %107 : vector<8x384xf32>
    %109 = vector.broadcast %30 : vector<8x1xf32> to vector<8x384xf32>
    %110 = arith.mulf %108, %109 : vector<8x384xf32>
    %111 = arith.truncf %102 : vector<8x384xf32> to vector<8x384xbf16>
    %112 = arith.truncf %110 : vector<8x384xf32> to vector<8x384xbf16>
    %cst_49 = arith.constant dense<0.000000e+00> : vector<8x8xf32>
    %113 = tpu.matmul %111, %112, %cst_49 {dimension_numbers = #tpu.dot_dimension_numbers<[1], [1], [0], [0], [0, 0, 1, 0], [], []>} : vector<8x384xbf16>, vector<8x384xbf16>, vector<8x8xf32> -> vector<8x8xf32>
    %114 = arith.mulf %113, %31 : vector<8x8xf32>
    %cst_50 = arith.constant dense<0.000000e+00> : vector<8xf32>
    %115 = vector.multi_reduction <add>, %114, %cst_50 [1] : vector<8x8xf32> to vector<8xf32>
    %116 = vector.shape_cast %115 : vector<8xf32> to vector<8x1xf32>
    %cst_51 = arith.constant 9.99999971E-10 : f32
    %117 = vector.broadcast %cst_51 : f32 to vector<8x1xf32>
    %118 = arith.maximumf %116, %117 : vector<8x1xf32>
    %119 = arith.truncf %114 : vector<8x8xf32> to vector<8x8xbf16>
    %120 = arith.truncf %96 : vector<8x64xf32> to vector<8x64xbf16>
    %cst_52 = arith.constant dense<0.000000e+00> : vector<8x64xf32>
    %121 = tpu.matmul %119, %120, %cst_52 {dimension_numbers = #tpu.dot_dimension_numbers<[1], [0], [0], [1], [0, 0, 1, 1], [], []>} : vector<8x8xbf16>, vector<8x64xbf16>, vector<8x64xf32> -> vector<8x64xf32>
    %122 = tpu.reciprocal %118 {approx = true} : vector<8x1xf32> -> vector<8x1xf32>
    %123 = vector.broadcast %122 : vector<8x1xf32> to vector<8x64xf32>
    %124 = arith.mulf %121, %123 : vector<8x64xf32>
    %125 = vector.extract_strided_slice %27 {offsets = [0, 192], sizes = [8, 64], strides = [1, 1]} : vector<8x768xf32> to vector<8x64xf32>
    %126 = vector.extract_strided_slice %27 {offsets = [0, 448], sizes = [8, 64], strides = [1, 1]} : vector<8x768xf32> to vector<8x64xf32>
    %127 = vector.extract_strided_slice %27 {offsets = [0, 704], sizes = [8, 64], strides = [1, 1]} : vector<8x768xf32> to vector<8x64xf32>
    %128 = arith.truncf %125 : vector<8x64xf32> to vector<8x64xbf16>
    %cst_53 = arith.constant dense<0.000000e+00> : vector<8x384xf32>
    %129 = tpu.matmul %128, %28, %cst_53 {dimension_numbers = #tpu.dot_dimension_numbers<[1], [0], [0], [1], [0, 0, 1, 1], [], []>} : vector<8x64xbf16>, vector<64x384xbf16>, vector<8x384xf32> -> vector<8x384xf32>
    %cst_54 = arith.constant 0.000000e+00 : f32
    %130 = vector.broadcast %cst_54 : f32 to vector<8x384xf32>
    %131 = arith.maximumf %129, %130 : vector<8x384xf32>
    %132 = vector.broadcast %29 : vector<1x384xf32> to vector<8x384xf32>
    %133 = arith.addf %131, %132 : vector<8x384xf32>
    %134 = arith.truncf %126 : vector<8x64xf32> to vector<8x64xbf16>
    %cst_55 = arith.constant dense<0.000000e+00> : vector<8x384xf32>
    %135 = tpu.matmul %134, %28, %cst_55 {dimension_numbers = #tpu.dot_dimension_numbers<[1], [0], [0], [1], [0, 0, 1, 1], [], []>} : vector<8x64xbf16>, vector<64x384xbf16>, vector<8x384xf32> -> vector<8x384xf32>
    %cst_56 = arith.constant 0.000000e+00 : f32
    %136 = vector.broadcast %cst_56 : f32 to vector<8x384xf32>
    %137 = arith.maximumf %135, %136 : vector<8x384xf32>
    %138 = vector.broadcast %29 : vector<1x384xf32> to vector<8x384xf32>
    %139 = arith.addf %137, %138 : vector<8x384xf32>
    %140 = vector.broadcast %30 : vector<8x1xf32> to vector<8x384xf32>
    %141 = arith.mulf %139, %140 : vector<8x384xf32>
    %142 = arith.truncf %133 : vector<8x384xf32> to vector<8x384xbf16>
    %143 = arith.truncf %141 : vector<8x384xf32> to vector<8x384xbf16>
    %cst_57 = arith.constant dense<0.000000e+00> : vector<8x8xf32>
    %144 = tpu.matmul %142, %143, %cst_57 {dimension_numbers = #tpu.dot_dimension_numbers<[1], [1], [0], [0], [0, 0, 1, 0], [], []>} : vector<8x384xbf16>, vector<8x384xbf16>, vector<8x8xf32> -> vector<8x8xf32>
    %145 = arith.mulf %144, %31 : vector<8x8xf32>
    %cst_58 = arith.constant dense<0.000000e+00> : vector<8xf32>
    %146 = vector.multi_reduction <add>, %145, %cst_58 [1] : vector<8x8xf32> to vector<8xf32>
    %147 = vector.shape_cast %146 : vector<8xf32> to vector<8x1xf32>
    %cst_59 = arith.constant 9.99999971E-10 : f32
    %148 = vector.broadcast %cst_59 : f32 to vector<8x1xf32>
    %149 = arith.maximumf %147, %148 : vector<8x1xf32>
    %150 = arith.truncf %145 : vector<8x8xf32> to vector<8x8xbf16>
    %151 = arith.truncf %127 : vector<8x64xf32> to vector<8x64xbf16>
    %cst_60 = arith.constant dense<0.000000e+00> : vector<8x64xf32>
    %152 = tpu.matmul %150, %151, %cst_60 {dimension_numbers = #tpu.dot_dimension_numbers<[1], [0], [0], [1], [0, 0, 1, 1], [], []>} : vector<8x8xbf16>, vector<8x64xbf16>, vector<8x64xf32> -> vector<8x64xf32>
    %153 = tpu.reciprocal %149 {approx = true} : vector<8x1xf32> -> vector<8x1xf32>
    %154 = vector.broadcast %153 : vector<8x1xf32> to vector<8x64xf32>
    %155 = arith.mulf %152, %154 : vector<8x64xf32>
    %156 = tpu.concatenate %62, %93, %124, %155 in 1 : vector<8x64xf32>, vector<8x64xf32>, vector<8x64xf32>, vector<8x64xf32> -> vector<8x256xf32>
    %c0_61 = arith.constant 0 : index
    %c0_62 = arith.constant 0 : index
    %157 = vector.load %arg16[%c0_61, %c0_62] : memref<1x64xf32, #tpu.memory_space<vmem>>, vector<1x64xf32>
    %158 = vector.broadcast %157 : vector<1x64xf32> to vector<8x64xf32>
    %159 = arith.mulf %0, %158 : vector<8x64xf32>
    %c0_63 = arith.constant 0 : index
    %c0_64 = arith.constant 0 : index
    %160 = vector.load %arg15[%c0_63, %c0_64] : memref<1x64xf32, #tpu.memory_space<vmem>>, vector<1x64xf32>
    %161 = vector.broadcast %160 : vector<1x64xf32> to vector<8x64xf32>
    %162 = arith.addf %159, %161 : vector<8x64xf32>
    %163 = arith.truncf %156 : vector<8x256xf32> to vector<8x256xbf16>
    %c0_65 = arith.constant 0 : index
    %c0_66 = arith.constant 0 : index
    %164 = vector.load %arg14[%c0_65, %c0_66] : memref<256x64xbf16, #tpu.memory_space<vmem>>, vector<256x64xbf16>
    %cst_67 = arith.constant dense<0.000000e+00> : vector<8x64xf32>
    %165 = tpu.matmul %163, %164, %cst_67 {dimension_numbers = #tpu.dot_dimension_numbers<[1], [0], [0], [1], [0, 0, 1, 1], [], []>} : vector<8x256xbf16>, vector<256x64xbf16>, vector<8x64xf32> -> vector<8x64xf32>
    %166 = arith.addf %162, %165 : vector<8x64xf32>
    %167 = arith.addf %25, %166 : vector<8x64xf32>
    %168 = arith.truncf %167 : vector<8x64xf32> to vector<8x64xbf16>
    %c0_68 = arith.constant 0 : index
    %c0_69 = arith.constant 0 : index
    %169 = vector.load %arg17[%c0_68, %c0_69] : memref<64x128xbf16, #tpu.memory_space<vmem>>, vector<64x128xbf16>
    %cst_70 = arith.constant dense<0.000000e+00> : vector<8x128xf32>
    %170 = tpu.matmul %168, %169, %cst_70 {dimension_numbers = #tpu.dot_dimension_numbers<[1], [0], [0], [1], [0, 0, 1, 1], [], []>} : vector<8x64xbf16>, vector<64x128xbf16>, vector<8x128xf32> -> vector<8x128xf32>
    %c0_71 = arith.constant 0 : index
    %c0_72 = arith.constant 0 : index
    %171 = vector.load %arg18[%c0_71, %c0_72] : memref<1x128xf32, #tpu.memory_space<vmem>>, vector<1x128xf32>
    %172 = vector.broadcast %171 : vector<1x128xf32> to vector<8x128xf32>
    %173 = arith.addf %170, %172 : vector<8x128xf32>
    %cst_73 = arith.constant 0.000000e+00 : f32
    %174 = vector.broadcast %cst_73 : f32 to vector<8x128xf32>
    %175 = arith.maximumf %173, %174 : vector<8x128xf32>
    %176 = arith.truncf %175 : vector<8x128xf32> to vector<8x128xbf16>
    %c0_74 = arith.constant 0 : index
    %c0_75 = arith.constant 0 : index
    %177 = vector.load %arg19[%c0_74, %c0_75] : memref<128x64xbf16, #tpu.memory_space<vmem>>, vector<128x64xbf16>
    %cst_76 = arith.constant dense<0.000000e+00> : vector<8x64xf32>
    %178 = tpu.matmul %176, %177, %cst_76 {dimension_numbers = #tpu.dot_dimension_numbers<[1], [0], [0], [1], [0, 0, 1, 1], [], []>} : vector<8x128xbf16>, vector<128x64xbf16>, vector<8x64xf32> -> vector<8x64xf32>
    %c0_77 = arith.constant 0 : index
    %c0_78 = arith.constant 0 : index
    %179 = vector.load %arg20[%c0_77, %c0_78] : memref<1x64xf32, #tpu.memory_space<vmem>>, vector<1x64xf32>
    %180 = vector.broadcast %179 : vector<1x64xf32> to vector<8x64xf32>
    %181 = arith.addf %178, %180 : vector<8x64xf32>
    %c0_79 = arith.constant 0 : index
    %c0_80 = arith.constant 0 : index
    %182 = vector.load %arg21[%c0_79, %c0_80] : memref<1x64xf32, #tpu.memory_space<vmem>>, vector<1x64xf32>
    %183 = vector.broadcast %182 : vector<1x64xf32> to vector<8x64xf32>
    %184 = arith.mulf %167, %183 : vector<8x64xf32>
    %185 = arith.addf %181, %184 : vector<8x64xf32>
    %c0_81 = arith.constant 0 : index
    %c0_82 = arith.constant 0 : index
    %186 = vector.load %arg22[%c0_81, %c0_82] : memref<8x64xf32, #tpu.memory_space<vmem>>, vector<8x64xf32>
    tpu.vector_store %arg22[%c0_81, %c0_82], %185 {strides = array<i32>} : memref<8x64xf32, #tpu.memory_space<vmem>>, vector<8x64xf32>,
    return
  }
  func.func @transform_0(%arg0: i32) -> (i32, i32) {
    %c0_i32 = arith.constant 0 : i32
    %c0_i32_0 = arith.constant 0 : i32
    return %arg0, %c0_i32 : i32, i32
  }
  func.func @transform_1(%arg0: i32) -> (i32, i32) {
    %c0_i32 = arith.constant 0 : i32
    %c0_i32_0 = arith.constant 0 : i32
    return %arg0, %c0_i32 : i32, i32
  }
  func.func @transform_2(%arg0: i32) -> (i32, i32) {
    %c0_i32 = arith.constant 0 : i32
    %c0_i32_0 = arith.constant 0 : i32
    return %arg0, %c0_i32 : i32, i32
  }
  func.func @transform_3(%arg0: i32) -> (i32, i32) {
    %c0_i32 = arith.constant 0 : i32
    %c0_i32_0 = arith.constant 0 : i32
    return %arg0, %c0_i32 : i32, i32
  }
  func.func @transform_4(%arg0: i32) -> (i32, i32) {
    %c0_i32 = arith.constant 0 : i32
    %c0_i32_0 = arith.constant 0 : i32
    %c0_i32_1 = arith.constant 0 : i32
    return %c0_i32, %c0_i32_0 : i32, i32
  }
  func.func @transform_5(%arg0: i32) -> (i32, i32) {
    %c0_i32 = arith.constant 0 : i32
    %c0_i32_0 = arith.constant 0 : i32
    %c0_i32_1 = arith.constant 0 : i32
    return %c0_i32, %c0_i32_0 : i32, i32
  }
  func.func @transform_6(%arg0: i32) -> (i32, i32) {
    %c0_i32 = arith.constant 0 : i32
    %c0_i32_0 = arith.constant 0 : i32
    %c0_i32_1 = arith.constant 0 : i32
    return %c0_i32, %c0_i32_0 : i32, i32
  }
  func.func @transform_7(%arg0: i32) -> (i32, i32) {
    %c0_i32 = arith.constant 0 : i32
    %c0_i32_0 = arith.constant 0 : i32
    %c0_i32_1 = arith.constant 0 : i32
    return %c0_i32, %c0_i32_0 : i32, i32
  }
  func.func @transform_8(%arg0: i32) -> (i32, i32) {
    %c0_i32 = arith.constant 0 : i32
    %c0_i32_0 = arith.constant 0 : i32
    %c0_i32_1 = arith.constant 0 : i32
    return %c0_i32, %c0_i32_0 : i32, i32
  }
  func.func @transform_9(%arg0: i32) -> (i32, i32) {
    %c0_i32 = arith.constant 0 : i32
    %c0_i32_0 = arith.constant 0 : i32
    %c0_i32_1 = arith.constant 0 : i32
    return %c0_i32, %c0_i32_0 : i32, i32
  }
  func.func @transform_10(%arg0: i32) -> (i32, i32) {
    %c0_i32 = arith.constant 0 : i32
    %c0_i32_0 = arith.constant 0 : i32
    %c0_i32_1 = arith.constant 0 : i32
    return %c0_i32, %c0_i32_0 : i32, i32
  }
  func.func @transform_11(%arg0: i32) -> (i32, i32) {
    %c0_i32 = arith.constant 0 : i32
    %c0_i32_0 = arith.constant 0 : i32
    %c0_i32_1 = arith.constant 0 : i32
    return %c0_i32, %c0_i32_0 : i32, i32
  }
  func.func @transform_12(%arg0: i32) -> (i32, i32) {
    %c0_i32 = arith.constant 0 : i32
    %c0_i32_0 = arith.constant 0 : i32
    %c0_i32_1 = arith.constant 0 : i32
    return %c0_i32, %c0_i32_0 : i32, i32
  }
  func.func @transform_13(%arg0: i32) -> (i32, i32) {
    %c0_i32 = arith.constant 0 : i32
    %c0_i32_0 = arith.constant 0 : i32
    %c0_i32_1 = arith.constant 0 : i32
    return %c0_i32, %c0_i32_0 : i32, i32
  }
  func.func @transform_14(%arg0: i32) -> (i32, i32) {
    %c0_i32 = arith.constant 0 : i32
    %c0_i32_0 = arith.constant 0 : i32
    %c0_i32_1 = arith.constant 0 : i32
    return %c0_i32, %c0_i32_0 : i32, i32
  }
  func.func @transform_15(%arg0: i32) -> (i32, i32) {
    %c0_i32 = arith.constant 0 : i32
    %c0_i32_0 = arith.constant 0 : i32
    %c0_i32_1 = arith.constant 0 : i32
    return %c0_i32, %c0_i32_0 : i32, i32
  }
  func.func @transform_16(%arg0: i32) -> (i32, i32) {
    %c0_i32 = arith.constant 0 : i32
    %c0_i32_0 = arith.constant 0 : i32
    %c0_i32_1 = arith.constant 0 : i32
    return %c0_i32, %c0_i32_0 : i32, i32
  }
  func.func @transform_17(%arg0: i32) -> (i32, i32) {
    %c0_i32 = arith.constant 0 : i32
    %c0_i32_0 = arith.constant 0 : i32
    %c0_i32_1 = arith.constant 0 : i32
    return %c0_i32, %c0_i32_0 : i32, i32
  }
  func.func @transform_18(%arg0: i32) -> (i32, i32) {
    %c0_i32 = arith.constant 0 : i32
    %c0_i32_0 = arith.constant 0 : i32
    %c0_i32_1 = arith.constant 0 : i32
    return %c0_i32, %c0_i32_0 : i32, i32
  }
  func.func @transform_19(%arg0: i32) -> (i32, i32) {
    %c0_i32 = arith.constant 0 : i32
    %c0_i32_0 = arith.constant 0 : i32
    %c0_i32_1 = arith.constant 0 : i32
    return %c0_i32, %c0_i32_0 : i32, i32
  }
  func.func @transform_20(%arg0: i32) -> (i32, i32) {
    %c0_i32 = arith.constant 0 : i32
    %c0_i32_0 = arith.constant 0 : i32
    %c0_i32_1 = arith.constant 0 : i32
    return %c0_i32, %c0_i32_0 : i32, i32
  }
  func.func @transform_21(%arg0: i32) -> (i32, i32) {
    %c0_i32 = arith.constant 0 : i32
    %c0_i32_0 = arith.constant 0 : i32
    return %arg0, %c0_i32 : i32, i32
  }
}

module attributes {stable_mosaic.version = 11 : i64} {
  func.func @_out_mlp_kernel(%arg0: i32, %arg1: memref<8x64xf32, #tpu.memory_space<vmem>>, %arg2: memref<64x64xbf16, #tpu.memory_space<vmem>>, %arg3: memref<1x64xf32, #tpu.memory_space<vmem>>, %arg4: memref<64x128xbf16, #tpu.memory_space<vmem>>, %arg5: memref<1x128xf32, #tpu.memory_space<vmem>>, %arg6: memref<128x64xbf16, #tpu.memory_space<vmem>>, %arg7: memref<1x64xf32, #tpu.memory_space<vmem>>, %arg8: memref<8x64xf32, #tpu.memory_space<vmem>>) attributes {dimension_semantics = [#tpu.dimension_semantics<parallel>], iteration_bounds = array<i64: 2>, scalar_prefetch = 0 : i64, scratch_operands = 0 : i64, tpu.core_type = #tpu.core_type<tc>, window_params = [{transform_indices = @transform_0, window_bounds = array<i64: 8, 64>}, {pipeline_mode = #tpu.pipeline_mode<synchronous>, transform_indices = @transform_1, window_bounds = array<i64: 64, 64>}, {pipeline_mode = #tpu.pipeline_mode<synchronous>, transform_indices = @transform_2, window_bounds = array<i64: 1, 64>}, {pipeline_mode = #tpu.pipeline_mode<synchronous>, transform_indices = @transform_3, window_bounds = array<i64: 64, 128>}, {pipeline_mode = #tpu.pipeline_mode<synchronous>, transform_indices = @transform_4, window_bounds = array<i64: 1, 128>}, {pipeline_mode = #tpu.pipeline_mode<synchronous>, transform_indices = @transform_5, window_bounds = array<i64: 128, 64>}, {pipeline_mode = #tpu.pipeline_mode<synchronous>, transform_indices = @transform_6, window_bounds = array<i64: 1, 64>}, {transform_indices = @transform_7, window_bounds = array<i64: 8, 64>}]} {
    %c0 = arith.constant 0 : index
    %c0_0 = arith.constant 0 : index
    %0 = vector.load %arg1[%c0, %c0_0] : memref<8x64xf32, #tpu.memory_space<vmem>>, vector<8x64xf32>
    %1 = arith.truncf %0 : vector<8x64xf32> to vector<8x64xbf16>
    %c0_1 = arith.constant 0 : index
    %c0_2 = arith.constant 0 : index
    %2 = vector.load %arg2[%c0_1, %c0_2] : memref<64x64xbf16, #tpu.memory_space<vmem>>, vector<64x64xbf16>
    %cst = arith.constant dense<0.000000e+00> : vector<8x64xf32>
    %3 = tpu.matmul %1, %2, %cst {dimension_numbers = #tpu.dot_dimension_numbers<[1], [0], [0], [1], [0, 0, 1, 1], [], []>} : vector<8x64xbf16>, vector<64x64xbf16>, vector<8x64xf32> -> vector<8x64xf32>
    %c0_3 = arith.constant 0 : index
    %c0_4 = arith.constant 0 : index
    %4 = vector.load %arg3[%c0_3, %c0_4] : memref<1x64xf32, #tpu.memory_space<vmem>>, vector<1x64xf32>
    %5 = vector.broadcast %4 : vector<1x64xf32> to vector<8x64xf32>
    %6 = arith.addf %3, %5 : vector<8x64xf32>
    %cst_5 = arith.constant 0.000000e+00 : f32
    %7 = vector.broadcast %cst_5 : f32 to vector<8x64xf32>
    %8 = arith.maximumf %6, %7 : vector<8x64xf32>
    %9 = arith.truncf %8 : vector<8x64xf32> to vector<8x64xbf16>
    %c0_6 = arith.constant 0 : index
    %c0_7 = arith.constant 0 : index
    %10 = vector.load %arg4[%c0_6, %c0_7] : memref<64x128xbf16, #tpu.memory_space<vmem>>, vector<64x128xbf16>
    %cst_8 = arith.constant dense<0.000000e+00> : vector<8x128xf32>
    %11 = tpu.matmul %9, %10, %cst_8 {dimension_numbers = #tpu.dot_dimension_numbers<[1], [0], [0], [1], [0, 0, 1, 1], [], []>} : vector<8x64xbf16>, vector<64x128xbf16>, vector<8x128xf32> -> vector<8x128xf32>
    %c0_9 = arith.constant 0 : index
    %c0_10 = arith.constant 0 : index
    %12 = vector.load %arg5[%c0_9, %c0_10] : memref<1x128xf32, #tpu.memory_space<vmem>>, vector<1x128xf32>
    %13 = vector.broadcast %12 : vector<1x128xf32> to vector<8x128xf32>
    %14 = arith.addf %11, %13 : vector<8x128xf32>
    %cst_11 = arith.constant 0.000000e+00 : f32
    %15 = vector.broadcast %cst_11 : f32 to vector<8x128xf32>
    %16 = arith.maximumf %14, %15 : vector<8x128xf32>
    %17 = arith.truncf %16 : vector<8x128xf32> to vector<8x128xbf16>
    %c0_12 = arith.constant 0 : index
    %c0_13 = arith.constant 0 : index
    %18 = vector.load %arg6[%c0_12, %c0_13] : memref<128x64xbf16, #tpu.memory_space<vmem>>, vector<128x64xbf16>
    %cst_14 = arith.constant dense<0.000000e+00> : vector<8x64xf32>
    %19 = tpu.matmul %17, %18, %cst_14 {dimension_numbers = #tpu.dot_dimension_numbers<[1], [0], [0], [1], [0, 0, 1, 1], [], []>} : vector<8x128xbf16>, vector<128x64xbf16>, vector<8x64xf32> -> vector<8x64xf32>
    %c0_15 = arith.constant 0 : index
    %c0_16 = arith.constant 0 : index
    %20 = vector.load %arg7[%c0_15, %c0_16] : memref<1x64xf32, #tpu.memory_space<vmem>>, vector<1x64xf32>
    %21 = vector.broadcast %20 : vector<1x64xf32> to vector<8x64xf32>
    %22 = arith.addf %19, %21 : vector<8x64xf32>
    %c0_17 = arith.constant 0 : index
    %c0_18 = arith.constant 0 : index
    %23 = vector.load %arg8[%c0_17, %c0_18] : memref<8x64xf32, #tpu.memory_space<vmem>>, vector<8x64xf32>
    tpu.vector_store %arg8[%c0_17, %c0_18], %22 {strides = array<i32>} : memref<8x64xf32, #tpu.memory_space<vmem>>, vector<8x64xf32>,
    return
  }
  func.func @transform_0(%arg0: i32) -> (i32, i32) {
    %c0_i32 = arith.constant 0 : i32
    %c0_i32_0 = arith.constant 0 : i32
    return %arg0, %c0_i32 : i32, i32
  }
  func.func @transform_1(%arg0: i32) -> (i32, i32) {
    %c0_i32 = arith.constant 0 : i32
    %c0_i32_0 = arith.constant 0 : i32
    %c0_i32_1 = arith.constant 0 : i32
    return %c0_i32, %c0_i32_0 : i32, i32
  }
  func.func @transform_2(%arg0: i32) -> (i32, i32) {
    %c0_i32 = arith.constant 0 : i32
    %c0_i32_0 = arith.constant 0 : i32
    %c0_i32_1 = arith.constant 0 : i32
    return %c0_i32, %c0_i32_0 : i32, i32
  }
  func.func @transform_3(%arg0: i32) -> (i32, i32) {
    %c0_i32 = arith.constant 0 : i32
    %c0_i32_0 = arith.constant 0 : i32
    %c0_i32_1 = arith.constant 0 : i32
    return %c0_i32, %c0_i32_0 : i32, i32
  }
  func.func @transform_4(%arg0: i32) -> (i32, i32) {
    %c0_i32 = arith.constant 0 : i32
    %c0_i32_0 = arith.constant 0 : i32
    %c0_i32_1 = arith.constant 0 : i32
    return %c0_i32, %c0_i32_0 : i32, i32
  }
  func.func @transform_5(%arg0: i32) -> (i32, i32) {
    %c0_i32 = arith.constant 0 : i32
    %c0_i32_0 = arith.constant 0 : i32
    %c0_i32_1 = arith.constant 0 : i32
    return %c0_i32, %c0_i32_0 : i32, i32
  }
  func.func @transform_6(%arg0: i32) -> (i32, i32) {
    %c0_i32 = arith.constant 0 : i32
    %c0_i32_0 = arith.constant 0 : i32
    %c0_i32_1 = arith.constant 0 : i32
    return %c0_i32, %c0_i32_0 : i32, i32
  }
  func.func @transform_7(%arg0: i32) -> (i32, i32) {
    %c0_i32 = arith.constant 0 : i32
    %c0_i32_0 = arith.constant 0 : i32
    return %arg0, %c0_i32 : i32, i32
  }
}

</mosaic_0001>

<bundles_post_ra>
// kernel: spd_encoder_forward.12
= control target key start
LH: loop header
LB: loop body
LE: loop exit
PB: predicated region body
PF: predicated region fallthrough
CT: control target
= control target key end

     0   :  { %s313_s12 = smov 0   ;;  %s339_s0 = inlined_call_operand.vmem [shape: f32[16,20], index: 0, kind: input, shape index: {}]   ;;  %s340_s1 = inlined_call_operand.vmem [shape: bf16[20,64], index: 1, kind: input, shape index: {}]   ;;  %s341_s2 = inlined_call_operand.vmem [shape: f32[1,64], index: 2, kind: input, shape index: {}]   ;;  %s342_s3 = inlined_call_operand.vmem [shape: f32[16,64], index: 3, kind: output, shape index: {}]  }
   0x1 LB: > { %s261_s13 = sadd.s32 4294967295, %s291_s12   ;;  %p265_p0 = scmp.ge.s32.totalorder %s291_s12, 1  ;;  %s291_s12 = sphi %s313_s12, %s13_s12  }
   0x2   : > { %p136_p1 = scmp.lt.s32.totalorder %s291_s12, 3 }
   0x4   : > { %p137_p2 = pnand %p265_p0, %p136_p1 }
   0x5   : > { %p158_p3 = scmp.lt.s32.totalorder (!%p137_p2), %s261_s13, 1 }
   0x6   : > { %140 = sbr.rel (%p137_p2) target bundleno = 158 (0x9e), region = 32 }
   0xb   : > { %v171_v0 = vld [vmem:[%s340_s1 + $0x8] sm:$0x3]  ;;  %vm189_vm0 = vcmask 1041408   ;;  %s344_s13 = smov (!%p158_p3, %s261_s13), 1  ;;  %v275_v4 = vld [vmem:[%s340_s1] sm:$0xff]  ;;  %vm185_vm1 = vcmask 162816  }
   0xc   : > { %v181_v1 = vunpack.c.l.b16 %v171_v0  ;;  %s266_s16 = sshll.u32 %s344_s13, 3  ;;  %v284_v7 = vld [vmem:[%s341_s2] ss:$0 sm:$0xff]  ;;  %vm206_vm2 = vcmask 523264  }
   0xd   : > { %s161_s19 = scalar_lea.vmem %s339_s0, %s266_s16  ;;  %s165_s26 = scalar_lea.vmem %s342_s3, %s266_s16 }
   0xe   : > { %v183_v2 = vpack.c.b16 %v181_v1, %v181_v1  ;;  %v167_v5 = vld [vmem:[%s161_s19] sm:$0xff] }
   0xf   : > { %v168_v6 = vpack.c.bf16 %v167_v5, %v167_v5 }
  0x10   : > { %v191_v3 = vsel %vm189_vm0, %v183_v2, 0 }
  0x11   : > { %199 = vmatpush.bf16.msra.mxu0 %v191_v3 }
  0x15   : > { %200 = vmatpush.bf16.msra.mxu0 %v275_v4 }
  0x18   : > { %272 = vmatmul.msk.bf16.vlgmr.msra.gmra.mxu0 %vm185_vm1, %v168_v6 }
  0x95   : > { %v202_v8 = vpop.f32.mrf.mxu0 }
  0x96   : > { %v203_v9 = vadd.f32 %v284_v7, %v202_v8 }
  0x98   : > { %207 = vst.msk [vmem:[%s165_s26] sm:$0xff] %vm206_vm2, %v203_v9 }
  0x9d   : > { %v204_v10 = vpop.f32.mrf.mxu0 }
  0x9e PF: > { %s13_s12 = sadd.s32 1, %s291_s12  }
  0x9f   : > { %p10_p4 = scmp.ge.s32.totalorder %s13_s12, 4  }
  0xa1   :  { %12 = sbr.rel (!%p10_p4) target bundleno = 1 (0x1), region = 62 }

// kernel: spd_encoder_forward.23
= control target key start
LH: loop header
LB: loop body
LE: loop exit
PB: predicated region body
PF: predicated region fallthrough
CT: control target
= control target key end

     0   :  { %12 = vsyncpa [#allocation3], 0  ;;  %s926_s0 = inlined_call_operand.vmem [shape: f32[16,64], index: 0, kind: input, shape index: {}]   ;;  %s927_s1 = inlined_call_operand.vmem [shape: bf16[64,64], index: 1, kind: input, shape index: {}]   ;;  %s928_s2 = inlined_call_operand.vmem [shape: f32[1,64], index: 2, kind: input, shape index: {}]   ;;  %s929_s3 = inlined_call_operand.vmem [shape: bf16[64,128], index: 3, kind: input, shape index: {}]   ;;  %s930_s4 = inlined_call_operand.vmem [shape: f32[1,128], index: 4, kind: input, shape index: {}]   ;;  %s931_s5 = inlined_call_operand.vmem [shape: bf16[128,64], index: 5, kind: input, shape index: {}]   ;;  %s932_s6 = inlined_call_operand.vmem [shape: f32[1,64], index: 6, kind: input, shape index: {}]   ;;  %s933_s7 = inlined_call_operand.hbm [shape: f32[16,64], index: 7, kind: output, shape index: {}]  }
   0x1   :  { %14 = vsyncpa [#allocation3 + $0x1], 0  ;;  %s781_s24 = smov 0   ;;  %s783_s25 = smov 0  }
   0x2   :  { %s785_s26 = smov 0   ;;  %s787_s27 = smov 0  }
   0x3 LB: > { %s802_s28 = sadd.s32 4294967295, %s739_s27   ;;  %s543_s29 = sadd.s32 4294967294, %s739_s27   ;;  %s739_s27 = sphi %s787_s27, %s939_s27   ;;  %s735_s26 = sphi %s785_s26, %s938_s26   ;;  %s731_s25 = sphi %s783_s25, %s937_s25   ;;  %s727_s24 = sphi %s781_s24, %s936_s24  }
   0x4   : > { %s806_s30 = sadd.s32 1, %s739_s27   ;;  %s179_s8 = sadd.s32 1, %s735_s26 }
   0x5   : > { %s176_s9 = ssub.s32 %s739_s27, %s806_s30  ;;  %p189_p0 = scmp.ne.s32.totalorder %s735_s26, %s731_s25 }
   0x6   : > { %p177_p1 = scmp.eq.s32.totalorder %s176_s9, 0  ;;  %p190_p2 = scmp.eq.s32.totalorder %s802_s28, 1 }
   0x7   : > { %p195_p3 = scmp.ne.s32.totalorder %s731_s25, %s727_s24  ;;  %p196_p4 = scmp.eq.s32.totalorder %s543_s29, 1 }
   0x8   : > { %s817_s10 = scalar_select %p177_p1, %s735_s26, %s179_s8  }
   0x9   : > { %p819_p5 = por %p190_p2, %p189_p0  ;;  %p823_p6 = por %p196_p4, %p195_p3 }
   0xa   : > { %p546_p7 = scmp.ge.s32.totalorder %s739_s27, 1  ;;  %p239_p8 = scmp.lt.s32.totalorder %s739_s27, 3 }
   0xc   : > { %p240_p9 = pnand %p546_p7, %p239_p8 }
   0xd   : > { %p270_p10 = scmp.lt.s32.totalorder (!%p240_p9), %s802_s28, 1  ;;  %s267_s9 = sand.u32 (!%p240_p9), 1, %s731_s25  }
   0xe   : > { %243 = sbr.rel (%p240_p9) target bundleno = 439 (0x1b7), region = 48  ;;  %s547_s14 = sshll.u32 (!%p240_p9), %s267_s9, 3 }
   0xf   : > { %s269_s20 = scalar_lea.vmem (!%p240_p9), [#allocation2], %s547_s14  ;;  %s697_s14 = scalar_lea.hbm (!%p240_p9), %s933_s7, 16 }
  0x10   : > { %s481_s21 = sshll.u32 (!%p240_p9), %s269_s20, 4  ;;  %s482_s21 = int_to_ptr.vmem [resolvable:$true] %s481_s21 }
  0x13   : > { %v622_v0 = vld [vmem:[%s927_s1 + $0x18] sm:$0xff]  ;;  %v621_v2 = vld [vmem:[%s927_s1 + $0x10] sm:$0xff]  ;;  %s271_s19 = scalar_select %p270_p10, %s802_s28, 1  ;;  %v620_v4 = vld [vmem:[%s927_s1 + $0x8] sm:$0xff]  ;;  %vm313_vm0 = vcmask 523264  }
  0x14   : > { %v626_v1 = vld [vmem:[%s929_s3 + $0x18] sm:$0xff]  ;;  %321 = vmatpush.bf16.msra.mxu0 %v622_v0  ;;  %v625_v3 = vld [vmem:[%s929_s3 + $0x10] sm:$0xff]  ;;  %v619_v5 = vld [vmem:[%s927_s1] sm:$0xff] }
  0x15   : > { %375 = vmatpush.bf16.msra.mxu1 %v626_v1  ;;  %s548_s22 = sshll.u32 %s271_s19, 3  ;;  %v624_v8 = vld [vmem:[%s929_s3 + $0x8] sm:$0xff]  ;;  %v623_v9 = vld [vmem:[%s929_s3] sm:$0xff]  ;;  %v634_v10 = vld [vmem:[%s931_s5 + $0x38] sm:$0xff] }
  0x16   : > { %s273_s13 = scalar_lea.vmem %s926_s0, %s548_s22  ;;  %454 = vmatpush.bf16.msra.mxu2 %v634_v10  ;;  %v633_v11 = vld [vmem:[%s931_s5 + $0x30] sm:$0xff]  ;;  %v632_v12 = vld [vmem:[%s931_s5 + $0x28] sm:$0xff]  ;;  %v631_v13 = vld [vmem:[%s931_s5 + $0x20] sm:$0xff] }
  0x17   : > { %v275_v6 = vld [vmem:[%s273_s13] sm:$0xff]  ;;  %v630_v14 = vld [vmem:[%s931_s5 + $0x18] sm:$0xff]  ;;  %v629_v15 = vld [vmem:[%s931_s5 + $0x10] sm:$0xff]  ;;  %s616_s13 = sshll.u32 %s802_s28, 3  ;;  %s469_s28 = scalar_lea.sflag [#allocation3], %s267_s9 }
  0x18   : > { %322 = vmatpush.bf16.msra.mxu0 %v621_v2  ;;  %v276_v7 = vpack.c.bf16 %v275_v6, %v275_v6  ;;  %v674_v16 = vld [vmem:[%s928_s2] ss:$0 sm:$0xff]  ;;  %v628_v22 = vld [vmem:[%s931_s5 + $0x8] sm:$0xff]  ;;  %s479_s17 = scalar_lea.hbm %s933_s7, %s616_s13 }
  0x19   : > { %376 = vmatpush.bf16.msra.mxu1 %v625_v3  ;;  %v627_v23 = vld [vmem:[%s931_s5] sm:$0xff]  ;;  %s483_s22 = sshll.u32 %s479_s17, 4  ;;  %s484_s22 = int_to_ptr.hbm [resolvable:$true] %s483_s22 }
  0x1a   : > { %455 = vmatpush.bf16.msra.mxu2 %v633_v11  ;;  %v675_v24 = vld [vmem:[%s930_s4] ss:$0 sm:$0xff]  ;;  %s691_s23 = sshra.s32 %s484_s22, 4  ;;  %s692_s23 = int_to_ptr.hbm [resolvable:$true] %s691_s23 }
  0x1b   : > { %v676_v30 = vld [vmem:[%s932_s6] ss:$0 sm:$0xff]  ;;  %s693_s29 = scalar_lea.hbm %s692_s23, 8  ;;  %p698_p0 = scmp.lt.s32.totalorder %s692_s23, %s933_s7 }
  0x1c   : > { %323 = vmatpush.bf16.msra.mxu0 %v620_v4  ;;  %p694_p11 = scmp.ne.s32.totalorder %s692_s23, %s693_s29  ;;  %p699_p1 = scmp.lt.s32.totalorder %s697_s14, %s693_s29 }
  0x1d   : > { %377 = vmatpush.bf16.msra.mxu1 %v624_v8 }
  0x1e   : > { %456 = vmatpush.bf16.msra.mxu2 %v632_v12  ;;  %p695_p12 = pnand %p694_p11, %p819_p5  ;;  %p700_p2 = por %p699_p1, %p698_p0 }
  0x20   : > { %324 = vmatpush.bf16.msra.mxu0 %v619_v5  ;;  %p696_p13 = pneg %p695_p12 }
  0x21   : > { %378 = vmatpush.bf16.msra.mxu1 %v623_v9 }
  0x22   : > { %457 = vmatpush.bf16.msra.mxu2 %v631_v13  ;;  %p701_p3 = pnand %p700_p2, %p696_p13 }
  0x23   : > { %565 = vmatmul.msk.bf16.vlgmr.msra.gmra.mxu0 %vm313_vm0, %v276_v7 }
  0x26   : > { %458 = vmatpush.bf16.msra.mxu2 %v630_v14 }
  0x2a   : > { %459 = vmatpush.bf16.msra.mxu2 %v629_v15 }
  0x2e   : > { %460 = vmatpush.bf16.msra.mxu2 %v628_v22 }
  0x32   : > { %461 = vmatpush.bf16.msra.mxu2 %v627_v23 }
  0xa0   : > { %v326_v17 = vpop.f32.mrf.mxu0 }
  0xa1   : > { %v327_v18 = vadd.f32 %v674_v16, %v326_v17 }
  0xa3   : > { %v330_v19 = vmax.f32 %v327_v18, 0.0 }
  0xa5   : > { %v331_v20 = vpack.c.bf16 %v330_v19, %v330_v19 }
  0xa7   : > { %582 = vmatmul.msk.bf16.vlgmr.msra.gmra.mxu1 %vm313_vm0, %v331_v20 }
  0xa8   : > { %v328_v21 = vpop.f32.mrf.mxu0 }
 0x124   : > { %v380_v25 = vpop.f32.mrf.mxu1 }
 0x125   : > { %v381_v26 = vadd.f32 %v675_v24, %v380_v25 }
 0x127   : > { %v384_v27 = vmax.f32 %v381_v26, 0.0 }
 0x129   : > { %v385_v28 = vpack.c.bf16 %v384_v27, %v384_v27 }
 0x12b   : > { %462 = vmatmul.bf16.vlgmr.msra.gmra.mxu2 %v385_v28 }
 0x12c   : > { %v382_v29 = vpop.f32.mrf.mxu1 }
 0x1ae   : > { %v463_v31 = vpop.f32.mrf.mxu2 }
 0x1af   : > { %v464_v32 = vadd.f32 %v676_v30, %v463_v31 }
 0x1b1   : > { %467 = vst.msk [vmem:[%s269_s20] sm:$0xff] %vm313_vm0, %v464_v32 }
 0x1b2   : > { %704 = shalt.err (!%p701_p3)
}
 0x1b3   : > { %635 = dma.vmem_to_hbm [thread:$0]  (%p819_p5), %s482_s21, 128, %s484_s22, %s469_s28  }
 0x1b6   : > { %v465_v33 = vpop.f32.mrf.mxu2 }
 0x1b7 PF: > { %p641_p4 = scmp.ge.s32.totalorder %s739_s27, 2  ;;  %s495_s9 = sand.u32 1, %s727_s24  }
 0x1b8   : > { %s496_s17 = scalar_lea.sflag [#allocation3], %s495_s9 }
 0x1b9   : > { %p638_p7 = pnand %p641_p4, %p823_p6 }
 0x1bb   : > { %p639_p8 = pneg %p638_p7 }
 0x1bd   : > { %722 = dma.done.wait (%p639_p8), %s496_s17, 128  }
 0x1be   : > { %724 = vsyncadd (%p639_p8), %s496_s17, 4294967168  ;;  %p17_p9 = scmp.ge.s32.totalorder %s806_s30, 4   ;;  %s936_s24 = smov %s731_s25 }
 0x1bf   : > { %s937_s25 = smov %s735_s26  ;;  %s938_s26 = smov %s817_s10 }
 0x1c0   : > { %s939_s27 = smov %s806_s30  ;;  %19 = sbr.rel (!%p17_p9) target bundleno = 3 (0x3), region = 83 }
 0x1c5   :  { %502 = vsyncpa [#allocation3], 1 }
 0x1c6   :  { %504 = vsyncpa [#allocation3 + $0x1], 1 }

// kernel: spd_encoder_forward.13
= control target key start
LH: loop header
LB: loop body
LE: loop exit
PB: predicated region body
PF: predicated region fallthrough
CT: control target
= control target key end

     0   :  { %s4078_s0 = inlined_call_operand.vmem [shape: f32[16,8], index: 0, kind: input, shape index: {}]   ;;  %s4079_s1 = inlined_call_operand.vmem [shape: f32[16,64], index: 1, kind: input, shape index: {}]   ;;  %s4080_s2 = inlined_call_operand.vmem [shape: f32[16,1], index: 2, kind: input, shape index: {}]   ;;  %s4081_s3 = inlined_call_operand.vmem [shape: f32[16,1], index: 3, kind: input, shape index: {}]   ;;  %s4082_s4 = inlined_call_operand.vmem [shape: f32[8,8], index: 4, kind: input, shape index: {}]   ;;  %s4083_s5 = inlined_call_operand.vmem [shape: bf16[64,64], index: 5, kind: input, shape index: {}]   ;;  %s4084_s6 = inlined_call_operand.vmem [shape: f32[1,64], index: 6, kind: input, shape index: {}]   ;;  %s4085_s7 = inlined_call_operand.vmem [shape: bf16[64,64], index: 7, kind: input, shape index: {}]   ;;  %s4086_s8 = inlined_call_operand.hbm [shape: f32[1,64], index: 8, kind: input, shape index: {}]   ;;  %s4087_s9 = inlined_call_operand.vmem [shape: f32[1,64], index: 9, kind: input, shape index: {}]   ;;  %s4088_s10 = inlined_call_operand.vmem [shape: bf16[64,768], index: 10, kind: input, shape index: {}]   ;;  %s4089_s11 = inlined_call_operand.hbm [shape: bf16[64,384], index: 11, kind: input, shape index: {}]   ;;  %s4090_s12 = inlined_call_operand.hbm [shape: f32[1,384], index: 12, kind: input, shape index: {}]   ;;  %s4091_s13 = inlined_call_operand.vmem [shape: bf16[256,64], index: 13, kind: input, shape index: {}]   ;;  %s4092_s14 = inlined_call_operand.hbm [shape: f32[1,64], index: 14, kind: input, shape index: {}]   ;;  %s4093_s15 = inlined_call_operand.vmem [shape: f32[1,64], index: 15, kind: input, shape index: {}]   ;;  %s4094_s16 = inlined_call_operand.hbm [shape: bf16[64,128], index: 16, kind: input, shape index: {}]   ;;  %s4095_s17 = inlined_call_operand.hbm [shape: f32[1,128], index: 17, kind: input, shape index: {}]   ;;  %s4096_s18 = inlined_call_operand.vmem [shape: bf16[128,64], index: 18, kind: input, shape index: {}]   ;;  %s4097_s19 = inlined_call_operand.hbm [shape: f32[1,64], index: 19, kind: input, shape index: {}]   ;;  %s4098_s20 = inlined_call_operand.hbm [shape: f32[1,64], index: 20, kind: input, shape index: {}]   ;;  %s4099_s21 = inlined_call_operand.vmem [shape: f32[16,64], index: 21, kind: output, shape index: {}]  }
   0x1   :  { %4102 = sst [smem:[#allocation21_spill]] %s4078_s0 }
   0x2   :  { %4103 = sst [smem:[#allocation22_spill]] %s4079_s1 }
   0x3   :  { %4104 = sst [smem:[#allocation23_spill]] %s4080_s2 }
   0x4   :  { %4105 = sst [smem:[#allocation24_spill]] %s4081_s3 }
   0x5   :  { %4106 = sst [smem:[#allocation25_spill]] %s4082_s4 }
   0x6   :  { %4107 = sst [smem:[#allocation26_spill]] %s4083_s5 }
   0x7   :  { %4108 = sst [smem:[#allocation27_spill]] %s4089_s11 }
   0x8   :  { %4109 = sst [smem:[#allocation28_spill]] %s4092_s14 }
   0x9   :  { %4110 = sst [smem:[#allocation29_spill]] %s4095_s17 }
   0xa   :  { %4111 = sst [smem:[#allocation30_spill]] %s4099_s21 }
   0xb   :  { %26 = vsyncpa [#allocation3], 0 }
   0xc   :  { %27 = vsyncpa [#allocation5], 0 }
   0xd   :  { %28 = vsyncpa [#allocation8], 0 }
   0xe   :  { %29 = vsyncpa [#allocation11], 0 }
   0xf   :  { %30 = vsyncpa [#allocation14], 0  ;;  %s3418_s2 = smov 0  }
  0x10 LB: > { %4112 = sst [smem:[#allocation20_spill]] %s3292_s2  ;;  %s3427_s3 = sadd.s32 4294967295, %s3292_s2   ;;  %s3292_s2 = sphi %s3418_s2, %s36_s2  }
  0x11   : > { %s4113_s11 = sld [smem:[#allocation27_spill]]  ;;  %p2489_p0 = scmp.ge.s32.totalorder %s3292_s2, 1 }
  0x12   : > { %p528_p1 = scmp.lt.s32.totalorder %s3292_s2, 3  ;;  %p2970_p2 = scmp.eq.s32.totalorder %s3427_s3, 0 }
  0x13   : > { %s3294_s29 = smov [#allocation4]   ;;  %s4115_s14 = sld [smem:[#allocation28_spill]] }
  0x14   : > { %p3432_p3 = pnand %p2489_p0, %p528_p1  ;;  %s571_s0 = sshll.u32 %s3294_s29, 4  ;;  %s572_s0 = int_to_ptr.vmem [resolvable:$true] %s571_s0 }
  0x15   : > { %s3295_s23 = smov [#allocation7]   ;;  %s4117_s17 = sld [smem:[#allocation29_spill]] }
  0x16   : > { %p2945_p4 = pneg %p3432_p3  ;;  %s601_s1 = sshll.u32 %s3295_s23, 4  ;;  %s602_s1 = int_to_ptr.vmem [resolvable:$true] %s601_s1 }
  0x17   : > { %s569_s27 = sshll.u32 %s4113_s11, 4  ;;  %s3296_s29 = smov 192   ;;  %s570_s27 = int_to_ptr.hbm [resolvable:$true] %s569_s27 }
  0x18   : > { %p3443_p5 = pnand %p2970_p2, %p2945_p4  ;;  %s3297_s4 = smov 12  }
  0x19   : > { %s599_s5 = sshll.u32 %s4115_s14, 4  ;;  %s3298_s30 = smov [#allocation10]   ;;  %s600_s5 = int_to_ptr.hbm [resolvable:$true] %s599_s5 }
  0x1a   : > { %2951 = dma.hbm_to_vmem [thread:$0]  (!%p3443_p5), %s570_s27, 1536, %s572_s0, [#allocation5], %s3296_s29, %s3296_s29, %s3297_s4  }
  0x1b   : > { %s628_s26 = sshll.u32 %s4117_s17, 4  ;;  %s630_s11 = sshll.u32 %s3298_s30, 4  ;;  %s629_s26 = int_to_ptr.hbm [resolvable:$true] %s628_s26  ;;  %s631_s11 = int_to_ptr.vmem [resolvable:$true] %s630_s11 }
  0x1c   : > { %2957 = dma.hbm_to_vmem [thread:$0]  (!%p3443_p5), %s600_s5, 16, %s602_s1, [#allocation8]  }
  0x1d   : > { %s552_s23 = sshll.u32 %s4086_s8, 4  ;;  %s584_s17 = sshll.u32 %s4090_s12, 4  ;;  %s553_s23 = int_to_ptr.hbm [resolvable:$true] %s552_s23  ;;  %s585_s17 = int_to_ptr.hbm [resolvable:$true] %s584_s17 }
  0x1e   : > { %2963 = dma.hbm_to_vmem [thread:$0]  (!%p3443_p5), %s629_s26, 16, %s631_s11, [#allocation11]  }
  0x1f   : > { %s3299_s21 = smov [#allocation2]   ;;  %s3300_s0 = smov [#allocation6]  }
  0x20   : > { %s554_s27 = sshll.u32 %s3299_s21, 4  ;;  %s586_s5 = sshll.u32 %s3300_s0, 4  ;;  %s555_s27 = int_to_ptr.vmem [resolvable:$true] %s554_s27  ;;  %s587_s5 = int_to_ptr.vmem [resolvable:$true] %s586_s5 }
  0x21   : > { %2948 = dma.hbm_to_vmem [thread:$0]  (!%p3443_p5), %s553_s23, 16, %s555_s27, [#allocation3]  }
  0x22   : > { %s613_s1 = sshll.u32 %s4094_s16, 4  ;;  %s3301_s11 = smov [#allocation9]   ;;  %s614_s1 = int_to_ptr.hbm [resolvable:$true] %s613_s1 }
  0x23   : > { %2954 = dma.hbm_to_vmem [thread:$0]  (!%p3443_p5), %s585_s17, 48, %s587_s5, [#allocation5]  }
  0x24   : > { %s615_s26 = sshll.u32 %s3301_s11, 4  ;;  %s643_s4 = sshll.u32 %s4097_s19, 4  ;;  %s616_s26 = int_to_ptr.vmem [resolvable:$true] %s615_s26  ;;  %s644_s4 = int_to_ptr.hbm [resolvable:$true] %s643_s4 }
  0x25   : > { %s3302_s30 = smov 64   ;;  %s3303_s23 = smov 4  }
  0x26   : > { %2960 = dma.hbm_to_vmem [thread:$0]  (!%p3443_p5), %s614_s1, 512, %s616_s26, [#allocation8], %s3302_s30, %s3302_s30, %s3303_s23  }
  0x27   : > { %s3304_s24 = smov [#allocation12]   ;;  %s655_s14 = sshll.u32 %s4098_s20, 4  ;;  %s656_s14 = int_to_ptr.hbm [resolvable:$true] %s655_s14 }
  0x28   : > { %s645_s25 = sshll.u32 %s3304_s24, 4  ;;  %s3305_s17 = smov [#allocation13]   ;;  %s646_s25 = int_to_ptr.vmem [resolvable:$true] %s645_s25 }
  0x29   : > { %2966 = dma.hbm_to_vmem [thread:$0]  (!%p3443_p5), %s644_s4, 16, %s646_s25, [#allocation11]  }
  0x2a   : > { %s657_s5 = sshll.u32 %s3305_s17, 4  ;;  %698 = sbr.rel (%p3432_p3) target bundleno = 2305 (0x901), region = 104  ;;  %s658_s5 = int_to_ptr.vmem [resolvable:$true] %s657_s5 }
  0x2b   : > { %2969 = dma.hbm_to_vmem [thread:$0]  (!%p3443_p5), %s656_s14, 16, %s658_s5, [#allocation14]  }
  0x2f   : > { %3271 = dma.done.wait (%p2970_p2), [#allocation3], 16  }
  0x30   : > { %3273 = vsyncadd (%p2970_p2), [#allocation3], 4294967280 }
  0x31   : > { %3275 = dma.done.wait (%p2970_p2), [#allocation5], 1584  }
  0x32   : > { %3277 = vsyncadd (%p2970_p2), [#allocation5], 4294965712 }
  0x33   : > { %3279 = dma.done.wait (%p2970_p2), [#allocation8], 528  }
  0x34   : > { %3281 = vsyncadd (%p2970_p2), [#allocation8], 4294966768 }
  0x35   : > { %3283 = dma.done.wait (%p2970_p2), [#allocation11], 32  }
  0x36   : > { %3285 = vsyncadd (%p2970_p2), [#allocation11], 4294967264 }
  0x37   : > { %3287 = dma.done.wait (%p2970_p2), [#allocation14], 16  }
  0x38   : > { %3289 = vsyncadd (%p2970_p2), [#allocation14], 4294967280  ;;  %p804_p6 = scmp.lt.s32.totalorder %s3427_s3, 1  ;;  %v3306_v0 = vmov 0   ;;  %s4118_s1 = sld [smem:[#allocation23_spill]]  ;;  %vm894_vm0 = vcmask 523264  }
  0x39   : > { %3008 = vset.pattern.permute.xlu0 %v3306_v0  ;;  %v2867_v2 = vld [vmem:[%s4088_s10 + $0x94] sm:$0xf]  ;;  %v2624_v3 = vld [vmem:[%s4088_s10 + $0xa8] sm:$0xf0]  ;;  %v2861_v4 = vld [vmem:[%s4088_s10 + $0x64] sm:$0xf] }
  0x3a   : > { %s4127_s3 = smov (!%p804_p6, %s3427_s3), 1  ;;  %v2600_v5 = vld [vmem:[%s4088_s10 + $0x78] sm:$0xf0]  ;;  %v2627_v6 = vor.u32 %v2867_v2, %v2624_v3  ;;  %s4119_s0 = sld [smem:[#allocation24_spill]]  ;;  %v2855_v7 = vld [vmem:[%s4088_s10 + $0x34] sm:$0xf] }
  0x3b   : > { %s3505_s28 = sshll.u32 %s4127_s3, 3  ;;  %v2603_v8 = vor.u32 %v2861_v4, %v2600_v5  ;;  %v2576_v9 = vld [vmem:[%s4088_s10 + $0x48] sm:$0xf0]  ;;  %v2849_v12 = vld [vmem:[%s4088_s10 + $0x4] sm:$0xf]  ;;  %s4120_s29 = sld [smem:[#allocation22_spill]] }
  0x3c   : > { %1134 = vmatpush.bf16.msra.mxu0 %v2627_v6  ;;  %v2579_v11 = vor.u32 %v2855_v7, %v2576_v9  ;;  %v2552_v13 = vld [vmem:[%s4088_s10 + $0x18] sm:$0xf0]  ;;  %v2869_v15 = vld [vmem:[%s4088_s10 + $0xa4] sm:$0xf]  ;;  %v2863_v18 = vld [vmem:[%s4088_s10 + $0x74] sm:$0xf] }
  0x3d   : > { %v2555_v14 = vor.u32 %v2849_v12, %v2552_v13  ;;  %v2640_v16 = vld [vmem:[%s4088_s10 + $0xb8] sm:$0xf0]  ;;  %v2616_v19 = vld [vmem:[%s4088_s10 + $0x88] sm:$0xf0]  ;;  %v2857_v21 = vld [vmem:[%s4088_s10 + $0x44] sm:$0xf] }
  0x3e   : > { %s815_s11 = scalar_lea.vmem %s4118_s1, %s3505_s28  ;;  %v2643_v17 = vor.u32 %v2869_v15, %v2640_v16  ;;  %v2619_v20 = vor.u32 %v2863_v18, %v2616_v19  ;;  %v2592_v22 = vld [vmem:[%s4088_s10 + $0x58] sm:$0xf0]  ;;  %v2851_v24 = vld [vmem:[%s4088_s10 + $0x14] sm:$0xf]  ;;  %v2568_v25 = vld [vmem:[%s4088_s10 + $0x28] sm:$0xf0] }
  0x3f   : > { %v826_v1 = vld [vmem:[%s815_s11] sm:$0xff]  ;;  %v2595_v23 = vor.u32 %v2857_v21, %v2592_v22  ;;  %v2571_v26 = vor.u32 %v2851_v24, %v2568_v25  ;;  %s4121_s3 = sld [smem:[#allocation21_spill]]  ;;  %v2622_v29 = vld [vmem:[%s4088_s10 + $0x90] sm:$0xf]  ;;  %v2870_v30 = vld [vmem:[%s4088_s10 + $0xa4] sm:$0xf0] }
  0x40   : > { %829 = vperm.xlu0 %3008, %v826_v1   ;;  %s819_s14 = scalar_lea.vmem %s4119_s0, %s3505_s28  ;;  %1135 = vmatpush.bf16.msra.mxu0 %v2603_v8  ;;  %vm840_vm1 = vcmask 1043456   ;;  %v2623_v34 = vor.u32 %v2870_v30, %v2622_v29  ;;  %v2598_v35 = vld [vmem:[%s4088_s10 + $0x60] sm:$0xf]  ;;  %v2864_v36 = vld [vmem:[%s4088_s10 + $0x74] sm:$0xf0]  ;;  %vm836_vm2 = vcmask 64512  }
  0x41   : > { %v1212_v10 = vld [vmem:[%s819_s14] sm:$0xff]  ;;  %s3567_s4 = scalar_lea.vmem %s4120_s29, %s3505_s28  ;;  %v2599_v39 = vor.u32 %v2864_v36, %v2598_v35  ;;  %v2574_v40 = vld [vmem:[%s4088_s10 + $0x30] sm:$0xf]  ;;  %v2858_v41 = vld [vmem:[%s4088_s10 + $0x44] sm:$0xf0]  ;;  %s4122_s23 = sld [smem:[#allocation26_spill]] }
  0x42   : > { %v825_v27 = vld [vmem:[%s3567_s4] sm:$0xff]  ;;  %v2575_v43 = vor.u32 %v2858_v41, %v2574_v40  ;;  %v2852_v45 = vld [vmem:[%s4088_s10 + $0x14] sm:$0xf0]  ;;  %v2614_v50 = vld [vmem:[%s4088_s10 + $0x70] sm:$0xf]  ;;  %s4123_s22 = sld [smem:[#allocation25_spill]] }
  0x43   : > { %v2550_v44 = vld [vmem:[%s4088_s10] sm:$0xf]  ;;  %v2872_v47 = vld [vmem:[%s4088_s10 + $0xb4] sm:$0xf0]  ;;  %v2866_v51 = vld [vmem:[%s4088_s10 + $0x84] sm:$0xf0] }
  0x44   : > { %1136 = vmatpush.bf16.msra.mxu0 %v2579_v11  ;;  %v2638_v46 = vld [vmem:[%s4088_s10 + $0xa0] sm:$0xf]  ;;  %v2551_v48 = vor.u32 %v2852_v45, %v2550_v44  ;;  %v2615_v52 = vor.u32 %v2866_v51, %v2614_v50  ;;  %v2860_v54 = vld [vmem:[%s4088_s10 + $0x54] sm:$0xf0]  ;;  %v2566_v56 = vld [vmem:[%s4088_s10 + $0x10] sm:$0xf] }
  0x45   : > { %s807_s24 = scalar_lea.vmem %s4121_s3, %s3505_s28  ;;  %v2639_v49 = vor.u32 %v2872_v47, %v2638_v46  ;;  %v2590_v53 = vld [vmem:[%s4088_s10 + $0x40] sm:$0xf]  ;;  %v2854_v57 = vld [vmem:[%s4088_s10 + $0x24] sm:$0xf0]  ;;  %v2630_v62 = vld [vmem:[%s4088_s10 + $0x98] sm:$0xf] }
  0x46   : > { %v834_v32 = vld [vmem:[%s807_s24] sm:$0xff]  ;;  %v2591_v55 = vor.u32 %v2860_v54, %v2590_v53  ;;  %v2567_v58 = vor.u32 %v2854_v57, %v2566_v56  ;;  %v2871_v63 = vld [vmem:[%s4088_s10 + $0xac] sm:$0xf0]  ;;  %v2606_v4 = vld [vmem:[%s4088_s10 + $0x68] sm:$0xf]  ;;  %s3307_s3 = smov 64  }
  0x47   : > { %v835_v38 = vpack.c.bf16 %v834_v32, %v834_v32  ;;  %v2844_v42 = vld [vmem:[%s4122_s23 + $0x18] sm:$0xff]  ;;  %v2843_v59 = vld [vmem:[%s4122_s23 + $0x10] sm:$0xff]  ;;  %v2842_v60 = vld [vmem:[%s4122_s23 + $0x8] sm:$0xff]  ;;  %v2631_v1 = vor.u32 %v2871_v63, %v2630_v62  ;;  %s4124_s30 = sld [smem:[#allocation30_spill]] }
  0x48   : > { %1385 = vperm.xlu0 %3008, %v1212_v10   ;;  %1137 = vmatpush.bf16.msra.mxu0 %v2555_v14  ;;  %v2841_v61 = vld [vmem:[%s4122_s23] sm:$0xff]  ;;  %v2696_v0 = vld [vmem:[#allocation4 + $0x50] sm:$0xf]  ;;  %v2684_v6 = vld [vmem:[#allocation4 + $0x38] sm:$0xf] }
  0x49   : > { %902 = vmatpush.bf16.msra.mxu1 %v2844_v42  ;;  %v2884_v2 = vld [vmem:[#allocation4 + $0x58] sm:$0xf0]  ;;  %v2881_v8 = vld [vmem:[#allocation4 + $0x40] sm:$0xf0]  ;;  %v2582_v10 = vld [vmem:[%s4088_s10 + $0x38] sm:$0xf] }
  0x4a   : > { %v3653_v3 = vor.u32 %v2884_v2, %v2696_v0  ;;  %v2865_v5 = vld [vmem:[%s4088_s10 + $0x7c] sm:$0xf0]  ;;  %v3662_v9 = vor.u32 %v2881_v8, %v2684_v6  ;;  %v2859_v11 = vld [vmem:[%s4088_s10 + $0x4c] sm:$0xf0]  ;;  %v2558_v16 = vld [vmem:[%s4088_s10 + $0x8] sm:$0xf] }
  0x4b   : > { %v2607_v7 = vor.u32 %v2865_v5, %v2606_v4  ;;  %v2672_v12 = vld [vmem:[#allocation4 + $0x20] sm:$0xf]  ;;  %v2583_v13 = vor.u32 %v2859_v11, %v2582_v10  ;;  %v2878_v14 = vld [vmem:[#allocation4 + $0x28] sm:$0xf0]  ;;  %v2660_v18 = vld [vmem:[#allocation4 + $0x8] sm:$0xf] }
  0x4c   : > { %1186 = vmatpush.bf16.msrb.mxu0 %v2643_v17  ;;  %v3671_v15 = vor.u32 %v2878_v14, %v2672_v12  ;;  %v2853_v17 = vld [vmem:[%s4088_s10 + $0x1c] sm:$0xf0]  ;;  %v2688_v22 = vld [vmem:[#allocation4 + $0x48] sm:$0xf]  ;;  %v2664_v29 = vld [vmem:[#allocation4 + $0x18] sm:$0xf] }
  0x4d   : > { %903 = vmatpush.bf16.msra.mxu1 %v2843_v59  ;;  %v2559_v19 = vor.u32 %v2853_v17, %v2558_v16  ;;  %v2877_v30 = vld [vmem:[#allocation4 + $0x20] sm:$0xf0]  ;;  %v2874_v35 = vld [vmem:[#allocation4 + $0x8] sm:$0xf0]  ;;  %v2848_v41 = vld [vmem:[%s4085_s7 + $0x18] sm:$0xff]  ;;  %s823_s24 = scalar_lea.vmem %s4124_s30, %s3505_s28 }
  0x4e   : > { %956 = vmatpush.bf16.msra.mxu2 %v2848_v41  ;;  %v2847_v42 = vld [vmem:[%s4085_s7 + $0x10] sm:$0xff]  ;;  %v2846_v46 = vld [vmem:[%s4085_s7 + $0x8] sm:$0xff]  ;;  %v2868_v53 = vld [vmem:[%s4088_s10 + $0x9c] sm:$0xf] }
  0x4f   : > { %v2632_v54 = vld [vmem:[%s4088_s10 + $0xb0] sm:$0xf0]  ;;  %v2862_v56 = vld [vmem:[%s4088_s10 + $0x6c] sm:$0xf]  ;;  %v2608_v57 = vld [vmem:[%s4088_s10 + $0x80] sm:$0xf0] }
  0x50   : > { %1187 = vmatpush.bf16.msrb.mxu0 %v2619_v20  ;;  %v2875_v20 = vld [vmem:[#allocation4 + $0x10] sm:$0xf0]  ;;  %v2611_v59 = vor.u32 %v2862_v56, %v2608_v57  ;;  %v2856_v62 = vld [vmem:[%s4088_s10 + $0x3c] sm:$0xf]  ;;  %v2678_v2 = vld [vmem:[#allocation4 + $0x3c] sm:$0xf0] }
  0x51   : > { %904 = vmatpush.bf16.msra.mxu1 %v2842_v60  ;;  %v3680_v21 = vor.u32 %v2875_v20, %v2660_v18  ;;  %v2690_v60 = vld [vmem:[#allocation4 + $0x54] sm:$0xf0]  ;;  %v2584_v63 = vld [vmem:[%s4088_s10 + $0x50] sm:$0xf0]  ;;  %v2850_v5 = vld [vmem:[%s4088_s10 + $0xc] sm:$0xf] }
  0x52   : > { %957 = vmatpush.bf16.msra.mxu2 %v2847_v42  ;;  %v2879_v0 = vld [vmem:[#allocation4 + $0x34] sm:$0xf]  ;;  %v2560_v6 = vld [vmem:[%s4088_s10 + $0x20] sm:$0xf0]  ;;  %v2666_v8 = vld [vmem:[#allocation4 + $0x24] sm:$0xf0] }
  0x53   : > { %v3753_v4 = vor.u32 %v2879_v0, %v2678_v2  ;;  %v2563_v10 = vor.u32 %v2850_v5, %v2560_v6  ;;  %v2873_v12 = vld [vmem:[#allocation4 + $0x4] sm:$0xf]  ;;  %v3010_v16 = vld [vmem:[%s4084_s6] ss:$0 sm:$0xff] }
  0x54   : > { %1188 = vmatpush.bf16.msrb.mxu0 %v2595_v23  ;;  %v2883_v23 = vld [vmem:[#allocation4 + $0x50] sm:$0xf0] }
  0x55   : > { %905 = vmatpush.bf16.msra.mxu1 %v2841_v61  ;;  %v3683_v24 = vor.u32 %v2883_v23, %v2688_v22 }
  0x56   : > { %958 = vmatpush.bf16.msra.mxu2 %v2846_v46 }
  0x58   : > { %1189 = vmatpush.bf16.msrb.mxu0 %v2571_v26  ;;  %v2676_v26 = vld [vmem:[#allocation4 + $0x30] sm:$0xf] }
  0x59   : > { %1147 = vmatpush.bf16.msrb.mxu1 %v2631_v1  ;;  %v2587_v1 = vor.u32 %v2856_v62, %v2584_v63 }
  0x5d   : > { %1148 = vmatpush.bf16.msrb.mxu1 %v2607_v7  ;;  %v2876_v7 = vld [vmem:[#allocation4 + $0x1c] sm:$0xf] }
  0x5e   : > { %v3762_v11 = vor.u32 %v2876_v7, %v2666_v8 }
  0x61   : > { %1149 = vmatpush.bf16.msrb.mxu1 %v2583_v13  ;;  %v2654_v13 = vld [vmem:[#allocation4 + $0xc] sm:$0xf0] }
  0x62   : > { %v3765_v14 = vor.u32 %v2873_v12, %v2654_v13 }
  0x65   : > { %1150 = vmatpush.bf16.msrb.mxu1 %v2559_v19 }
  0xb2   : > { %v830_v28 = vpop.permute.xlu0 %829 }
  0xb3   : > { %v832_v31 = vmul.f32 %v830_v28, %v825_v27  ;;  %v2880_v27 = vld [vmem:[#allocation4 + $0x38] sm:$0xf0] }
  0xb4   : > { %v3686_v28 = vor.u32 %v2880_v27, %v2676_v26 }
  0xb5   : > { %v3580_v33 = vpack.c.bf16 %v832_v31, %v832_v31  ;;  %v3689_v31 = vor.u32 %v2877_v30, %v2664_v29 }
  0xb7   : > { %2645 = vmatmul.msk.bf16.vlgmr.msra.gmra.mxu0 %vm894_vm0, %v3580_v33  ;;  %v842_v37 = vsel %vm840_vm1, %v3580_v33, 0 }
  0xb8   : > { %851 = vmatpush.bf16.msra.mxu3 %v842_v37  ;;  %1342 = vmatpush.bf16.msra.mxu0 %v3683_v24 }
  0xba   : > { %v3809_v46 = vpop.permute.xlu0 %1385 }
  0xbb   : > { %2513 = vmatmul.msk.bf16.vlgmr.msra.gmra.mxu3 %vm836_vm2, %v835_v38 }
  0xbc   : > { %1121 = vmatpush.bf16.msrb.mxu3 %v2623_v34  ;;  %1343 = vmatpush.bf16.msra.mxu0 %v3686_v28  ;;  %v2652_v34 = vld [vmem:[#allocation4] sm:$0xf] }
  0xbd   : > { %v3692_v36 = vor.u32 %v2874_v35, %v2652_v34 }
  0xc0   : > { %1122 = vmatpush.bf16.msrb.mxu3 %v2599_v39  ;;  %1344 = vmatpush.bf16.msra.mxu0 %v3689_v31 }
  0xc4   : > { %1123 = vmatpush.bf16.msrb.mxu3 %v2575_v43  ;;  %1345 = vmatpush.bf16.msra.mxu0 %v3692_v36 }
  0xc7   : > { %2649 = vmatmul.msk.bf16.vlgmr.msrb.gmra.mxu0 %vm894_vm0, %v3580_v33 }
  0xc8   : > { %1124 = vmatpush.bf16.msrb.mxu3 %v2551_v48 }
  0xcb   : > { %2644 = vmatmul.msk.bf16.vlgmr.msrb.gmra.mxu3 %vm894_vm0, %v3580_v33 }
  0xcc   : > { %1173 = vmatpush.bf16.msra.mxu3 %v2639_v49 }
  0xd0   : > { %1174 = vmatpush.bf16.msra.mxu3 %v2615_v52  ;;  %v2845_v52 = vld [vmem:[%s4085_s7] sm:$0xff] }
  0xd1   : > { %959 = vmatpush.bf16.msra.mxu2 %v2845_v52 }
  0xd4   : > { %1175 = vmatpush.bf16.msra.mxu3 %v2591_v55  ;;  %v2635_v55 = vor.u32 %v2868_v53, %v2632_v54 }
  0xd6   : > { %1160 = vmatpush.bf16.msrb.mxu2 %v2635_v55 }
  0xd8   : > { %1176 = vmatpush.bf16.msra.mxu3 %v2567_v58  ;;  %v2882_v58 = vld [vmem:[#allocation4 + $0x4c] sm:$0xf] }
  0xd9   : > { %v3744_v61 = vor.u32 %v2882_v58, %v2690_v60 }
  0xda   : > { %1161 = vmatpush.bf16.msrb.mxu2 %v2611_v59 }
  0xdb   : > { %2648 = vmatmul.msk.bf16.vlgmr.msra.gmra.mxu3 %vm894_vm0, %v3580_v33 }
  0xdc   : > { %1312 = vmatpush.bf16.msrb.mxu3 %v3653_v3 }
  0xde   : > { %1162 = vmatpush.bf16.msrb.mxu2 %v2587_v1 }
  0xe0   : > { %1313 = vmatpush.bf16.msrb.mxu3 %v3662_v9 }
  0xe2   : > { %1163 = vmatpush.bf16.msrb.mxu2 %v2563_v10 }
  0xe4   : > { %1314 = vmatpush.bf16.msrb.mxu3 %v3671_v15 }
  0xe8   : > { %1315 = vmatpush.bf16.msrb.mxu3 %v3680_v21 }
 0x134   : > { %v1139_v25 = vpop.f32.mrf.mxu0 }
 0x135   : > { %v3725_v51 = vpack.c.bf16 %v1139_v25, %v1139_v25 }
 0x13c   : > { %v1141_v32 = vpop.f32.mrf.mxu0 }
 0x13e   : > { %v853_v37 = vpop.f32.mrf.mxu3 }
 0x13f   : > { %v857_v38 = vpack.c.bf16 %v853_v37, %v853_v37  ;;  %v1211_v37 = vld [vmem:[#allocation6] sm:$0x7] }
 0x140   : > { %v3836_v7 = vperm.slane %v1211_v37, 2 }
 0x141   : > { %2530 = vmatmul.msk.bf16.vlgmr.msra.gmra.mxu1 %vm894_vm0, %v857_v38 }
 0x142   : > { %1286 = vmatpush.bf16.msra.mxu1 %v3683_v24 }
 0x144   : > { %v3697_v39 = vpop.f32.mrf.mxu0 }
 0x145   : > { %v3786_v29 = vpack.c.bf16 %v3697_v39, %v3697_v39  ;;  %v3804_v39 = vperm.slane %v1211_v37, 1 }
 0x146   : > { %v855_v40 = vpop.f32.mrf.mxu3  ;;  %1287 = vmatpush.bf16.msra.mxu1 %v3686_v28 }
 0x147   : > { %v3806_v40 = vperm.slane %v1211_v37, 0 }
 0x14a   : > { %1288 = vmatpush.bf16.msra.mxu1 %v3689_v31 }
 0x14c   : > { %v1193_v43 = vpop.f32.mrf.mxu0 }
 0x14e   : > { %v1126_v44 = vpop.f32.mrf.mxu3  ;;  %1289 = vmatpush.bf16.msra.mxu1 %v3692_v36 }
 0x14f   : > { %v3708_v45 = vpack.c.bf16 %v1126_v44, %v1126_v44 }
 0x151   : > { %2646 = vmatmul.msk.bf16.vlgmr.msrb.gmra.mxu1 %vm894_vm0, %v3580_v33  ;;  %1465 = vrot.lane.b32.xlu1 %v3708_v45, %s3307_s3 }
 0x152   : > { %2700 = vmatmul.msk.bf16.vlgmr.msrb.gmra.mxu3 %vm894_vm0, %v3708_v45  ;;  %1355 = vmatpush.bf16.msrb.mxu1 %v3744_v61 }
 0x156   : > { %v1128_v47 = vpop.f32.mrf.mxu3  ;;  %1356 = vmatpush.bf16.msrb.mxu1 %v3753_v4 }
 0x15a   : > { %1357 = vmatpush.bf16.msrb.mxu1 %v3762_v11 }
 0x15e   : > { %v1178_v48 = vpop.f32.mrf.mxu3  ;;  %1358 = vmatpush.bf16.msrb.mxu1 %v3765_v14 }
 0x15f   : > { %v3719_v49 = vpack.c.bf16 %v1178_v48, %v1178_v48 }
 0x161   : > { %2698 = vmatmul.msk.bf16.vlgmr.msra.gmra.mxu1 %vm894_vm0, %v3708_v45  ;;  %1621 = vrot.lane.b32.xlu2 %v3719_v49, %s3307_s3 }
 0x166   : > { %v1180_v50 = vpop.f32.mrf.mxu3 }
 0x169   : > { %1819 = vrot.lane.b32.xlu2 %v3725_v51, %s3307_s3 }
 0x1bb   : > { %v1622_v12 = vpop.permute.xlu2 %1621 }
 0x1be   : > { %v907_v17 = vpop.f32.mrf.mxu1 }
 0x1bf   : > { %v908_v18 = vadd.f32 %v3010_v16, %v907_v17 }
 0x1c1   : > { %v911_v19 = vmax.f32 %v908_v18, 0.0  ;;  %v1627_v18 = vsel %vm840_vm1, %v1622_v12, 0  ;;  %v1801_v12 = vsel %vm840_vm1, %v3786_v29, 0 }
 0x1c3   : > { %v912_v20 = vpack.c.bf16 %v911_v19, %v911_v19  ;;  %v1466_v1 = vpop.permute.xlu1 %1465 }
 0x1c5   : > { %2547 = vmatmul.msk.bf16.vlgmr.msra.gmra.mxu2 %vm894_vm0, %v912_v20 }
 0x1c6   : > { %v909_v22 = vpop.f32.mrf.mxu1  ;;  %1299 = vmatpush.bf16.msra.mxu2 %v3744_v61 }
 0x1ca   : > { %1300 = vmatpush.bf16.msra.mxu2 %v3753_v4 }
 0x1ce   : > { %v1152_v23 = vpop.f32.mrf.mxu1  ;;  %1301 = vmatpush.bf16.msra.mxu2 %v3762_v11 }
 0x1cf   : > { %v1334_v25 = vpack.c.bf16 %v1152_v23, %v1152_v23 }
 0x1d1   : > { %2701 = vmatmul.msk.bf16.vlgmr.msra.gmra.mxu0 %vm894_vm0, %v1334_v25  ;;  %1516 = vrot.lane.b32.xlu1 %v1334_v25, %s3307_s3 }
 0x1d2   : > { %2702 = vmatmul.msk.bf16.vlgmr.msrb.gmra.mxu1 %vm894_vm0, %v1334_v25  ;;  %1302 = vmatpush.bf16.msra.mxu2 %v3765_v14 }
 0x1d5   : > { %v3779_v26 = vpop.f32.mrf.mxu3  ;;  %2647 = vmatmul.msk.bf16.vlgmr.msrb.gmra.mxu2 %vm894_vm0, %v3580_v33  ;;  %v1447_v33 = vsel %vm840_vm1, %v3719_v49, 0 }
 0x1d6   : > { %v1154_v27 = vpop.f32.mrf.mxu1  ;;  %1368 = vmatpush.bf16.msrb.mxu2 %v3653_v3  ;;  %v1323_v17 = vmax.f32 %v3779_v26, 0.0 }
 0x1d8   : > { %v1333_v22 = vadd.f32 %v3836_v7, %v1323_v17 }
 0x1d9   : > { %1975 = vrot.lane.b32.xlu1 %v3786_v29, %s3307_s3 }
 0x1da   : > { %1369 = vmatpush.bf16.msrb.mxu2 %v3662_v9  ;;  %v1393_v23 = vpack.c.bf16 %v1333_v22, %v1333_v22 }
 0x1dd   : > { %v1319_v30 = vpop.f32.mrf.mxu3 }
 0x1de   : > { %v1291_v32 = vpop.f32.mrf.mxu1  ;;  %1370 = vmatpush.bf16.msrb.mxu2 %v3671_v15 }
 0x1df   : > { %v1321_v49 = vmax.f32 %v1291_v32, 0.0 }
 0x1e1   : > { %v1331_v56 = vadd.f32 %v3806_v40, %v1321_v49 }
 0x1e2   : > { %1371 = vmatpush.bf16.msrb.mxu2 %v3680_v21 }
 0x1e3   : > { %v1391_v59 = vpack.c.bf16 %v1331_v56, %v1331_v56 }
 0x1e5   : > { %2699 = vmatmul.msk.bf16.vlgmr.msra.gmra.mxu2 %vm894_vm0, %v3708_v45 }
 0x1e6   : > { %1456 = vmatpush.bf16.msra.mxu2 %v1447_v33  ;;  %v1293_v34 = vpop.f32.mrf.mxu1 }
 0x1f5   : > { %2703 = vmatmul.msk.bf16.vlgmr.msrb.gmra.mxu2 %vm894_vm0, %v1334_v25 }
 0x1f6   : > { %1525 = vmatpush.bf16.msrb.mxu2 %v3683_v24 }
 0x1fa   : > { %1526 = vmatpush.bf16.msrb.mxu2 %v3686_v28 }
 0x1fe   : > { %1527 = vmatpush.bf16.msrb.mxu2 %v3689_v31 }
 0x202   : > { %1528 = vmatpush.bf16.msrb.mxu2 %v3692_v36 }
 0x243   : > { %v1517_v13 = vpop.permute.xlu1 %1516 }
 0x248   : > { %v3802_v35 = vpop.f32.mrf.mxu2 }
 0x24e   : > { %v1347_v38 = vpop.f32.mrf.mxu0 }
 0x24f   : > { %v1377_v41 = vmax.f32 %v1347_v38, 0.0  ;;  %v1360_v42 = vpop.f32.mrf.mxu1 }
 0x250   : > { %v1378_v43 = vmax.f32 %v1360_v42, 0.0  ;;  %v963_v44 = vpop.f32.mrf.mxu2 }
 0x251   : > { %v1380_v45 = vadd.f32 %v1377_v41, %v3806_v40  ;;  %v3862_v44 = vld [vmem:[%s4123_s22] sm:$0xff] }
 0x252   : > { %v1381_v47 = vadd.f32 %v1378_v43, %v3804_v39 }
 0x253   : > { %v1388_v48 = vmul.f32 %v3809_v46, %v1380_v45 }
 0x254   : > { %v1389_v50 = vmul.f32 %v3809_v46, %v1381_v47 }
 0x255   : > { %v1394_v52 = vpack.c.bf16 %v1388_v48, %v1388_v48 }
 0x256   : > { %v1395_v53 = vpack.c.bf16 %v1389_v50, %v1389_v50  ;;  %v1349_v54 = vpop.f32.mrf.mxu0 }
 0x257   : > { %v1362_v55 = vpop.f32.mrf.mxu1  ;;  %1404 = vmatpush.bf16.xpose.msra.mxu3 %v1394_v52 }
 0x258   : > { %1417 = vmatpush.bf16.xpose.msrb.mxu0 %v1395_v53  ;;  %v1165_v57 = vpop.f32.mrf.mxu2 }
 0x259   : > { %v3816_v58 = vpack.c.bf16 %v1165_v57, %v1165_v57 }
 0x25b   : > { %1870 = vrot.lane.b32.xlu0 %v3816_v58, %s3307_s3 }
 0x25e   : > { %1405 = vmatmul.bf16.vlgmr.msra.gmra.mxu3 %v1391_v59 }
 0x25f   : > { %1474 = vmatpush.bf16.msrb.mxu3 %v3683_v24 }
 0x260   : > { %1487 = vmatpush.bf16.msra.mxu0 %v3744_v61  ;;  %v1167_v60 = vpop.f32.mrf.mxu2 }
 0x263   : > { %1475 = vmatpush.bf16.msrb.mxu3 %v3686_v28 }
 0x264   : > { %1488 = vmatpush.bf16.msra.mxu0 %v3753_v4 }
 0x267   : > { %1476 = vmatpush.bf16.msrb.mxu3 %v3689_v31 }
 0x268   : > { %1489 = vmatpush.bf16.msra.mxu0 %v3762_v11  ;;  %v1304_v62 = vpop.f32.mrf.mxu2 }
 0x269   : > { %v1322_v63 = vmax.f32 %v1304_v62, 0.0 }
 0x26b   : > { %1477 = vmatpush.bf16.msrb.mxu3 %v3692_v36  ;;  %v1332_v0 = vadd.f32 %v3804_v39, %v1322_v63 }
 0x26c   : > { %1490 = vmatpush.bf16.msra.mxu0 %v3765_v14 }
 0x26d   : > { %v1392_v2 = vpack.c.bf16 %v1332_v0, %v1332_v0 }
 0x26e   : > { %2705 = vmatmul.msk.bf16.vlgmr.msrb.gmra.mxu3 %vm894_vm0, %v1466_v1 }
 0x26f   : > { %1538 = vmatpush.bf16.msra.mxu3 %v3744_v61  ;;  %1418 = vmatmul.bf16.vlgmr.msrb.gmra.mxu0 %v1392_v2 }
 0x270   : > { %v1306_v5 = vpop.f32.mrf.mxu2  ;;  %1551 = vmatpush.bf16.msrb.mxu0 %v3653_v3 }
 0x273   : > { %1539 = vmatpush.bf16.msra.mxu3 %v3753_v4 }
 0x274   : > { %1552 = vmatpush.bf16.msrb.mxu0 %v3662_v9 }
 0x277   : > { %1540 = vmatpush.bf16.msra.mxu3 %v3762_v11 }
 0x278   : > { %v1373_v6 = vpop.f32.mrf.mxu2  ;;  %1553 = vmatpush.bf16.msrb.mxu0 %v3671_v15 }
 0x279   : > { %v1379_v8 = vmax.f32 %v1373_v6, 0.0 }
 0x27b   : > { %1541 = vmatpush.bf16.msra.mxu3 %v3765_v14  ;;  %v1382_v10 = vadd.f32 %v1379_v8, %v3836_v7 }
 0x27c   : > { %1554 = vmatpush.bf16.msrb.mxu0 %v3680_v21 }
 0x27d   : > { %v1390_v16 = vmul.f32 %v3809_v46, %v1382_v10 }
 0x27e   : > { %2709 = vmatmul.msk.bf16.vlgmr.msra.gmra.mxu3 %vm894_vm0, %v1517_v13 }
 0x27f   : > { %v1396_v19 = vpack.c.bf16 %v1390_v16, %v1390_v16  ;;  %2706 = vmatmul.msk.bf16.vlgmr.msra.gmra.mxu0 %vm894_vm0, %v1466_v1 }
 0x280   : > { %1636 = vmatpush.bf16.msra.mxu0 %v1627_v18  ;;  %v1375_v20 = vpop.f32.mrf.mxu2 }
 0x281   : > { %1430 = vmatpush.bf16.xpose.msra.mxu1 %v1396_v19 }
 0x288   : > { %1431 = vmatmul.bf16.vlgmr.msra.gmra.mxu1 %v1393_v23 }
 0x289   : > { %1500 = vmatpush.bf16.msrb.mxu1 %v3653_v3 }
 0x28d   : > { %1501 = vmatpush.bf16.msrb.mxu1 %v3662_v9 }
 0x28f   : > { %2710 = vmatmul.msk.bf16.vlgmr.msrb.gmra.mxu0 %vm894_vm0, %v1517_v13 }
 0x290   : > { %1701 = vmatpush.bf16.msrb.mxu0 %v3683_v24 }
 0x291   : > { %1502 = vmatpush.bf16.msrb.mxu1 %v3671_v15 }
 0x294   : > { %1702 = vmatpush.bf16.msrb.mxu0 %v3686_v28 }
 0x295   : > { %1503 = vmatpush.bf16.msrb.mxu1 %v3680_v21 }
 0x298   : > { %2707 = vmatmul.msk.bf16.vlgmr.msrb.gmra.mxu1 %vm894_vm0, %v1466_v1  ;;  %1703 = vmatpush.bf16.msrb.mxu0 %v3689_v31 }
 0x29c   : > { %1704 = vmatpush.bf16.msrb.mxu0 %v3692_v36 }
 0x2e1   : > { %v1406_v25 = vpop.f32.mrf.mxu3 }
 0x2e9   : > { %v1408_v26 = vpop.f32.mrf.mxu3 }
 0x2ec   : > { %v1419_v27 = vpop.f32.mrf.mxu0 }
 0x2ed   : > { %v1420_v41 = vadd.f32 %v1419_v27, %v1406_v25 }
 0x2f1   : > { %v3856_v30 = vpop.f32.mrf.mxu3 }
 0x2f2   : > { %v1509_v22 = vmax.f32 %v3856_v30, 0.0 }
 0x2f4   : > { %v1421_v32 = vpop.f32.mrf.mxu0  ;;  %v1512_v27 = vadd.f32 %v1509_v22, %v3806_v40 }
 0x2f6   : > { %v1569_v32 = vpack.c.bf16 %v1512_v27, %v1512_v27 }
 0x2f9   : > { %v1481_v33 = vpop.f32.mrf.mxu3 }
 0x2fc   : > { %v1492_v34 = vpop.f32.mrf.mxu0 }
 0x2fd   : > { %v1510_v6 = vmax.f32 %v1492_v34, 0.0 }
 0x2ff   : > { %v1513_v8 = vadd.f32 %v1510_v6, %v3804_v39 }
 0x301   : > { %v1543_v37 = vpop.f32.mrf.mxu3  ;;  %v1570_v10 = vpack.c.bf16 %v1513_v8, %v1513_v8 }
 0x302   : > { %v1561_v38 = vmax.f32 %v1543_v37, 0.0 }
 0x304   : > { %v1564_v42 = vadd.f32 %v1561_v38, %v3804_v39  ;;  %v1494_v43 = vpop.f32.mrf.mxu0 }
 0x305   : > { %v1432_v45 = vpop.f32.mrf.mxu1 }
 0x306   : > { %v1433_v47 = vadd.f32 %v1432_v45, %v1420_v41  ;;  %v1567_v48 = vmul.f32 %v1564_v42, %v3809_v46 }
 0x308   : > { %v3866_v49 = vmul.f32 %v1433_v47, %v3862_v44  ;;  %v1573_v53 = vpack.c.bf16 %v1567_v48, %v1567_v48 }
 0x309   : > { %v1545_v50 = vpop.f32.mrf.mxu3 }
 0x30a   : > { %v1441_v52 = vpack.c.bf16 %v3866_v49, %v3866_v49 }
 0x30c   : > { %2704 = vmatmul.msk.bf16.vlgmr.msra.gmra.mxu2 %vm836_vm2, %v1441_v52  ;;  %v1556_v54 = vpop.f32.mrf.mxu0 }
 0x30d   : > { %v1562_v55 = vmax.f32 %v1556_v54, 0.0  ;;  %1595 = vmatpush.bf16.xpose.msra.mxu2 %v1573_v53  ;;  %v1434_v56 = vpop.f32.mrf.mxu1  ;;  %v3925_v54 = vpop.permute.xlu2 %1819 }
 0x30f   : > { %v1565_v57 = vadd.f32 %v1562_v55, %v3836_v7 }
 0x311   : > { %v1568_v59 = vmul.f32 %v1565_v57, %v3809_v46 }
 0x313   : > { %v1574_v60 = vpack.c.bf16 %v1568_v59, %v1568_v59 }
 0x314   : > { %v1558_v62 = vpop.f32.mrf.mxu0 }
 0x315   : > { %v1505_v63 = vpop.f32.mrf.mxu1  ;;  %1608 = vmatpush.bf16.xpose.msrb.mxu3 %v1574_v60 }
 0x316   : > { %v1511_v0 = vmax.f32 %v1505_v63, 0.0 }
 0x318   : > { %v1514_v1 = vadd.f32 %v1511_v0, %v3836_v7 }
 0x31a   : > { %v1571_v2 = vpack.c.bf16 %v1514_v1, %v1514_v1 }
 0x31c   : > { %2708 = vmatmul.msk.bf16.vlgmr.msrb.gmra.mxu2 %vm894_vm0, %v1517_v13  ;;  %1609 = vmatmul.bf16.vlgmr.msrb.gmra.mxu3 %v1571_v2 }
 0x31d   : > { %1678 = vmatpush.bf16.msra.mxu3 %v3653_v3  ;;  %v1507_v5 = vpop.f32.mrf.mxu1  ;;  %1665 = vmatpush.bf16.msrb.mxu2 %v3744_v61 }
 0x321   : > { %1679 = vmatpush.bf16.msra.mxu3 %v3662_v9  ;;  %1666 = vmatpush.bf16.msrb.mxu2 %v3753_v4 }
 0x325   : > { %1680 = vmatpush.bf16.msra.mxu3 %v3671_v15  ;;  %1667 = vmatpush.bf16.msrb.mxu2 %v3762_v11 }
 0x329   : > { %1681 = vmatpush.bf16.msra.mxu3 %v3680_v21  ;;  %1668 = vmatpush.bf16.msrb.mxu2 %v3765_v14 }
 0x32c   : > { %1596 = vmatmul.bf16.vlgmr.msra.gmra.mxu2 %v1570_v10  ;;  %2714 = vmatmul.msk.bf16.vlgmr.msra.gmra.mxu3 %vm894_vm0, %v3725_v51 }
 0x32d   : > { %1727 = vmatpush.bf16.msra.mxu2 %v3653_v3 }
 0x331   : > { %1728 = vmatpush.bf16.msra.mxu2 %v3662_v9 }
 0x335   : > { %1729 = vmatpush.bf16.msra.mxu2 %v3671_v15 }
 0x339   : > { %1730 = vmatpush.bf16.msra.mxu2 %v3680_v21 }
 0x33c   : > { %2713 = vmatmul.msk.bf16.vlgmr.msrb.gmra.mxu2 %vm894_vm0, %v3725_v51 }
 0x33d   : > { %1810 = vmatpush.bf16.msrb.mxu2 %v1801_v12 }
 0x34c   : > { %2717 = vmatmul.msk.bf16.vlgmr.msra.gmra.mxu2 %vm894_vm0, %v3816_v58 }
 0x34d   : > { %1879 = vmatpush.bf16.msra.mxu2 %v3683_v24 }
 0x351   : > { %1880 = vmatpush.bf16.msra.mxu2 %v3686_v28 }
 0x355   : > { %1881 = vmatpush.bf16.msra.mxu2 %v3689_v31 }
 0x359   : > { %1882 = vmatpush.bf16.msra.mxu2 %v3692_v36 }
 0x38f   : > { %v3900_v13 = vpop.f32.mrf.mxu2 }
 0x397   : > { %v1460_v16 = vpop.f32.mrf.mxu2 }
 0x39f   : > { %v1530_v17 = vpop.f32.mrf.mxu2  ;;  %v1610_v29 = vpop.f32.mrf.mxu3 }
 0x3a0   : > { %v1560_v18 = vmax.f32 %v1530_v17, 0.0 }
 0x3a2   : > { %v1563_v19 = vadd.f32 %v1560_v18, %v3806_v40 }
 0x3a4   : > { %v1566_v20 = vmul.f32 %v1563_v19, %v3809_v46  ;;  %v1976_v19 = vpop.permute.xlu1 %1975 }
 0x3a5   : > { %v1981_v22 = vsel %vm840_vm1, %v1976_v19, 0 }
 0x3a6   : > { %v1572_v23 = vpack.c.bf16 %v1566_v20, %v1566_v20 }
 0x3a7   : > { %v1532_v25 = vpop.f32.mrf.mxu2  ;;  %v1612_v26 = vpop.f32.mrf.mxu3 }
 0x3a8   : > { %1582 = vmatpush.bf16.xpose.msra.mxu1 %v1572_v23  ;;  %v1871_v25 = vpop.permute.xlu0 %1870 }
 0x3af   : > { %1583 = vmatmul.bf16.vlgmr.msra.gmra.mxu1 %v1569_v32  ;;  %v1597_v33 = vpop.f32.mrf.mxu2  ;;  %v1683_v34 = vpop.f32.mrf.mxu3 }
 0x3b0   : > { %1652 = vmatpush.bf16.msrb.mxu1 %v3683_v24  ;;  %v1689_v48 = vmax.f32 %v1683_v34, 0.0 }
 0x3b2   : > { %v1692_v53 = vadd.f32 %v1689_v48, %v3836_v7 }
 0x3b4   : > { %1653 = vmatpush.bf16.msrb.mxu1 %v3686_v28 }
 0x3b7   : > { %v1599_v30 = vpop.f32.mrf.mxu2  ;;  %v1685_v37 = vpop.f32.mrf.mxu3 }
 0x3b8   : > { %1654 = vmatpush.bf16.msrb.mxu1 %v3689_v31 }
 0x3bc   : > { %1655 = vmatpush.bf16.msrb.mxu1 %v3692_v36 }
 0x3bf   : > { %2712 = vmatmul.msk.bf16.vlgmr.msrb.gmra.mxu1 %vm894_vm0, %v3725_v51  ;;  %v1670_v38 = vpop.f32.mrf.mxu2  ;;  %v1747_v51 = vpack.c.bf16 %v1692_v53, %v1692_v53 }
 0x3c0   : > { %1714 = vmatpush.bf16.msra.mxu1 %v3744_v61  ;;  %v1688_v10 = vmax.f32 %v1670_v38, 0.0 }
 0x3c2   : > { %v1691_v17 = vadd.f32 %v1688_v10, %v3804_v39 }
 0x3c4   : > { %1715 = vmatpush.bf16.msra.mxu1 %v3753_v4 }
 0x3c7   : > { %v1672_v41 = vpop.f32.mrf.mxu2 }
 0x3c8   : > { %1716 = vmatpush.bf16.msra.mxu1 %v3762_v11 }
 0x3cc   : > { %1717 = vmatpush.bf16.msra.mxu1 %v3765_v14 }
 0x3cf   : > { %2716 = vmatmul.msk.bf16.vlgmr.msra.gmra.mxu1 %vm894_vm0, %v3816_v58  ;;  %v1732_v42 = vpop.f32.mrf.mxu2 }
 0x3d0   : > { %v1738_v43 = vmax.f32 %v1732_v42, 0.0 }
 0x3d2   : > { %v1741_v45 = vadd.f32 %v1738_v43, %v3836_v7 }
 0x3d4   : > { %v1744_v47 = vmul.f32 %v1741_v45, %v3809_v46 }
 0x3d6   : > { %v1750_v50 = vpack.c.bf16 %v1744_v47, %v1744_v47 }
 0x3d7   : > { %v1734_v52 = vpop.f32.mrf.mxu2 }
 0x3d8   : > { %1784 = vmatpush.bf16.xpose.msrb.mxu1 %v1750_v50 }
 0x3df   : > { %1785 = vmatmul.bf16.vlgmr.msrb.gmra.mxu1 %v1747_v51 }
 0x3e0   : > { %1854 = vmatpush.bf16.msra.mxu1 %v3653_v3 }
 0x3e4   : > { %1855 = vmatpush.bf16.msra.mxu1 %v3662_v9 }
 0x3e8   : > { %1856 = vmatpush.bf16.msra.mxu1 %v3671_v15 }
 0x3ec   : > { %1857 = vmatpush.bf16.msra.mxu1 %v3680_v21 }
 0x3ef   : > { %2721 = vmatmul.msk.bf16.vlgmr.msra.gmra.mxu1 %vm894_vm0, %v3925_v54 }
 0x42c   : > { %v1584_v55 = vpop.f32.mrf.mxu1 }
 0x42d   : > { %v1598_v56 = vadd.f32 %v1597_v33, %v1584_v55 }
 0x42f   : > { %v1611_v57 = vadd.f32 %v1610_v29, %v1598_v56  ;;  %v1746_v29 = vpack.c.bf16 %v1691_v17, %v1691_v17 }
 0x431   : > { %v1614_v59 = vmul.f32 %v1611_v57, %v3862_v44 }
 0x433   : > { %v1615_v60 = vsel %vm836_vm2, %v1614_v59, 0.0  ;;  %v1619_v62 = vpack.c.bf16 %v1614_v59, %v1614_v59 }
 0x434   : > { %v1586_v63 = vpop.f32.mrf.mxu1  ;;  %1616 = vadd.xlane.f32.xlu0 %v1615_v60 }
 0x435   : > { %2711 = vmatmul.msk.bf16.vlgmr.msra.gmra.mxu0 %vm836_vm2, %v1619_v62 }
 0x43c   : > { %v1657_v0 = vpop.f32.mrf.mxu1 }
 0x43d   : > { %v1687_v37 = vmax.f32 %v1657_v0, 0.0 }
 0x43f   : > { %v1690_v42 = vadd.f32 %v1687_v37, %v3806_v40 }
 0x441   : > { %v1745_v43 = vpack.c.bf16 %v1690_v42, %v1690_v42  ;;  %v2887_v42 = vld [vmem:[%s4091_s13 + $0x10] sm:$0xff] }
 0x444   : > { %v1659_v1 = vpop.f32.mrf.mxu1 }
 0x445   : > { %2715 = vmatmul.msk.bf16.vlgmr.msrb.gmra.mxu0 %vm894_vm0, %v3816_v58 }
 0x44c   : > { %v1719_v2 = vpop.f32.mrf.mxu1 }
 0x44d   : > { %v1737_v5 = vmax.f32 %v1719_v2, 0.0 }
 0x44f   : > { %v1740_v6 = vadd.f32 %v1737_v5, %v3804_v39 }
 0x451   : > { %v1743_v8 = vmul.f32 %v1740_v6, %v3809_v46 }
 0x453   : > { %v1749_v12 = vpack.c.bf16 %v1743_v8, %v1743_v8 }
 0x454   : > { %v1721_v16 = vpop.f32.mrf.mxu1 }
 0x455   : > { %1771 = vmatpush.bf16.xpose.msra.mxu0 %v1749_v12 }
 0x45c   : > { %1772 = vmatmul.bf16.vlgmr.msra.gmra.mxu0 %v1746_v29  ;;  %v1786_v18 = vpop.f32.mrf.mxu1 }
 0x45d   : > { %1841 = vmatpush.bf16.msrb.mxu0 %v3744_v61 }
 0x461   : > { %1842 = vmatpush.bf16.msrb.mxu0 %v3753_v4 }
 0x464   : > { %v1788_v58 = vpop.f32.mrf.mxu1 }
 0x465   : > { %1843 = vmatpush.bf16.msrb.mxu0 %v3762_v11 }
 0x469   : > { %1844 = vmatpush.bf16.msrb.mxu0 %v3765_v14 }
 0x46c   : > { %2720 = vmatmul.msk.bf16.vlgmr.msrb.gmra.mxu0 %vm894_vm0, %v3925_v54  ;;  %v1859_v20 = vpop.f32.mrf.mxu1 }
 0x46d   : > { %1905 = vmatpush.bf16.msra.mxu0 %v3653_v3  ;;  %v1865_v50 = vmax.f32 %v1859_v20, 0.0 }
 0x471   : > { %1906 = vmatpush.bf16.msra.mxu0 %v3662_v9 }
 0x474   : > { %v1861_v23 = vpop.f32.mrf.mxu1 }
 0x475   : > { %1907 = vmatpush.bf16.msra.mxu0 %v3671_v15 }
 0x479   : > { %1908 = vmatpush.bf16.msra.mxu0 %v3680_v21 }
 0x47c   : > { %2724 = vmatmul.msk.bf16.vlgmr.msra.gmra.mxu0 %vm894_vm0, %v1871_v25 }
 0x47d   : > { %1990 = vmatpush.bf16.msrb.mxu0 %v1981_v22 }
 0x4a7   : > { %v1617_v3 = vpop.xlane.xlu0 %1616 }
 0x4a8   : > { %v1618_v26 = vmax.f32 %v1617_v3, 1e-09 }
 0x4aa   : > { %3017 = vrcp.f32 %v1618_v26 }
 0x4b0   : > { %v3018_v9 = vpop.eup %3017 }
 0x4b2   : > { %v1638_v27 = vpop.f32.mrf.mxu0 }
 0x4b3   : > { %v1643_v15 = vmul.f32 %v3018_v9, %v1638_v27  ;;  %v2892_v27 = vld [vmem:[%s4091_s13 + $0x38] sm:$0xff] }
 0x4b5   : > { %1999 = vrot.lane.b32.xlu0 %v1643_v15, %s3307_s3  ;;  %v2891_v15 = vld [vmem:[%s4091_s13 + $0x30] sm:$0xff] }
 0x4ba   : > { %v1640_v32 = vpop.f32.mrf.mxu0 }
 0x4c2   : > { %v1706_v33 = vpop.f32.mrf.mxu0 }
 0x4c3   : > { %v1736_v34 = vmax.f32 %v1706_v33, 0.0 }
 0x4c5   : > { %v1739_v30 = vadd.f32 %v1736_v34, %v3806_v40 }
 0x4c7   : > { %v1742_v21 = vmul.f32 %v1739_v30, %v3809_v46 }
 0x4c9   : > { %v1748_v38 = vpack.c.bf16 %v1742_v21, %v1742_v21 }
 0x4ca   : > { %v1708_v41 = vpop.f32.mrf.mxu0 }
 0x4cb   : > { %1758 = vmatpush.bf16.xpose.msrb.mxu3 %v1748_v38  ;;  %v1437_v38 = vsel %vm836_vm2, %v3866_v49, 0.0  ;;  %v2889_v41 = vld [vmem:[%s4091_s13 + $0x20] sm:$0xff]  ;;  %v2886_v49 = vld [vmem:[%s4091_s13 + $0x8] sm:$0xff] }
 0x4d2   : > { %1759 = vmatmul.bf16.vlgmr.msrb.gmra.mxu3 %v1745_v43  ;;  %v2885_v43 = vld [vmem:[%s4091_s13] sm:$0xff] }
 0x4d3   : > { %1828 = vmatpush.bf16.msra.mxu3 %v3683_v24 }
 0x4d7   : > { %1829 = vmatpush.bf16.msra.mxu3 %v3686_v28 }
 0x4d9   : > { %v1773_v45 = vpop.f32.mrf.mxu0 }
 0x4db   : > { %1830 = vmatpush.bf16.msra.mxu3 %v3689_v31 }
 0x4df   : > { %1831 = vmatpush.bf16.msra.mxu3 %v3692_v36 }
 0x4e1   : > { %v1775_v47 = vpop.f32.mrf.mxu0 }
 0x4e2   : > { %2719 = vmatmul.msk.bf16.vlgmr.msra.gmra.mxu3 %vm894_vm0, %v3925_v54  ;;  %v2899_v47 = vld [vmem:[%s4091_s13 + $0x70] sm:$0xff] }
 0x4e3   : > { %1892 = vmatpush.bf16.msrb.mxu3 %v3744_v61 }
 0x4e7   : > { %1893 = vmatpush.bf16.msrb.mxu3 %v3753_v4 }
 0x4e9   : > { %v1846_v24 = vpop.f32.mrf.mxu0 }
 0x4ea   : > { %v1864_v2 = vmax.f32 %v1846_v24, 0.0  ;;  %v2898_v24 = vld [vmem:[%s4091_s13 + $0x68] sm:$0xff] }
 0x4eb   : > { %1894 = vmatpush.bf16.msrb.mxu3 %v3762_v11  ;;  %v1868_v11 = vadd.f32 %v1865_v50, %v3836_v7 }
 0x4ec   : > { %v1867_v8 = vadd.f32 %v1864_v2, %v3804_v39 }
 0x4ed   : > { %v1925_v53 = vpack.c.bf16 %v1868_v11, %v1868_v11 }
 0x4ee   : > { %v1924_v10 = vpack.c.bf16 %v1867_v8, %v1867_v8 }
 0x4ef   : > { %1895 = vmatpush.bf16.msrb.mxu3 %v3765_v14 }
 0x4f1   : > { %v1848_v28 = vpop.f32.mrf.mxu0 }
 0x4f2   : > { %2723 = vmatmul.msk.bf16.vlgmr.msrb.gmra.mxu3 %vm894_vm0, %v1871_v25 }
 0x4f9   : > { %v1910_v31 = vpop.f32.mrf.mxu0 }
 0x4fa   : > { %v1916_v48 = vmax.f32 %v1910_v31, 0.0 }
 0x4fc   : > { %v1919_v36 = vadd.f32 %v1916_v48, %v3836_v7  ;;  %v2897_v48 = vld [vmem:[%s4091_s13 + $0x60] sm:$0xff] }
 0x4fe   : > { %v1922_v61 = vmul.f32 %v1919_v36, %v3809_v46  ;;  %v2896_v36 = vld [vmem:[%s4091_s13 + $0x58] sm:$0xff] }
 0x500   : > { %v1928_v4 = vpack.c.bf16 %v1922_v61, %v1922_v61 }
 0x501   : > { %v1912_v52 = vpop.f32.mrf.mxu0 }
 0x502   : > { %1962 = vmatpush.bf16.xpose.msra.mxu3 %v1928_v4  ;;  %v2895_v4 = vld [vmem:[%s4091_s13 + $0x50] sm:$0xff] }
 0x509   : > { %1963 = vmatmul.bf16.vlgmr.msra.gmra.mxu3 %v1925_v53 }
 0x555   : > { %v1760_v51 = vpop.f32.mrf.mxu3 }
 0x556   : > { %v1774_v14 = vadd.f32 %v1773_v45, %v1760_v51  ;;  %v2900_v45 = vld [vmem:[%s4091_s13 + $0x78] sm:$0xff]  ;;  %v2894_v51 = vld [vmem:[%s4091_s13 + $0x48] sm:$0xff] }
 0x558   : > { %v1787_v54 = vadd.f32 %v1786_v18, %v1774_v14 }
 0x55a   : > { %v1790_v55 = vmul.f32 %v1787_v54, %v3862_v44 }
 0x55c   : > { %v1791_v56 = vsel %vm836_vm2, %v1790_v55, 0.0  ;;  %v1795_v57 = vpack.c.bf16 %v1790_v55, %v1790_v55  ;;  %v2000_v55 = vpop.permute.xlu0 %1999 }
 0x55d   : > { %v1762_v59 = vpop.f32.mrf.mxu3  ;;  %1792 = vadd.xlane.f32.xlu1 %v1791_v56 }
 0x55e   : > { %2718 = vmatmul.msk.bf16.vlgmr.msrb.gmra.mxu2 %vm836_vm2, %v1795_v57 }
 0x565   : > { %v1833_v60 = vpop.f32.mrf.mxu3 }
 0x566   : > { %v1863_v22 = vmax.f32 %v1833_v60, 0.0  ;;  %v2893_v60 = vld [vmem:[%s4091_s13 + $0x40] sm:$0xff] }
 0x568   : > { %v1866_v3 = vadd.f32 %v1863_v22, %v3806_v40  ;;  %v3011_v22 = vld [vmem:[#allocation2] ss:$0 sm:$0xff] }
 0x56d   : > { %v1835_v62 = vpop.f32.mrf.mxu3 }
 0x56e   : > { %2722 = vmatmul.msk.bf16.vlgmr.msra.gmra.mxu2 %vm894_vm0, %v1871_v25 }
 0x575   : > { %v1897_v63 = vpop.f32.mrf.mxu3 }
 0x576   : > { %v1915_v7 = vmax.f32 %v1897_v63, 0.0 }
 0x578   : > { %v1918_v0 = vadd.f32 %v1915_v7, %v3804_v39  ;;  %v1923_v39 = vpack.c.bf16 %v1866_v3, %v1866_v3  ;;  %v3012_v3 = vld [vmem:[%s4087_s9] ss:$0 sm:$0xff] }
 0x57a   : > { %v1921_v1 = vmul.f32 %v1918_v0, %v3809_v46 }
 0x57c   : > { %v1927_v5 = vpack.c.bf16 %v1921_v1, %v1921_v1 }
 0x57d   : > { %v1899_v6 = vpop.f32.mrf.mxu3 }
 0x57e   : > { %1949 = vmatpush.bf16.xpose.msrb.mxu2 %v1927_v5  ;;  %v2904_v5 = vld [vmem:[#allocation9 + $0x18] sm:$0xff]  ;;  %v2903_v6 = vld [vmem:[#allocation9 + $0x10] sm:$0xff] }
 0x57f   : > { %2220 = vmatpush.bf16.msrb.mxu3 %v2904_v5 }
 0x583   : > { %2221 = vmatpush.bf16.msrb.mxu3 %v2903_v6 }
 0x585   : > { %1950 = vmatmul.bf16.vlgmr.msrb.gmra.mxu2 %v1924_v10 }
 0x586   : > { %2161 = vmatpush.bf16.msra.mxu2 %v2900_v45  ;;  %v3015_v45 = vld [vmem:[#allocation12] ss:$0 sm:$0xff] }
 0x58a   : > { %2162 = vmatpush.bf16.msra.mxu2 %v2899_v47  ;;  %v3016_v47 = vld [vmem:[#allocation13] ss:$0 sm:$0xff] }
 0x58c   : > { %v1964_v12 = vpop.f32.mrf.mxu3 }
 0x58e   : > { %2163 = vmatpush.bf16.msra.mxu2 %v2898_v24 }
 0x592   : > { %2164 = vmatpush.bf16.msra.mxu2 %v2897_v48 }
 0x594   : > { %v1966_v16 = vpop.f32.mrf.mxu3 }
 0x595   : > { %v2901_v16 = vld [vmem:[#allocation9] sm:$0xff] }
 0x596   : > { %2165 = vmatpush.bf16.msra.mxu2 %v2896_v36 }
 0x59a   : > { %2166 = vmatpush.bf16.msra.mxu2 %v2895_v4 }
 0x59e   : > { %2167 = vmatpush.bf16.msra.mxu2 %v2894_v51 }
 0x5a2   : > { %2168 = vmatpush.bf16.msra.mxu2 %v2893_v60 }
 0x5d0   : > { %v1793_v62 = vpop.xlane.xlu1 %1792 }
 0x5d1   : > { %v1794_v63 = vmax.f32 %v1793_v62, 1e-09 }
 0x5e1   : > { %v3974_v17 = vpop.f32.mrf.mxu2 }
 0x5e9   : > { %v1814_v29 = vpop.f32.mrf.mxu2 }
 0x5ea   : > { %v2911_v29 = vld [vmem:[%s4096_s18 + $0x30] sm:$0xff] }
 0x5f1   : > { %v1884_v18 = vpop.f32.mrf.mxu2 }
 0x5f2   : > { %v1914_v58 = vmax.f32 %v1884_v18, 0.0  ;;  %v2910_v18 = vld [vmem:[%s4096_s18 + $0x28] sm:$0xff] }
 0x5f4   : > { %v1917_v19 = vadd.f32 %v1914_v58, %v3806_v40  ;;  %v2909_v58 = vld [vmem:[%s4096_s18 + $0x20] sm:$0xff] }
 0x5f6   : > { %v1920_v20 = vmul.f32 %v1917_v19, %v3809_v46  ;;  %v2890_v46 = vld [vmem:[%s4091_s13 + $0x28] sm:$0xff]  ;;  %v3009_v19 = vld [vmem:[%s4093_s15] ss:$0 sm:$0xff] }
 0x5f8   : > { %v1926_v23 = vpack.c.bf16 %v1920_v20, %v1920_v20  ;;  %v2908_v20 = vld [vmem:[%s4096_s18 + $0x18] sm:$0xff] }
 0x5f9   : > { %v1886_v25 = vpop.f32.mrf.mxu2 }
 0x5fa   : > { %1936 = vmatpush.bf16.xpose.msrb.mxu1 %v1926_v23  ;;  %v3025_v23 = vld [vmem:[%s3567_s4] sm:$0xff] }
 0x5fb   : > { %v2012_v25 = vmul.f32 %v3025_v23, %v3009_v19 }
 0x601   : > { %1937 = vmatmul.bf16.vlgmr.msrb.gmra.mxu1 %v1923_v39  ;;  %v3013_v39 = vld [vmem:[#allocation7] ss:$0 sm:$0xff] }
 0x602   : > { %2148 = vmatpush.bf16.msra.mxu1 %v2892_v27  ;;  %v969_v27 = vmul.f32 %v3025_v23, %v3012_v3 }
 0x606   : > { %2149 = vmatpush.bf16.msra.mxu1 %v2891_v15  ;;  %v2017_v15 = vadd.f32 %v3013_v39, %v2012_v25 }
 0x608   : > { %v1951_v26 = vpop.f32.mrf.mxu2 }
 0x60a   : > { %2150 = vmatpush.bf16.msra.mxu1 %v2890_v46 }
 0x60e   : > { %2151 = vmatpush.bf16.msra.mxu1 %v2889_v41 }
 0x610   : > { %v1953_v9 = vpop.f32.mrf.mxu2 }
 0x611   : > { %v962_v9 = vadd.f32 %v3011_v22, %v3802_v35  ;;  %v2905_v35 = vld [vmem:[%s4096_s18] sm:$0xff] }
 0x67e   : > { %v1938_v40 = vpop.f32.mrf.mxu1 }
 0x67f   : > { %v1952_v32 = vadd.f32 %v1951_v26, %v1938_v40  ;;  %v2907_v26 = vld [vmem:[%s4096_s18 + $0x10] sm:$0xff] }
 0x681   : > { %v1965_v33 = vadd.f32 %v1964_v12, %v1952_v32  ;;  %v2902_v12 = vld [vmem:[#allocation9 + $0x8] sm:$0xff]  ;;  %v970_v32 = vadd.f32 %v969_v27, %v962_v9 }
 0x682   : > { %2222 = vmatpush.bf16.msrb.mxu3 %v2902_v12 }
 0x683   : > { %v1968_v34 = vmul.f32 %v1965_v33, %v3862_v44  ;;  %v2888_v44 = vld [vmem:[%s4091_s13 + $0x18] sm:$0xff] }
 0x684   : > { %2152 = vmatpush.bf16.msra.mxu1 %v2888_v44 }
 0x685   : > { %v1969_v30 = vsel %vm836_vm2, %v1968_v34, 0.0  ;;  %v1973_v21 = vpack.c.bf16 %v1968_v34, %v1968_v34 }
 0x686   : > { %v1940_v37 = vpop.f32.mrf.mxu1  ;;  %1970 = vadd.xlane.f32.xlu2 %v1969_v30  ;;  %2223 = vmatpush.bf16.msrb.mxu3 %v2901_v16 }
 0x687   : > { %2725 = vmatmul.msk.bf16.vlgmr.msrb.gmra.mxu0 %vm836_vm2, %v1973_v21  ;;  %v2906_v37 = vld [vmem:[%s4096_s18 + $0x8] sm:$0xff] }
 0x688   : > { %2153 = vmatpush.bf16.msra.mxu1 %v2887_v42 }
 0x68c   : > { %2154 = vmatpush.bf16.msra.mxu1 %v2886_v49 }
 0x68e   : > { %1438 = vadd.xlane.f32.xlu2 %v1437_v38  ;;  %v3014_v38 = vld [vmem:[#allocation10] ss:$0 sm:$0xff] }
 0x690   : > { %2155 = vmatpush.bf16.msra.mxu1 %v2885_v43 }
 0x6f9   : > { %v1971_v28 = vpop.xlane.xlu2 %1970 }
 0x6fa   : > { %v1972_v31 = vmax.f32 %v1971_v28, 1e-09 }
 0x6fc   : > { %3019 = vrcp.f32 %v1972_v31 }
 0x701   : > { %v1439_v61 = vpop.xlane.xlu2 %1438 }
 0x702   : > { %v1440_v50 = vmax.f32 %v1439_v61, 1e-09  ;;  %v3020_v52 = vpop.eup %3019 }
 0x704   : > { %3021 = vrcp.f32 %v1440_v50  ;;  %v1992_v11 = vpop.f32.mrf.mxu0 }
 0x705   : > { %v1997_v53 = vmul.f32 %v3020_v52, %v1992_v11  ;;  %3023 = vrcp.f32 %v1794_v63 }
 0x707   : > { %2003 = vrot.lane.b32.xlu2 %v1997_v53, %s3307_s3 }
 0x70a   : > { %v3022_v14 = vpop.eup %3021 }
 0x70b   : > { %v1463_v54 = vmul.f32 %v3022_v14, %v3900_v13  ;;  %v3024_v7 = vpop.eup %3023 }
 0x70c   : > { %v1994_v56 = vpop.f32.mrf.mxu0  ;;  %v1817_v0 = vmul.f32 %v3024_v7, %v3974_v17  ;;  %v2912_v17 = vld [vmem:[%s4096_s18 + $0x38] sm:$0xff] }
 0x70d   : > { %v2006_v57 = vsel %vm894_vm0, %v1463_v54, %v2000_v55  ;;  %2299 = vmatpush.bf16.msra.mxu0 %v2912_v17 }
 0x70e   : > { %v2018_v59 = vpack.c.bf16 %v2006_v57, %v2006_v57 }
 0x710   : > { %2156 = vmatmul.bf16.vlgmr.msra.gmra.mxu1 %v2018_v59 }
 0x711   : > { %2300 = vmatpush.bf16.msra.mxu0 %v2911_v29 }
 0x715   : > { %2301 = vmatpush.bf16.msra.mxu0 %v2910_v18 }
 0x719   : > { %2302 = vmatpush.bf16.msra.mxu0 %v2909_v58 }
 0x71d   : > { %2303 = vmatpush.bf16.msra.mxu0 %v2908_v20 }
 0x721   : > { %2304 = vmatpush.bf16.msra.mxu0 %v2907_v26 }
 0x725   : > { %2305 = vmatpush.bf16.msra.mxu0 %v2906_v37 }
 0x729   : > { %2306 = vmatpush.bf16.msra.mxu0 %v2905_v35 }
 0x761   : > { %v2004_v1 = vpop.permute.xlu2 %2003 }
 0x762   : > { %v2007_v13 = vsel %vm894_vm0, %v1817_v0, %v2004_v1 }
 0x763   : > { %v2019_v2 = vpack.c.bf16 %v2007_v13, %v2007_v13 }
 0x765   : > { %2169 = vmatmul.bf16.vlgmr.msra.gmra.mxu2 %v2019_v2 }
 0x78d   : > { %v2157_v8 = vpop.f32.mrf.mxu1 }
 0x795   : > { %v2159_v10 = vpop.f32.mrf.mxu1 }
 0x7e8   : > { %v2170_v46 = vpop.f32.mrf.mxu2 }
 0x7e9   : > { %v2171_v40 = vadd.f32 %v2170_v46, %v2157_v8 }
 0x7eb   : > { %v2174_v33 = vadd.f32 %v2171_v40, %v2017_v15 }
 0x7ed   : > { %v2175_v34 = vadd.f32 %v2174_v33, %v970_v32 }
 0x7ef   : > { %v2176_v30 = vpack.c.bf16 %v2175_v34, %v2175_v34  ;;  %v2316_v31 = vmul.f32 %v3016_v47, %v2175_v34 }
 0x7f0   : > { %v2172_v21 = vpop.f32.mrf.mxu2 }
 0x7f1   : > { %2806 = vmatmul.msk.bf16.vlgmr.msrb.gmra.mxu3 %vm894_vm0, %v2176_v30 }
 0x874   : > { %v2225_v41 = vpop.f32.mrf.mxu3 }
 0x875   : > { %v2226_v44 = vadd.f32 %v3014_v38, %v2225_v41 }
 0x877   : > { %v2229_v42 = vmax.f32 %v2226_v44, 0.0 }
 0x879   : > { %v2230_v49 = vpack.c.bf16 %v2229_v42, %v2229_v42 }
 0x87b   : > { %2307 = vmatmul.bf16.vlgmr.msra.gmra.mxu0 %v2230_v49 }
 0x87c   : > { %v2227_v43 = vpop.f32.mrf.mxu3 }
 0x8f8   : > { %v2308_v24 = vpop.f32.mrf.mxu0 }
 0x8f9   : > { %v2309_v28 = vadd.f32 %v3015_v45, %v2308_v24 }
 0x8fb   : > { %v2317_v48 = vadd.f32 %v2316_v31, %v2309_v28 }
 0x8fd   : > { %2318 = vst.msk [vmem:[%s823_s24] sm:$0xff] %vm894_vm0, %v2317_v48 }
 0x900   : > { %v2310_v36 = vpop.f32.mrf.mxu0 }
 0x901 PF: > { %s4125_s25 = sld [smem:[#allocation20_spill]] }
 0x907   : > { %s36_s2 = sadd.s32 1, %s4125_s25  }
 0x908   : > { %p33_p7 = scmp.ge.s32.totalorder %s36_s2, 4  }
 0x90a   :  { %35 = sbr.rel (!%p33_p7) target bundleno = 16 (0x10), region = 176 }
 0x90f   :  { %2338 = vsyncpa [#allocation3], 1 }
 0x910   :  { %2340 = vsyncpa [#allocation3 + $0x1], 1 }
 0x911   :  { %2341 = vsyncpa [#allocation5], 1 }
 0x912   :  { %2342 = vsyncpa [#allocation8], 1 }
 0x913   :  { %2343 = vsyncpa [#allocation11], 1 }
 0x914   :  { %2344 = vsyncpa [#allocation14], 1 }

// kernel: spd_encoder_forward.22
= control target key start
LH: loop header
LB: loop body
LE: loop exit
PB: predicated region body
PF: predicated region fallthrough
CT: control target
= control target key end

     0   :  { %s4292_s0 = inlined_call_operand.vmem [shape: f32[16,8], index: 0, kind: input, shape index: {}]   ;;  %s4293_s1 = inlined_call_operand.vmem [shape: f32[16,64], index: 1, kind: input, shape index: {}]   ;;  %s4294_s2 = inlined_call_operand.vmem [shape: f32[16,1], index: 2, kind: input, shape index: {}]   ;;  %s4295_s3 = inlined_call_operand.vmem [shape: f32[16,1], index: 3, kind: input, shape index: {}]   ;;  %s4296_s4 = inlined_call_operand.vmem [shape: f32[8,8], index: 4, kind: input, shape index: {}]   ;;  %s4297_s5 = inlined_call_operand.vmem [shape: bf16[64,64], index: 5, kind: input, shape index: {}]   ;;  %s4298_s6 = inlined_call_operand.hbm [shape: f32[1,64], index: 6, kind: input, shape index: {}]   ;;  %s4299_s7 = inlined_call_operand.vmem [shape: bf16[64,64], index: 7, kind: input, shape index: {}]   ;;  %s4300_s8 = inlined_call_operand.hbm [shape: f32[1,64], index: 8, kind: input, shape index: {}]   ;;  %s4301_s9 = inlined_call_operand.hbm [shape: f32[1,64], index: 9, kind: input, shape index: {}]   ;;  %s4302_s10 = inlined_call_operand.vmem [shape: bf16[64,768], index: 10, kind: input, shape index: {}]   ;;  %s4303_s11 = inlined_call_operand.hbm [shape: bf16[64,384], index: 11, kind: input, shape index: {}]   ;;  %s4304_s12 = inlined_call_operand.hbm [shape: f32[1,384], index: 12, kind: input, shape index: {}]   ;;  %s4305_s13 = inlined_call_operand.vmem [shape: bf16[256,64], index: 13, kind: input, shape index: {}]   ;;  %s4306_s14 = inlined_call_operand.hbm [shape: f32[1,64], index: 14, kind: input, shape index: {}]   ;;  %s4307_s15 = inlined_call_operand.hbm [shape: f32[1,64], index: 15, kind: input, shape index: {}]   ;;  %s4308_s16 = inlined_call_operand.hbm [shape: bf16[64,128], index: 16, kind: input, shape index: {}]   ;;  %s4309_s17 = inlined_call_operand.hbm [shape: f32[1,128], index: 17, kind: input, shape index: {}]   ;;  %s4310_s18 = inlined_call_operand.vmem [shape: bf16[128,64], index: 18, kind: input, shape index: {}]   ;;  %s4311_s19 = inlined_call_operand.hbm [shape: f32[1,64], index: 19, kind: input, shape index: {}]   ;;  %s4312_s20 = inlined_call_operand.hbm [shape: f32[1,64], index: 20, kind: input, shape index: {}]   ;;  %s4313_s21 = inlined_call_operand.vmem [shape: f32[16,64], index: 21, kind: output, shape index: {}]  }
   0x1   :  { %4316 = sst [smem:[#allocation26_spill]] %s4292_s0 }
   0x2   :  { %4317 = sst [smem:[#allocation27_spill]] %s4293_s1 }
   0x3   :  { %4318 = sst [smem:[#allocation28_spill]] %s4294_s2 }
   0x4   :  { %4319 = sst [smem:[#allocation29_spill]] %s4295_s3 }
   0x5   :  { %4320 = sst [smem:[#allocation30_spill]] %s4296_s4 }
   0x6   :  { %4321 = sst [smem:[#allocation31_spill]] %s4297_s5 }
   0x7   :  { %4322 = sst [smem:[#allocation32_spill]] %s4300_s8 }
   0x8   :  { %4323 = sst [smem:[#allocation33_spill]] %s4303_s11 }
   0x9   :  { %4324 = sst [smem:[#allocation34_spill]] %s4313_s21 }
   0xa   :  { %26 = vsyncpa [#allocation3], 0 }
   0xb   :  { %27 = vsyncpa [#allocation5], 0 }
   0xc   :  { %28 = vsyncpa [#allocation8], 0 }
   0xd   :  { %29 = vsyncpa [#allocation11], 0 }
   0xe   :  { %30 = vsyncpa [#allocation14], 0 }
   0xf   :  { %31 = vsyncpa [#allocation17], 0  ;;  %s3622_s2 = smov 0  }
  0x10 LB: > { %4325 = sst [smem:[#allocation25_spill]] %s3493_s2  ;;  %s3631_s3 = sadd.s32 4294967295, %s3493_s2   ;;  %s3493_s2 = sphi %s3622_s2, %s37_s2  }
  0x11   : > { %s4326_s8 = sld [smem:[#allocation32_spill]]  ;;  %p2560_p0 = scmp.ge.s32.totalorder %s3493_s2, 1 }
  0x12   : > { %p529_p1 = scmp.lt.s32.totalorder %s3493_s2, 3  ;;  %p3068_p2 = scmp.eq.s32.totalorder %s3631_s3, 0 }
  0x13   : > { %s3495_s29 = smov [#allocation4]   ;;  %s4328_s11 = sld [smem:[#allocation33_spill]] }
  0x14   : > { %p3636_p3 = pnand %p2560_p0, %p529_p1  ;;  %s564_s0 = sshll.u32 %s3495_s29, 4  ;;  %s565_s0 = int_to_ptr.vmem [resolvable:$true] %s564_s0 }
  0x15   : > { %s3496_s23 = smov [#allocation7]   ;;  %s618_s26 = sshll.u32 %s4306_s14, 4  ;;  %s619_s26 = int_to_ptr.hbm [resolvable:$true] %s618_s26 }
  0x16   : > { %p3034_p4 = pneg %p3636_p3  ;;  %s590_s1 = sshll.u32 %s3496_s23, 4  ;;  %s591_s1 = int_to_ptr.vmem [resolvable:$true] %s590_s1 }
  0x17   : > { %s562_s27 = sshll.u32 %s4326_s8, 4  ;;  %s3497_s29 = smov 192   ;;  %s563_s27 = int_to_ptr.hbm [resolvable:$true] %s562_s27 }
  0x18   : > { %p3647_p5 = pnand %p3068_p2, %p3034_p4  ;;  %s3498_s4 = smov 12  }
  0x19   : > { %s588_s5 = sshll.u32 %s4328_s11, 4  ;;  %s3499_s30 = smov [#allocation10]   ;;  %s589_s5 = int_to_ptr.hbm [resolvable:$true] %s588_s5 }
  0x1a   : > { %3040 = dma.hbm_to_vmem [thread:$0]  (!%p3647_p5), %s563_s27, 16, %s565_s0, [#allocation5]  }
  0x1b   : > { %3046 = dma.hbm_to_vmem [thread:$0]  (!%p3647_p5), %s589_s5, 1536, %s591_s1, [#allocation8], %s3497_s29, %s3497_s29, %s3498_s4  }
  0x1c   : > { %s620_s8 = sshll.u32 %s3499_s30, 4  ;;  %s641_s21 = sshll.u32 %s4308_s16, 4  ;;  %s621_s8 = int_to_ptr.vmem [resolvable:$true] %s620_s8  ;;  %s642_s21 = int_to_ptr.hbm [resolvable:$true] %s641_s21 }
  0x1d   : > { %3052 = dma.hbm_to_vmem [thread:$0]  (!%p3647_p5), %s619_s26, 16, %s621_s8, [#allocation11]  }
  0x1e   : > { %s3500_s23 = smov [#allocation13]   ;;  %s671_s25 = sshll.u32 %s4311_s19, 4  ;;  %s672_s25 = int_to_ptr.hbm [resolvable:$true] %s671_s25 }
  0x1f   : > { %s643_s24 = sshll.u32 %s3500_s23, 4  ;;  %s3501_s5 = smov 64   ;;  %s644_s24 = int_to_ptr.vmem [resolvable:$true] %s643_s24 }
  0x20   : > { %s3502_s1 = smov 4   ;;  %s3503_s11 = smov [#allocation16]  }
  0x21   : > { %3058 = dma.hbm_to_vmem [thread:$0]  (!%p3647_p5), %s642_s21, 512, %s644_s24, [#allocation14], %s3501_s5, %s3501_s5, %s3502_s1  }
  0x22   : > { %s673_s2 = sshll.u32 %s3503_s11, 4  ;;  %s547_s8 = sshll.u32 %s4298_s6, 4  ;;  %s674_s2 = int_to_ptr.vmem [resolvable:$true] %s673_s2  ;;  %s548_s8 = int_to_ptr.hbm [resolvable:$true] %s547_s8 }
  0x23   : > { %3064 = dma.hbm_to_vmem [thread:$0]  (!%p3647_p5), %s672_s25, 16, %s674_s2, [#allocation17]  }
  0x24   : > { %s574_s23 = sshll.u32 %s4301_s9, 4  ;;  %s3504_s27 = smov [#allocation2]   ;;  %s575_s23 = int_to_ptr.hbm [resolvable:$true] %s574_s23 }
  0x25   : > { %s549_s0 = sshll.u32 %s3504_s27, 4  ;;  %s3505_s21 = smov [#allocation6]   ;;  %s550_s0 = int_to_ptr.vmem [resolvable:$true] %s549_s0 }
  0x26   : > { %3037 = dma.hbm_to_vmem [thread:$0]  (!%p3647_p5), %s548_s8, 16, %s550_s0, [#allocation3]  }
  0x27   : > { %s576_s24 = sshll.u32 %s3505_s21, 4  ;;  %s603_s11 = sshll.u32 %s4304_s12, 4  ;;  %s577_s24 = int_to_ptr.vmem [resolvable:$true] %s576_s24  ;;  %s604_s11 = int_to_ptr.hbm [resolvable:$true] %s603_s11 }
  0x28   : > { %3043 = dma.hbm_to_vmem [thread:$0]  (!%p3647_p5), %s575_s23, 16, %s577_s24, [#allocation5]  }
  0x29   : > { %s630_s29 = sshll.u32 %s4307_s15, 4  ;;  %s3506_s4 = smov [#allocation9]   ;;  %s631_s29 = int_to_ptr.hbm [resolvable:$true] %s630_s29 }
  0x2a   : > { %s605_s26 = sshll.u32 %s3506_s4, 4  ;;  %s3507_s8 = smov [#allocation12]   ;;  %s606_s26 = int_to_ptr.vmem [resolvable:$true] %s605_s26 }
  0x2b   : > { %3049 = dma.hbm_to_vmem [thread:$0]  (!%p3647_p5), %s604_s11, 48, %s606_s26, [#allocation8]  }
  0x2c   : > { %s632_s30 = sshll.u32 %s3507_s8, 4  ;;  %s656_s21 = sshll.u32 %s4309_s17, 4  ;;  %s633_s30 = int_to_ptr.vmem [resolvable:$true] %s632_s30  ;;  %s657_s21 = int_to_ptr.hbm [resolvable:$true] %s656_s21 }
  0x2d   : > { %3055 = dma.hbm_to_vmem [thread:$0]  (!%p3647_p5), %s631_s29, 16, %s633_s30, [#allocation11]  }
  0x2e   : > { %s683_s5 = sshll.u32 %s4312_s20, 4  ;;  %s3508_s1 = smov [#allocation15]   ;;  %s684_s5 = int_to_ptr.hbm [resolvable:$true] %s683_s5 }
  0x2f   : > { %s658_s25 = sshll.u32 %s3508_s1, 4  ;;  %s3509_s11 = smov [#allocation18]   ;;  %s659_s25 = int_to_ptr.vmem [resolvable:$true] %s658_s25 }
  0x30   : > { %3061 = dma.hbm_to_vmem [thread:$0]  (!%p3647_p5), %s657_s21, 16, %s659_s25, [#allocation14]  }
  0x31   : > { %s685_s2 = sshll.u32 %s3509_s11, 4  ;;  %726 = sbr.rel (%p3636_p3) target bundleno = 2314 (0x90a), region = 104  ;;  %s686_s2 = int_to_ptr.vmem [resolvable:$true] %s685_s2 }
  0x32   : > { %3067 = dma.hbm_to_vmem [thread:$0]  (!%p3647_p5), %s684_s5, 16, %s686_s2, [#allocation17]  }
  0x36   : > { %3468 = dma.done.wait (%p3068_p2), [#allocation3], 16  }
  0x37   : > { %3470 = vsyncadd (%p3068_p2), [#allocation3], 4294967280 }
  0x38   : > { %3472 = dma.done.wait (%p3068_p2), [#allocation5], 32  }
  0x39   : > { %3474 = vsyncadd (%p3068_p2), [#allocation5], 4294967264 }
  0x3a   : > { %3476 = dma.done.wait (%p3068_p2), [#allocation8], 1584  }
  0x3b   : > { %3478 = vsyncadd (%p3068_p2), [#allocation8], 4294965712 }
  0x3c   : > { %3480 = dma.done.wait (%p3068_p2), [#allocation11], 32  }
  0x3d   : > { %3482 = vsyncadd (%p3068_p2), [#allocation11], 4294967264 }
  0x3e   : > { %3484 = dma.done.wait (%p3068_p2), [#allocation14], 528  }
  0x3f   : > { %3486 = vsyncadd (%p3068_p2), [#allocation14], 4294966768 }
  0x40   : > { %3488 = dma.done.wait (%p3068_p2), [#allocation17], 32  }
  0x41   : > { %3490 = vsyncadd (%p3068_p2), [#allocation17], 4294967264  ;;  %p847_p6 = scmp.lt.s32.totalorder %s3631_s3, 1  ;;  %v3510_v0 = vmov 0   ;;  %s4330_s4 = sld [smem:[#allocation28_spill]]  ;;  %vm937_vm0 = vcmask 523264  }
  0x42   : > { %3115 = vset.pattern.permute.xlu0 %v3510_v0  ;;  %v2944_v2 = vld [vmem:[%s4302_s10 + $0x94] sm:$0xf]  ;;  %v2701_v3 = vld [vmem:[%s4302_s10 + $0xa8] sm:$0xf0]  ;;  %v2938_v4 = vld [vmem:[%s4302_s10 + $0x64] sm:$0xf] }
  0x43   : > { %s4339_s3 = smov (!%p847_p6, %s3631_s3), 1  ;;  %v2677_v5 = vld [vmem:[%s4302_s10 + $0x78] sm:$0xf0]  ;;  %v2704_v6 = vor.u32 %v2944_v2, %v2701_v3  ;;  %s4331_s25 = sld [smem:[#allocation29_spill]]  ;;  %v2932_v7 = vld [vmem:[%s4302_s10 + $0x34] sm:$0xf] }
  0x44   : > { %s3728_s28 = sshll.u32 %s4339_s3, 3  ;;  %v2680_v8 = vor.u32 %v2938_v4, %v2677_v5  ;;  %v2653_v9 = vld [vmem:[%s4302_s10 + $0x48] sm:$0xf0]  ;;  %v2926_v12 = vld [vmem:[%s4302_s10 + $0x4] sm:$0xf]  ;;  %s4332_s21 = sld [smem:[#allocation27_spill]] }
  0x45   : > { %1177 = vmatpush.bf16.msra.mxu0 %v2704_v6  ;;  %v2656_v11 = vor.u32 %v2932_v7, %v2653_v9  ;;  %v2629_v13 = vld [vmem:[%s4302_s10 + $0x18] sm:$0xf0]  ;;  %v2946_v15 = vld [vmem:[%s4302_s10 + $0xa4] sm:$0xf]  ;;  %v2940_v18 = vld [vmem:[%s4302_s10 + $0x74] sm:$0xf] }
  0x46   : > { %v2632_v14 = vor.u32 %v2926_v12, %v2629_v13  ;;  %v2717_v16 = vld [vmem:[%s4302_s10 + $0xb8] sm:$0xf0]  ;;  %v2693_v19 = vld [vmem:[%s4302_s10 + $0x88] sm:$0xf0]  ;;  %v2934_v21 = vld [vmem:[%s4302_s10 + $0x44] sm:$0xf] }
  0x47   : > { %s858_s26 = scalar_lea.vmem %s4330_s4, %s3728_s28  ;;  %v2720_v17 = vor.u32 %v2946_v15, %v2717_v16  ;;  %v2696_v20 = vor.u32 %v2940_v18, %v2693_v19  ;;  %v2669_v22 = vld [vmem:[%s4302_s10 + $0x58] sm:$0xf0]  ;;  %v2928_v24 = vld [vmem:[%s4302_s10 + $0x14] sm:$0xf]  ;;  %v2645_v25 = vld [vmem:[%s4302_s10 + $0x28] sm:$0xf0] }
  0x48   : > { %v869_v1 = vld [vmem:[%s858_s26] sm:$0xff]  ;;  %v2672_v23 = vor.u32 %v2934_v21, %v2669_v22  ;;  %v2648_v26 = vor.u32 %v2928_v24, %v2645_v25  ;;  %s4333_s5 = sld [smem:[#allocation26_spill]]  ;;  %v2699_v29 = vld [vmem:[%s4302_s10 + $0x90] sm:$0xf]  ;;  %v2947_v30 = vld [vmem:[%s4302_s10 + $0xa4] sm:$0xf0] }
  0x49   : > { %872 = vperm.xlu0 %3115, %v869_v1   ;;  %s862_s11 = scalar_lea.vmem %s4331_s25, %s3728_s28  ;;  %1178 = vmatpush.bf16.msra.mxu0 %v2680_v8  ;;  %vm883_vm1 = vcmask 1043456   ;;  %v2700_v34 = vor.u32 %v2947_v30, %v2699_v29  ;;  %v2675_v35 = vld [vmem:[%s4302_s10 + $0x60] sm:$0xf]  ;;  %v2941_v36 = vld [vmem:[%s4302_s10 + $0x74] sm:$0xf0]  ;;  %vm879_vm2 = vcmask 64512  }
  0x4a   : > { %v1255_v10 = vld [vmem:[%s862_s11] sm:$0xff]  ;;  %s3790_s23 = scalar_lea.vmem %s4332_s21, %s3728_s28  ;;  %v2676_v39 = vor.u32 %v2941_v36, %v2675_v35  ;;  %v2651_v40 = vld [vmem:[%s4302_s10 + $0x30] sm:$0xf]  ;;  %v2935_v41 = vld [vmem:[%s4302_s10 + $0x44] sm:$0xf0]  ;;  %s3511_s2 = smov 64  }
  0x4b   : > { %v868_v27 = vld [vmem:[%s3790_s23] sm:$0xff]  ;;  %v2652_v43 = vor.u32 %v2935_v41, %v2651_v40  ;;  %v2929_v45 = vld [vmem:[%s4302_s10 + $0x14] sm:$0xf0]  ;;  %v2691_v50 = vld [vmem:[%s4302_s10 + $0x70] sm:$0xf]  ;;  %s4335_s27 = sld [smem:[#allocation30_spill]] }
  0x4c   : > { %v2627_v44 = vld [vmem:[%s4302_s10] sm:$0xf]  ;;  %v2949_v47 = vld [vmem:[%s4302_s10 + $0xb4] sm:$0xf0]  ;;  %v2943_v51 = vld [vmem:[%s4302_s10 + $0x84] sm:$0xf0] }
  0x4d   : > { %1179 = vmatpush.bf16.msra.mxu0 %v2656_v11  ;;  %v2715_v46 = vld [vmem:[%s4302_s10 + $0xa0] sm:$0xf]  ;;  %v2628_v48 = vor.u32 %v2929_v45, %v2627_v44  ;;  %v2692_v52 = vor.u32 %v2943_v51, %v2691_v50  ;;  %v2937_v54 = vld [vmem:[%s4302_s10 + $0x54] sm:$0xf0]  ;;  %v2643_v56 = vld [vmem:[%s4302_s10 + $0x10] sm:$0xf] }
  0x4e   : > { %s850_s1 = scalar_lea.vmem %s4333_s5, %s3728_s28  ;;  %s4334_s5 = sld [smem:[#allocation31_spill]]  ;;  %v2716_v49 = vor.u32 %v2949_v47, %v2715_v46  ;;  %v2667_v53 = vld [vmem:[%s4302_s10 + $0x40] sm:$0xf]  ;;  %v2931_v57 = vld [vmem:[%s4302_s10 + $0x24] sm:$0xf0]  ;;  %v2925_v41 = vld [vmem:[%s4299_s7 + $0x18] sm:$0xff] }
  0x4f   : > { %v877_v32 = vld [vmem:[%s850_s1] sm:$0xff]  ;;  %v2668_v55 = vor.u32 %v2937_v54, %v2667_v53  ;;  %v2644_v58 = vor.u32 %v2931_v57, %v2643_v56  ;;  %v2707_v62 = vld [vmem:[%s4302_s10 + $0x98] sm:$0xf]  ;;  %v2948_v63 = vld [vmem:[%s4302_s10 + $0xac] sm:$0xf0]  ;;  %999 = vmatpush.bf16.msra.mxu2 %v2925_v41  ;;  %s4336_s25 = sld [smem:[#allocation34_spill]] }
  0x50   : > { %v878_v38 = vpack.c.bf16 %v877_v32, %v877_v32  ;;  %v2773_v0 = vld [vmem:[#allocation7 + $0x50] sm:$0xf]  ;;  %v2708_v1 = vor.u32 %v2948_v63, %v2707_v62  ;;  %v2961_v2 = vld [vmem:[#allocation7 + $0x58] sm:$0xf0]  ;;  %v2683_v4 = vld [vmem:[%s4302_s10 + $0x68] sm:$0xf] }
  0x51   : > { %1428 = vperm.xlu0 %3115, %v1255_v10   ;;  %1180 = vmatpush.bf16.msra.mxu0 %v2632_v14  ;;  %v3876_v3 = vor.u32 %v2961_v2, %v2773_v0  ;;  %v2942_v5 = vld [vmem:[%s4302_s10 + $0x7c] sm:$0xf0]  ;;  %v2958_v8 = vld [vmem:[#allocation7 + $0x40] sm:$0xf0]  ;;  %v2659_v10 = vld [vmem:[%s4302_s10 + $0x38] sm:$0xf] }
  0x52   : > { %v2761_v6 = vld [vmem:[#allocation7 + $0x38] sm:$0xf]  ;;  %v2684_v7 = vor.u32 %v2942_v5, %v2683_v4  ;;  %v2936_v11 = vld [vmem:[%s4302_s10 + $0x4c] sm:$0xf0]  ;;  %v2749_v12 = vld [vmem:[#allocation7 + $0x20] sm:$0xf] }
  0x53   : > { %v3885_v9 = vor.u32 %v2958_v8, %v2761_v6  ;;  %v2660_v13 = vor.u32 %v2936_v11, %v2659_v10  ;;  %v2955_v14 = vld [vmem:[#allocation7 + $0x28] sm:$0xf0]  ;;  %v2635_v16 = vld [vmem:[%s4302_s10 + $0x8] sm:$0xf]  ;;  %v2737_v18 = vld [vmem:[#allocation7 + $0x8] sm:$0xf] }
  0x54   : > { %v2921_v42 = vld [vmem:[%s4334_s5 + $0x18] sm:$0xff]  ;;  %v2920_v59 = vld [vmem:[%s4334_s5 + $0x10] sm:$0xff]  ;;  %v2919_v60 = vld [vmem:[%s4334_s5 + $0x8] sm:$0xff]  ;;  %v3894_v15 = vor.u32 %v2955_v14, %v2749_v12 }
  0x55   : > { %1229 = vmatpush.bf16.msrb.mxu0 %v2720_v17  ;;  %945 = vmatpush.bf16.msra.mxu1 %v2921_v42  ;;  %v2918_v61 = vld [vmem:[%s4334_s5] sm:$0xff]  ;;  %v2765_v22 = vld [vmem:[#allocation7 + $0x48] sm:$0xf]  ;;  %v2954_v30 = vld [vmem:[#allocation7 + $0x20] sm:$0xf0]  ;;  %s866_s11 = scalar_lea.vmem %s4336_s25, %s3728_s28 }
  0x56   : > { %v2930_v17 = vld [vmem:[%s4302_s10 + $0x1c] sm:$0xf0]  ;;  %v2951_v35 = vld [vmem:[#allocation7 + $0x8] sm:$0xf0]  ;;  %v2923_v46 = vld [vmem:[%s4299_s7 + $0x8] sm:$0xff] }
  0x57   : > { %v2636_v19 = vor.u32 %v2930_v17, %v2635_v16  ;;  %v2741_v29 = vld [vmem:[#allocation7 + $0x18] sm:$0xf]  ;;  %v2924_v42 = vld [vmem:[%s4299_s7 + $0x10] sm:$0xff]  ;;  %v2939_v56 = vld [vmem:[%s4302_s10 + $0x6c] sm:$0xf] }
  0x58   : > { %1000 = vmatpush.bf16.msra.mxu2 %v2924_v42  ;;  %v2945_v53 = vld [vmem:[%s4302_s10 + $0x9c] sm:$0xf]  ;;  %v2709_v54 = vld [vmem:[%s4302_s10 + $0xb0] sm:$0xf0]  ;;  %v2685_v57 = vld [vmem:[%s4302_s10 + $0x80] sm:$0xf0] }
  0x59   : > { %1230 = vmatpush.bf16.msrb.mxu0 %v2696_v20  ;;  %946 = vmatpush.bf16.msra.mxu1 %v2920_v59  ;;  %v2952_v20 = vld [vmem:[#allocation7 + $0x10] sm:$0xf0]  ;;  %v2688_v59 = vor.u32 %v2939_v56, %v2685_v57  ;;  %v2661_v63 = vld [vmem:[%s4302_s10 + $0x50] sm:$0xf0]  ;;  %v2755_v2 = vld [vmem:[#allocation7 + $0x3c] sm:$0xf0] }
  0x5a   : > { %v3903_v21 = vor.u32 %v2952_v20, %v2737_v18  ;;  %v2933_v62 = vld [vmem:[%s4302_s10 + $0x3c] sm:$0xf]  ;;  %v2927_v5 = vld [vmem:[%s4302_s10 + $0xc] sm:$0xf]  ;;  %v2637_v6 = vld [vmem:[%s4302_s10 + $0x20] sm:$0xf0] }
  0x5b   : > { %v2956_v0 = vld [vmem:[#allocation7 + $0x34] sm:$0xf]  ;;  %v2743_v8 = vld [vmem:[#allocation7 + $0x24] sm:$0xf0]  ;;  %v2640_v10 = vor.u32 %v2927_v5, %v2637_v6  ;;  %v2950_v12 = vld [vmem:[#allocation7 + $0x4] sm:$0xf] }
  0x5c   : > { %1001 = vmatpush.bf16.msra.mxu2 %v2923_v46  ;;  %v3976_v4 = vor.u32 %v2956_v0, %v2755_v2  ;;  %v3117_v16 = vld [vmem:[#allocation2] ss:$0 sm:$0xff] }
  0x5d   : > { %1231 = vmatpush.bf16.msrb.mxu0 %v2672_v23  ;;  %947 = vmatpush.bf16.msra.mxu1 %v2919_v60  ;;  %v2960_v23 = vld [vmem:[#allocation7 + $0x50] sm:$0xf0]  ;;  %v2767_v60 = vld [vmem:[#allocation7 + $0x54] sm:$0xf0] }
  0x5e   : > { %v3906_v24 = vor.u32 %v2960_v23, %v2765_v22 }
  0x61   : > { %1232 = vmatpush.bf16.msrb.mxu0 %v2648_v26  ;;  %948 = vmatpush.bf16.msra.mxu1 %v2918_v61  ;;  %v2753_v26 = vld [vmem:[#allocation7 + $0x30] sm:$0xf] }
  0x65   : > { %1190 = vmatpush.bf16.msrb.mxu1 %v2708_v1  ;;  %v2664_v1 = vor.u32 %v2933_v62, %v2661_v63 }
  0x69   : > { %1191 = vmatpush.bf16.msrb.mxu1 %v2684_v7  ;;  %v2953_v7 = vld [vmem:[#allocation7 + $0x1c] sm:$0xf] }
  0x6a   : > { %v3985_v11 = vor.u32 %v2953_v7, %v2743_v8 }
  0x6d   : > { %1192 = vmatpush.bf16.msrb.mxu1 %v2660_v13  ;;  %v2731_v13 = vld [vmem:[#allocation7 + $0xc] sm:$0xf0] }
  0x6e   : > { %v3988_v14 = vor.u32 %v2950_v12, %v2731_v13 }
  0x71   : > { %1193 = vmatpush.bf16.msrb.mxu1 %v2636_v19 }
  0xbb   : > { %v873_v28 = vpop.permute.xlu0 %872 }
  0xbc   : > { %v875_v31 = vmul.f32 %v873_v28, %v868_v27  ;;  %v2957_v27 = vld [vmem:[#allocation7 + $0x38] sm:$0xf0] }
  0xbd   : > { %v3909_v28 = vor.u32 %v2957_v27, %v2753_v26 }
  0xbe   : > { %v3803_v33 = vpack.c.bf16 %v875_v31, %v875_v31  ;;  %v3912_v31 = vor.u32 %v2954_v30, %v2741_v29 }
  0xc0   : > { %2722 = vmatmul.msk.bf16.vlgmr.msra.gmra.mxu0 %vm937_vm0, %v3803_v33  ;;  %v885_v37 = vsel %vm883_vm1, %v3803_v33, 0 }
  0xc1   : > { %894 = vmatpush.bf16.msra.mxu3 %v885_v37  ;;  %1385 = vmatpush.bf16.msra.mxu0 %v3906_v24 }
  0xc3   : > { %v4029_v46 = vpop.permute.xlu0 %1428 }
  0xc4   : > { %2590 = vmatmul.msk.bf16.vlgmr.msra.gmra.mxu3 %vm879_vm2, %v878_v38 }
  0xc5   : > { %1164 = vmatpush.bf16.msrb.mxu3 %v2700_v34  ;;  %1386 = vmatpush.bf16.msra.mxu0 %v3909_v28  ;;  %v2729_v34 = vld [vmem:[#allocation7] sm:$0xf] }
  0xc6   : > { %v3915_v36 = vor.u32 %v2951_v35, %v2729_v34 }
  0xc9   : > { %1165 = vmatpush.bf16.msrb.mxu3 %v2676_v39  ;;  %1387 = vmatpush.bf16.msra.mxu0 %v3912_v31 }
  0xcd   : > { %1166 = vmatpush.bf16.msrb.mxu3 %v2652_v43  ;;  %1388 = vmatpush.bf16.msra.mxu0 %v3915_v36 }
  0xd0   : > { %2726 = vmatmul.msk.bf16.vlgmr.msrb.gmra.mxu0 %vm937_vm0, %v3803_v33 }
  0xd1   : > { %1167 = vmatpush.bf16.msrb.mxu3 %v2628_v48 }
  0xd4   : > { %2721 = vmatmul.msk.bf16.vlgmr.msrb.gmra.mxu3 %vm937_vm0, %v3803_v33 }
  0xd5   : > { %1216 = vmatpush.bf16.msra.mxu3 %v2716_v49 }
  0xd9   : > { %1217 = vmatpush.bf16.msra.mxu3 %v2692_v52  ;;  %v2922_v52 = vld [vmem:[%s4299_s7] sm:$0xff] }
  0xda   : > { %1002 = vmatpush.bf16.msra.mxu2 %v2922_v52 }
  0xdd   : > { %1218 = vmatpush.bf16.msra.mxu3 %v2668_v55  ;;  %v2712_v55 = vor.u32 %v2945_v53, %v2709_v54 }
  0xdf   : > { %1203 = vmatpush.bf16.msrb.mxu2 %v2712_v55 }
  0xe1   : > { %1219 = vmatpush.bf16.msra.mxu3 %v2644_v58  ;;  %v2959_v58 = vld [vmem:[#allocation7 + $0x4c] sm:$0xf] }
  0xe2   : > { %v3967_v61 = vor.u32 %v2959_v58, %v2767_v60 }
  0xe3   : > { %1204 = vmatpush.bf16.msrb.mxu2 %v2688_v59 }
  0xe4   : > { %2725 = vmatmul.msk.bf16.vlgmr.msra.gmra.mxu3 %vm937_vm0, %v3803_v33 }
  0xe5   : > { %1355 = vmatpush.bf16.msrb.mxu3 %v3876_v3 }
  0xe7   : > { %1205 = vmatpush.bf16.msrb.mxu2 %v2664_v1 }
  0xe9   : > { %1356 = vmatpush.bf16.msrb.mxu3 %v3885_v9 }
  0xeb   : > { %1206 = vmatpush.bf16.msrb.mxu2 %v2640_v10 }
  0xed   : > { %1357 = vmatpush.bf16.msrb.mxu3 %v3894_v15 }
  0xf1   : > { %1358 = vmatpush.bf16.msrb.mxu3 %v3903_v21 }
 0x13d   : > { %v1182_v25 = vpop.f32.mrf.mxu0 }
 0x13e   : > { %v3948_v51 = vpack.c.bf16 %v1182_v25, %v1182_v25 }
 0x145   : > { %v1184_v32 = vpop.f32.mrf.mxu0 }
 0x147   : > { %v896_v37 = vpop.f32.mrf.mxu3 }
 0x148   : > { %v900_v38 = vpack.c.bf16 %v896_v37, %v896_v37  ;;  %v1254_v37 = vld [vmem:[#allocation9] sm:$0x7] }
 0x149   : > { %v4056_v7 = vperm.slane %v1254_v37, 2 }
 0x14a   : > { %2607 = vmatmul.msk.bf16.vlgmr.msra.gmra.mxu1 %vm937_vm0, %v900_v38 }
 0x14b   : > { %1329 = vmatpush.bf16.msra.mxu1 %v3906_v24 }
 0x14d   : > { %v3920_v39 = vpop.f32.mrf.mxu0 }
 0x14e   : > { %v4006_v29 = vpack.c.bf16 %v3920_v39, %v3920_v39  ;;  %v4024_v39 = vperm.slane %v1254_v37, 1 }
 0x14f   : > { %v898_v40 = vpop.f32.mrf.mxu3  ;;  %1330 = vmatpush.bf16.msra.mxu1 %v3909_v28 }
 0x150   : > { %v4026_v40 = vperm.slane %v1254_v37, 0 }
 0x153   : > { %1331 = vmatpush.bf16.msra.mxu1 %v3912_v31 }
 0x155   : > { %v1236_v43 = vpop.f32.mrf.mxu0 }
 0x157   : > { %v1169_v44 = vpop.f32.mrf.mxu3  ;;  %1332 = vmatpush.bf16.msra.mxu1 %v3915_v36 }
 0x158   : > { %v3931_v45 = vpack.c.bf16 %v1169_v44, %v1169_v44 }
 0x15a   : > { %2723 = vmatmul.msk.bf16.vlgmr.msrb.gmra.mxu1 %vm937_vm0, %v3803_v33  ;;  %1508 = vrot.lane.b32.xlu1 %v3931_v45, %s3511_s2 }
 0x15b   : > { %2777 = vmatmul.msk.bf16.vlgmr.msrb.gmra.mxu3 %vm937_vm0, %v3931_v45  ;;  %1398 = vmatpush.bf16.msrb.mxu1 %v3967_v61 }
 0x15f   : > { %v1171_v47 = vpop.f32.mrf.mxu3  ;;  %1399 = vmatpush.bf16.msrb.mxu1 %v3976_v4 }
 0x163   : > { %1400 = vmatpush.bf16.msrb.mxu1 %v3985_v11 }
 0x167   : > { %v1221_v48 = vpop.f32.mrf.mxu3  ;;  %1401 = vmatpush.bf16.msrb.mxu1 %v3988_v14 }
 0x168   : > { %v3942_v49 = vpack.c.bf16 %v1221_v48, %v1221_v48 }
 0x16a   : > { %2775 = vmatmul.msk.bf16.vlgmr.msra.gmra.mxu1 %vm937_vm0, %v3931_v45  ;;  %1664 = vrot.lane.b32.xlu2 %v3942_v49, %s3511_s2 }
 0x16f   : > { %v1223_v50 = vpop.f32.mrf.mxu3 }
 0x172   : > { %1862 = vrot.lane.b32.xlu2 %v3948_v51, %s3511_s2 }
 0x1c4   : > { %v1665_v12 = vpop.permute.xlu2 %1664 }
 0x1c7   : > { %v950_v17 = vpop.f32.mrf.mxu1 }
 0x1c8   : > { %v951_v18 = vadd.f32 %v3117_v16, %v950_v17 }
 0x1ca   : > { %v954_v19 = vmax.f32 %v951_v18, 0.0  ;;  %v1670_v18 = vsel %vm883_vm1, %v1665_v12, 0  ;;  %v1844_v12 = vsel %vm883_vm1, %v4006_v29, 0 }
 0x1cc   : > { %v955_v20 = vpack.c.bf16 %v954_v19, %v954_v19  ;;  %v1509_v1 = vpop.permute.xlu1 %1508 }
 0x1ce   : > { %2624 = vmatmul.msk.bf16.vlgmr.msra.gmra.mxu2 %vm937_vm0, %v955_v20 }
 0x1cf   : > { %v952_v22 = vpop.f32.mrf.mxu1  ;;  %1342 = vmatpush.bf16.msra.mxu2 %v3967_v61 }
 0x1d3   : > { %1343 = vmatpush.bf16.msra.mxu2 %v3976_v4 }
 0x1d7   : > { %v1195_v23 = vpop.f32.mrf.mxu1  ;;  %1344 = vmatpush.bf16.msra.mxu2 %v3985_v11 }
 0x1d8   : > { %v1377_v25 = vpack.c.bf16 %v1195_v23, %v1195_v23 }
 0x1da   : > { %2778 = vmatmul.msk.bf16.vlgmr.msra.gmra.mxu0 %vm937_vm0, %v1377_v25  ;;  %1559 = vrot.lane.b32.xlu1 %v1377_v25, %s3511_s2 }
 0x1db   : > { %2779 = vmatmul.msk.bf16.vlgmr.msrb.gmra.mxu1 %vm937_vm0, %v1377_v25  ;;  %1345 = vmatpush.bf16.msra.mxu2 %v3988_v14 }
 0x1de   : > { %v3999_v26 = vpop.f32.mrf.mxu3  ;;  %2724 = vmatmul.msk.bf16.vlgmr.msrb.gmra.mxu2 %vm937_vm0, %v3803_v33  ;;  %v1490_v33 = vsel %vm883_vm1, %v3942_v49, 0 }
 0x1df   : > { %v1197_v27 = vpop.f32.mrf.mxu1  ;;  %1411 = vmatpush.bf16.msrb.mxu2 %v3876_v3  ;;  %v1366_v17 = vmax.f32 %v3999_v26, 0.0 }
 0x1e1   : > { %v1376_v22 = vadd.f32 %v4056_v7, %v1366_v17 }
 0x1e2   : > { %2018 = vrot.lane.b32.xlu1 %v4006_v29, %s3511_s2 }
 0x1e3   : > { %1412 = vmatpush.bf16.msrb.mxu2 %v3885_v9  ;;  %v1436_v23 = vpack.c.bf16 %v1376_v22, %v1376_v22 }
 0x1e6   : > { %v1362_v30 = vpop.f32.mrf.mxu3 }
 0x1e7   : > { %v1334_v32 = vpop.f32.mrf.mxu1  ;;  %1413 = vmatpush.bf16.msrb.mxu2 %v3894_v15 }
 0x1e8   : > { %v1364_v49 = vmax.f32 %v1334_v32, 0.0 }
 0x1ea   : > { %v1374_v56 = vadd.f32 %v4026_v40, %v1364_v49 }
 0x1eb   : > { %1414 = vmatpush.bf16.msrb.mxu2 %v3903_v21 }
 0x1ec   : > { %v1434_v59 = vpack.c.bf16 %v1374_v56, %v1374_v56 }
 0x1ee   : > { %2776 = vmatmul.msk.bf16.vlgmr.msra.gmra.mxu2 %vm937_vm0, %v3931_v45 }
 0x1ef   : > { %1499 = vmatpush.bf16.msra.mxu2 %v1490_v33  ;;  %v1336_v34 = vpop.f32.mrf.mxu1 }
 0x1fe   : > { %2780 = vmatmul.msk.bf16.vlgmr.msrb.gmra.mxu2 %vm937_vm0, %v1377_v25 }
 0x1ff   : > { %1568 = vmatpush.bf16.msrb.mxu2 %v3906_v24 }
 0x203   : > { %1569 = vmatpush.bf16.msrb.mxu2 %v3909_v28 }
 0x207   : > { %1570 = vmatpush.bf16.msrb.mxu2 %v3912_v31 }
 0x20b   : > { %1571 = vmatpush.bf16.msrb.mxu2 %v3915_v36 }
 0x24c   : > { %v1560_v13 = vpop.permute.xlu1 %1559 }
 0x251   : > { %v4022_v35 = vpop.f32.mrf.mxu2 }
 0x257   : > { %v1390_v38 = vpop.f32.mrf.mxu0 }
 0x258   : > { %v1420_v41 = vmax.f32 %v1390_v38, 0.0  ;;  %v1403_v42 = vpop.f32.mrf.mxu1 }
 0x259   : > { %v1421_v43 = vmax.f32 %v1403_v42, 0.0  ;;  %v1006_v44 = vpop.f32.mrf.mxu2 }
 0x25a   : > { %v1423_v45 = vadd.f32 %v1420_v41, %v4026_v40  ;;  %v4082_v44 = vld [vmem:[%s4335_s27] sm:$0xff] }
 0x25b   : > { %v1424_v47 = vadd.f32 %v1421_v43, %v4024_v39 }
 0x25c   : > { %v1431_v48 = vmul.f32 %v4029_v46, %v1423_v45 }
 0x25d   : > { %v1432_v50 = vmul.f32 %v4029_v46, %v1424_v47 }
 0x25e   : > { %v1437_v52 = vpack.c.bf16 %v1431_v48, %v1431_v48 }
 0x25f   : > { %v1438_v53 = vpack.c.bf16 %v1432_v50, %v1432_v50  ;;  %v1392_v54 = vpop.f32.mrf.mxu0 }
 0x260   : > { %v1405_v55 = vpop.f32.mrf.mxu1  ;;  %1447 = vmatpush.bf16.xpose.msra.mxu3 %v1437_v52 }
 0x261   : > { %1460 = vmatpush.bf16.xpose.msrb.mxu0 %v1438_v53  ;;  %v1208_v57 = vpop.f32.mrf.mxu2 }
 0x262   : > { %v4036_v58 = vpack.c.bf16 %v1208_v57, %v1208_v57 }
 0x264   : > { %1913 = vrot.lane.b32.xlu0 %v4036_v58, %s3511_s2 }
 0x267   : > { %1448 = vmatmul.bf16.vlgmr.msra.gmra.mxu3 %v1434_v59 }
 0x268   : > { %1517 = vmatpush.bf16.msrb.mxu3 %v3906_v24 }
 0x269   : > { %1530 = vmatpush.bf16.msra.mxu0 %v3967_v61  ;;  %v1210_v60 = vpop.f32.mrf.mxu2 }
 0x26c   : > { %1518 = vmatpush.bf16.msrb.mxu3 %v3909_v28 }
 0x26d   : > { %1531 = vmatpush.bf16.msra.mxu0 %v3976_v4 }
 0x270   : > { %1519 = vmatpush.bf16.msrb.mxu3 %v3912_v31 }
 0x271   : > { %1532 = vmatpush.bf16.msra.mxu0 %v3985_v11  ;;  %v1347_v62 = vpop.f32.mrf.mxu2 }
 0x272   : > { %v1365_v63 = vmax.f32 %v1347_v62, 0.0 }
 0x274   : > { %1520 = vmatpush.bf16.msrb.mxu3 %v3915_v36  ;;  %v1375_v0 = vadd.f32 %v4024_v39, %v1365_v63 }
 0x275   : > { %1533 = vmatpush.bf16.msra.mxu0 %v3988_v14 }
 0x276   : > { %v1435_v2 = vpack.c.bf16 %v1375_v0, %v1375_v0 }
 0x277   : > { %2782 = vmatmul.msk.bf16.vlgmr.msrb.gmra.mxu3 %vm937_vm0, %v1509_v1 }
 0x278   : > { %1581 = vmatpush.bf16.msra.mxu3 %v3967_v61  ;;  %1461 = vmatmul.bf16.vlgmr.msrb.gmra.mxu0 %v1435_v2 }
 0x279   : > { %v1349_v5 = vpop.f32.mrf.mxu2  ;;  %1594 = vmatpush.bf16.msrb.mxu0 %v3876_v3 }
 0x27c   : > { %1582 = vmatpush.bf16.msra.mxu3 %v3976_v4 }
 0x27d   : > { %1595 = vmatpush.bf16.msrb.mxu0 %v3885_v9 }
 0x280   : > { %1583 = vmatpush.bf16.msra.mxu3 %v3985_v11 }
 0x281   : > { %v1416_v6 = vpop.f32.mrf.mxu2  ;;  %1596 = vmatpush.bf16.msrb.mxu0 %v3894_v15 }
 0x282   : > { %v1422_v8 = vmax.f32 %v1416_v6, 0.0 }
 0x284   : > { %1584 = vmatpush.bf16.msra.mxu3 %v3988_v14  ;;  %v1425_v10 = vadd.f32 %v1422_v8, %v4056_v7 }
 0x285   : > { %1597 = vmatpush.bf16.msrb.mxu0 %v3903_v21 }
 0x286   : > { %v1433_v16 = vmul.f32 %v4029_v46, %v1425_v10 }
 0x287   : > { %2786 = vmatmul.msk.bf16.vlgmr.msra.gmra.mxu3 %vm937_vm0, %v1560_v13 }
 0x288   : > { %v1439_v19 = vpack.c.bf16 %v1433_v16, %v1433_v16  ;;  %2783 = vmatmul.msk.bf16.vlgmr.msra.gmra.mxu0 %vm937_vm0, %v1509_v1 }
 0x289   : > { %1679 = vmatpush.bf16.msra.mxu0 %v1670_v18  ;;  %v1418_v20 = vpop.f32.mrf.mxu2 }
 0x28a   : > { %1473 = vmatpush.bf16.xpose.msra.mxu1 %v1439_v19 }
 0x291   : > { %1474 = vmatmul.bf16.vlgmr.msra.gmra.mxu1 %v1436_v23 }
 0x292   : > { %1543 = vmatpush.bf16.msrb.mxu1 %v3876_v3 }
 0x296   : > { %1544 = vmatpush.bf16.msrb.mxu1 %v3885_v9 }
 0x298   : > { %2787 = vmatmul.msk.bf16.vlgmr.msrb.gmra.mxu0 %vm937_vm0, %v1560_v13 }
 0x299   : > { %1744 = vmatpush.bf16.msrb.mxu0 %v3906_v24 }
 0x29a   : > { %1545 = vmatpush.bf16.msrb.mxu1 %v3894_v15 }
 0x29d   : > { %1745 = vmatpush.bf16.msrb.mxu0 %v3909_v28 }
 0x29e   : > { %1546 = vmatpush.bf16.msrb.mxu1 %v3903_v21 }
 0x2a1   : > { %2784 = vmatmul.msk.bf16.vlgmr.msrb.gmra.mxu1 %vm937_vm0, %v1509_v1  ;;  %1746 = vmatpush.bf16.msrb.mxu0 %v3912_v31 }
 0x2a5   : > { %1747 = vmatpush.bf16.msrb.mxu0 %v3915_v36 }
 0x2ea   : > { %v1449_v25 = vpop.f32.mrf.mxu3 }
 0x2f2   : > { %v1451_v26 = vpop.f32.mrf.mxu3 }
 0x2f5   : > { %v1462_v27 = vpop.f32.mrf.mxu0 }
 0x2f6   : > { %v1463_v41 = vadd.f32 %v1462_v27, %v1449_v25 }
 0x2fa   : > { %v4076_v30 = vpop.f32.mrf.mxu3 }
 0x2fb   : > { %v1552_v22 = vmax.f32 %v4076_v30, 0.0 }
 0x2fd   : > { %v1464_v32 = vpop.f32.mrf.mxu0  ;;  %v1555_v27 = vadd.f32 %v1552_v22, %v4026_v40 }
 0x2ff   : > { %v1612_v32 = vpack.c.bf16 %v1555_v27, %v1555_v27 }
 0x302   : > { %v1524_v33 = vpop.f32.mrf.mxu3 }
 0x305   : > { %v1535_v34 = vpop.f32.mrf.mxu0 }
 0x306   : > { %v1553_v6 = vmax.f32 %v1535_v34, 0.0 }
 0x308   : > { %v1556_v8 = vadd.f32 %v1553_v6, %v4024_v39 }
 0x30a   : > { %v1586_v37 = vpop.f32.mrf.mxu3  ;;  %v1613_v10 = vpack.c.bf16 %v1556_v8, %v1556_v8 }
 0x30b   : > { %v1604_v38 = vmax.f32 %v1586_v37, 0.0 }
 0x30d   : > { %v1607_v42 = vadd.f32 %v1604_v38, %v4024_v39  ;;  %v1537_v43 = vpop.f32.mrf.mxu0 }
 0x30e   : > { %v1475_v45 = vpop.f32.mrf.mxu1 }
 0x30f   : > { %v1476_v47 = vadd.f32 %v1475_v45, %v1463_v41  ;;  %v1610_v48 = vmul.f32 %v1607_v42, %v4029_v46 }
 0x311   : > { %v4086_v49 = vmul.f32 %v1476_v47, %v4082_v44  ;;  %v1616_v53 = vpack.c.bf16 %v1610_v48, %v1610_v48 }
 0x312   : > { %v1588_v50 = vpop.f32.mrf.mxu3 }
 0x313   : > { %v1484_v52 = vpack.c.bf16 %v4086_v49, %v4086_v49 }
 0x315   : > { %2781 = vmatmul.msk.bf16.vlgmr.msra.gmra.mxu2 %vm879_vm2, %v1484_v52  ;;  %v1599_v54 = vpop.f32.mrf.mxu0 }
 0x316   : > { %v1605_v55 = vmax.f32 %v1599_v54, 0.0  ;;  %1638 = vmatpush.bf16.xpose.msra.mxu2 %v1616_v53  ;;  %v1477_v56 = vpop.f32.mrf.mxu1  ;;  %v4145_v54 = vpop.permute.xlu2 %1862 }
 0x318   : > { %v1608_v57 = vadd.f32 %v1605_v55, %v4056_v7 }
 0x31a   : > { %v1611_v59 = vmul.f32 %v1608_v57, %v4029_v46 }
 0x31c   : > { %v1617_v60 = vpack.c.bf16 %v1611_v59, %v1611_v59 }
 0x31d   : > { %v1601_v62 = vpop.f32.mrf.mxu0 }
 0x31e   : > { %v1548_v63 = vpop.f32.mrf.mxu1  ;;  %1651 = vmatpush.bf16.xpose.msrb.mxu3 %v1617_v60 }
 0x31f   : > { %v1554_v0 = vmax.f32 %v1548_v63, 0.0 }
 0x321   : > { %v1557_v1 = vadd.f32 %v1554_v0, %v4056_v7 }
 0x323   : > { %v1614_v2 = vpack.c.bf16 %v1557_v1, %v1557_v1 }
 0x325   : > { %2785 = vmatmul.msk.bf16.vlgmr.msrb.gmra.mxu2 %vm937_vm0, %v1560_v13  ;;  %1652 = vmatmul.bf16.vlgmr.msrb.gmra.mxu3 %v1614_v2 }
 0x326   : > { %1721 = vmatpush.bf16.msra.mxu3 %v3876_v3  ;;  %v1550_v5 = vpop.f32.mrf.mxu1  ;;  %1708 = vmatpush.bf16.msrb.mxu2 %v3967_v61 }
 0x32a   : > { %1722 = vmatpush.bf16.msra.mxu3 %v3885_v9  ;;  %1709 = vmatpush.bf16.msrb.mxu2 %v3976_v4 }
 0x32e   : > { %1723 = vmatpush.bf16.msra.mxu3 %v3894_v15  ;;  %1710 = vmatpush.bf16.msrb.mxu2 %v3985_v11 }
 0x332   : > { %1724 = vmatpush.bf16.msra.mxu3 %v3903_v21  ;;  %1711 = vmatpush.bf16.msrb.mxu2 %v3988_v14 }
 0x335   : > { %1639 = vmatmul.bf16.vlgmr.msra.gmra.mxu2 %v1613_v10  ;;  %2791 = vmatmul.msk.bf16.vlgmr.msra.gmra.mxu3 %vm937_vm0, %v3948_v51 }
 0x336   : > { %1770 = vmatpush.bf16.msra.mxu2 %v3876_v3 }
 0x33a   : > { %1771 = vmatpush.bf16.msra.mxu2 %v3885_v9 }
 0x33e   : > { %1772 = vmatpush.bf16.msra.mxu2 %v3894_v15 }
 0x342   : > { %1773 = vmatpush.bf16.msra.mxu2 %v3903_v21 }
 0x345   : > { %2790 = vmatmul.msk.bf16.vlgmr.msrb.gmra.mxu2 %vm937_vm0, %v3948_v51 }
 0x346   : > { %1853 = vmatpush.bf16.msrb.mxu2 %v1844_v12 }
 0x355   : > { %2794 = vmatmul.msk.bf16.vlgmr.msra.gmra.mxu2 %vm937_vm0, %v4036_v58 }
 0x356   : > { %1922 = vmatpush.bf16.msra.mxu2 %v3906_v24 }
 0x35a   : > { %1923 = vmatpush.bf16.msra.mxu2 %v3909_v28 }
 0x35e   : > { %1924 = vmatpush.bf16.msra.mxu2 %v3912_v31 }
 0x362   : > { %1925 = vmatpush.bf16.msra.mxu2 %v3915_v36 }
 0x398   : > { %v4120_v13 = vpop.f32.mrf.mxu2 }
 0x3a0   : > { %v1503_v16 = vpop.f32.mrf.mxu2 }
 0x3a8   : > { %v1573_v17 = vpop.f32.mrf.mxu2  ;;  %v1653_v29 = vpop.f32.mrf.mxu3 }
 0x3a9   : > { %v1603_v18 = vmax.f32 %v1573_v17, 0.0 }
 0x3ab   : > { %v1606_v19 = vadd.f32 %v1603_v18, %v4026_v40 }
 0x3ad   : > { %v1609_v20 = vmul.f32 %v1606_v19, %v4029_v46  ;;  %v2019_v19 = vpop.permute.xlu1 %2018 }
 0x3ae   : > { %v2024_v22 = vsel %vm883_vm1, %v2019_v19, 0 }
 0x3af   : > { %v1615_v23 = vpack.c.bf16 %v1609_v20, %v1609_v20 }
 0x3b0   : > { %v1575_v25 = vpop.f32.mrf.mxu2  ;;  %v1655_v26 = vpop.f32.mrf.mxu3 }
 0x3b1   : > { %1625 = vmatpush.bf16.xpose.msra.mxu1 %v1615_v23  ;;  %v1914_v25 = vpop.permute.xlu0 %1913 }
 0x3b8   : > { %1626 = vmatmul.bf16.vlgmr.msra.gmra.mxu1 %v1612_v32  ;;  %v1640_v33 = vpop.f32.mrf.mxu2  ;;  %v1726_v34 = vpop.f32.mrf.mxu3 }
 0x3b9   : > { %1695 = vmatpush.bf16.msrb.mxu1 %v3906_v24  ;;  %v1732_v48 = vmax.f32 %v1726_v34, 0.0 }
 0x3bb   : > { %v1735_v53 = vadd.f32 %v1732_v48, %v4056_v7 }
 0x3bd   : > { %1696 = vmatpush.bf16.msrb.mxu1 %v3909_v28 }
 0x3c0   : > { %v1642_v30 = vpop.f32.mrf.mxu2  ;;  %v1728_v37 = vpop.f32.mrf.mxu3 }
 0x3c1   : > { %1697 = vmatpush.bf16.msrb.mxu1 %v3912_v31 }
 0x3c5   : > { %1698 = vmatpush.bf16.msrb.mxu1 %v3915_v36 }
 0x3c8   : > { %2789 = vmatmul.msk.bf16.vlgmr.msrb.gmra.mxu1 %vm937_vm0, %v3948_v51  ;;  %v1713_v38 = vpop.f32.mrf.mxu2  ;;  %v1790_v51 = vpack.c.bf16 %v1735_v53, %v1735_v53 }
 0x3c9   : > { %1757 = vmatpush.bf16.msra.mxu1 %v3967_v61  ;;  %v1731_v10 = vmax.f32 %v1713_v38, 0.0 }
 0x3cb   : > { %v1734_v17 = vadd.f32 %v1731_v10, %v4024_v39 }
 0x3cd   : > { %1758 = vmatpush.bf16.msra.mxu1 %v3976_v4 }
 0x3d0   : > { %v1715_v41 = vpop.f32.mrf.mxu2 }
 0x3d1   : > { %1759 = vmatpush.bf16.msra.mxu1 %v3985_v11 }
 0x3d5   : > { %1760 = vmatpush.bf16.msra.mxu1 %v3988_v14 }
 0x3d8   : > { %2793 = vmatmul.msk.bf16.vlgmr.msra.gmra.mxu1 %vm937_vm0, %v4036_v58  ;;  %v1775_v42 = vpop.f32.mrf.mxu2 }
 0x3d9   : > { %v1781_v43 = vmax.f32 %v1775_v42, 0.0 }
 0x3db   : > { %v1784_v45 = vadd.f32 %v1781_v43, %v4056_v7 }
 0x3dd   : > { %v1787_v47 = vmul.f32 %v1784_v45, %v4029_v46 }
 0x3df   : > { %v1793_v50 = vpack.c.bf16 %v1787_v47, %v1787_v47 }
 0x3e0   : > { %v1777_v52 = vpop.f32.mrf.mxu2 }
 0x3e1   : > { %1827 = vmatpush.bf16.xpose.msrb.mxu1 %v1793_v50 }
 0x3e8   : > { %1828 = vmatmul.bf16.vlgmr.msrb.gmra.mxu1 %v1790_v51 }
 0x3e9   : > { %1897 = vmatpush.bf16.msra.mxu1 %v3876_v3 }
 0x3ed   : > { %1898 = vmatpush.bf16.msra.mxu1 %v3885_v9 }
 0x3f1   : > { %1899 = vmatpush.bf16.msra.mxu1 %v3894_v15 }
 0x3f5   : > { %1900 = vmatpush.bf16.msra.mxu1 %v3903_v21 }
 0x3f8   : > { %2798 = vmatmul.msk.bf16.vlgmr.msra.gmra.mxu1 %vm937_vm0, %v4145_v54 }
 0x435   : > { %v1627_v55 = vpop.f32.mrf.mxu1 }
 0x436   : > { %v1641_v56 = vadd.f32 %v1640_v33, %v1627_v55 }
 0x438   : > { %v1654_v57 = vadd.f32 %v1653_v29, %v1641_v56  ;;  %v1789_v29 = vpack.c.bf16 %v1734_v17, %v1734_v17 }
 0x43a   : > { %v1657_v59 = vmul.f32 %v1654_v57, %v4082_v44 }
 0x43c   : > { %v1658_v60 = vsel %vm879_vm2, %v1657_v59, 0.0  ;;  %v1662_v62 = vpack.c.bf16 %v1657_v59, %v1657_v59 }
 0x43d   : > { %v1629_v63 = vpop.f32.mrf.mxu1  ;;  %1659 = vadd.xlane.f32.xlu0 %v1658_v60 }
 0x43e   : > { %2788 = vmatmul.msk.bf16.vlgmr.msra.gmra.mxu0 %vm879_vm2, %v1662_v62 }
 0x445   : > { %v1700_v0 = vpop.f32.mrf.mxu1 }
 0x446   : > { %v1730_v37 = vmax.f32 %v1700_v0, 0.0 }
 0x448   : > { %v1733_v42 = vadd.f32 %v1730_v37, %v4026_v40 }
 0x44a   : > { %v1788_v43 = vpack.c.bf16 %v1733_v42, %v1733_v42  ;;  %v2964_v42 = vld [vmem:[%s4305_s13 + $0x10] sm:$0xff] }
 0x44d   : > { %v1702_v1 = vpop.f32.mrf.mxu1 }
 0x44e   : > { %2792 = vmatmul.msk.bf16.vlgmr.msrb.gmra.mxu0 %vm937_vm0, %v4036_v58 }
 0x455   : > { %v1762_v2 = vpop.f32.mrf.mxu1 }
 0x456   : > { %v1780_v5 = vmax.f32 %v1762_v2, 0.0 }
 0x458   : > { %v1783_v6 = vadd.f32 %v1780_v5, %v4024_v39 }
 0x45a   : > { %v1786_v8 = vmul.f32 %v1783_v6, %v4029_v46 }
 0x45c   : > { %v1792_v12 = vpack.c.bf16 %v1786_v8, %v1786_v8 }
 0x45d   : > { %v1764_v16 = vpop.f32.mrf.mxu1 }
 0x45e   : > { %1814 = vmatpush.bf16.xpose.msra.mxu0 %v1792_v12 }
 0x465   : > { %1815 = vmatmul.bf16.vlgmr.msra.gmra.mxu0 %v1789_v29  ;;  %v1829_v18 = vpop.f32.mrf.mxu1 }
 0x466   : > { %1884 = vmatpush.bf16.msrb.mxu0 %v3967_v61 }
 0x46a   : > { %1885 = vmatpush.bf16.msrb.mxu0 %v3976_v4 }
 0x46d   : > { %v1831_v58 = vpop.f32.mrf.mxu1 }
 0x46e   : > { %1886 = vmatpush.bf16.msrb.mxu0 %v3985_v11 }
 0x472   : > { %1887 = vmatpush.bf16.msrb.mxu0 %v3988_v14 }
 0x475   : > { %2797 = vmatmul.msk.bf16.vlgmr.msrb.gmra.mxu0 %vm937_vm0, %v4145_v54  ;;  %v1902_v20 = vpop.f32.mrf.mxu1 }
 0x476   : > { %1948 = vmatpush.bf16.msra.mxu0 %v3876_v3  ;;  %v1908_v50 = vmax.f32 %v1902_v20, 0.0 }
 0x47a   : > { %1949 = vmatpush.bf16.msra.mxu0 %v3885_v9 }
 0x47d   : > { %v1904_v23 = vpop.f32.mrf.mxu1 }
 0x47e   : > { %1950 = vmatpush.bf16.msra.mxu0 %v3894_v15 }
 0x482   : > { %1951 = vmatpush.bf16.msra.mxu0 %v3903_v21 }
 0x485   : > { %2801 = vmatmul.msk.bf16.vlgmr.msra.gmra.mxu0 %vm937_vm0, %v1914_v25 }
 0x486   : > { %2033 = vmatpush.bf16.msrb.mxu0 %v2024_v22 }
 0x4b0   : > { %v1660_v3 = vpop.xlane.xlu0 %1659 }
 0x4b1   : > { %v1661_v26 = vmax.f32 %v1660_v3, 1e-09 }
 0x4b3   : > { %3124 = vrcp.f32 %v1661_v26 }
 0x4b9   : > { %v3125_v9 = vpop.eup %3124 }
 0x4bb   : > { %v1681_v27 = vpop.f32.mrf.mxu0 }
 0x4bc   : > { %v1686_v15 = vmul.f32 %v3125_v9, %v1681_v27  ;;  %v2969_v27 = vld [vmem:[%s4305_s13 + $0x38] sm:$0xff] }
 0x4be   : > { %2042 = vrot.lane.b32.xlu0 %v1686_v15, %s3511_s2  ;;  %v2968_v15 = vld [vmem:[%s4305_s13 + $0x30] sm:$0xff] }
 0x4c3   : > { %v1683_v32 = vpop.f32.mrf.mxu0 }
 0x4cb   : > { %v1749_v33 = vpop.f32.mrf.mxu0 }
 0x4cc   : > { %v1779_v34 = vmax.f32 %v1749_v33, 0.0 }
 0x4ce   : > { %v1782_v30 = vadd.f32 %v1779_v34, %v4026_v40 }
 0x4d0   : > { %v1785_v21 = vmul.f32 %v1782_v30, %v4029_v46 }
 0x4d2   : > { %v1791_v38 = vpack.c.bf16 %v1785_v21, %v1785_v21 }
 0x4d3   : > { %v1751_v41 = vpop.f32.mrf.mxu0 }
 0x4d4   : > { %1801 = vmatpush.bf16.xpose.msrb.mxu3 %v1791_v38  ;;  %v1480_v38 = vsel %vm879_vm2, %v4086_v49, 0.0  ;;  %v2966_v41 = vld [vmem:[%s4305_s13 + $0x20] sm:$0xff]  ;;  %v2963_v49 = vld [vmem:[%s4305_s13 + $0x8] sm:$0xff] }
 0x4db   : > { %1802 = vmatmul.bf16.vlgmr.msrb.gmra.mxu3 %v1788_v43  ;;  %v2962_v43 = vld [vmem:[%s4305_s13] sm:$0xff] }
 0x4dc   : > { %1871 = vmatpush.bf16.msra.mxu3 %v3906_v24 }
 0x4e0   : > { %1872 = vmatpush.bf16.msra.mxu3 %v3909_v28 }
 0x4e2   : > { %v1816_v45 = vpop.f32.mrf.mxu0 }
 0x4e4   : > { %1873 = vmatpush.bf16.msra.mxu3 %v3912_v31 }
 0x4e8   : > { %1874 = vmatpush.bf16.msra.mxu3 %v3915_v36 }
 0x4ea   : > { %v1818_v47 = vpop.f32.mrf.mxu0 }
 0x4eb   : > { %2796 = vmatmul.msk.bf16.vlgmr.msra.gmra.mxu3 %vm937_vm0, %v4145_v54  ;;  %v2976_v47 = vld [vmem:[%s4305_s13 + $0x70] sm:$0xff] }
 0x4ec   : > { %1935 = vmatpush.bf16.msrb.mxu3 %v3967_v61 }
 0x4f0   : > { %1936 = vmatpush.bf16.msrb.mxu3 %v3976_v4 }
 0x4f2   : > { %v1889_v24 = vpop.f32.mrf.mxu0 }
 0x4f3   : > { %v1907_v2 = vmax.f32 %v1889_v24, 0.0  ;;  %v2975_v24 = vld [vmem:[%s4305_s13 + $0x68] sm:$0xff] }
 0x4f4   : > { %1937 = vmatpush.bf16.msrb.mxu3 %v3985_v11  ;;  %v1911_v11 = vadd.f32 %v1908_v50, %v4056_v7 }
 0x4f5   : > { %v1910_v8 = vadd.f32 %v1907_v2, %v4024_v39 }
 0x4f6   : > { %v1968_v53 = vpack.c.bf16 %v1911_v11, %v1911_v11 }
 0x4f7   : > { %v1967_v10 = vpack.c.bf16 %v1910_v8, %v1910_v8 }
 0x4f8   : > { %1938 = vmatpush.bf16.msrb.mxu3 %v3988_v14 }
 0x4fa   : > { %v1891_v28 = vpop.f32.mrf.mxu0 }
 0x4fb   : > { %2800 = vmatmul.msk.bf16.vlgmr.msrb.gmra.mxu3 %vm937_vm0, %v1914_v25 }
 0x502   : > { %v1953_v31 = vpop.f32.mrf.mxu0 }
 0x503   : > { %v1959_v48 = vmax.f32 %v1953_v31, 0.0 }
 0x505   : > { %v1962_v36 = vadd.f32 %v1959_v48, %v4056_v7  ;;  %v2974_v48 = vld [vmem:[%s4305_s13 + $0x60] sm:$0xff] }
 0x507   : > { %v1965_v61 = vmul.f32 %v1962_v36, %v4029_v46  ;;  %v2973_v36 = vld [vmem:[%s4305_s13 + $0x58] sm:$0xff] }
 0x509   : > { %v1971_v4 = vpack.c.bf16 %v1965_v61, %v1965_v61 }
 0x50a   : > { %v1955_v52 = vpop.f32.mrf.mxu0 }
 0x50b   : > { %2005 = vmatpush.bf16.xpose.msra.mxu3 %v1971_v4  ;;  %v2972_v4 = vld [vmem:[%s4305_s13 + $0x50] sm:$0xff] }
 0x512   : > { %2006 = vmatmul.bf16.vlgmr.msra.gmra.mxu3 %v1968_v53 }
 0x55e   : > { %v1803_v51 = vpop.f32.mrf.mxu3 }
 0x55f   : > { %v1817_v14 = vadd.f32 %v1816_v45, %v1803_v51  ;;  %v2977_v45 = vld [vmem:[%s4305_s13 + $0x78] sm:$0xff]  ;;  %v2971_v51 = vld [vmem:[%s4305_s13 + $0x48] sm:$0xff] }
 0x561   : > { %v1830_v54 = vadd.f32 %v1829_v18, %v1817_v14 }
 0x563   : > { %v1833_v55 = vmul.f32 %v1830_v54, %v4082_v44 }
 0x565   : > { %v1834_v56 = vsel %vm879_vm2, %v1833_v55, 0.0  ;;  %v1838_v57 = vpack.c.bf16 %v1833_v55, %v1833_v55  ;;  %v2043_v55 = vpop.permute.xlu0 %2042 }
 0x566   : > { %v1805_v59 = vpop.f32.mrf.mxu3  ;;  %1835 = vadd.xlane.f32.xlu1 %v1834_v56 }
 0x567   : > { %2795 = vmatmul.msk.bf16.vlgmr.msrb.gmra.mxu2 %vm879_vm2, %v1838_v57 }
 0x56e   : > { %v1876_v60 = vpop.f32.mrf.mxu3 }
 0x56f   : > { %v1906_v22 = vmax.f32 %v1876_v60, 0.0  ;;  %v2970_v60 = vld [vmem:[%s4305_s13 + $0x40] sm:$0xff] }
 0x571   : > { %v1909_v3 = vadd.f32 %v1906_v22, %v4026_v40  ;;  %v3118_v22 = vld [vmem:[#allocation4] ss:$0 sm:$0xff] }
 0x576   : > { %v1878_v62 = vpop.f32.mrf.mxu3 }
 0x577   : > { %2799 = vmatmul.msk.bf16.vlgmr.msra.gmra.mxu2 %vm937_vm0, %v1914_v25 }
 0x57e   : > { %v1940_v63 = vpop.f32.mrf.mxu3 }
 0x57f   : > { %v1958_v7 = vmax.f32 %v1940_v63, 0.0 }
 0x581   : > { %v1961_v0 = vadd.f32 %v1958_v7, %v4024_v39  ;;  %v1966_v39 = vpack.c.bf16 %v1909_v3, %v1909_v3  ;;  %v3119_v3 = vld [vmem:[#allocation6] ss:$0 sm:$0xff] }
 0x583   : > { %v1964_v1 = vmul.f32 %v1961_v0, %v4029_v46 }
 0x585   : > { %v1970_v5 = vpack.c.bf16 %v1964_v1, %v1964_v1 }
 0x586   : > { %v1942_v6 = vpop.f32.mrf.mxu3 }
 0x587   : > { %1992 = vmatpush.bf16.xpose.msrb.mxu2 %v1970_v5  ;;  %v2981_v5 = vld [vmem:[#allocation13 + $0x18] sm:$0xff]  ;;  %v2980_v6 = vld [vmem:[#allocation13 + $0x10] sm:$0xff] }
 0x588   : > { %2263 = vmatpush.bf16.msrb.mxu3 %v2981_v5 }
 0x58c   : > { %2264 = vmatpush.bf16.msrb.mxu3 %v2980_v6 }
 0x58e   : > { %1993 = vmatmul.bf16.vlgmr.msrb.gmra.mxu2 %v1967_v10 }
 0x58f   : > { %2204 = vmatpush.bf16.msra.mxu2 %v2977_v45  ;;  %v3122_v45 = vld [vmem:[#allocation16] ss:$0 sm:$0xff] }
 0x593   : > { %2205 = vmatpush.bf16.msra.mxu2 %v2976_v47  ;;  %v3123_v47 = vld [vmem:[#allocation18] ss:$0 sm:$0xff] }
 0x595   : > { %v2007_v12 = vpop.f32.mrf.mxu3 }
 0x597   : > { %2206 = vmatpush.bf16.msra.mxu2 %v2975_v24 }
 0x59b   : > { %2207 = vmatpush.bf16.msra.mxu2 %v2974_v48 }
 0x59d   : > { %v2009_v16 = vpop.f32.mrf.mxu3 }
 0x59e   : > { %v2978_v16 = vld [vmem:[#allocation13] sm:$0xff] }
 0x59f   : > { %2208 = vmatpush.bf16.msra.mxu2 %v2973_v36 }
 0x5a3   : > { %2209 = vmatpush.bf16.msra.mxu2 %v2972_v4 }
 0x5a7   : > { %2210 = vmatpush.bf16.msra.mxu2 %v2971_v51 }
 0x5ab   : > { %2211 = vmatpush.bf16.msra.mxu2 %v2970_v60 }
 0x5d9   : > { %v1836_v62 = vpop.xlane.xlu1 %1835 }
 0x5da   : > { %v1837_v63 = vmax.f32 %v1836_v62, 1e-09 }
 0x5ea   : > { %v4194_v17 = vpop.f32.mrf.mxu2 }
 0x5f2   : > { %v1857_v29 = vpop.f32.mrf.mxu2 }
 0x5f3   : > { %v2988_v29 = vld [vmem:[%s4310_s18 + $0x30] sm:$0xff] }
 0x5fa   : > { %v1927_v18 = vpop.f32.mrf.mxu2 }
 0x5fb   : > { %v1957_v58 = vmax.f32 %v1927_v18, 0.0  ;;  %v2987_v18 = vld [vmem:[%s4310_s18 + $0x28] sm:$0xff] }
 0x5fd   : > { %v1960_v19 = vadd.f32 %v1957_v58, %v4026_v40  ;;  %v2986_v58 = vld [vmem:[%s4310_s18 + $0x20] sm:$0xff] }
 0x5ff   : > { %v1963_v20 = vmul.f32 %v1960_v19, %v4029_v46  ;;  %v2967_v46 = vld [vmem:[%s4305_s13 + $0x28] sm:$0xff] }
 0x600   : > { %v3116_v19 = vld [vmem:[#allocation12] ss:$0 sm:$0xff] }
 0x601   : > { %v1969_v23 = vpack.c.bf16 %v1963_v20, %v1963_v20  ;;  %v2985_v20 = vld [vmem:[%s4310_s18 + $0x18] sm:$0xff] }
 0x602   : > { %v1929_v25 = vpop.f32.mrf.mxu2 }
 0x603   : > { %1979 = vmatpush.bf16.xpose.msrb.mxu1 %v1969_v23  ;;  %v3132_v23 = vld [vmem:[%s3790_s23] sm:$0xff] }
 0x604   : > { %v2055_v25 = vmul.f32 %v3132_v23, %v3116_v19 }
 0x60a   : > { %1980 = vmatmul.bf16.vlgmr.msrb.gmra.mxu1 %v1966_v39  ;;  %v3120_v39 = vld [vmem:[#allocation10] ss:$0 sm:$0xff] }
 0x60b   : > { %2191 = vmatpush.bf16.msra.mxu1 %v2969_v27  ;;  %v1012_v27 = vmul.f32 %v3132_v23, %v3119_v3 }
 0x60f   : > { %2192 = vmatpush.bf16.msra.mxu1 %v2968_v15  ;;  %v2060_v15 = vadd.f32 %v3120_v39, %v2055_v25 }
 0x611   : > { %v1994_v26 = vpop.f32.mrf.mxu2 }
 0x613   : > { %2193 = vmatpush.bf16.msra.mxu1 %v2967_v46 }
 0x617   : > { %2194 = vmatpush.bf16.msra.mxu1 %v2966_v41 }
 0x619   : > { %v1996_v9 = vpop.f32.mrf.mxu2 }
 0x61a   : > { %v1005_v9 = vadd.f32 %v3118_v22, %v4022_v35  ;;  %v2982_v35 = vld [vmem:[%s4310_s18] sm:$0xff] }
 0x687   : > { %v1981_v40 = vpop.f32.mrf.mxu1 }
 0x688   : > { %v1995_v32 = vadd.f32 %v1994_v26, %v1981_v40  ;;  %v2984_v26 = vld [vmem:[%s4310_s18 + $0x10] sm:$0xff] }
 0x68a   : > { %v2008_v33 = vadd.f32 %v2007_v12, %v1995_v32  ;;  %v2979_v12 = vld [vmem:[#allocation13 + $0x8] sm:$0xff]  ;;  %v1013_v32 = vadd.f32 %v1012_v27, %v1005_v9 }
 0x68b   : > { %2265 = vmatpush.bf16.msrb.mxu3 %v2979_v12 }
 0x68c   : > { %v2011_v34 = vmul.f32 %v2008_v33, %v4082_v44  ;;  %v2965_v44 = vld [vmem:[%s4305_s13 + $0x18] sm:$0xff] }
 0x68d   : > { %2195 = vmatpush.bf16.msra.mxu1 %v2965_v44 }
 0x68e   : > { %v2012_v30 = vsel %vm879_vm2, %v2011_v34, 0.0  ;;  %v2016_v21 = vpack.c.bf16 %v2011_v34, %v2011_v34 }
 0x68f   : > { %v1983_v37 = vpop.f32.mrf.mxu1  ;;  %2013 = vadd.xlane.f32.xlu2 %v2012_v30  ;;  %2266 = vmatpush.bf16.msrb.mxu3 %v2978_v16 }
 0x690   : > { %2802 = vmatmul.msk.bf16.vlgmr.msrb.gmra.mxu0 %vm879_vm2, %v2016_v21  ;;  %v2983_v37 = vld [vmem:[%s4310_s18 + $0x8] sm:$0xff] }
 0x691   : > { %2196 = vmatpush.bf16.msra.mxu1 %v2964_v42 }
 0x695   : > { %2197 = vmatpush.bf16.msra.mxu1 %v2963_v49 }
 0x697   : > { %1481 = vadd.xlane.f32.xlu2 %v1480_v38  ;;  %v3121_v38 = vld [vmem:[#allocation15] ss:$0 sm:$0xff] }
 0x699   : > { %2198 = vmatpush.bf16.msra.mxu1 %v2962_v43 }
 0x702   : > { %v2014_v28 = vpop.xlane.xlu2 %2013 }
 0x703   : > { %v2015_v31 = vmax.f32 %v2014_v28, 1e-09 }
 0x705   : > { %3126 = vrcp.f32 %v2015_v31 }
 0x70a   : > { %v1482_v61 = vpop.xlane.xlu2 %1481 }
 0x70b   : > { %v1483_v50 = vmax.f32 %v1482_v61, 1e-09  ;;  %v3127_v52 = vpop.eup %3126 }
 0x70d   : > { %3128 = vrcp.f32 %v1483_v50  ;;  %v2035_v11 = vpop.f32.mrf.mxu0 }
 0x70e   : > { %v2040_v53 = vmul.f32 %v3127_v52, %v2035_v11  ;;  %3130 = vrcp.f32 %v1837_v63 }
 0x710   : > { %2046 = vrot.lane.b32.xlu2 %v2040_v53, %s3511_s2 }
 0x713   : > { %v3129_v14 = vpop.eup %3128 }
 0x714   : > { %v1506_v54 = vmul.f32 %v3129_v14, %v4120_v13  ;;  %v3131_v7 = vpop.eup %3130 }
 0x715   : > { %v2037_v56 = vpop.f32.mrf.mxu0  ;;  %v1860_v0 = vmul.f32 %v3131_v7, %v4194_v17  ;;  %v2989_v17 = vld [vmem:[%s4310_s18 + $0x38] sm:$0xff] }
 0x716   : > { %v2049_v57 = vsel %vm937_vm0, %v1506_v54, %v2043_v55  ;;  %2342 = vmatpush.bf16.msra.mxu0 %v2989_v17 }
 0x717   : > { %v2061_v59 = vpack.c.bf16 %v2049_v57, %v2049_v57 }
 0x719   : > { %2199 = vmatmul.bf16.vlgmr.msra.gmra.mxu1 %v2061_v59 }
 0x71a   : > { %2343 = vmatpush.bf16.msra.mxu0 %v2988_v29 }
 0x71e   : > { %2344 = vmatpush.bf16.msra.mxu0 %v2987_v18 }
 0x722   : > { %2345 = vmatpush.bf16.msra.mxu0 %v2986_v58 }
 0x726   : > { %2346 = vmatpush.bf16.msra.mxu0 %v2985_v20 }
 0x72a   : > { %2347 = vmatpush.bf16.msra.mxu0 %v2984_v26 }
 0x72e   : > { %2348 = vmatpush.bf16.msra.mxu0 %v2983_v37 }
 0x732   : > { %2349 = vmatpush.bf16.msra.mxu0 %v2982_v35 }
 0x76a   : > { %v2047_v1 = vpop.permute.xlu2 %2046 }
 0x76b   : > { %v2050_v13 = vsel %vm937_vm0, %v1860_v0, %v2047_v1 }
 0x76c   : > { %v2062_v2 = vpack.c.bf16 %v2050_v13, %v2050_v13 }
 0x76e   : > { %2212 = vmatmul.bf16.vlgmr.msra.gmra.mxu2 %v2062_v2 }
 0x796   : > { %v2200_v8 = vpop.f32.mrf.mxu1 }
 0x79e   : > { %v2202_v10 = vpop.f32.mrf.mxu1 }
 0x7f1   : > { %v2213_v46 = vpop.f32.mrf.mxu2 }
 0x7f2   : > { %v2214_v40 = vadd.f32 %v2213_v46, %v2200_v8 }
 0x7f4   : > { %v2217_v33 = vadd.f32 %v2214_v40, %v2060_v15 }
 0x7f6   : > { %v2218_v34 = vadd.f32 %v2217_v33, %v1013_v32 }
 0x7f8   : > { %v2219_v30 = vpack.c.bf16 %v2218_v34, %v2218_v34  ;;  %v2359_v31 = vmul.f32 %v3123_v47, %v2218_v34 }
 0x7f9   : > { %v2215_v21 = vpop.f32.mrf.mxu2 }
 0x7fa   : > { %2883 = vmatmul.msk.bf16.vlgmr.msrb.gmra.mxu3 %vm937_vm0, %v2219_v30 }
 0x87d   : > { %v2268_v41 = vpop.f32.mrf.mxu3 }
 0x87e   : > { %v2269_v44 = vadd.f32 %v3121_v38, %v2268_v41 }
 0x880   : > { %v2272_v42 = vmax.f32 %v2269_v44, 0.0 }
 0x882   : > { %v2273_v49 = vpack.c.bf16 %v2272_v42, %v2272_v42 }
 0x884   : > { %2350 = vmatmul.bf16.vlgmr.msra.gmra.mxu0 %v2273_v49 }
 0x885   : > { %v2270_v43 = vpop.f32.mrf.mxu3 }
 0x901   : > { %v2351_v24 = vpop.f32.mrf.mxu0 }
 0x902   : > { %v2352_v28 = vadd.f32 %v3122_v45, %v2351_v24 }
 0x904   : > { %v2360_v48 = vadd.f32 %v2359_v31, %v2352_v28 }
 0x906   : > { %2361 = vst.msk [vmem:[%s866_s11] sm:$0xff] %vm937_vm0, %v2360_v48 }
 0x909   : > { %v2353_v36 = vpop.f32.mrf.mxu0 }
 0x90a PF: > { %s4337_s22 = sld [smem:[#allocation25_spill]] }
 0x910   : > { %s37_s2 = sadd.s32 1, %s4337_s22  }
 0x911   : > { %p34_p7 = scmp.ge.s32.totalorder %s37_s2, 4  }
 0x913   :  { %36 = sbr.rel (!%p34_p7) target bundleno = 16 (0x10), region = 188 }
 0x918   :  { %2381 = vsyncpa [#allocation3], 1 }
 0x919   :  { %2383 = vsyncpa [#allocation3 + $0x1], 1 }
 0x91a   :  { %2384 = vsyncpa [#allocation5], 1 }
 0x91b   :  { %2385 = vsyncpa [#allocation8], 1 }
 0x91c   :  { %2386 = vsyncpa [#allocation11], 1 }
 0x91d   :  { %2387 = vsyncpa [#allocation14], 1 }
 0x91e   :  { %2388 = vsyncpa [#allocation17], 1 }

// kernel: spd_encoder_forward.14
= control target key start
LH: loop header
LB: loop body
LE: loop exit
PB: predicated region body
PF: predicated region fallthrough
CT: control target
= control target key end

     0   :  { %s4365_s0 = inlined_call_operand.vmem [shape: f32[16,8], index: 0, kind: input, shape index: {}]   ;;  %s4366_s1 = inlined_call_operand.vmem [shape: f32[16,64], index: 1, kind: input, shape index: {}]   ;;  %s4367_s2 = inlined_call_operand.vmem [shape: f32[16,1], index: 2, kind: input, shape index: {}]   ;;  %s4368_s3 = inlined_call_operand.vmem [shape: f32[16,1], index: 3, kind: input, shape index: {}]   ;;  %s4369_s4 = inlined_call_operand.vmem [shape: f32[8,8], index: 4, kind: input, shape index: {}]   ;;  %s4370_s5 = inlined_call_operand.hbm [shape: bf16[64,64], index: 5, kind: input, shape index: {}]   ;;  %s4371_s6 = inlined_call_operand.vmem [shape: f32[1,64], index: 6, kind: input, shape index: {}]   ;;  %s4372_s7 = inlined_call_operand.hbm [shape: bf16[64,64], index: 7, kind: input, shape index: {}]   ;;  %s4373_s8 = inlined_call_operand.hbm [shape: f32[1,64], index: 8, kind: input, shape index: {}]   ;;  %s4374_s9 = inlined_call_operand.hbm [shape: f32[1,64], index: 9, kind: input, shape index: {}]   ;;  %s4375_s10 = inlined_call_operand.vmem [shape: bf16[64,768], index: 10, kind: input, shape index: {}]   ;;  %s4376_s11 = inlined_call_operand.hbm [shape: bf16[64,384], index: 11, kind: input, shape index: {}]   ;;  %s4377_s12 = inlined_call_operand.hbm [shape: f32[1,384], index: 12, kind: input, shape index: {}]   ;;  %s4378_s13 = inlined_call_operand.vmem [shape: bf16[256,64], index: 13, kind: input, shape index: {}]   ;;  %s4379_s14 = inlined_call_operand.hbm [shape: f32[1,64], index: 14, kind: input, shape index: {}]   ;;  %s4380_s15 = inlined_call_operand.hbm [shape: f32[1,64], index: 15, kind: input, shape index: {}]   ;;  %s4381_s16 = inlined_call_operand.hbm [shape: bf16[64,128], index: 16, kind: input, shape index: {}]   ;;  %s4382_s17 = inlined_call_operand.hbm [shape: f32[1,128], index: 17, kind: input, shape index: {}]   ;;  %s4383_s18 = inlined_call_operand.vmem [shape: bf16[128,64], index: 18, kind: input, shape index: {}]   ;;  %s4384_s19 = inlined_call_operand.hbm [shape: f32[1,64], index: 19, kind: input, shape index: {}]   ;;  %s4385_s20 = inlined_call_operand.hbm [shape: f32[1,64], index: 20, kind: input, shape index: {}]   ;;  %s4386_s21 = inlined_call_operand.vmem [shape: f32[16,64], index: 21, kind: output, shape index: {}]  }
   0x1   :  { %4389 = sst [smem:[#allocation29_spill]] %s4365_s0 }
   0x2   :  { %4390 = sst [smem:[#allocation30_spill]] %s4366_s1 }
   0x3   :  { %4391 = sst [smem:[#allocation31_spill]] %s4367_s2 }
   0x4   :  { %4392 = sst [smem:[#allocation32_spill]] %s4368_s3 }
   0x5   :  { %4393 = sst [smem:[#allocation33_spill]] %s4369_s4 }
   0x6   :  { %4394 = sst [smem:[#allocation34_spill]] %s4370_s5 }
   0x7   :  { %4395 = sst [smem:[#allocation35_spill]] %s4372_s7 }
   0x8   :  { %4396 = sst [smem:[#allocation36_spill]] %s4374_s9 }
   0x9   :  { %4397 = sst [smem:[#allocation37_spill]] %s4377_s12 }
   0xa   :  { %4398 = sst [smem:[#allocation38_spill]] %s4386_s21 }
   0xb   :  { %26 = vsyncpa [#allocation3], 0 }
   0xc   :  { %27 = vsyncpa [#allocation5], 0 }
   0xd   :  { %28 = vsyncpa [#allocation8], 0 }
   0xe   :  { %29 = vsyncpa [#allocation11], 0 }
   0xf   :  { %30 = vsyncpa [#allocation14], 0 }
  0x10   :  { %31 = vsyncpa [#allocation17], 0 }
  0x11   :  { %32 = vsyncpa [#allocation20], 0  ;;  %s3698_s2 = smov 0  }
  0x12 LB: > { %4399 = sst [smem:[#allocation28_spill]] %s3568_s2  ;;  %s3704_s25 = sadd.s32 4294967295, %s3568_s2   ;;  %s3568_s2 = sphi %s3698_s2, %s38_s2  }
  0x13   : > { %p2589_p0 = scmp.ge.s32.totalorder %s3568_s2, 1  ;;  %p530_p1 = scmp.lt.s32.totalorder %s3568_s2, 3 }
  0x14   : > { %p3106_p2 = scmp.eq.s32.totalorder %s3704_s25, 0  ;;  %s4400_s7 = sld [smem:[#allocation35_spill]] }
  0x15   : > { %p3712_p3 = pnand %p2589_p0, %p530_p1  ;;  %s4402_s9 = sld [smem:[#allocation36_spill]] }
  0x16   : > { %s3570_s30 = smov [#allocation4]   ;;  %s3571_s23 = smov [#allocation7]  }
  0x17   : > { %p3069_p4 = pneg %p3712_p3  ;;  %s563_s5 = sshll.u32 %s3570_s30, 4  ;;  %s564_s5 = int_to_ptr.vmem [resolvable:$true] %s563_s5 }
  0x18   : > { %s590_s1 = sshll.u32 %s3571_s23, 4  ;;  %s4404_s12 = sld [smem:[#allocation37_spill]]  ;;  %s591_s1 = int_to_ptr.vmem [resolvable:$true] %s590_s1 }
  0x19   : > { %p3723_p5 = pnand %p3106_p2, %p3069_p4  ;;  %s4388_s29 = smov 64  }
  0x1a   : > { %s561_s3 = sshll.u32 %s4400_s7, 4  ;;  %s3573_s0 = smov 4   ;;  %s562_s3 = int_to_ptr.hbm [resolvable:$true] %s561_s3 }
  0x1b   : > { %s588_s4 = sshll.u32 %s4402_s9, 4  ;;  %s3574_s30 = smov [#allocation10]   ;;  %s589_s4 = int_to_ptr.hbm [resolvable:$true] %s588_s4 }
  0x1c   : > { %3075 = dma.hbm_to_vmem [thread:$0]  (!%p3723_p5), %s562_s3, 512, %s564_s5, [#allocation5], %s4388_s29, %s4388_s29, %s3573_s0  }
  0x1d   : > { %3081 = dma.hbm_to_vmem [thread:$0]  (!%p3723_p5), %s589_s4, 16, %s591_s1, [#allocation8]  }
  0x1e   : > { %s617_s27 = sshll.u32 %s4404_s12, 4  ;;  %s619_s7 = sshll.u32 %s3574_s30, 4  ;;  %s618_s27 = int_to_ptr.hbm [resolvable:$true] %s617_s27  ;;  %s620_s7 = int_to_ptr.vmem [resolvable:$true] %s619_s7 }
  0x1f   : > { %s644_s24 = sshll.u32 %s4380_s15, 4  ;;  %s670_s2 = sshll.u32 %s4382_s17, 4  ;;  %s645_s24 = int_to_ptr.hbm [resolvable:$true] %s644_s24  ;;  %s671_s2 = int_to_ptr.hbm [resolvable:$true] %s670_s2 }
  0x20   : > { %3087 = dma.hbm_to_vmem [thread:$0]  (!%p3723_p5), %s618_s27, 48, %s620_s7, [#allocation11]  }
  0x21   : > { %s3575_s21 = smov [#allocation13]   ;;  %s3576_s4 = smov [#allocation16]  }
  0x22   : > { %s646_s3 = sshll.u32 %s3575_s21, 4  ;;  %s672_s5 = sshll.u32 %s3576_s4, 4  ;;  %s647_s3 = int_to_ptr.vmem [resolvable:$true] %s646_s3  ;;  %s673_s5 = int_to_ptr.vmem [resolvable:$true] %s672_s5 }
  0x23   : > { %3093 = dma.hbm_to_vmem [thread:$0]  (!%p3723_p5), %s645_s24, 16, %s647_s3, [#allocation14]  }
  0x24   : > { %s4405_s30 = sld [smem:[#allocation34_spill]]  ;;  %s576_s27 = sshll.u32 %s4373_s8, 4  ;;  %s577_s27 = int_to_ptr.hbm [resolvable:$true] %s576_s27 }
  0x25   : > { %3099 = dma.hbm_to_vmem [thread:$0]  (!%p3723_p5), %s671_s2, 16, %s673_s5, [#allocation17]  }
  0x26   : > { %s3577_s21 = smov [#allocation2]   ;;  %s3578_s24 = smov [#allocation6]  }
  0x27   : > { %s546_s26 = sshll.u32 %s3577_s21, 4  ;;  %s578_s3 = sshll.u32 %s3578_s24, 4  ;;  %s547_s26 = int_to_ptr.vmem [resolvable:$true] %s546_s26  ;;  %s579_s3 = int_to_ptr.vmem [resolvable:$true] %s578_s3 }
  0x28   : > { %s602_s2 = sshll.u32 %s4376_s11, 4  ;;  %s3579_s5 = smov [#allocation9]   ;;  %s603_s2 = int_to_ptr.hbm [resolvable:$true] %s602_s2 }
  0x29   : > { %3078 = dma.hbm_to_vmem [thread:$0]  (!%p3723_p5), %s577_s27, 16, %s579_s3, [#allocation5]  }
  0x2a   : > { %s544_s23 = sshll.u32 %s4405_s30, 4  ;;  %s604_s1 = sshll.u32 %s3579_s5, 4  ;;  %s545_s23 = int_to_ptr.hbm [resolvable:$true] %s544_s23  ;;  %s605_s1 = int_to_ptr.vmem [resolvable:$true] %s604_s1 }
  0x2b   : > { %3072 = dma.hbm_to_vmem [thread:$0]  (!%p3723_p5), %s545_s23, 512, %s547_s26, [#allocation3], %s4388_s29, %s4388_s29, %s3573_s0  }
  0x2c   : > { %s632_s12 = sshll.u32 %s4379_s14, 4  ;;  %s3580_s23 = smov 192   ;;  %s633_s12 = int_to_ptr.hbm [resolvable:$true] %s632_s12 }
  0x2d   : > { %s3581_s21 = smov 12   ;;  %s3582_s26 = smov [#allocation12]  }
  0x2e   : > { %3084 = dma.hbm_to_vmem [thread:$0]  (!%p3723_p5), %s603_s2, 1536, %s605_s1, [#allocation8], %s3580_s23, %s3580_s23, %s3581_s21  }
  0x2f   : > { %s634_s24 = sshll.u32 %s3582_s26, 4  ;;  %s655_s27 = sshll.u32 %s4381_s16, 4  ;;  %s635_s24 = int_to_ptr.vmem [resolvable:$true] %s634_s24  ;;  %s656_s27 = int_to_ptr.hbm [resolvable:$true] %s655_s27 }
  0x30   : > { %3090 = dma.hbm_to_vmem [thread:$0]  (!%p3723_p5), %s633_s12, 16, %s635_s24, [#allocation11]  }
  0x31   : > { %s685_s30 = sshll.u32 %s4384_s19, 4  ;;  %s3583_s7 = smov [#allocation15]   ;;  %s686_s30 = int_to_ptr.hbm [resolvable:$true] %s685_s30 }
  0x32   : > { %s657_s29 = sshll.u32 %s3583_s7, 4  ;;  %s4406_s2 = smov 64   ;;  %s658_s29 = int_to_ptr.vmem [resolvable:$true] %s657_s29 }
  0x33   : > { %3096 = dma.hbm_to_vmem [thread:$0]  (!%p3723_p5), %s656_s27, 512, %s658_s29, [#allocation14], %s4406_s2, %s4406_s2, %s3573_s0  }
  0x34   : > { %s3584_s1 = smov [#allocation18]   ;;  %s697_s12 = sshll.u32 %s4385_s20, 4  ;;  %s698_s12 = int_to_ptr.hbm [resolvable:$true] %s697_s12 }
  0x35   : > { %s687_s23 = sshll.u32 %s3584_s1, 4  ;;  %s3585_s24 = smov [#allocation19]   ;;  %s688_s23 = int_to_ptr.vmem [resolvable:$true] %s687_s23 }
  0x36   : > { %3102 = dma.hbm_to_vmem [thread:$0]  (!%p3723_p5), %s686_s30, 16, %s688_s23, [#allocation17]  }
  0x37   : > { %s699_s4 = sshll.u32 %s3585_s24, 4  ;;  %740 = sbr.rel (%p3712_p3) target bundleno = 2322 (0x912), region = 104  ;;  %s700_s4 = int_to_ptr.vmem [resolvable:$true] %s699_s4 }
  0x38   : > { %3105 = dma.hbm_to_vmem [thread:$0]  (!%p3723_p5), %s698_s12, 16, %s700_s4, [#allocation20]  }
  0x3c   : > { %3539 = dma.done.wait (%p3106_p2), [#allocation3], 512  }
  0x3d   : > { %3541 = vsyncadd (%p3106_p2), [#allocation3], 4294966784 }
  0x3e   : > { %3543 = dma.done.wait (%p3106_p2), [#allocation5], 528  }
  0x3f   : > { %3545 = vsyncadd (%p3106_p2), [#allocation5], 4294966768 }
  0x40   : > { %3547 = dma.done.wait (%p3106_p2), [#allocation8], 1552  }
  0x41   : > { %3549 = vsyncadd (%p3106_p2), [#allocation8], 4294965744 }
  0x42   : > { %3551 = dma.done.wait (%p3106_p2), [#allocation11], 64  }
  0x43   : > { %3553 = vsyncadd (%p3106_p2), [#allocation11], 4294967232 }
  0x44   : > { %3555 = dma.done.wait (%p3106_p2), [#allocation14], 528  }
  0x45   : > { %3557 = vsyncadd (%p3106_p2), [#allocation14], 4294966768 }
  0x46   : > { %3559 = dma.done.wait (%p3106_p2), [#allocation17], 32  }
  0x47   : > { %3561 = vsyncadd (%p3106_p2), [#allocation17], 4294967264 }
  0x48   : > { %3563 = dma.done.wait (%p3106_p2), [#allocation20], 16  }
  0x49   : > { %3565 = vsyncadd (%p3106_p2), [#allocation20], 4294967280  ;;  %p866_p6 = scmp.lt.s32.totalorder %s3704_s25, 1  ;;  %v3586_v0 = vmov 0   ;;  %s4407_s0 = sld [smem:[#allocation31_spill]]  ;;  %vm956_vm0 = vcmask 523264  }
  0x4a   : > { %3156 = vset.pattern.permute.xlu0 %v3586_v0  ;;  %v2975_v2 = vld [vmem:[%s4375_s10 + $0x94] sm:$0xf]  ;;  %v2732_v3 = vld [vmem:[%s4375_s10 + $0xa8] sm:$0xf0]  ;;  %v2969_v4 = vld [vmem:[%s4375_s10 + $0x64] sm:$0xf] }
  0x4b   : > { %s4415_s25 = smov (!%p866_p6, %s3704_s25), 1  ;;  %v2708_v5 = vld [vmem:[%s4375_s10 + $0x78] sm:$0xf0]  ;;  %v2735_v6 = vor.u32 %v2975_v2, %v2732_v3  ;;  %s4408_s26 = sld [smem:[#allocation32_spill]]  ;;  %v2963_v7 = vld [vmem:[%s4375_s10 + $0x34] sm:$0xf] }
  0x4c   : > { %s3822_s28 = sshll.u32 %s4415_s25, 3  ;;  %v2711_v8 = vor.u32 %v2969_v4, %v2708_v5  ;;  %v2684_v9 = vld [vmem:[%s4375_s10 + $0x48] sm:$0xf0]  ;;  %v2957_v12 = vld [vmem:[%s4375_s10 + $0x4] sm:$0xf]  ;;  %s4409_s5 = sld [smem:[#allocation30_spill]] }
  0x4d   : > { %1196 = vmatpush.bf16.msra.mxu0 %v2735_v6  ;;  %v2687_v11 = vor.u32 %v2963_v7, %v2684_v9  ;;  %v2660_v13 = vld [vmem:[%s4375_s10 + $0x18] sm:$0xf0]  ;;  %v2977_v15 = vld [vmem:[%s4375_s10 + $0xa4] sm:$0xf]  ;;  %v2971_v18 = vld [vmem:[%s4375_s10 + $0x74] sm:$0xf] }
  0x4e   : > { %v2663_v14 = vor.u32 %v2957_v12, %v2660_v13  ;;  %v2748_v16 = vld [vmem:[%s4375_s10 + $0xb8] sm:$0xf0]  ;;  %v2724_v19 = vld [vmem:[%s4375_s10 + $0x88] sm:$0xf0]  ;;  %v2965_v21 = vld [vmem:[%s4375_s10 + $0x44] sm:$0xf] }
  0x4f   : > { %s877_s9 = scalar_lea.vmem %s4407_s0, %s3822_s28  ;;  %v2751_v17 = vor.u32 %v2977_v15, %v2748_v16  ;;  %v2727_v20 = vor.u32 %v2971_v18, %v2724_v19  ;;  %v2700_v22 = vld [vmem:[%s4375_s10 + $0x58] sm:$0xf0]  ;;  %v2959_v24 = vld [vmem:[%s4375_s10 + $0x14] sm:$0xf]  ;;  %v2676_v25 = vld [vmem:[%s4375_s10 + $0x28] sm:$0xf0] }
  0x50   : > { %v888_v1 = vld [vmem:[%s877_s9] sm:$0xff]  ;;  %v2703_v23 = vor.u32 %v2965_v21, %v2700_v22  ;;  %v2679_v26 = vor.u32 %v2959_v24, %v2676_v25  ;;  %s4410_s25 = sld [smem:[#allocation29_spill]]  ;;  %v2730_v29 = vld [vmem:[%s4375_s10 + $0x90] sm:$0xf]  ;;  %v2978_v30 = vld [vmem:[%s4375_s10 + $0xa4] sm:$0xf0] }
  0x51   : > { %891 = vperm.xlu0 %3156, %v888_v1   ;;  %s881_s12 = scalar_lea.vmem %s4408_s26, %s3822_s28  ;;  %1197 = vmatpush.bf16.msra.mxu0 %v2711_v8  ;;  %vm902_vm1 = vcmask 1043456   ;;  %v2731_v34 = vor.u32 %v2978_v30, %v2730_v29  ;;  %v2706_v35 = vld [vmem:[%s4375_s10 + $0x60] sm:$0xf]  ;;  %v2972_v36 = vld [vmem:[%s4375_s10 + $0x74] sm:$0xf0]  ;;  %vm898_vm2 = vcmask 64512  }
  0x52   : > { %v1274_v10 = vld [vmem:[%s881_s12] sm:$0xff]  ;;  %s3884_s30 = scalar_lea.vmem %s4409_s5, %s3822_s28  ;;  %v2707_v39 = vor.u32 %v2972_v36, %v2706_v35  ;;  %v2682_v40 = vld [vmem:[%s4375_s10 + $0x30] sm:$0xf]  ;;  %v2966_v41 = vld [vmem:[%s4375_s10 + $0x44] sm:$0xf0]  ;;  %s3587_s2 = smov 64  }
  0x53   : > { %v887_v27 = vld [vmem:[%s3884_s30] sm:$0xff]  ;;  %v2952_v42 = vld [vmem:[#allocation2 + $0x18] sm:$0xff]  ;;  %v2683_v43 = vor.u32 %v2966_v41, %v2682_v40  ;;  %v2722_v50 = vld [vmem:[%s4375_s10 + $0x70] sm:$0xf]  ;;  %s4411_s26 = sld [smem:[#allocation33_spill]] }
  0x54   : > { %964 = vmatpush.bf16.msra.mxu1 %v2952_v42  ;;  %v2658_v44 = vld [vmem:[%s4375_s10] sm:$0xf]  ;;  %v2960_v45 = vld [vmem:[%s4375_s10 + $0x14] sm:$0xf0]  ;;  %v2974_v51 = vld [vmem:[%s4375_s10 + $0x84] sm:$0xf0] }
  0x55   : > { %1198 = vmatpush.bf16.msra.mxu0 %v2687_v11  ;;  %v2746_v46 = vld [vmem:[%s4375_s10 + $0xa0] sm:$0xf]  ;;  %v2980_v47 = vld [vmem:[%s4375_s10 + $0xb4] sm:$0xf0]  ;;  %v2659_v48 = vor.u32 %v2960_v45, %v2658_v44  ;;  %v2723_v52 = vor.u32 %v2974_v51, %v2722_v50  ;;  %v2674_v56 = vld [vmem:[%s4375_s10 + $0x10] sm:$0xf] }
  0x56   : > { %s869_s1 = scalar_lea.vmem %s4410_s25, %s3822_s28  ;;  %v2747_v49 = vor.u32 %v2980_v47, %v2746_v46  ;;  %v2698_v53 = vld [vmem:[%s4375_s10 + $0x40] sm:$0xf]  ;;  %v2968_v54 = vld [vmem:[%s4375_s10 + $0x54] sm:$0xf0]  ;;  %v2962_v57 = vld [vmem:[%s4375_s10 + $0x24] sm:$0xf0] }
  0x57   : > { %v896_v32 = vld [vmem:[%s869_s1] sm:$0xff]  ;;  %v2699_v55 = vor.u32 %v2968_v54, %v2698_v53  ;;  %v2675_v58 = vor.u32 %v2962_v57, %v2674_v56  ;;  %v2951_v59 = vld [vmem:[#allocation2 + $0x10] sm:$0xff]  ;;  %v2950_v60 = vld [vmem:[#allocation2 + $0x8] sm:$0xff] }
  0x58   : > { %v897_v38 = vpack.c.bf16 %v896_v32, %v896_v32  ;;  %965 = vmatpush.bf16.msra.mxu1 %v2951_v59  ;;  %v2949_v61 = vld [vmem:[#allocation2] sm:$0xff]  ;;  %v2738_v62 = vld [vmem:[%s4375_s10 + $0x98] sm:$0xf]  ;;  %v2979_v63 = vld [vmem:[%s4375_s10 + $0xac] sm:$0xf0] }
  0x59   : > { %1447 = vperm.xlu0 %3156, %v1274_v10   ;;  %1199 = vmatpush.bf16.msra.mxu0 %v2663_v14  ;;  %v2804_v0 = vld [vmem:[#allocation9 + $0x50] sm:$0xf]  ;;  %v2739_v1 = vor.u32 %v2979_v63, %v2738_v62  ;;  %v2992_v2 = vld [vmem:[#allocation9 + $0x58] sm:$0xf0]  ;;  %v2714_v4 = vld [vmem:[%s4375_s10 + $0x68] sm:$0xf] }
  0x5a   : > { %v3958_v3 = vor.u32 %v2992_v2, %v2804_v0  ;;  %v2973_v5 = vld [vmem:[%s4375_s10 + $0x7c] sm:$0xf0]  ;;  %v2792_v6 = vld [vmem:[#allocation9 + $0x38] sm:$0xf]  ;;  %v2989_v8 = vld [vmem:[#allocation9 + $0x40] sm:$0xf0] }
  0x5b   : > { %v2715_v7 = vor.u32 %v2973_v5, %v2714_v4  ;;  %v3967_v9 = vor.u32 %v2989_v8, %v2792_v6  ;;  %v2690_v10 = vld [vmem:[%s4375_s10 + $0x38] sm:$0xf]  ;;  %v2967_v11 = vld [vmem:[%s4375_s10 + $0x4c] sm:$0xf0]  ;;  %v2780_v12 = vld [vmem:[#allocation9 + $0x20] sm:$0xf] }
  0x5c   : > { %966 = vmatpush.bf16.msra.mxu1 %v2950_v60  ;;  %v2691_v13 = vor.u32 %v2967_v11, %v2690_v10  ;;  %v2986_v14 = vld [vmem:[#allocation9 + $0x28] sm:$0xf0]  ;;  %v2666_v16 = vld [vmem:[%s4375_s10 + $0x8] sm:$0xf]  ;;  %v2768_v18 = vld [vmem:[#allocation9 + $0x8] sm:$0xf] }
  0x5d   : > { %1248 = vmatpush.bf16.msrb.mxu0 %v2751_v17  ;;  %v3976_v15 = vor.u32 %v2986_v14, %v2780_v12  ;;  %v2961_v17 = vld [vmem:[%s4375_s10 + $0x1c] sm:$0xf0]  ;;  %v2796_v22 = vld [vmem:[#allocation9 + $0x48] sm:$0xf]  ;;  %v2772_v29 = vld [vmem:[#allocation9 + $0x18] sm:$0xf] }
  0x5e   : > { %v2667_v19 = vor.u32 %v2961_v17, %v2666_v16  ;;  %v2985_v30 = vld [vmem:[#allocation9 + $0x20] sm:$0xf0]  ;;  %v2982_v35 = vld [vmem:[#allocation9 + $0x8] sm:$0xf0]  ;;  %v2956_v41 = vld [vmem:[#allocation4 + $0x18] sm:$0xff] }
  0x5f   : > { %1018 = vmatpush.bf16.msra.mxu2 %v2956_v41  ;;  %v2955_v42 = vld [vmem:[#allocation4 + $0x10] sm:$0xff]  ;;  %v2954_v46 = vld [vmem:[#allocation4 + $0x8] sm:$0xff]  ;;  %v2976_v53 = vld [vmem:[%s4375_s10 + $0x9c] sm:$0xf] }
  0x60   : > { %967 = vmatpush.bf16.msra.mxu1 %v2949_v61  ;;  %v2740_v54 = vld [vmem:[%s4375_s10 + $0xb0] sm:$0xf0]  ;;  %v2970_v56 = vld [vmem:[%s4375_s10 + $0x6c] sm:$0xf]  ;;  %v2716_v57 = vld [vmem:[%s4375_s10 + $0x80] sm:$0xf0] }
  0x61   : > { %1249 = vmatpush.bf16.msrb.mxu0 %v2727_v20  ;;  %v2983_v20 = vld [vmem:[#allocation9 + $0x10] sm:$0xf0]  ;;  %v2719_v59 = vor.u32 %v2970_v56, %v2716_v57  ;;  %v2798_v60 = vld [vmem:[#allocation9 + $0x54] sm:$0xf0]  ;;  %v2692_v63 = vld [vmem:[%s4375_s10 + $0x50] sm:$0xf0] }
  0x62   : > { %v3985_v21 = vor.u32 %v2983_v20, %v2768_v18  ;;  %v2964_v62 = vld [vmem:[%s4375_s10 + $0x3c] sm:$0xf]  ;;  %v2987_v0 = vld [vmem:[#allocation9 + $0x34] sm:$0xf]  ;;  %v2786_v2 = vld [vmem:[#allocation9 + $0x3c] sm:$0xf0] }
  0x63   : > { %1019 = vmatpush.bf16.msra.mxu2 %v2955_v42  ;;  %v4046_v4 = vor.u32 %v2987_v0, %v2786_v2  ;;  %v2958_v5 = vld [vmem:[%s4375_s10 + $0xc] sm:$0xf]  ;;  %v2668_v6 = vld [vmem:[%s4375_s10 + $0x20] sm:$0xf0]  ;;  %v2981_v12 = vld [vmem:[#allocation9 + $0x4] sm:$0xf] }
  0x64   : > { %1209 = vmatpush.bf16.msrb.mxu1 %v2739_v1  ;;  %v2695_v1 = vor.u32 %v2964_v62, %v2692_v63  ;;  %v2774_v8 = vld [vmem:[#allocation9 + $0x24] sm:$0xf0]  ;;  %v2671_v10 = vor.u32 %v2958_v5, %v2668_v6  ;;  %v3158_v16 = vld [vmem:[%s4371_s6] ss:$0 sm:$0xff] }
  0x65   : > { %1250 = vmatpush.bf16.msrb.mxu0 %v2703_v23  ;;  %v2991_v23 = vld [vmem:[#allocation9 + $0x50] sm:$0xf0] }
  0x66   : > { %v3988_v24 = vor.u32 %v2991_v23, %v2796_v22 }
  0x67   : > { %1020 = vmatpush.bf16.msra.mxu2 %v2954_v46 }
  0x68   : > { %1210 = vmatpush.bf16.msrb.mxu1 %v2715_v7  ;;  %v2984_v7 = vld [vmem:[#allocation9 + $0x1c] sm:$0xf] }
  0x69   : > { %1251 = vmatpush.bf16.msrb.mxu0 %v2679_v26  ;;  %v2784_v26 = vld [vmem:[#allocation9 + $0x30] sm:$0xf]  ;;  %v4055_v11 = vor.u32 %v2984_v7, %v2774_v8 }
  0x6c   : > { %1211 = vmatpush.bf16.msrb.mxu1 %v2691_v13  ;;  %v2762_v13 = vld [vmem:[#allocation9 + $0xc] sm:$0xf0] }
  0x6d   : > { %v4058_v14 = vor.u32 %v2981_v12, %v2762_v13 }
  0x70   : > { %1212 = vmatpush.bf16.msrb.mxu1 %v2667_v19 }
  0xc3   : > { %v892_v28 = vpop.permute.xlu0 %891 }
  0xc4   : > { %v894_v31 = vmul.f32 %v892_v28, %v887_v27  ;;  %v2988_v27 = vld [vmem:[#allocation9 + $0x38] sm:$0xf0] }
  0xc5   : > { %v3991_v28 = vor.u32 %v2988_v27, %v2784_v26 }
  0xc6   : > { %v3897_v33 = vpack.c.bf16 %v894_v31, %v894_v31  ;;  %v3994_v31 = vor.u32 %v2985_v30, %v2772_v29 }
  0xc8   : > { %2753 = vmatmul.msk.bf16.vlgmr.msra.gmra.mxu0 %vm956_vm0, %v3897_v33  ;;  %v904_v37 = vsel %vm902_vm1, %v3897_v33, 0 }
  0xc9   : > { %913 = vmatpush.bf16.msra.mxu3 %v904_v37  ;;  %1404 = vmatpush.bf16.msra.mxu0 %v3988_v24 }
  0xcb   : > { %v4102_v46 = vpop.permute.xlu0 %1447 }
  0xcc   : > { %2621 = vmatmul.msk.bf16.vlgmr.msra.gmra.mxu3 %vm898_vm2, %v897_v38 }
  0xcd   : > { %1183 = vmatpush.bf16.msrb.mxu3 %v2731_v34  ;;  %1405 = vmatpush.bf16.msra.mxu0 %v3991_v28  ;;  %v2760_v34 = vld [vmem:[#allocation9] sm:$0xf] }
  0xce   : > { %v3997_v36 = vor.u32 %v2982_v35, %v2760_v34 }
  0xd1   : > { %1184 = vmatpush.bf16.msrb.mxu3 %v2707_v39  ;;  %1406 = vmatpush.bf16.msra.mxu0 %v3994_v31 }
  0xd5   : > { %1185 = vmatpush.bf16.msrb.mxu3 %v2683_v43  ;;  %1407 = vmatpush.bf16.msra.mxu0 %v3997_v36 }
  0xd8   : > { %2757 = vmatmul.msk.bf16.vlgmr.msrb.gmra.mxu0 %vm956_vm0, %v3897_v33 }
  0xd9   : > { %1186 = vmatpush.bf16.msrb.mxu3 %v2659_v48 }
  0xdc   : > { %2752 = vmatmul.msk.bf16.vlgmr.msrb.gmra.mxu3 %vm956_vm0, %v3897_v33 }
  0xdd   : > { %1235 = vmatpush.bf16.msra.mxu3 %v2747_v49 }
  0xe1   : > { %1236 = vmatpush.bf16.msra.mxu3 %v2723_v52  ;;  %v2953_v52 = vld [vmem:[#allocation4] sm:$0xff] }
  0xe2   : > { %1021 = vmatpush.bf16.msra.mxu2 %v2953_v52 }
  0xe5   : > { %1237 = vmatpush.bf16.msra.mxu3 %v2699_v55  ;;  %v2743_v55 = vor.u32 %v2976_v53, %v2740_v54 }
  0xe7   : > { %1222 = vmatpush.bf16.msrb.mxu2 %v2743_v55 }
  0xe9   : > { %1238 = vmatpush.bf16.msra.mxu3 %v2675_v58  ;;  %v2990_v58 = vld [vmem:[#allocation9 + $0x4c] sm:$0xf] }
  0xea   : > { %v4037_v61 = vor.u32 %v2990_v58, %v2798_v60 }
  0xeb   : > { %1223 = vmatpush.bf16.msrb.mxu2 %v2719_v59 }
  0xec   : > { %2756 = vmatmul.msk.bf16.vlgmr.msra.gmra.mxu3 %vm956_vm0, %v3897_v33 }
  0xed   : > { %1374 = vmatpush.bf16.msrb.mxu3 %v3958_v3 }
  0xef   : > { %1224 = vmatpush.bf16.msrb.mxu2 %v2695_v1 }
  0xf1   : > { %1375 = vmatpush.bf16.msrb.mxu3 %v3967_v9 }
  0xf3   : > { %1225 = vmatpush.bf16.msrb.mxu2 %v2671_v10 }
  0xf5   : > { %1376 = vmatpush.bf16.msrb.mxu3 %v3976_v15 }
  0xf9   : > { %1377 = vmatpush.bf16.msrb.mxu3 %v3985_v21 }
 0x145   : > { %v1201_v25 = vpop.f32.mrf.mxu0 }
 0x146   : > { %v4021_v51 = vpack.c.bf16 %v1201_v25, %v1201_v25 }
 0x14d   : > { %v1203_v32 = vpop.f32.mrf.mxu0 }
 0x14f   : > { %v915_v37 = vpop.f32.mrf.mxu3 }
 0x150   : > { %v919_v38 = vpack.c.bf16 %v915_v37, %v915_v37  ;;  %v1273_v37 = vld [vmem:[#allocation10] sm:$0x7] }
 0x151   : > { %v4129_v7 = vperm.slane %v1273_v37, 2 }
 0x152   : > { %2638 = vmatmul.msk.bf16.vlgmr.msra.gmra.mxu1 %vm956_vm0, %v919_v38 }
 0x153   : > { %1348 = vmatpush.bf16.msra.mxu1 %v3988_v24 }
 0x155   : > { %v4002_v39 = vpop.f32.mrf.mxu0 }
 0x156   : > { %v4079_v29 = vpack.c.bf16 %v4002_v39, %v4002_v39  ;;  %v4097_v39 = vperm.slane %v1273_v37, 1 }
 0x157   : > { %v917_v40 = vpop.f32.mrf.mxu3  ;;  %1349 = vmatpush.bf16.msra.mxu1 %v3991_v28 }
 0x158   : > { %v4099_v40 = vperm.slane %v1273_v37, 0 }
 0x15b   : > { %1350 = vmatpush.bf16.msra.mxu1 %v3994_v31 }
 0x15d   : > { %v1255_v43 = vpop.f32.mrf.mxu0 }
 0x15f   : > { %v1188_v44 = vpop.f32.mrf.mxu3  ;;  %1351 = vmatpush.bf16.msra.mxu1 %v3997_v36 }
 0x160   : > { %v4007_v45 = vpack.c.bf16 %v1188_v44, %v1188_v44 }
 0x162   : > { %2754 = vmatmul.msk.bf16.vlgmr.msrb.gmra.mxu1 %vm956_vm0, %v3897_v33  ;;  %1527 = vrot.lane.b32.xlu1 %v4007_v45, %s3587_s2 }
 0x163   : > { %2808 = vmatmul.msk.bf16.vlgmr.msrb.gmra.mxu3 %vm956_vm0, %v4007_v45  ;;  %1417 = vmatpush.bf16.msrb.mxu1 %v4037_v61 }
 0x167   : > { %v1190_v47 = vpop.f32.mrf.mxu3  ;;  %1418 = vmatpush.bf16.msrb.mxu1 %v4046_v4 }
 0x16b   : > { %1419 = vmatpush.bf16.msrb.mxu1 %v4055_v11 }
 0x16f   : > { %v1240_v48 = vpop.f32.mrf.mxu3  ;;  %1420 = vmatpush.bf16.msrb.mxu1 %v4058_v14 }
 0x170   : > { %v4015_v49 = vpack.c.bf16 %v1240_v48, %v1240_v48 }
 0x172   : > { %2806 = vmatmul.msk.bf16.vlgmr.msra.gmra.mxu1 %vm956_vm0, %v4007_v45  ;;  %1683 = vrot.lane.b32.xlu2 %v4015_v49, %s3587_s2 }
 0x177   : > { %v1242_v50 = vpop.f32.mrf.mxu3 }
 0x17a   : > { %1881 = vrot.lane.b32.xlu2 %v4021_v51, %s3587_s2 }
 0x1cc   : > { %v1684_v12 = vpop.permute.xlu2 %1683 }
 0x1cf   : > { %v969_v17 = vpop.f32.mrf.mxu1 }
 0x1d0   : > { %v970_v18 = vadd.f32 %v3158_v16, %v969_v17 }
 0x1d2   : > { %v973_v19 = vmax.f32 %v970_v18, 0.0  ;;  %v1689_v18 = vsel %vm902_vm1, %v1684_v12, 0  ;;  %v1863_v12 = vsel %vm902_vm1, %v4079_v29, 0 }
 0x1d4   : > { %v974_v20 = vpack.c.bf16 %v973_v19, %v973_v19  ;;  %v1528_v1 = vpop.permute.xlu1 %1527 }
 0x1d6   : > { %2655 = vmatmul.msk.bf16.vlgmr.msra.gmra.mxu2 %vm956_vm0, %v974_v20 }
 0x1d7   : > { %v971_v22 = vpop.f32.mrf.mxu1  ;;  %1361 = vmatpush.bf16.msra.mxu2 %v4037_v61 }
 0x1db   : > { %1362 = vmatpush.bf16.msra.mxu2 %v4046_v4 }
 0x1df   : > { %v1214_v23 = vpop.f32.mrf.mxu1  ;;  %1363 = vmatpush.bf16.msra.mxu2 %v4055_v11 }
 0x1e0   : > { %v1396_v25 = vpack.c.bf16 %v1214_v23, %v1214_v23 }
 0x1e2   : > { %2809 = vmatmul.msk.bf16.vlgmr.msra.gmra.mxu0 %vm956_vm0, %v1396_v25  ;;  %1578 = vrot.lane.b32.xlu1 %v1396_v25, %s3587_s2 }
 0x1e3   : > { %2810 = vmatmul.msk.bf16.vlgmr.msrb.gmra.mxu1 %vm956_vm0, %v1396_v25  ;;  %1364 = vmatpush.bf16.msra.mxu2 %v4058_v14 }
 0x1e6   : > { %v4072_v26 = vpop.f32.mrf.mxu3  ;;  %2755 = vmatmul.msk.bf16.vlgmr.msrb.gmra.mxu2 %vm956_vm0, %v3897_v33  ;;  %v1509_v33 = vsel %vm902_vm1, %v4015_v49, 0 }
 0x1e7   : > { %v1216_v27 = vpop.f32.mrf.mxu1  ;;  %1430 = vmatpush.bf16.msrb.mxu2 %v3958_v3  ;;  %v1385_v17 = vmax.f32 %v4072_v26, 0.0 }
 0x1e9   : > { %v1395_v22 = vadd.f32 %v4129_v7, %v1385_v17 }
 0x1ea   : > { %2037 = vrot.lane.b32.xlu1 %v4079_v29, %s3587_s2 }
 0x1eb   : > { %1431 = vmatpush.bf16.msrb.mxu2 %v3967_v9  ;;  %v1455_v23 = vpack.c.bf16 %v1395_v22, %v1395_v22 }
 0x1ee   : > { %v1381_v30 = vpop.f32.mrf.mxu3 }
 0x1ef   : > { %v1353_v32 = vpop.f32.mrf.mxu1  ;;  %1432 = vmatpush.bf16.msrb.mxu2 %v3976_v15 }
 0x1f0   : > { %v1383_v49 = vmax.f32 %v1353_v32, 0.0 }
 0x1f2   : > { %v1393_v56 = vadd.f32 %v4099_v40, %v1383_v49 }
 0x1f3   : > { %1433 = vmatpush.bf16.msrb.mxu2 %v3985_v21 }
 0x1f4   : > { %v1453_v59 = vpack.c.bf16 %v1393_v56, %v1393_v56 }
 0x1f6   : > { %2807 = vmatmul.msk.bf16.vlgmr.msra.gmra.mxu2 %vm956_vm0, %v4007_v45 }
 0x1f7   : > { %1518 = vmatpush.bf16.msra.mxu2 %v1509_v33  ;;  %v1355_v34 = vpop.f32.mrf.mxu1 }
 0x206   : > { %2811 = vmatmul.msk.bf16.vlgmr.msrb.gmra.mxu2 %vm956_vm0, %v1396_v25 }
 0x207   : > { %1587 = vmatpush.bf16.msrb.mxu2 %v3988_v24 }
 0x20b   : > { %1588 = vmatpush.bf16.msrb.mxu2 %v3991_v28 }
 0x20f   : > { %1589 = vmatpush.bf16.msrb.mxu2 %v3994_v31 }
 0x213   : > { %1590 = vmatpush.bf16.msrb.mxu2 %v3997_v36 }
 0x254   : > { %v1579_v13 = vpop.permute.xlu1 %1578 }
 0x259   : > { %v4095_v35 = vpop.f32.mrf.mxu2 }
 0x25f   : > { %v1409_v38 = vpop.f32.mrf.mxu0 }
 0x260   : > { %v1439_v41 = vmax.f32 %v1409_v38, 0.0  ;;  %v1422_v42 = vpop.f32.mrf.mxu1 }
 0x261   : > { %v1440_v43 = vmax.f32 %v1422_v42, 0.0  ;;  %v1025_v44 = vpop.f32.mrf.mxu2 }
 0x262   : > { %v1442_v45 = vadd.f32 %v1439_v41, %v4099_v40  ;;  %v4155_v44 = vld [vmem:[%s4411_s26] sm:$0xff] }
 0x263   : > { %v1443_v47 = vadd.f32 %v1440_v43, %v4097_v39 }
 0x264   : > { %v1450_v48 = vmul.f32 %v4102_v46, %v1442_v45 }
 0x265   : > { %v1451_v50 = vmul.f32 %v4102_v46, %v1443_v47 }
 0x266   : > { %v1456_v52 = vpack.c.bf16 %v1450_v48, %v1450_v48 }
 0x267   : > { %v1457_v53 = vpack.c.bf16 %v1451_v50, %v1451_v50  ;;  %v1411_v54 = vpop.f32.mrf.mxu0 }
 0x268   : > { %v1424_v55 = vpop.f32.mrf.mxu1  ;;  %1466 = vmatpush.bf16.xpose.msra.mxu3 %v1456_v52 }
 0x269   : > { %1479 = vmatpush.bf16.xpose.msrb.mxu0 %v1457_v53  ;;  %v1227_v57 = vpop.f32.mrf.mxu2 }
 0x26a   : > { %v4109_v58 = vpack.c.bf16 %v1227_v57, %v1227_v57 }
 0x26c   : > { %1932 = vrot.lane.b32.xlu0 %v4109_v58, %s3587_s2 }
 0x26f   : > { %1467 = vmatmul.bf16.vlgmr.msra.gmra.mxu3 %v1453_v59 }
 0x270   : > { %1536 = vmatpush.bf16.msrb.mxu3 %v3988_v24 }
 0x271   : > { %1549 = vmatpush.bf16.msra.mxu0 %v4037_v61  ;;  %v1229_v60 = vpop.f32.mrf.mxu2 }
 0x274   : > { %1537 = vmatpush.bf16.msrb.mxu3 %v3991_v28 }
 0x275   : > { %1550 = vmatpush.bf16.msra.mxu0 %v4046_v4 }
 0x278   : > { %1538 = vmatpush.bf16.msrb.mxu3 %v3994_v31 }
 0x279   : > { %1551 = vmatpush.bf16.msra.mxu0 %v4055_v11  ;;  %v1366_v62 = vpop.f32.mrf.mxu2 }
 0x27a   : > { %v1384_v63 = vmax.f32 %v1366_v62, 0.0 }
 0x27c   : > { %1539 = vmatpush.bf16.msrb.mxu3 %v3997_v36  ;;  %v1394_v0 = vadd.f32 %v4097_v39, %v1384_v63 }
 0x27d   : > { %1552 = vmatpush.bf16.msra.mxu0 %v4058_v14 }
 0x27e   : > { %v1454_v2 = vpack.c.bf16 %v1394_v0, %v1394_v0 }
 0x27f   : > { %2813 = vmatmul.msk.bf16.vlgmr.msrb.gmra.mxu3 %vm956_vm0, %v1528_v1 }
 0x280   : > { %1600 = vmatpush.bf16.msra.mxu3 %v4037_v61  ;;  %1480 = vmatmul.bf16.vlgmr.msrb.gmra.mxu0 %v1454_v2 }
 0x281   : > { %v1368_v5 = vpop.f32.mrf.mxu2  ;;  %1613 = vmatpush.bf16.msrb.mxu0 %v3958_v3 }
 0x284   : > { %1601 = vmatpush.bf16.msra.mxu3 %v4046_v4 }
 0x285   : > { %1614 = vmatpush.bf16.msrb.mxu0 %v3967_v9 }
 0x288   : > { %1602 = vmatpush.bf16.msra.mxu3 %v4055_v11 }
 0x289   : > { %v1435_v6 = vpop.f32.mrf.mxu2  ;;  %1615 = vmatpush.bf16.msrb.mxu0 %v3976_v15 }
 0x28a   : > { %v1441_v8 = vmax.f32 %v1435_v6, 0.0 }
 0x28c   : > { %1603 = vmatpush.bf16.msra.mxu3 %v4058_v14  ;;  %v1444_v10 = vadd.f32 %v1441_v8, %v4129_v7 }
 0x28d   : > { %1616 = vmatpush.bf16.msrb.mxu0 %v3985_v21 }
 0x28e   : > { %v1452_v16 = vmul.f32 %v4102_v46, %v1444_v10 }
 0x28f   : > { %2817 = vmatmul.msk.bf16.vlgmr.msra.gmra.mxu3 %vm956_vm0, %v1579_v13 }
 0x290   : > { %v1458_v19 = vpack.c.bf16 %v1452_v16, %v1452_v16  ;;  %2814 = vmatmul.msk.bf16.vlgmr.msra.gmra.mxu0 %vm956_vm0, %v1528_v1 }
 0x291   : > { %1698 = vmatpush.bf16.msra.mxu0 %v1689_v18  ;;  %v1437_v20 = vpop.f32.mrf.mxu2 }
 0x292   : > { %1492 = vmatpush.bf16.xpose.msra.mxu1 %v1458_v19 }
 0x299   : > { %1493 = vmatmul.bf16.vlgmr.msra.gmra.mxu1 %v1455_v23 }
 0x29a   : > { %1562 = vmatpush.bf16.msrb.mxu1 %v3958_v3 }
 0x29e   : > { %1563 = vmatpush.bf16.msrb.mxu1 %v3967_v9 }
 0x2a0   : > { %2818 = vmatmul.msk.bf16.vlgmr.msrb.gmra.mxu0 %vm956_vm0, %v1579_v13 }
 0x2a1   : > { %1763 = vmatpush.bf16.msrb.mxu0 %v3988_v24 }
 0x2a2   : > { %1564 = vmatpush.bf16.msrb.mxu1 %v3976_v15 }
 0x2a5   : > { %1764 = vmatpush.bf16.msrb.mxu0 %v3991_v28 }
 0x2a6   : > { %1565 = vmatpush.bf16.msrb.mxu1 %v3985_v21 }
 0x2a9   : > { %2815 = vmatmul.msk.bf16.vlgmr.msrb.gmra.mxu1 %vm956_vm0, %v1528_v1  ;;  %1765 = vmatpush.bf16.msrb.mxu0 %v3994_v31 }
 0x2ad   : > { %1766 = vmatpush.bf16.msrb.mxu0 %v3997_v36 }
 0x2f2   : > { %v1468_v25 = vpop.f32.mrf.mxu3 }
 0x2fa   : > { %v1470_v26 = vpop.f32.mrf.mxu3 }
 0x2fd   : > { %v1481_v27 = vpop.f32.mrf.mxu0 }
 0x2fe   : > { %v1482_v41 = vadd.f32 %v1481_v27, %v1468_v25 }
 0x302   : > { %v4149_v30 = vpop.f32.mrf.mxu3 }
 0x303   : > { %v1571_v22 = vmax.f32 %v4149_v30, 0.0 }
 0x305   : > { %v1483_v32 = vpop.f32.mrf.mxu0  ;;  %v1574_v27 = vadd.f32 %v1571_v22, %v4099_v40 }
 0x307   : > { %v1631_v32 = vpack.c.bf16 %v1574_v27, %v1574_v27 }
 0x30a   : > { %v1543_v33 = vpop.f32.mrf.mxu3 }
 0x30d   : > { %v1554_v34 = vpop.f32.mrf.mxu0 }
 0x30e   : > { %v1572_v6 = vmax.f32 %v1554_v34, 0.0 }
 0x310   : > { %v1575_v8 = vadd.f32 %v1572_v6, %v4097_v39 }
 0x312   : > { %v1605_v37 = vpop.f32.mrf.mxu3  ;;  %v1632_v10 = vpack.c.bf16 %v1575_v8, %v1575_v8 }
 0x313   : > { %v1623_v38 = vmax.f32 %v1605_v37, 0.0 }
 0x315   : > { %v1626_v42 = vadd.f32 %v1623_v38, %v4097_v39  ;;  %v1556_v43 = vpop.f32.mrf.mxu0 }
 0x316   : > { %v1494_v45 = vpop.f32.mrf.mxu1 }
 0x317   : > { %v1495_v47 = vadd.f32 %v1494_v45, %v1482_v41  ;;  %v1629_v48 = vmul.f32 %v1626_v42, %v4102_v46 }
 0x319   : > { %v4159_v49 = vmul.f32 %v1495_v47, %v4155_v44  ;;  %v1635_v53 = vpack.c.bf16 %v1629_v48, %v1629_v48 }
 0x31a   : > { %v1607_v50 = vpop.f32.mrf.mxu3 }
 0x31b   : > { %v1503_v52 = vpack.c.bf16 %v4159_v49, %v4159_v49 }
 0x31d   : > { %2812 = vmatmul.msk.bf16.vlgmr.msra.gmra.mxu2 %vm898_vm2, %v1503_v52  ;;  %v1618_v54 = vpop.f32.mrf.mxu0 }
 0x31e   : > { %v1624_v55 = vmax.f32 %v1618_v54, 0.0  ;;  %1657 = vmatpush.bf16.xpose.msra.mxu2 %v1635_v53  ;;  %v1496_v56 = vpop.f32.mrf.mxu1  ;;  %v4218_v54 = vpop.permute.xlu2 %1881 }
 0x320   : > { %v1627_v57 = vadd.f32 %v1624_v55, %v4129_v7 }
 0x322   : > { %v1630_v59 = vmul.f32 %v1627_v57, %v4102_v46 }
 0x324   : > { %v1636_v60 = vpack.c.bf16 %v1630_v59, %v1630_v59 }
 0x325   : > { %v1620_v62 = vpop.f32.mrf.mxu0 }
 0x326   : > { %v1567_v63 = vpop.f32.mrf.mxu1  ;;  %1670 = vmatpush.bf16.xpose.msrb.mxu3 %v1636_v60 }
 0x327   : > { %v1573_v0 = vmax.f32 %v1567_v63, 0.0 }
 0x329   : > { %v1576_v1 = vadd.f32 %v1573_v0, %v4129_v7 }
 0x32b   : > { %v1633_v2 = vpack.c.bf16 %v1576_v1, %v1576_v1 }
 0x32d   : > { %2816 = vmatmul.msk.bf16.vlgmr.msrb.gmra.mxu2 %vm956_vm0, %v1579_v13  ;;  %1671 = vmatmul.bf16.vlgmr.msrb.gmra.mxu3 %v1633_v2 }
 0x32e   : > { %1740 = vmatpush.bf16.msra.mxu3 %v3958_v3  ;;  %v1569_v5 = vpop.f32.mrf.mxu1  ;;  %1727 = vmatpush.bf16.msrb.mxu2 %v4037_v61 }
 0x332   : > { %1741 = vmatpush.bf16.msra.mxu3 %v3967_v9  ;;  %1728 = vmatpush.bf16.msrb.mxu2 %v4046_v4 }
 0x336   : > { %1742 = vmatpush.bf16.msra.mxu3 %v3976_v15  ;;  %1729 = vmatpush.bf16.msrb.mxu2 %v4055_v11 }
 0x33a   : > { %1743 = vmatpush.bf16.msra.mxu3 %v3985_v21  ;;  %1730 = vmatpush.bf16.msrb.mxu2 %v4058_v14 }
 0x33d   : > { %1658 = vmatmul.bf16.vlgmr.msra.gmra.mxu2 %v1632_v10  ;;  %2822 = vmatmul.msk.bf16.vlgmr.msra.gmra.mxu3 %vm956_vm0, %v4021_v51 }
 0x33e   : > { %1789 = vmatpush.bf16.msra.mxu2 %v3958_v3 }
 0x342   : > { %1790 = vmatpush.bf16.msra.mxu2 %v3967_v9 }
 0x346   : > { %1791 = vmatpush.bf16.msra.mxu2 %v3976_v15 }
 0x34a   : > { %1792 = vmatpush.bf16.msra.mxu2 %v3985_v21 }
 0x34d   : > { %2821 = vmatmul.msk.bf16.vlgmr.msrb.gmra.mxu2 %vm956_vm0, %v4021_v51 }
 0x34e   : > { %1872 = vmatpush.bf16.msrb.mxu2 %v1863_v12 }
 0x35d   : > { %2825 = vmatmul.msk.bf16.vlgmr.msra.gmra.mxu2 %vm956_vm0, %v4109_v58 }
 0x35e   : > { %1941 = vmatpush.bf16.msra.mxu2 %v3988_v24 }
 0x362   : > { %1942 = vmatpush.bf16.msra.mxu2 %v3991_v28 }
 0x366   : > { %1943 = vmatpush.bf16.msra.mxu2 %v3994_v31 }
 0x36a   : > { %1944 = vmatpush.bf16.msra.mxu2 %v3997_v36 }
 0x3a0   : > { %v4193_v13 = vpop.f32.mrf.mxu2 }
 0x3a8   : > { %v1522_v16 = vpop.f32.mrf.mxu2 }
 0x3b0   : > { %v1592_v17 = vpop.f32.mrf.mxu2  ;;  %v1672_v29 = vpop.f32.mrf.mxu3 }
 0x3b1   : > { %v1622_v18 = vmax.f32 %v1592_v17, 0.0 }
 0x3b3   : > { %v1625_v19 = vadd.f32 %v1622_v18, %v4099_v40 }
 0x3b5   : > { %v1628_v20 = vmul.f32 %v1625_v19, %v4102_v46  ;;  %v2038_v19 = vpop.permute.xlu1 %2037 }
 0x3b6   : > { %v2043_v22 = vsel %vm902_vm1, %v2038_v19, 0 }
 0x3b7   : > { %v1634_v23 = vpack.c.bf16 %v1628_v20, %v1628_v20 }
 0x3b8   : > { %v1594_v25 = vpop.f32.mrf.mxu2  ;;  %v1674_v26 = vpop.f32.mrf.mxu3 }
 0x3b9   : > { %1644 = vmatpush.bf16.xpose.msra.mxu1 %v1634_v23  ;;  %v1933_v25 = vpop.permute.xlu0 %1932 }
 0x3c0   : > { %1645 = vmatmul.bf16.vlgmr.msra.gmra.mxu1 %v1631_v32  ;;  %v1659_v33 = vpop.f32.mrf.mxu2  ;;  %v1745_v34 = vpop.f32.mrf.mxu3 }
 0x3c1   : > { %1714 = vmatpush.bf16.msrb.mxu1 %v3988_v24  ;;  %v1751_v48 = vmax.f32 %v1745_v34, 0.0 }
 0x3c3   : > { %v1754_v53 = vadd.f32 %v1751_v48, %v4129_v7 }
 0x3c5   : > { %1715 = vmatpush.bf16.msrb.mxu1 %v3991_v28 }
 0x3c8   : > { %v1661_v30 = vpop.f32.mrf.mxu2  ;;  %v1747_v37 = vpop.f32.mrf.mxu3 }
 0x3c9   : > { %1716 = vmatpush.bf16.msrb.mxu1 %v3994_v31 }
 0x3cd   : > { %1717 = vmatpush.bf16.msrb.mxu1 %v3997_v36 }
 0x3d0   : > { %2820 = vmatmul.msk.bf16.vlgmr.msrb.gmra.mxu1 %vm956_vm0, %v4021_v51  ;;  %v1732_v38 = vpop.f32.mrf.mxu2  ;;  %v1809_v51 = vpack.c.bf16 %v1754_v53, %v1754_v53 }
 0x3d1   : > { %1776 = vmatpush.bf16.msra.mxu1 %v4037_v61  ;;  %v1750_v10 = vmax.f32 %v1732_v38, 0.0 }
 0x3d3   : > { %v1753_v17 = vadd.f32 %v1750_v10, %v4097_v39 }
 0x3d5   : > { %1777 = vmatpush.bf16.msra.mxu1 %v4046_v4 }
 0x3d8   : > { %v1734_v41 = vpop.f32.mrf.mxu2 }
 0x3d9   : > { %1778 = vmatpush.bf16.msra.mxu1 %v4055_v11 }
 0x3dd   : > { %1779 = vmatpush.bf16.msra.mxu1 %v4058_v14 }
 0x3e0   : > { %2824 = vmatmul.msk.bf16.vlgmr.msra.gmra.mxu1 %vm956_vm0, %v4109_v58  ;;  %v1794_v42 = vpop.f32.mrf.mxu2 }
 0x3e1   : > { %v1800_v43 = vmax.f32 %v1794_v42, 0.0 }
 0x3e3   : > { %v1803_v45 = vadd.f32 %v1800_v43, %v4129_v7 }
 0x3e5   : > { %v1806_v47 = vmul.f32 %v1803_v45, %v4102_v46 }
 0x3e7   : > { %v1812_v50 = vpack.c.bf16 %v1806_v47, %v1806_v47 }
 0x3e8   : > { %v1796_v52 = vpop.f32.mrf.mxu2 }
 0x3e9   : > { %1846 = vmatpush.bf16.xpose.msrb.mxu1 %v1812_v50 }
 0x3f0   : > { %1847 = vmatmul.bf16.vlgmr.msrb.gmra.mxu1 %v1809_v51 }
 0x3f1   : > { %1916 = vmatpush.bf16.msra.mxu1 %v3958_v3 }
 0x3f5   : > { %1917 = vmatpush.bf16.msra.mxu1 %v3967_v9 }
 0x3f9   : > { %1918 = vmatpush.bf16.msra.mxu1 %v3976_v15 }
 0x3fd   : > { %1919 = vmatpush.bf16.msra.mxu1 %v3985_v21 }
 0x400   : > { %2829 = vmatmul.msk.bf16.vlgmr.msra.gmra.mxu1 %vm956_vm0, %v4218_v54 }
 0x43d   : > { %v1646_v55 = vpop.f32.mrf.mxu1 }
 0x43e   : > { %v1660_v56 = vadd.f32 %v1659_v33, %v1646_v55 }
 0x440   : > { %v1673_v57 = vadd.f32 %v1672_v29, %v1660_v56  ;;  %v1808_v29 = vpack.c.bf16 %v1753_v17, %v1753_v17 }
 0x442   : > { %v1676_v59 = vmul.f32 %v1673_v57, %v4155_v44 }
 0x444   : > { %v1677_v60 = vsel %vm898_vm2, %v1676_v59, 0.0  ;;  %v1681_v62 = vpack.c.bf16 %v1676_v59, %v1676_v59 }
 0x445   : > { %v1648_v63 = vpop.f32.mrf.mxu1  ;;  %1678 = vadd.xlane.f32.xlu0 %v1677_v60 }
 0x446   : > { %2819 = vmatmul.msk.bf16.vlgmr.msra.gmra.mxu0 %vm898_vm2, %v1681_v62 }
 0x44d   : > { %v1719_v0 = vpop.f32.mrf.mxu1 }
 0x44e   : > { %v1749_v37 = vmax.f32 %v1719_v0, 0.0 }
 0x450   : > { %v1752_v42 = vadd.f32 %v1749_v37, %v4099_v40 }
 0x452   : > { %v1807_v43 = vpack.c.bf16 %v1752_v42, %v1752_v42  ;;  %v2995_v42 = vld [vmem:[%s4378_s13 + $0x10] sm:$0xff] }
 0x455   : > { %v1721_v1 = vpop.f32.mrf.mxu1 }
 0x456   : > { %2823 = vmatmul.msk.bf16.vlgmr.msrb.gmra.mxu0 %vm956_vm0, %v4109_v58 }
 0x45d   : > { %v1781_v2 = vpop.f32.mrf.mxu1 }
 0x45e   : > { %v1799_v5 = vmax.f32 %v1781_v2, 0.0 }
 0x460   : > { %v1802_v6 = vadd.f32 %v1799_v5, %v4097_v39 }
 0x462   : > { %v1805_v8 = vmul.f32 %v1802_v6, %v4102_v46 }
 0x464   : > { %v1811_v12 = vpack.c.bf16 %v1805_v8, %v1805_v8 }
 0x465   : > { %v1783_v16 = vpop.f32.mrf.mxu1 }
 0x466   : > { %1833 = vmatpush.bf16.xpose.msra.mxu0 %v1811_v12 }
 0x46d   : > { %1834 = vmatmul.bf16.vlgmr.msra.gmra.mxu0 %v1808_v29  ;;  %v1848_v18 = vpop.f32.mrf.mxu1 }
 0x46e   : > { %1903 = vmatpush.bf16.msrb.mxu0 %v4037_v61 }
 0x472   : > { %1904 = vmatpush.bf16.msrb.mxu0 %v4046_v4 }
 0x475   : > { %v1850_v58 = vpop.f32.mrf.mxu1 }
 0x476   : > { %1905 = vmatpush.bf16.msrb.mxu0 %v4055_v11 }
 0x47a   : > { %1906 = vmatpush.bf16.msrb.mxu0 %v4058_v14 }
 0x47d   : > { %2828 = vmatmul.msk.bf16.vlgmr.msrb.gmra.mxu0 %vm956_vm0, %v4218_v54  ;;  %v1921_v20 = vpop.f32.mrf.mxu1 }
 0x47e   : > { %1967 = vmatpush.bf16.msra.mxu0 %v3958_v3  ;;  %v1927_v50 = vmax.f32 %v1921_v20, 0.0 }
 0x482   : > { %1968 = vmatpush.bf16.msra.mxu0 %v3967_v9 }
 0x485   : > { %v1923_v23 = vpop.f32.mrf.mxu1 }
 0x486   : > { %1969 = vmatpush.bf16.msra.mxu0 %v3976_v15 }
 0x48a   : > { %1970 = vmatpush.bf16.msra.mxu0 %v3985_v21 }
 0x48d   : > { %2832 = vmatmul.msk.bf16.vlgmr.msra.gmra.mxu0 %vm956_vm0, %v1933_v25 }
 0x48e   : > { %2052 = vmatpush.bf16.msrb.mxu0 %v2043_v22 }
 0x4b8   : > { %v1679_v3 = vpop.xlane.xlu0 %1678 }
 0x4b9   : > { %v1680_v26 = vmax.f32 %v1679_v3, 1e-09 }
 0x4bb   : > { %3165 = vrcp.f32 %v1680_v26 }
 0x4c1   : > { %v3166_v9 = vpop.eup %3165 }
 0x4c3   : > { %v1700_v27 = vpop.f32.mrf.mxu0 }
 0x4c4   : > { %v1705_v15 = vmul.f32 %v3166_v9, %v1700_v27  ;;  %v3000_v27 = vld [vmem:[%s4378_s13 + $0x38] sm:$0xff] }
 0x4c6   : > { %2061 = vrot.lane.b32.xlu0 %v1705_v15, %s3587_s2  ;;  %v2999_v15 = vld [vmem:[%s4378_s13 + $0x30] sm:$0xff] }
 0x4cb   : > { %v1702_v32 = vpop.f32.mrf.mxu0 }
 0x4d3   : > { %v1768_v33 = vpop.f32.mrf.mxu0 }
 0x4d4   : > { %v1798_v34 = vmax.f32 %v1768_v33, 0.0 }
 0x4d6   : > { %v1801_v30 = vadd.f32 %v1798_v34, %v4099_v40 }
 0x4d8   : > { %v1804_v21 = vmul.f32 %v1801_v30, %v4102_v46 }
 0x4da   : > { %v1810_v38 = vpack.c.bf16 %v1804_v21, %v1804_v21 }
 0x4db   : > { %v1770_v41 = vpop.f32.mrf.mxu0 }
 0x4dc   : > { %1820 = vmatpush.bf16.xpose.msrb.mxu3 %v1810_v38  ;;  %v1499_v38 = vsel %vm898_vm2, %v4159_v49, 0.0  ;;  %v2997_v41 = vld [vmem:[%s4378_s13 + $0x20] sm:$0xff]  ;;  %v2994_v49 = vld [vmem:[%s4378_s13 + $0x8] sm:$0xff] }
 0x4e3   : > { %1821 = vmatmul.bf16.vlgmr.msrb.gmra.mxu3 %v1807_v43  ;;  %v2993_v43 = vld [vmem:[%s4378_s13] sm:$0xff] }
 0x4e4   : > { %1890 = vmatpush.bf16.msra.mxu3 %v3988_v24 }
 0x4e8   : > { %1891 = vmatpush.bf16.msra.mxu3 %v3991_v28 }
 0x4ea   : > { %v1835_v45 = vpop.f32.mrf.mxu0 }
 0x4ec   : > { %1892 = vmatpush.bf16.msra.mxu3 %v3994_v31 }
 0x4f0   : > { %1893 = vmatpush.bf16.msra.mxu3 %v3997_v36 }
 0x4f2   : > { %v1837_v47 = vpop.f32.mrf.mxu0 }
 0x4f3   : > { %2827 = vmatmul.msk.bf16.vlgmr.msra.gmra.mxu3 %vm956_vm0, %v4218_v54  ;;  %v3007_v47 = vld [vmem:[%s4378_s13 + $0x70] sm:$0xff] }
 0x4f4   : > { %1954 = vmatpush.bf16.msrb.mxu3 %v4037_v61 }
 0x4f8   : > { %1955 = vmatpush.bf16.msrb.mxu3 %v4046_v4 }
 0x4fa   : > { %v1908_v24 = vpop.f32.mrf.mxu0 }
 0x4fb   : > { %v1926_v2 = vmax.f32 %v1908_v24, 0.0  ;;  %v3006_v24 = vld [vmem:[%s4378_s13 + $0x68] sm:$0xff] }
 0x4fc   : > { %1956 = vmatpush.bf16.msrb.mxu3 %v4055_v11  ;;  %v1930_v11 = vadd.f32 %v1927_v50, %v4129_v7 }
 0x4fd   : > { %v1929_v8 = vadd.f32 %v1926_v2, %v4097_v39 }
 0x4fe   : > { %v1987_v53 = vpack.c.bf16 %v1930_v11, %v1930_v11 }
 0x4ff   : > { %v1986_v10 = vpack.c.bf16 %v1929_v8, %v1929_v8 }
 0x500   : > { %1957 = vmatpush.bf16.msrb.mxu3 %v4058_v14 }
 0x502   : > { %v1910_v28 = vpop.f32.mrf.mxu0 }
 0x503   : > { %2831 = vmatmul.msk.bf16.vlgmr.msrb.gmra.mxu3 %vm956_vm0, %v1933_v25 }
 0x50a   : > { %v1972_v31 = vpop.f32.mrf.mxu0 }
 0x50b   : > { %v1978_v48 = vmax.f32 %v1972_v31, 0.0 }
 0x50d   : > { %v1981_v36 = vadd.f32 %v1978_v48, %v4129_v7  ;;  %v3005_v48 = vld [vmem:[%s4378_s13 + $0x60] sm:$0xff] }
 0x50f   : > { %v1984_v61 = vmul.f32 %v1981_v36, %v4102_v46  ;;  %v3004_v36 = vld [vmem:[%s4378_s13 + $0x58] sm:$0xff] }
 0x511   : > { %v1990_v4 = vpack.c.bf16 %v1984_v61, %v1984_v61 }
 0x512   : > { %v1974_v52 = vpop.f32.mrf.mxu0 }
 0x513   : > { %2024 = vmatpush.bf16.xpose.msra.mxu3 %v1990_v4  ;;  %v3003_v4 = vld [vmem:[%s4378_s13 + $0x50] sm:$0xff] }
 0x51a   : > { %2025 = vmatmul.bf16.vlgmr.msra.gmra.mxu3 %v1987_v53 }
 0x566   : > { %v1822_v51 = vpop.f32.mrf.mxu3 }
 0x567   : > { %v1836_v14 = vadd.f32 %v1835_v45, %v1822_v51  ;;  %v3008_v45 = vld [vmem:[%s4378_s13 + $0x78] sm:$0xff]  ;;  %v3002_v51 = vld [vmem:[%s4378_s13 + $0x48] sm:$0xff] }
 0x569   : > { %v1849_v54 = vadd.f32 %v1848_v18, %v1836_v14 }
 0x56b   : > { %v1852_v55 = vmul.f32 %v1849_v54, %v4155_v44 }
 0x56d   : > { %v1853_v56 = vsel %vm898_vm2, %v1852_v55, 0.0  ;;  %v1857_v57 = vpack.c.bf16 %v1852_v55, %v1852_v55  ;;  %v2062_v55 = vpop.permute.xlu0 %2061 }
 0x56e   : > { %v1824_v59 = vpop.f32.mrf.mxu3  ;;  %1854 = vadd.xlane.f32.xlu1 %v1853_v56 }
 0x56f   : > { %2826 = vmatmul.msk.bf16.vlgmr.msrb.gmra.mxu2 %vm898_vm2, %v1857_v57 }
 0x576   : > { %v1895_v60 = vpop.f32.mrf.mxu3 }
 0x577   : > { %v1925_v22 = vmax.f32 %v1895_v60, 0.0  ;;  %v3001_v60 = vld [vmem:[%s4378_s13 + $0x40] sm:$0xff] }
 0x579   : > { %v1928_v3 = vadd.f32 %v1925_v22, %v4099_v40  ;;  %v3159_v22 = vld [vmem:[#allocation6] ss:$0 sm:$0xff] }
 0x57e   : > { %v1897_v62 = vpop.f32.mrf.mxu3 }
 0x57f   : > { %2830 = vmatmul.msk.bf16.vlgmr.msra.gmra.mxu2 %vm956_vm0, %v1933_v25 }
 0x586   : > { %v1959_v63 = vpop.f32.mrf.mxu3 }
 0x587   : > { %v1977_v7 = vmax.f32 %v1959_v63, 0.0 }
 0x589   : > { %v1980_v0 = vadd.f32 %v1977_v7, %v4097_v39  ;;  %v1985_v39 = vpack.c.bf16 %v1928_v3, %v1928_v3  ;;  %v3160_v3 = vld [vmem:[#allocation7] ss:$0 sm:$0xff] }
 0x58b   : > { %v1983_v1 = vmul.f32 %v1980_v0, %v4102_v46 }
 0x58d   : > { %v1989_v5 = vpack.c.bf16 %v1983_v1, %v1983_v1 }
 0x58e   : > { %v1961_v6 = vpop.f32.mrf.mxu3 }
 0x58f   : > { %2011 = vmatpush.bf16.xpose.msrb.mxu2 %v1989_v5  ;;  %v3012_v5 = vld [vmem:[#allocation15 + $0x18] sm:$0xff]  ;;  %v3011_v6 = vld [vmem:[#allocation15 + $0x10] sm:$0xff] }
 0x590   : > { %2282 = vmatpush.bf16.msrb.mxu3 %v3012_v5 }
 0x594   : > { %2283 = vmatpush.bf16.msrb.mxu3 %v3011_v6 }
 0x596   : > { %2012 = vmatmul.bf16.vlgmr.msrb.gmra.mxu2 %v1986_v10 }
 0x597   : > { %2223 = vmatpush.bf16.msra.mxu2 %v3008_v45  ;;  %v3163_v45 = vld [vmem:[#allocation18] ss:$0 sm:$0xff] }
 0x59b   : > { %2224 = vmatpush.bf16.msra.mxu2 %v3007_v47  ;;  %v3164_v47 = vld [vmem:[#allocation19] ss:$0 sm:$0xff] }
 0x59d   : > { %v2026_v12 = vpop.f32.mrf.mxu3 }
 0x59f   : > { %2225 = vmatpush.bf16.msra.mxu2 %v3006_v24 }
 0x5a3   : > { %2226 = vmatpush.bf16.msra.mxu2 %v3005_v48 }
 0x5a5   : > { %v2028_v16 = vpop.f32.mrf.mxu3 }
 0x5a6   : > { %v3009_v16 = vld [vmem:[#allocation15] sm:$0xff] }
 0x5a7   : > { %2227 = vmatpush.bf16.msra.mxu2 %v3004_v36 }
 0x5ab   : > { %2228 = vmatpush.bf16.msra.mxu2 %v3003_v4 }
 0x5af   : > { %2229 = vmatpush.bf16.msra.mxu2 %v3002_v51 }
 0x5b3   : > { %2230 = vmatpush.bf16.msra.mxu2 %v3001_v60 }
 0x5e1   : > { %v1855_v62 = vpop.xlane.xlu1 %1854 }
 0x5e2   : > { %v1856_v63 = vmax.f32 %v1855_v62, 1e-09 }
 0x5f2   : > { %v4267_v17 = vpop.f32.mrf.mxu2 }
 0x5fa   : > { %v1876_v29 = vpop.f32.mrf.mxu2 }
 0x5fb   : > { %v3019_v29 = vld [vmem:[%s4383_s18 + $0x30] sm:$0xff] }
 0x602   : > { %v1946_v18 = vpop.f32.mrf.mxu2 }
 0x603   : > { %v1976_v58 = vmax.f32 %v1946_v18, 0.0  ;;  %v3018_v18 = vld [vmem:[%s4383_s18 + $0x28] sm:$0xff] }
 0x605   : > { %v1979_v19 = vadd.f32 %v1976_v58, %v4099_v40  ;;  %v3017_v58 = vld [vmem:[%s4383_s18 + $0x20] sm:$0xff] }
 0x607   : > { %v1982_v20 = vmul.f32 %v1979_v19, %v4102_v46  ;;  %v2998_v46 = vld [vmem:[%s4378_s13 + $0x28] sm:$0xff] }
 0x608   : > { %v3157_v19 = vld [vmem:[#allocation13] ss:$0 sm:$0xff] }
 0x609   : > { %v1988_v23 = vpack.c.bf16 %v1982_v20, %v1982_v20  ;;  %v3016_v20 = vld [vmem:[%s4383_s18 + $0x18] sm:$0xff] }
 0x60a   : > { %v1948_v25 = vpop.f32.mrf.mxu2 }
 0x60b   : > { %1998 = vmatpush.bf16.xpose.msrb.mxu1 %v1988_v23  ;;  %v3173_v23 = vld [vmem:[%s3884_s30] sm:$0xff] }
 0x60c   : > { %v2074_v25 = vmul.f32 %v3173_v23, %v3157_v19 }
 0x612   : > { %1999 = vmatmul.bf16.vlgmr.msrb.gmra.mxu1 %v1985_v39  ;;  %v3161_v39 = vld [vmem:[#allocation12] ss:$0 sm:$0xff] }
 0x613   : > { %2210 = vmatpush.bf16.msra.mxu1 %v3000_v27  ;;  %v1031_v27 = vmul.f32 %v3173_v23, %v3160_v3 }
 0x617   : > { %2211 = vmatpush.bf16.msra.mxu1 %v2999_v15  ;;  %v2079_v15 = vadd.f32 %v3161_v39, %v2074_v25 }
 0x619   : > { %v2013_v26 = vpop.f32.mrf.mxu2 }
 0x61b   : > { %2212 = vmatpush.bf16.msra.mxu1 %v2998_v46 }
 0x61f   : > { %2213 = vmatpush.bf16.msra.mxu1 %v2997_v41 }
 0x621   : > { %v2015_v9 = vpop.f32.mrf.mxu2 }
 0x622   : > { %v1024_v9 = vadd.f32 %v3159_v22, %v4095_v35  ;;  %v3013_v35 = vld [vmem:[%s4383_s18] sm:$0xff] }
 0x68f   : > { %v2000_v40 = vpop.f32.mrf.mxu1 }
 0x690   : > { %v2014_v32 = vadd.f32 %v2013_v26, %v2000_v40  ;;  %v3015_v26 = vld [vmem:[%s4383_s18 + $0x10] sm:$0xff] }
 0x692   : > { %v2027_v33 = vadd.f32 %v2026_v12, %v2014_v32  ;;  %v3010_v12 = vld [vmem:[#allocation15 + $0x8] sm:$0xff]  ;;  %v1032_v32 = vadd.f32 %v1031_v27, %v1024_v9 }
 0x693   : > { %2284 = vmatpush.bf16.msrb.mxu3 %v3010_v12 }
 0x694   : > { %v2030_v34 = vmul.f32 %v2027_v33, %v4155_v44  ;;  %v2996_v44 = vld [vmem:[%s4378_s13 + $0x18] sm:$0xff] }
 0x695   : > { %2214 = vmatpush.bf16.msra.mxu1 %v2996_v44 }
 0x696   : > { %v2031_v30 = vsel %vm898_vm2, %v2030_v34, 0.0  ;;  %v2035_v21 = vpack.c.bf16 %v2030_v34, %v2030_v34 }
 0x697   : > { %v2002_v37 = vpop.f32.mrf.mxu1  ;;  %2032 = vadd.xlane.f32.xlu2 %v2031_v30  ;;  %2285 = vmatpush.bf16.msrb.mxu3 %v3009_v16 }
 0x698   : > { %2833 = vmatmul.msk.bf16.vlgmr.msrb.gmra.mxu0 %vm898_vm2, %v2035_v21  ;;  %v3014_v37 = vld [vmem:[%s4383_s18 + $0x8] sm:$0xff] }
 0x699   : > { %2215 = vmatpush.bf16.msra.mxu1 %v2995_v42 }
 0x69d   : > { %2216 = vmatpush.bf16.msra.mxu1 %v2994_v49 }
 0x69f   : > { %1500 = vadd.xlane.f32.xlu2 %v1499_v38  ;;  %v3162_v38 = vld [vmem:[#allocation16] ss:$0 sm:$0xff] }
 0x6a1   : > { %2217 = vmatpush.bf16.msra.mxu1 %v2993_v43 }
 0x70a   : > { %v2033_v28 = vpop.xlane.xlu2 %2032 }
 0x70b   : > { %v2034_v31 = vmax.f32 %v2033_v28, 1e-09 }
 0x70d   : > { %3167 = vrcp.f32 %v2034_v31 }
 0x712   : > { %v1501_v61 = vpop.xlane.xlu2 %1500 }
 0x713   : > { %v1502_v50 = vmax.f32 %v1501_v61, 1e-09  ;;  %v3168_v52 = vpop.eup %3167 }
 0x715   : > { %3169 = vrcp.f32 %v1502_v50  ;;  %v2054_v11 = vpop.f32.mrf.mxu0 }
 0x716   : > { %v2059_v53 = vmul.f32 %v3168_v52, %v2054_v11  ;;  %3171 = vrcp.f32 %v1856_v63 }
 0x718   : > { %2065 = vrot.lane.b32.xlu2 %v2059_v53, %s3587_s2  ;;  %s4412_s2 = sld [smem:[#allocation38_spill]] }
 0x71b   : > { %v3170_v14 = vpop.eup %3169 }
 0x71c   : > { %v1525_v54 = vmul.f32 %v3170_v14, %v4193_v13  ;;  %v3172_v7 = vpop.eup %3171 }
 0x71d   : > { %v2056_v56 = vpop.f32.mrf.mxu0  ;;  %v1879_v0 = vmul.f32 %v3172_v7, %v4267_v17  ;;  %v3020_v17 = vld [vmem:[%s4383_s18 + $0x38] sm:$0xff] }
 0x71e   : > { %v2068_v57 = vsel %vm956_vm0, %v1525_v54, %v2062_v55  ;;  %2361 = vmatpush.bf16.msra.mxu0 %v3020_v17  ;;  %s885_s12 = scalar_lea.vmem %s4412_s2, %s3822_s28 }
 0x71f   : > { %v2080_v59 = vpack.c.bf16 %v2068_v57, %v2068_v57 }
 0x721   : > { %2218 = vmatmul.bf16.vlgmr.msra.gmra.mxu1 %v2080_v59 }
 0x722   : > { %2362 = vmatpush.bf16.msra.mxu0 %v3019_v29 }
 0x726   : > { %2363 = vmatpush.bf16.msra.mxu0 %v3018_v18 }
 0x72a   : > { %2364 = vmatpush.bf16.msra.mxu0 %v3017_v58 }
 0x72e   : > { %2365 = vmatpush.bf16.msra.mxu0 %v3016_v20 }
 0x732   : > { %2366 = vmatpush.bf16.msra.mxu0 %v3015_v26 }
 0x736   : > { %2367 = vmatpush.bf16.msra.mxu0 %v3014_v37 }
 0x73a   : > { %2368 = vmatpush.bf16.msra.mxu0 %v3013_v35 }
 0x772   : > { %v2066_v1 = vpop.permute.xlu2 %2065 }
 0x773   : > { %v2069_v13 = vsel %vm956_vm0, %v1879_v0, %v2066_v1 }
 0x774   : > { %v2081_v2 = vpack.c.bf16 %v2069_v13, %v2069_v13 }
 0x776   : > { %2231 = vmatmul.bf16.vlgmr.msra.gmra.mxu2 %v2081_v2 }
 0x79e   : > { %v2219_v8 = vpop.f32.mrf.mxu1 }
 0x7a6   : > { %v2221_v10 = vpop.f32.mrf.mxu1 }
 0x7f9   : > { %v2232_v46 = vpop.f32.mrf.mxu2 }
 0x7fa   : > { %v2233_v40 = vadd.f32 %v2232_v46, %v2219_v8 }
 0x7fc   : > { %v2236_v33 = vadd.f32 %v2233_v40, %v2079_v15 }
 0x7fe   : > { %v2237_v34 = vadd.f32 %v2236_v33, %v1032_v32 }
 0x800   : > { %v2238_v30 = vpack.c.bf16 %v2237_v34, %v2237_v34  ;;  %v2378_v31 = vmul.f32 %v3164_v47, %v2237_v34 }
 0x801   : > { %v2234_v21 = vpop.f32.mrf.mxu2 }
 0x802   : > { %2914 = vmatmul.msk.bf16.vlgmr.msrb.gmra.mxu3 %vm956_vm0, %v2238_v30 }
 0x885   : > { %v2287_v41 = vpop.f32.mrf.mxu3 }
 0x886   : > { %v2288_v44 = vadd.f32 %v3162_v38, %v2287_v41 }
 0x888   : > { %v2291_v42 = vmax.f32 %v2288_v44, 0.0 }
 0x88a   : > { %v2292_v49 = vpack.c.bf16 %v2291_v42, %v2291_v42 }
 0x88c   : > { %2369 = vmatmul.bf16.vlgmr.msra.gmra.mxu0 %v2292_v49 }
 0x88d   : > { %v2289_v43 = vpop.f32.mrf.mxu3 }
 0x909   : > { %v2370_v24 = vpop.f32.mrf.mxu0 }
 0x90a   : > { %v2371_v28 = vadd.f32 %v3163_v45, %v2370_v24 }
 0x90c   : > { %v2379_v48 = vadd.f32 %v2378_v31, %v2371_v28 }
 0x90e   : > { %2380 = vst.msk [vmem:[%s885_s12] sm:$0xff] %vm956_vm0, %v2379_v48 }
 0x911   : > { %v2372_v36 = vpop.f32.mrf.mxu0 }
 0x912 PF: > { %s4413_s24 = sld [smem:[#allocation28_spill]] }
 0x918   : > { %s38_s2 = sadd.s32 1, %s4413_s24  }
 0x919   : > { %p35_p7 = scmp.ge.s32.totalorder %s38_s2, 4  }
 0x91b   :  { %37 = sbr.rel (!%p35_p7) target bundleno = 18 (0x12), region = 192 }
 0x920   :  { %2400 = vsyncpa [#allocation3], 1 }
 0x921   :  { %2402 = vsyncpa [#allocation3 + $0x1], 1 }
 0x922   :  { %2403 = vsyncpa [#allocation5], 1 }
 0x923   :  { %2404 = vsyncpa [#allocation8], 1 }
 0x924   :  { %2405 = vsyncpa [#allocation11], 1 }
 0x925   :  { %2406 = vsyncpa [#allocation14], 1 }
 0x926   :  { %2407 = vsyncpa [#allocation17], 1 }
 0x927   :  { %2408 = vsyncpa [#allocation20], 1 }

</bundles_post_ra>
